<compile_context>
chip_gen: v7x
topology: tpu7x:2x2x1
jax: 0.10.0
libtpu: 0.0.40
codegen_flags: <defaults>
</compile_context>

<pallas_src>
import math
from functools import partial

import jax
import jax.numpy as jnp
from jax import lax
from jax.experimental import pallas as pl
from jax.experimental.pallas import tpu as pltpu


# ----------------------------------------------------------------------------
# Pallas kernel 1: W @ patches + bias + optional ReLU   (the conv hot path)
#   w_ref: (Cout, K) bf16 | x_ref: (1, K, TS) bf16 | b_ref: (Cout, 1) f32
#   o_ref: (1, Cout, TS)  -> lane dim is the spatial axis (lane-dense stores)
# ----------------------------------------------------------------------------
def _matmul_bias_act_kernel(w_ref, x_ref, b_ref, o_ref, *, relu):
    acc = jnp.dot(w_ref[...], x_ref[0], preferred_element_type=jnp.float32)  # (Cout, TS) f32
    acc = acc + b_ref[...]                                                   # f32 epilogue
    if relu:
        acc = jnp.maximum(acc, 0.0)
    o_ref[0] = acc.astype(o_ref.dtype)


def _pick_spatial_tile(n, k):
    """Largest lane tile dividing n with a bf16 input block <= ~2 MiB (fits all TPU gens)."""
    for ts in (2048, 1024, 512, 256, 128):
        if n % ts == 0 and ts * k * 2 <= (2 << 20):
            return ts
    return n                      # tiny / non-128-divisible maps: single full-extent tile


def _flatten_w(w):
    """(Cout, Cin, kh, kw) OIHW -> (Cout, kh*kw*Cin), tap-major / channel-minor (matches im2col)."""
    cout, cin, kh, kw = w.shape
    return jnp.transpose(w, (0, 2, 3, 1)).reshape(cout, kh * kw * cin)


def _im2col_cf(x, ksize, up=1):
    """Channel-first im2col with the 2x nearest upsample (and zero padding) folded into the
    gather indices.  x: (B, C, h, w)  ->  patches (B, ksize*ksize*C, (h*up)*(w*up))."""
    b, c, h, w = x.shape
    ho, wo = h * up, w * up
    if ksize == 1 and up == 1:
        return x.reshape(b, c, h * w)
    pad = (ksize - 1) // 2
    oy = jnp.arange(ho)
    ox = jnp.arange(wo)
    taps = []
    for dy in range(ksize):
        ih = oy + dy - pad
        vh = (ih >= 0) & (ih < ho)
        sh = jnp.clip(ih, 0, ho - 1) // up
        for dx in range(ksize):
            iw = ox + dx - pad
            vw = (iw >= 0) & (iw < wo)
            sw = jnp.clip(iw, 0, wo - 1) // up
            t = x[:, :, sh, :][:, :, :, sw]                         # (B, C, ho, wo)
            mask = vh[:, None] & vw[None, :]
            taps.append(jnp.where(mask[None, None, :, :], t, 0).astype(x.dtype))
    return jnp.concatenate(taps, axis=1).reshape(b, ksize * ksize * c, ho * wo)


def conv_block(terms, relu=True, out_dtype=jnp.bfloat16):
    """Fused sum of stride-1 convolutions + single bias + optional ReLU (channel-first).

    terms: list of (x_nchw, w_oihw, bias, up) — each term is a conv with padding (k-1)//2
    applied to the 2x-nearest-upsampled input when up == 2.  All terms must share the
    output resolution; their results are summed (fused along the contraction axis K).
    Returns (B, Cout, Ho, Wo).
    """
    x0, w0, _, up0 = terms[0]
    B = x0.shape[0]
    Ho, Wo = x0.shape[2] * up0, x0.shape[3] * up0
    N = Ho * Wo

    patches, wflats, bias = [], [], None
    for (x, w, b, up) in terms:
        assert x.shape[2] * up == Ho and x.shape[3] * up == Wo
        patches.append(_im2col_cf(x.astype(jnp.bfloat16), w.shape[2], up))
        wflats.append(_flatten_w(w).astype(jnp.bfloat16))
        bias = b if bias is None else bias + b

    P = patches[0] if len(patches) == 1 else jnp.concatenate(patches, axis=1)   # (B, K, N)
    Wm = wflats[0] if len(wflats) == 1 else jnp.concatenate(wflats, axis=1)     # (Cout, K)
    K = P.shape[1]
    Cout = Wm.shape[0]
    bvec = bias.reshape(Cout, 1).astype(jnp.float32)

    TS = _pick_spatial_tile(N, K)
    grid = (B, N // TS)                               # >=2 steps (batch axis) for v7x megacore

    out = pl.pallas_call(
        partial(_matmul_bias_act_kernel, relu=relu),
        out_shape=jax.ShapeDtypeStruct((B, Cout, N), out_dtype),
        grid=grid,
        in_specs=[
            pl.BlockSpec((Cout, K), lambda b, t: (0, 0)),       # weights: resident
            pl.BlockSpec((1, K, TS), lambda b, t: (b, 0, t)),   # patches tile
            pl.BlockSpec((Cout, 1), lambda b, t: (0, 0)),       # bias: resident
        ],
        out_specs=pl.BlockSpec((1, Cout, TS), lambda b, t: (b, 0, t)),
        compiler_params=pltpu.CompilerParams(
            dimension_semantics=("parallel", "parallel")),
    )(Wm, P, bvec)
    return out.reshape(B, Cout, Ho, Wo)


# ----------------------------------------------------------------------------
# Pallas kernel 2: gim — normalize, similarity, masked top-k mean, softmax ch-0
# ----------------------------------------------------------------------------
def _topk_mean(x, k):
    """Mean of the k largest values along the last axis (torch.topk duplicate semantics)."""
    L = x.shape[-1]
    iota = lax.broadcasted_iota(jnp.int32, x.shape, x.ndim - 1)
    total = jnp.zeros(x.shape[:-1], jnp.float32)
    for _ in range(k):
        mx = jnp.max(x, axis=-1)
        total = total + mx
        is_max = x == mx[..., None]
        first = jnp.min(jnp.where(is_max, iota, L), axis=-1)
        x = jnp.where(iota == first[..., None], -jnp.inf, x)
    return total / float(k)


def _gim_kernel(ft_ref, fr_ref, m_ref, p0_ref, pos_ref, *, topk_pos, topk_neg):
    ft = ft_ref[...]                              # (B, T, C) f32
    fr = fr_ref[...]                              # (B, R, C) f32
    eps = 1e-12
    ftn = ft / jnp.maximum(jnp.sqrt(jnp.sum(ft * ft, axis=-1, keepdims=True)), eps)
    frn = fr / jnp.maximum(jnp.sqrt(jnp.sum(fr * fr, axis=-1, keepdims=True)), eps)
    sim = jnp.einsum('btc,brc->btr', ftn, frn, preferred_element_type=jnp.float32)  # (B,T,R)
    m = m_ref[...]                                # (B, 1, R)
    pos_map = _topk_mean(sim * m, topk_pos)       # (B, T)
    neg_map = _topk_mean(sim * (1.0 - m), topk_neg)
    pos_ref[...] = pos_map
    # softmax over the (pos, neg) pair, channel 0  == sigmoid(pos - neg)
    p0_ref[...] = 1.0 / (1.0 + jnp.exp(neg_map - pos_map))


def gim_pallas(ft_btc, fr_btc, mask_b1t, topk_pos=3, topk_neg=3):
    B, T, C = ft_btc.shape
    p0, pos = pl.pallas_call(
        partial(_gim_kernel, topk_pos=topk_pos, topk_neg=topk_neg),
        out_shape=(jax.ShapeDtypeStruct((B, T), jnp.float32),
                   jax.ShapeDtypeStruct((B, T), jnp.float32)),
        grid=(1,),
        in_specs=[
            pl.BlockSpec((B, T, C), lambda i: (0, 0, 0)),
            pl.BlockSpec((B, T, C), lambda i: (0, 0, 0)),
            pl.BlockSpec((B, 1, T), lambda i: (0, 0, 0)),
        ],
        out_specs=(pl.BlockSpec((B, T), lambda i: (0, 0)),
                   pl.BlockSpec((B, T), lambda i: (0, 0))),
    )(ft_btc, fr_btc, mask_b1t)
    return p0, pos


# ----------------------------------------------------------------------------
# Glue: nearest-neighbor mask resize (pure indexing, matches F.interpolate nearest)
# ----------------------------------------------------------------------------
def resize_nearest_nchw(x, out_h, out_w):
    B, C, H, W = x.shape
    ih = jnp.floor(jnp.arange(out_h) * (H / out_h)).astype(jnp.int32)
    iw = jnp.floor(jnp.arange(out_w) * (W / out_w)).astype(jnp.int32)
    return x[:, :, ih][:, :, :, iw]


# ----------------------------------------------------------------------------
# Parameter init (kaiming_normal_ fan_in, zero bias) — OIHW layout like PyTorch
# ----------------------------------------------------------------------------
def _init_conv(key, cout, cin, k):
    fan_in = cin * k * k
    std = math.sqrt(2.0 / fan_in)
    w = jax.random.normal(key, (cout, cin, k, k), jnp.float32) * std
    b = jnp.zeros((cout,), jnp.float32)
    return w, b


def init_segmnet_params(key,
                        segm_input_dim=(64, 64, 128, 256),
                        segm_inter_dim=(4, 16, 32, 64),
                        segm_dim=(64, 64),
                        mixer_channels=2):
    specs = {
        'segment0': (segm_dim[0], segm_input_dim[3], 1),
        'segment1': (segm_dim[1], segm_dim[0], 3),
        'mixer':    (segm_inter_dim[3], mixer_channels, 3),
        's3':       (segm_inter_dim[2], segm_inter_dim[3], 3),
        's2':       (segm_inter_dim[2], segm_inter_dim[2], 3),
        's1':       (segm_inter_dim[1], segm_inter_dim[1], 3),
        's0':       (segm_inter_dim[0], segm_inter_dim[0], 3),
        'f2':       (segm_inter_dim[2], segm_input_dim[2], 3),
        'f1':       (segm_inter_dim[1], segm_input_dim[1], 3),
        'f0':       (segm_inter_dim[0], segm_input_dim[0], 3),
        'post2':    (segm_inter_dim[1], segm_inter_dim[2], 3),
        'post1':    (segm_inter_dim[0], segm_inter_dim[1], 3),
        'post0':    (2, segm_inter_dim[0], 3),
    }
    keys = jax.random.split(key, len(specs))
    return {name: _init_conv(k, *spec) for k, (name, spec) in zip(keys, specs.items())}


# ----------------------------------------------------------------------------
# SegmNet forward (test_dist=None path; mixer_channels=2) — all NCHW
# ----------------------------------------------------------------------------
@jax.jit
def segmnet_forward(params, test_feat, train_feat3, mask0):
    p = params
    B = test_feat[3].shape[0]

    # segment0 (1x1 + ReLU) -> segment1 (3x3, no ReLU); test & train batched along N
    x_cat = jnp.concatenate([test_feat[3], train_feat3], axis=0)            # (2B, 256, 4, 4)
    y = conv_block([(x_cat, *p['segment0'], 1)], relu=True)
    f = conv_block([(y, *p['segment1'], 1)], relu=False, out_dtype=jnp.float32)  # (2B, 64, 4, 4)

    C = f.shape[1]
    h3, w3 = f.shape[2], f.shape[3]
    T = h3 * w3
    f_test = jnp.transpose(f[:B].reshape(B, C, T), (0, 2, 1))               # (B, T, C)
    f_train = jnp.transpose(f[B:].reshape(B, C, T), (0, 2, 1))

    mask_pos = resize_nearest_nchw(mask0, h3, w3).reshape(B, 1, T)          # (B, 1, T)

    # gim + 2-class softmax channel 0 (single Pallas kernel)
    p0, pred_pos = gim_pallas(f_test, f_train, mask_pos, topk_pos=3, topk_neg=3)

    # channel order (softmax_ch0, pred_pos) == torch cat along dim=1
    segm_layers = jnp.stack([p0, pred_pos], axis=1).reshape(B, 2, h3, w3)   # (B, 2, 4, 4)

    out = conv_block([(segm_layers, *p['mixer'], 1)])                       # (B, 64, 4, 4)
    out = conv_block([(out, *p['s3'], 2)])                                  # upsample folded -> (B,32,8,8)
    out = conv_block([(test_feat[2], *p['f2'], 1), (out, *p['s2'], 1)])     # fused f2+s2+add
    out = conv_block([(out, *p['post2'], 2)])                               # (B, 16, 16, 16)
    out = conv_block([(test_feat[1], *p['f1'], 1), (out, *p['s1'], 1)])     # fused f1+s1+add
    out = conv_block([(out, *p['post1'], 2)])                               # (B, 4, 32, 32)
    out = conv_block([(test_feat[0], *p['f0'], 1), (out, *p['s0'], 1)])     # fused f0+s0+add
    out = conv_block([(out, *p['post0'], 2)], relu=False, out_dtype=jnp.float32)  # (B, 2, 64, 64)
    return out


# ----------------------------------------------------------------------------
if __name__ == "__main__":
    key = jax.random.PRNGKey(0)
    kp, kd = jax.random.split(key)
    params = init_segmnet_params(kp)

    B = 2
    kx = jax.random.split(kd, 6)
    # feature pyramid (NCHW) with channels (64, 64, 128, 256) and spatial 32/16/8/4
    test_feat = [
        jax.random.normal(kx[0], (B, 64, 32, 32), jnp.float32),
        jax.random.normal(kx[1], (B, 64, 16, 16), jnp.float32),
        jax.random.normal(kx[2], (B, 128, 8, 8), jnp.float32),
        jax.random.normal(kx[3], (B, 256, 4, 4), jnp.float32),
    ]
    train_feat3 = jax.random.normal(kx[4], (B, 256, 4, 4), jnp.float32)
    mask0 = (jax.random.uniform(kx[5], (B, 1, 16, 16)) > 0.5).astype(jnp.float32)

    out = segmnet_forward(params, test_feat, train_feat3, mask0)
    jax.block_until_ready(out)
    assert out.shape == (B, 2, 64, 64), out.shape
    assert out.dtype == jnp.float32
    print("KERNEL_OK")
</pallas_src>

<mosaic_0001>
module attributes {stable_mosaic.version = 11 : i64} {
  func.func @_matmul_bias_act_kernel(%arg0: i32, %arg1: i32, %arg2: memref<64x256xbf16, #tpu.memory_space<vmem>>, %arg3: memref<1x256x16xbf16, #tpu.memory_space<vmem>>, %arg4: memref<64x1xf32, #tpu.memory_space<vmem>>, %arg5: memref<1x64x16xbf16, #tpu.memory_space<vmem>>) attributes {dimension_semantics = [#tpu.dimension_semantics<parallel>, #tpu.dimension_semantics<parallel>], iteration_bounds = array<i64: 4, 1>, scalar_prefetch = 0 : i64, scratch_operands = 0 : i64, tpu.core_type = #tpu.core_type<tc>, window_params = [{pipeline_mode = #tpu.pipeline_mode<synchronous>, transform_indices = @transform_0, window_bounds = array<i64: 64, 256>}, {transform_indices = @transform_1, window_bounds = array<i64: 1, 256, 16>}, {pipeline_mode = #tpu.pipeline_mode<synchronous>, transform_indices = @transform_2, window_bounds = array<i64: 64, 1>}, {transform_indices = @transform_3, window_bounds = array<i64: 1, 64, 16>}]} {
    %c0 = arith.constant 0 : index
    %c0_0 = arith.constant 0 : index
    %0 = vector.load %arg2[%c0, %c0_0] : memref<64x256xbf16, #tpu.memory_space<vmem>>, vector<64x256xbf16>
    %c0_1 = arith.constant 0 : index
    %c0_2 = arith.constant 0 : index
    %c0_3 = arith.constant 0 : index
    %1 = vector.load %arg3[%c0_1, %c0_2, %c0_3] : memref<1x256x16xbf16, #tpu.memory_space<vmem>>, vector<1x256x16xbf16>
    %2 = vector.shape_cast %1 : vector<1x256x16xbf16> to vector<256x16xbf16>
    %cst = arith.constant dense<0.000000e+00> : vector<64x16xf32>
    %3 = tpu.matmul %0, %2, %cst {dimension_numbers = #tpu.dot_dimension_numbers<[1], [0], [0], [1], [0, 0, 1, 1], [], []>} : vector<64x256xbf16>, vector<256x16xbf16>, vector<64x16xf32> -> vector<64x16xf32>
    %c0_4 = arith.constant 0 : index
    %c0_5 = arith.constant 0 : index
    %4 = vector.load %arg4[%c0_4, %c0_5] : memref<64x1xf32, #tpu.memory_space<vmem>>, vector<64x1xf32>
    %5 = vector.broadcast %4 : vector<64x1xf32> to vector<64x16xf32>
    %6 = arith.addf %3, %5 : vector<64x16xf32>
    %cst_6 = arith.constant 0.000000e+00 : f32
    %7 = vector.broadcast %cst_6 : f32 to vector<64x16xf32>
    %8 = arith.maximumf %6, %7 : vector<64x16xf32>
    %9 = arith.truncf %8 : vector<64x16xf32> to vector<64x16xbf16>
    %c0_7 = arith.constant 0 : index
    %c0_8 = arith.constant 0 : index
    %c0_9 = arith.constant 0 : index
    %10 = vector.load %arg5[%c0_7, %c0_8, %c0_9] : memref<1x64x16xbf16, #tpu.memory_space<vmem>>, vector<1x64x16xbf16>
    %11 = vector.shape_cast %10 : vector<1x64x16xbf16> to vector<64x16xbf16>
    %12 = vector.shape_cast %9 : vector<64x16xbf16> to vector<1x64x16xbf16>
    tpu.vector_store %arg5[%c0_7, %c0_8, %c0_9], %12 {strides = array<i32>} : memref<1x64x16xbf16, #tpu.memory_space<vmem>>, vector<1x64x16xbf16>,
    return
  }
  func.func @transform_0(%arg0: i32, %arg1: i32) -> (i32, i32) {
    %c0_i32 = arith.constant 0 : i32
    %c0_i32_0 = arith.constant 0 : i32
    %c0_i32_1 = arith.constant 0 : i32
    return %c0_i32, %c0_i32_0 : i32, i32
  }
  func.func @transform_1(%arg0: i32, %arg1: i32) -> (i32, i32, i32) {
    %c0_i32 = arith.constant 0 : i32
    %c0_i32_0 = arith.constant 0 : i32
    return %arg0, %c0_i32, %arg1 : i32, i32, i32
  }
  func.func @transform_2(%arg0: i32, %arg1: i32) -> (i32, i32) {
    %c0_i32 = arith.constant 0 : i32
    %c0_i32_0 = arith.constant 0 : i32
    %c0_i32_1 = arith.constant 0 : i32
    return %c0_i32, %c0_i32_0 : i32, i32
  }
  func.func @transform_3(%arg0: i32, %arg1: i32) -> (i32, i32, i32) {
    %c0_i32 = arith.constant 0 : i32
    %c0_i32_0 = arith.constant 0 : i32
    return %arg0, %c0_i32, %arg1 : i32, i32, i32
  }
}

module attributes {stable_mosaic.version = 11 : i64} {
  func.func @_matmul_bias_act_kernel(%arg0: i32, %arg1: i32, %arg2: memref<64x576xbf16, #tpu.memory_space<vmem>>, %arg3: memref<1x576x16xbf16, #tpu.memory_space<vmem>>, %arg4: memref<64x1xf32, #tpu.memory_space<vmem>>, %arg5: memref<1x64x16xf32, #tpu.memory_space<vmem>>) attributes {dimension_semantics = [#tpu.dimension_semantics<parallel>, #tpu.dimension_semantics<parallel>], iteration_bounds = array<i64: 4, 1>, scalar_prefetch = 0 : i64, scratch_operands = 0 : i64, tpu.core_type = #tpu.core_type<tc>, window_params = [{pipeline_mode = #tpu.pipeline_mode<synchronous>, transform_indices = @transform_0, window_bounds = array<i64: 64, 576>}, {transform_indices = @transform_1, window_bounds = array<i64: 1, 576, 16>}, {pipeline_mode = #tpu.pipeline_mode<synchronous>, transform_indices = @transform_2, window_bounds = array<i64: 64, 1>}, {transform_indices = @transform_3, window_bounds = array<i64: 1, 64, 16>}]} {
    %c0 = arith.constant 0 : index
    %c0_0 = arith.constant 0 : index
    %0 = vector.load %arg2[%c0, %c0_0] : memref<64x576xbf16, #tpu.memory_space<vmem>>, vector<64x576xbf16>
    %c0_1 = arith.constant 0 : index
    %c0_2 = arith.constant 0 : index
    %c0_3 = arith.constant 0 : index
    %1 = vector.load %arg3[%c0_1, %c0_2, %c0_3] : memref<1x576x16xbf16, #tpu.memory_space<vmem>>, vector<1x576x16xbf16>
    %2 = vector.shape_cast %1 : vector<1x576x16xbf16> to vector<576x16xbf16>
    %cst = arith.constant dense<0.000000e+00> : vector<64x16xf32>
    %3 = tpu.matmul %0, %2, %cst {dimension_numbers = #tpu.dot_dimension_numbers<[1], [0], [0], [1], [0, 0, 1, 1], [], []>} : vector<64x576xbf16>, vector<576x16xbf16>, vector<64x16xf32> -> vector<64x16xf32>
    %c0_4 = arith.constant 0 : index
    %c0_5 = arith.constant 0 : index
    %4 = vector.load %arg4[%c0_4, %c0_5] : memref<64x1xf32, #tpu.memory_space<vmem>>, vector<64x1xf32>
    %5 = vector.broadcast %4 : vector<64x1xf32> to vector<64x16xf32>
    %6 = arith.addf %3, %5 : vector<64x16xf32>
    %c0_6 = arith.constant 0 : index
    %c0_7 = arith.constant 0 : index
    %c0_8 = arith.constant 0 : index
    %7 = vector.load %arg5[%c0_6, %c0_7, %c0_8] : memref<1x64x16xf32, #tpu.memory_space<vmem>>, vector<1x64x16xf32>
    %8 = vector.shape_cast %7 : vector<1x64x16xf32> to vector<64x16xf32>
    %9 = vector.shape_cast %6 : vector<64x16xf32> to vector<1x64x16xf32>
    tpu.vector_store %arg5[%c0_6, %c0_7, %c0_8], %9 {strides = array<i32>} : memref<1x64x16xf32, #tpu.memory_space<vmem>>, vector<1x64x16xf32>,
    return
  }
  func.func @transform_0(%arg0: i32, %arg1: i32) -> (i32, i32) {
    %c0_i32 = arith.constant 0 : i32
    %c0_i32_0 = arith.constant 0 : i32
    %c0_i32_1 = arith.constant 0 : i32
    return %c0_i32, %c0_i32_0 : i32, i32
  }
  func.func @transform_1(%arg0: i32, %arg1: i32) -> (i32, i32, i32) {
    %c0_i32 = arith.constant 0 : i32
    %c0_i32_0 = arith.constant 0 : i32
    return %arg0, %c0_i32, %arg1 : i32, i32, i32
  }
  func.func @transform_2(%arg0: i32, %arg1: i32) -> (i32, i32) {
    %c0_i32 = arith.constant 0 : i32
    %c0_i32_0 = arith.constant 0 : i32
    %c0_i32_1 = arith.constant 0 : i32
    return %c0_i32, %c0_i32_0 : i32, i32
  }
  func.func @transform_3(%arg0: i32, %arg1: i32) -> (i32, i32, i32) {
    %c0_i32 = arith.constant 0 : i32
    %c0_i32_0 = arith.constant 0 : i32
    return %arg0, %c0_i32, %arg1 : i32, i32, i32
  }
}

module attributes {stable_mosaic.version = 11 : i64} {
  func.func @_gim_kernel(%arg0: i32, %arg1: memref<2x16x64xf32, #tpu.memory_space<vmem>>, %arg2: memref<2x16x64xf32, #tpu.memory_space<vmem>>, %arg3: memref<2x1x16xf32, #tpu.memory_space<vmem>>, %arg4: memref<2x16xf32, #tpu.memory_space<vmem>>, %arg5: memref<2x16xf32, #tpu.memory_space<vmem>>) attributes {dimension_semantics = [#tpu.dimension_semantics<arbitrary>], iteration_bounds = array<i64: 1>, scalar_prefetch = 0 : i64, scratch_operands = 0 : i64, tpu.core_type = #tpu.core_type<tc>, window_params = [{pipeline_mode = #tpu.pipeline_mode<synchronous>, transform_indices = @transform_0, window_bounds = array<i64: 2, 16, 64>}, {pipeline_mode = #tpu.pipeline_mode<synchronous>, transform_indices = @transform_1, window_bounds = array<i64: 2, 16, 64>}, {pipeline_mode = #tpu.pipeline_mode<synchronous>, transform_indices = @transform_2, window_bounds = array<i64: 2, 1, 16>}, {pipeline_mode = #tpu.pipeline_mode<synchronous>, transform_indices = @transform_3, window_bounds = array<i64: 2, 16>}, {pipeline_mode = #tpu.pipeline_mode<synchronous>, transform_indices = @transform_4, window_bounds = array<i64: 2, 16>}]} {
    %c0 = arith.constant 0 : index
    %c0_0 = arith.constant 0 : index
    %c0_1 = arith.constant 0 : index
    %0 = vector.load %arg1[%c0, %c0_0, %c0_1] : memref<2x16x64xf32, #tpu.memory_space<vmem>>, vector<2x16x64xf32>
    %c0_2 = arith.constant 0 : index
    %c0_3 = arith.constant 0 : index
    %c0_4 = arith.constant 0 : index
    %1 = vector.load %arg2[%c0_2, %c0_3, %c0_4] : memref<2x16x64xf32, #tpu.memory_space<vmem>>, vector<2x16x64xf32>
    %2 = arith.mulf %0, %0 : vector<2x16x64xf32>
    %cst = arith.constant dense<0.000000e+00> : vector<2x16xf32>
    %3 = vector.multi_reduction <add>, %2, %cst [2] : vector<2x16x64xf32> to vector<2x16xf32>
    %4 = vector.shape_cast %3 : vector<2x16xf32> to vector<2x16x1xf32>
    %5 = math.sqrt %4 : vector<2x16x1xf32>
    %cst_5 = arith.constant 9.99999996E-13 : f32
    %6 = vector.broadcast %cst_5 : f32 to vector<2x16x1xf32>
    %7 = arith.maximumf %5, %6 : vector<2x16x1xf32>
    %8 = vector.broadcast %7 : vector<2x16x1xf32> to vector<2x16x64xf32>
    %9 = arith.divf %0, %8 : vector<2x16x64xf32>
    %10 = arith.mulf %1, %1 : vector<2x16x64xf32>
    %cst_6 = arith.constant dense<0.000000e+00> : vector<2x16xf32>
    %11 = vector.multi_reduction <add>, %10, %cst_6 [2] : vector<2x16x64xf32> to vector<2x16xf32>
    %12 = vector.shape_cast %11 : vector<2x16xf32> to vector<2x16x1xf32>
    %13 = math.sqrt %12 : vector<2x16x1xf32>
    %cst_7 = arith.constant 9.99999996E-13 : f32
    %14 = vector.broadcast %cst_7 : f32 to vector<2x16x1xf32>
    %15 = arith.maximumf %13, %14 : vector<2x16x1xf32>
    %16 = vector.broadcast %15 : vector<2x16x1xf32> to vector<2x16x64xf32>
    %17 = arith.divf %1, %16 : vector<2x16x64xf32>
    "tpu.trace_start"() <{level = 10 : i32, message = "btc,brc->btr"}> : () -> ()
    %cst_8 = arith.constant dense<0.000000e+00> : vector<2x16x16xf32>
    %18 = tpu.matmul %9, %17, %cst_8 {dimension_numbers = #tpu.dot_dimension_numbers<[2], [2], [1], [1], [0, 0, 0, 1, 1, 1], [0], [0]>} : vector<2x16x64xf32>, vector<2x16x64xf32>, vector<2x16x16xf32> -> vector<2x16x16xf32>
    "tpu.trace_stop"() : () -> ()
    %c0_9 = arith.constant 0 : index
    %c0_10 = arith.constant 0 : index
    %c0_11 = arith.constant 0 : index
    %19 = vector.load %arg3[%c0_9, %c0_10, %c0_11] : memref<2x1x16xf32, #tpu.memory_space<vmem>>, vector<2x1x16xf32>
    %20 = vector.broadcast %19 : vector<2x1x16xf32> to vector<2x16x16xf32>
    %21 = arith.mulf %18, %20 : vector<2x16x16xf32>
    %22 = tpu.iota {dimensions = array<i32: 2>} : vector<2x16x16xi32>
    %cst_12 = arith.constant 0.000000e+00 : f32
    %23 = vector.broadcast %cst_12 : f32 to vector<2x16xf32>
    %cst_13 = arith.constant dense<0xFF800000> : vector<2x16xf32>
    %24 = vector.multi_reduction <maximumf>, %21, %cst_13 [2] : vector<2x16x16xf32> to vector<2x16xf32>
    %25 = arith.addf %23, %24 : vector<2x16xf32>
    %26 = vector.shape_cast %24 : vector<2x16xf32> to vector<2x16x1xf32>
    %27 = vector.broadcast %26 : vector<2x16x1xf32> to vector<2x16x16xf32>
    %28 = arith.cmpf oeq, %21, %27 : vector<2x16x16xf32>
    %c16_i32 = arith.constant 16 : i32
    %29 = vector.broadcast %c16_i32 : i32 to vector<2x16x16xi32>
    %30 = arith.select %28, %22, %29 : vector<2x16x16xi1>, vector<2x16x16xi32>
    %cst_14 = arith.constant dense<2147483647> : vector<2x16xi32>
    %31 = vector.multi_reduction <minsi>, %30, %cst_14 [2] : vector<2x16x16xi32> to vector<2x16xi32>
    %32 = vector.shape_cast %31 : vector<2x16xi32> to vector<2x16x1xi32>
    %33 = vector.broadcast %32 : vector<2x16x1xi32> to vector<2x16x16xi32>
    %34 = arith.cmpi eq, %22, %33 : vector<2x16x16xi32>
    %cst_15 = arith.constant 0xFF800000 : f32
    %35 = vector.broadcast %cst_15 : f32 to vector<2x16x16xf32>
    %36 = arith.select %34, %35, %21 : vector<2x16x16xi1>, vector<2x16x16xf32>
    %cst_16 = arith.constant dense<0xFF800000> : vector<2x16xf32>
    %37 = vector.multi_reduction <maximumf>, %36, %cst_16 [2] : vector<2x16x16xf32> to vector<2x16xf32>
    %38 = arith.addf %25, %37 : vector<2x16xf32>
    %39 = vector.shape_cast %37 : vector<2x16xf32> to vector<2x16x1xf32>
    %40 = vector.broadcast %39 : vector<2x16x1xf32> to vector<2x16x16xf32>
    %41 = arith.cmpf oeq, %36, %40 : vector<2x16x16xf32>
    %c16_i32_17 = arith.constant 16 : i32
    %42 = vector.broadcast %c16_i32_17 : i32 to vector<2x16x16xi32>
    %43 = arith.select %41, %22, %42 : vector<2x16x16xi1>, vector<2x16x16xi32>
    %cst_18 = arith.constant dense<2147483647> : vector<2x16xi32>
    %44 = vector.multi_reduction <minsi>, %43, %cst_18 [2] : vector<2x16x16xi32> to vector<2x16xi32>
    %45 = vector.shape_cast %44 : vector<2x16xi32> to vector<2x16x1xi32>
    %46 = vector.broadcast %45 : vector<2x16x1xi32> to vector<2x16x16xi32>
    %47 = arith.cmpi eq, %22, %46 : vector<2x16x16xi32>
    %cst_19 = arith.constant 0xFF800000 : f32
    %48 = vector.broadcast %cst_19 : f32 to vector<2x16x16xf32>
    %49 = arith.select %47, %48, %36 : vector<2x16x16xi1>, vector<2x16x16xf32>
    %cst_20 = arith.constant dense<0xFF800000> : vector<2x16xf32>
    %50 = vector.multi_reduction <maximumf>, %49, %cst_20 [2] : vector<2x16x16xf32> to vector<2x16xf32>
    %51 = arith.addf %38, %50 : vector<2x16xf32>
    %cst_21 = arith.constant 3.000000e+00 : f32
    %52 = vector.broadcast %cst_21 : f32 to vector<2x16xf32>
    %53 = arith.divf %51, %52 : vector<2x16xf32>
    %cst_22 = arith.constant 1.000000e+00 : f32
    %54 = vector.broadcast %cst_22 : f32 to vector<2x1x16xf32>
    %55 = arith.subf %54, %19 : vector<2x1x16xf32>
    %56 = vector.broadcast %55 : vector<2x1x16xf32> to vector<2x16x16xf32>
    %57 = arith.mulf %18, %56 : vector<2x16x16xf32>
    %58 = tpu.iota {dimensions = array<i32: 2>} : vector<2x16x16xi32>
    %cst_23 = arith.constant 0.000000e+00 : f32
    %59 = vector.broadcast %cst_23 : f32 to vector<2x16xf32>
    %cst_24 = arith.constant dense<0xFF800000> : vector<2x16xf32>
    %60 = vector.multi_reduction <maximumf>, %57, %cst_24 [2] : vector<2x16x16xf32> to vector<2x16xf32>
    %61 = arith.addf %59, %60 : vector<2x16xf32>
    %62 = vector.shape_cast %60 : vector<2x16xf32> to vector<2x16x1xf32>
    %63 = vector.broadcast %62 : vector<2x16x1xf32> to vector<2x16x16xf32>
    %64 = arith.cmpf oeq, %57, %63 : vector<2x16x16xf32>
    %c16_i32_25 = arith.constant 16 : i32
    %65 = vector.broadcast %c16_i32_25 : i32 to vector<2x16x16xi32>
    %66 = arith.select %64, %58, %65 : vector<2x16x16xi1>, vector<2x16x16xi32>
    %cst_26 = arith.constant dense<2147483647> : vector<2x16xi32>
    %67 = vector.multi_reduction <minsi>, %66, %cst_26 [2] : vector<2x16x16xi32> to vector<2x16xi32>
    %68 = vector.shape_cast %67 : vector<2x16xi32> to vector<2x16x1xi32>
    %69 = vector.broadcast %68 : vector<2x16x1xi32> to vector<2x16x16xi32>
    %70 = arith.cmpi eq, %58, %69 : vector<2x16x16xi32>
    %cst_27 = arith.constant 0xFF800000 : f32
    %71 = vector.broadcast %cst_27 : f32 to vector<2x16x16xf32>
    %72 = arith.select %70, %71, %57 : vector<2x16x16xi1>, vector<2x16x16xf32>
    %cst_28 = arith.constant dense<0xFF800000> : vector<2x16xf32>
    %73 = vector.multi_reduction <maximumf>, %72, %cst_28 [2] : vector<2x16x16xf32> to vector<2x16xf32>
    %74 = arith.addf %61, %73 : vector<2x16xf32>
    %75 = vector.shape_cast %73 : vector<2x16xf32> to vector<2x16x1xf32>
    %76 = vector.broadcast %75 : vector<2x16x1xf32> to vector<2x16x16xf32>
    %77 = arith.cmpf oeq, %72, %76 : vector<2x16x16xf32>
    %c16_i32_29 = arith.constant 16 : i32
    %78 = vector.broadcast %c16_i32_29 : i32 to vector<2x16x16xi32>
    %79 = arith.select %77, %58, %78 : vector<2x16x16xi1>, vector<2x16x16xi32>
    %cst_30 = arith.constant dense<2147483647> : vector<2x16xi32>
    %80 = vector.multi_reduction <minsi>, %79, %cst_30 [2] : vector<2x16x16xi32> to vector<2x16xi32>
    %81 = vector.shape_cast %80 : vector<2x16xi32> to vector<2x16x1xi32>
    %82 = vector.broadcast %81 : vector<2x16x1xi32> to vector<2x16x16xi32>
    %83 = arith.cmpi eq, %58, %82 : vector<2x16x16xi32>
    %cst_31 = arith.constant 0xFF800000 : f32
    %84 = vector.broadcast %cst_31 : f32 to vector<2x16x16xf32>
    %85 = arith.select %83, %84, %72 : vector<2x16x16xi1>, vector<2x16x16xf32>
    %cst_32 = arith.constant dense<0xFF800000> : vector<2x16xf32>
    %86 = vector.multi_reduction <maximumf>, %85, %cst_32 [2] : vector<2x16x16xf32> to vector<2x16xf32>
    %87 = arith.addf %74, %86 : vector<2x16xf32>
    %cst_33 = arith.constant 3.000000e+00 : f32
    %88 = vector.broadcast %cst_33 : f32 to vector<2x16xf32>
    %89 = arith.divf %87, %88 : vector<2x16xf32>
    %c0_34 = arith.constant 0 : index
    %c0_35 = arith.constant 0 : index
    %90 = vector.load %arg5[%c0_34, %c0_35] : memref<2x16xf32, #tpu.memory_space<vmem>>, vector<2x16xf32>
    tpu.vector_store %arg5[%c0_34, %c0_35], %53 {strides = array<i32>} : memref<2x16xf32, #tpu.memory_space<vmem>>, vector<2x16xf32>,
    %91 = arith.subf %89, %53 : vector<2x16xf32>
    %92 = math.exp %91 : vector<2x16xf32>
    %cst_36 = arith.constant 1.000000e+00 : f32
    %93 = vector.broadcast %cst_36 : f32 to vector<2x16xf32>
    %94 = arith.addf %93, %92 : vector<2x16xf32>
    %cst_37 = arith.constant 1.000000e+00 : f32
    %95 = vector.broadcast %cst_37 : f32 to vector<2x16xf32>
    %96 = arith.divf %95, %94 : vector<2x16xf32>
    %c0_38 = arith.constant 0 : index
    %c0_39 = arith.constant 0 : index
    %97 = vector.load %arg4[%c0_38, %c0_39] : memref<2x16xf32, #tpu.memory_space<vmem>>, vector<2x16xf32>
    tpu.vector_store %arg4[%c0_38, %c0_39], %96 {strides = array<i32>} : memref<2x16xf32, #tpu.memory_space<vmem>>, vector<2x16xf32>,
    return
  }
  func.func @transform_0(%arg0: i32) -> (i32, i32, i32) {
    %c0_i32 = arith.constant 0 : i32
    %c0_i32_0 = arith.constant 0 : i32
    %c0_i32_1 = arith.constant 0 : i32
    %c0_i32_2 = arith.constant 0 : i32
    return %c0_i32, %c0_i32_0, %c0_i32_1 : i32, i32, i32
  }
  func.func @transform_1(%arg0: i32) -> (i32, i32, i32) {
    %c0_i32 = arith.constant 0 : i32
    %c0_i32_0 = arith.constant 0 : i32
    %c0_i32_1 = arith.constant 0 : i32
    %c0_i32_2 = arith.constant 0 : i32
    return %c0_i32, %c0_i32_0, %c0_i32_1 : i32, i32, i32
  }
  func.func @transform_2(%arg0: i32) -> (i32, i32, i32) {
    %c0_i32 = arith.constant 0 : i32
    %c0_i32_0 = arith.constant 0 : i32
    %c0_i32_1 = arith.constant 0 : i32
    %c0_i32_2 = arith.constant 0 : i32
    return %c0_i32, %c0_i32_0, %c0_i32_1 : i32, i32, i32
  }
  func.func @transform_3(%arg0: i32) -> (i32, i32) {
    %c0_i32 = arith.constant 0 : i32
    %c0_i32_0 = arith.constant 0 : i32
    %c0_i32_1 = arith.constant 0 : i32
    return %c0_i32, %c0_i32_0 : i32, i32
  }
  func.func @transform_4(%arg0: i32) -> (i32, i32) {
    %c0_i32 = arith.constant 0 : i32
    %c0_i32_0 = arith.constant 0 : i32
    %c0_i32_1 = arith.constant 0 : i32
    return %c0_i32, %c0_i32_0 : i32, i32
  }
}

module attributes {stable_mosaic.version = 11 : i64} {
  func.func @_matmul_bias_act_kernel(%arg0: i32, %arg1: i32, %arg2: memref<64x18xbf16, #tpu.memory_space<vmem>>, %arg3: memref<1x18x16xbf16, #tpu.memory_space<vmem>>, %arg4: memref<64x1xf32, #tpu.memory_space<vmem>>, %arg5: memref<1x64x16xbf16, #tpu.memory_space<vmem>>) attributes {dimension_semantics = [#tpu.dimension_semantics<parallel>, #tpu.dimension_semantics<parallel>], iteration_bounds = array<i64: 2, 1>, scalar_prefetch = 0 : i64, scratch_operands = 0 : i64, tpu.core_type = #tpu.core_type<tc>, window_params = [{pipeline_mode = #tpu.pipeline_mode<synchronous>, transform_indices = @transform_0, window_bounds = array<i64: 64, 18>}, {transform_indices = @transform_1, window_bounds = array<i64: 1, 18, 16>}, {pipeline_mode = #tpu.pipeline_mode<synchronous>, transform_indices = @transform_2, window_bounds = array<i64: 64, 1>}, {transform_indices = @transform_3, window_bounds = array<i64: 1, 64, 16>}]} {
    %c0 = arith.constant 0 : index
    %c0_0 = arith.constant 0 : index
    %0 = vector.load %arg2[%c0, %c0_0] : memref<64x18xbf16, #tpu.memory_space<vmem>>, vector<64x18xbf16>
    %c0_1 = arith.constant 0 : index
    %c0_2 = arith.constant 0 : index
    %c0_3 = arith.constant 0 : index
    %1 = vector.load %arg3[%c0_1, %c0_2, %c0_3] : memref<1x18x16xbf16, #tpu.memory_space<vmem>>, vector<1x18x16xbf16>
    %2 = vector.shape_cast %1 : vector<1x18x16xbf16> to vector<18x16xbf16>
    %cst = arith.constant dense<0.000000e+00> : vector<64x16xf32>
    %3 = tpu.matmul %0, %2, %cst {dimension_numbers = #tpu.dot_dimension_numbers<[1], [0], [0], [1], [0, 0, 1, 1], [], []>} : vector<64x18xbf16>, vector<18x16xbf16>, vector<64x16xf32> -> vector<64x16xf32>
    %c0_4 = arith.constant 0 : index
    %c0_5 = arith.constant 0 : index
    %4 = vector.load %arg4[%c0_4, %c0_5] : memref<64x1xf32, #tpu.memory_space<vmem>>, vector<64x1xf32>
    %5 = vector.broadcast %4 : vector<64x1xf32> to vector<64x16xf32>
    %6 = arith.addf %3, %5 : vector<64x16xf32>
    %cst_6 = arith.constant 0.000000e+00 : f32
    %7 = vector.broadcast %cst_6 : f32 to vector<64x16xf32>
    %8 = arith.maximumf %6, %7 : vector<64x16xf32>
    %9 = arith.truncf %8 : vector<64x16xf32> to vector<64x16xbf16>
    %c0_7 = arith.constant 0 : index
    %c0_8 = arith.constant 0 : index
    %c0_9 = arith.constant 0 : index
    %10 = vector.load %arg5[%c0_7, %c0_8, %c0_9] : memref<1x64x16xbf16, #tpu.memory_space<vmem>>, vector<1x64x16xbf16>
    %11 = vector.shape_cast %10 : vector<1x64x16xbf16> to vector<64x16xbf16>
    %12 = vector.shape_cast %9 : vector<64x16xbf16> to vector<1x64x16xbf16>
    tpu.vector_store %arg5[%c0_7, %c0_8, %c0_9], %12 {strides = array<i32>} : memref<1x64x16xbf16, #tpu.memory_space<vmem>>, vector<1x64x16xbf16>,
    return
  }
  func.func @transform_0(%arg0: i32, %arg1: i32) -> (i32, i32) {
    %c0_i32 = arith.constant 0 : i32
    %c0_i32_0 = arith.constant 0 : i32
    %c0_i32_1 = arith.constant 0 : i32
    return %c0_i32, %c0_i32_0 : i32, i32
  }
  func.func @transform_1(%arg0: i32, %arg1: i32) -> (i32, i32, i32) {
    %c0_i32 = arith.constant 0 : i32
    %c0_i32_0 = arith.constant 0 : i32
    return %arg0, %c0_i32, %arg1 : i32, i32, i32
  }
  func.func @transform_2(%arg0: i32, %arg1: i32) -> (i32, i32) {
    %c0_i32 = arith.constant 0 : i32
    %c0_i32_0 = arith.constant 0 : i32
    %c0_i32_1 = arith.constant 0 : i32
    return %c0_i32, %c0_i32_0 : i32, i32
  }
  func.func @transform_3(%arg0: i32, %arg1: i32) -> (i32, i32, i32) {
    %c0_i32 = arith.constant 0 : i32
    %c0_i32_0 = arith.constant 0 : i32
    return %arg0, %c0_i32, %arg1 : i32, i32, i32
  }
}

module attributes {stable_mosaic.version = 11 : i64} {
  func.func @_matmul_bias_act_kernel(%arg0: i32, %arg1: i32, %arg2: memref<32x576xbf16, #tpu.memory_space<vmem>>, %arg3: memref<1x576x64xbf16, #tpu.memory_space<vmem>>, %arg4: memref<32x1xf32, #tpu.memory_space<vmem>>, %arg5: memref<1x32x64xbf16, #tpu.memory_space<vmem>>) attributes {dimension_semantics = [#tpu.dimension_semantics<parallel>, #tpu.dimension_semantics<parallel>], iteration_bounds = array<i64: 2, 1>, scalar_prefetch = 0 : i64, scratch_operands = 0 : i64, tpu.core_type = #tpu.core_type<tc>, window_params = [{pipeline_mode = #tpu.pipeline_mode<synchronous>, transform_indices = @transform_0, window_bounds = array<i64: 32, 576>}, {transform_indices = @transform_1, window_bounds = array<i64: 1, 576, 64>}, {pipeline_mode = #tpu.pipeline_mode<synchronous>, transform_indices = @transform_2, window_bounds = array<i64: 32, 1>}, {transform_indices = @transform_3, window_bounds = array<i64: 1, 32, 64>}]} {
    %c0 = arith.constant 0 : index
    %c0_0 = arith.constant 0 : index
    %0 = vector.load %arg2[%c0, %c0_0] : memref<32x576xbf16, #tpu.memory_space<vmem>>, vector<32x576xbf16>
    %c0_1 = arith.constant 0 : index
    %c0_2 = arith.constant 0 : index
    %c0_3 = arith.constant 0 : index
    %1 = vector.load %arg3[%c0_1, %c0_2, %c0_3] : memref<1x576x64xbf16, #tpu.memory_space<vmem>>, vector<1x576x64xbf16>
    %2 = vector.shape_cast %1 : vector<1x576x64xbf16> to vector<576x64xbf16>
    %cst = arith.constant dense<0.000000e+00> : vector<32x64xf32>
    %3 = tpu.matmul %0, %2, %cst {dimension_numbers = #tpu.dot_dimension_numbers<[1], [0], [0], [1], [0, 0, 1, 1], [], []>} : vector<32x576xbf16>, vector<576x64xbf16>, vector<32x64xf32> -> vector<32x64xf32>
    %c0_4 = arith.constant 0 : index
    %c0_5 = arith.constant 0 : index
    %4 = vector.load %arg4[%c0_4, %c0_5] : memref<32x1xf32, #tpu.memory_space<vmem>>, vector<32x1xf32>
    %5 = vector.broadcast %4 : vector<32x1xf32> to vector<32x64xf32>
    %6 = arith.addf %3, %5 : vector<32x64xf32>
    %cst_6 = arith.constant 0.000000e+00 : f32
    %7 = vector.broadcast %cst_6 : f32 to vector<32x64xf32>
    %8 = arith.maximumf %6, %7 : vector<32x64xf32>
    %9 = arith.truncf %8 : vector<32x64xf32> to vector<32x64xbf16>
    %c0_7 = arith.constant 0 : index
    %c0_8 = arith.constant 0 : index
    %c0_9 = arith.constant 0 : index
    %10 = vector.load %arg5[%c0_7, %c0_8, %c0_9] : memref<1x32x64xbf16, #tpu.memory_space<vmem>>, vector<1x32x64xbf16>
    %11 = vector.shape_cast %10 : vector<1x32x64xbf16> to vector<32x64xbf16>
    %12 = vector.shape_cast %9 : vector<32x64xbf16> to vector<1x32x64xbf16>
    tpu.vector_store %arg5[%c0_7, %c0_8, %c0_9], %12 {strides = array<i32>} : memref<1x32x64xbf16, #tpu.memory_space<vmem>>, vector<1x32x64xbf16>,
    return
  }
  func.func @transform_0(%arg0: i32, %arg1: i32) -> (i32, i32) {
    %c0_i32 = arith.constant 0 : i32
    %c0_i32_0 = arith.constant 0 : i32
    %c0_i32_1 = arith.constant 0 : i32
    return %c0_i32, %c0_i32_0 : i32, i32
  }
  func.func @transform_1(%arg0: i32, %arg1: i32) -> (i32, i32, i32) {
    %c0_i32 = arith.constant 0 : i32
    %c0_i32_0 = arith.constant 0 : i32
    return %arg0, %c0_i32, %arg1 : i32, i32, i32
  }
  func.func @transform_2(%arg0: i32, %arg1: i32) -> (i32, i32) {
    %c0_i32 = arith.constant 0 : i32
    %c0_i32_0 = arith.constant 0 : i32
    %c0_i32_1 = arith.constant 0 : i32
    return %c0_i32, %c0_i32_0 : i32, i32
  }
  func.func @transform_3(%arg0: i32, %arg1: i32) -> (i32, i32, i32) {
    %c0_i32 = arith.constant 0 : i32
    %c0_i32_0 = arith.constant 0 : i32
    return %arg0, %c0_i32, %arg1 : i32, i32, i32
  }
}

module attributes {stable_mosaic.version = 11 : i64} {
  func.func @_matmul_bias_act_kernel(%arg0: i32, %arg1: i32, %arg2: memref<32x1440xbf16, #tpu.memory_space<vmem>>, %arg3: memref<1x1440x64xbf16, #tpu.memory_space<vmem>>, %arg4: memref<32x1xf32, #tpu.memory_space<vmem>>, %arg5: memref<1x32x64xbf16, #tpu.memory_space<vmem>>) attributes {dimension_semantics = [#tpu.dimension_semantics<parallel>, #tpu.dimension_semantics<parallel>], iteration_bounds = array<i64: 2, 1>, scalar_prefetch = 0 : i64, scratch_operands = 0 : i64, tpu.core_type = #tpu.core_type<tc>, window_params = [{pipeline_mode = #tpu.pipeline_mode<synchronous>, transform_indices = @transform_0, window_bounds = array<i64: 32, 1440>}, {transform_indices = @transform_1, window_bounds = array<i64: 1, 1440, 64>}, {pipeline_mode = #tpu.pipeline_mode<synchronous>, transform_indices = @transform_2, window_bounds = array<i64: 32, 1>}, {transform_indices = @transform_3, window_bounds = array<i64: 1, 32, 64>}]} {
    %c0 = arith.constant 0 : index
    %c0_0 = arith.constant 0 : index
    %0 = vector.load %arg2[%c0, %c0_0] : memref<32x1440xbf16, #tpu.memory_space<vmem>>, vector<32x1440xbf16>
    %c0_1 = arith.constant 0 : index
    %c0_2 = arith.constant 0 : index
    %c0_3 = arith.constant 0 : index
    %1 = vector.load %arg3[%c0_1, %c0_2, %c0_3] : memref<1x1440x64xbf16, #tpu.memory_space<vmem>>, vector<1x1440x64xbf16>
    %2 = vector.shape_cast %1 : vector<1x1440x64xbf16> to vector<1440x64xbf16>
    %cst = arith.constant dense<0.000000e+00> : vector<32x64xf32>
    %3 = tpu.matmul %0, %2, %cst {dimension_numbers = #tpu.dot_dimension_numbers<[1], [0], [0], [1], [0, 0, 1, 1], [], []>} : vector<32x1440xbf16>, vector<1440x64xbf16>, vector<32x64xf32> -> vector<32x64xf32>
    %c0_4 = arith.constant 0 : index
    %c0_5 = arith.constant 0 : index
    %4 = vector.load %arg4[%c0_4, %c0_5] : memref<32x1xf32, #tpu.memory_space<vmem>>, vector<32x1xf32>
    %5 = vector.broadcast %4 : vector<32x1xf32> to vector<32x64xf32>
    %6 = arith.addf %3, %5 : vector<32x64xf32>
    %cst_6 = arith.constant 0.000000e+00 : f32
    %7 = vector.broadcast %cst_6 : f32 to vector<32x64xf32>
    %8 = arith.maximumf %6, %7 : vector<32x64xf32>
    %9 = arith.truncf %8 : vector<32x64xf32> to vector<32x64xbf16>
    %c0_7 = arith.constant 0 : index
    %c0_8 = arith.constant 0 : index
    %c0_9 = arith.constant 0 : index
    %10 = vector.load %arg5[%c0_7, %c0_8, %c0_9] : memref<1x32x64xbf16, #tpu.memory_space<vmem>>, vector<1x32x64xbf16>
    %11 = vector.shape_cast %10 : vector<1x32x64xbf16> to vector<32x64xbf16>
    %12 = vector.shape_cast %9 : vector<32x64xbf16> to vector<1x32x64xbf16>
    tpu.vector_store %arg5[%c0_7, %c0_8, %c0_9], %12 {strides = array<i32>} : memref<1x32x64xbf16, #tpu.memory_space<vmem>>, vector<1x32x64xbf16>,
    return
  }
  func.func @transform_0(%arg0: i32, %arg1: i32) -> (i32, i32) {
    %c0_i32 = arith.constant 0 : i32
    %c0_i32_0 = arith.constant 0 : i32
    %c0_i32_1 = arith.constant 0 : i32
    return %c0_i32, %c0_i32_0 : i32, i32
  }
  func.func @transform_1(%arg0: i32, %arg1: i32) -> (i32, i32, i32) {
    %c0_i32 = arith.constant 0 : i32
    %c0_i32_0 = arith.constant 0 : i32
    return %arg0, %c0_i32, %arg1 : i32, i32, i32
  }
  func.func @transform_2(%arg0: i32, %arg1: i32) -> (i32, i32) {
    %c0_i32 = arith.constant 0 : i32
    %c0_i32_0 = arith.constant 0 : i32
    %c0_i32_1 = arith.constant 0 : i32
    return %c0_i32, %c0_i32_0 : i32, i32
  }
  func.func @transform_3(%arg0: i32, %arg1: i32) -> (i32, i32, i32) {
    %c0_i32 = arith.constant 0 : i32
    %c0_i32_0 = arith.constant 0 : i32
    return %arg0, %c0_i32, %arg1 : i32, i32, i32
  }
}

module attributes {stable_mosaic.version = 11 : i64} {
  func.func @_matmul_bias_act_kernel(%arg0: i32, %arg1: i32, %arg2: memref<16x288xbf16, #tpu.memory_space<vmem>>, %arg3: memref<1x288x256xbf16, #tpu.memory_space<vmem>>, %arg4: memref<16x1xf32, #tpu.memory_space<vmem>>, %arg5: memref<1x16x256xbf16, #tpu.memory_space<vmem>>) attributes {dimension_semantics = [#tpu.dimension_semantics<parallel>, #tpu.dimension_semantics<parallel>], iteration_bounds = array<i64: 2, 1>, scalar_prefetch = 0 : i64, scratch_operands = 0 : i64, tpu.core_type = #tpu.core_type<tc>, window_params = [{pipeline_mode = #tpu.pipeline_mode<synchronous>, transform_indices = @transform_0, window_bounds = array<i64: 16, 288>}, {transform_indices = @transform_1, window_bounds = array<i64: 1, 288, 256>}, {pipeline_mode = #tpu.pipeline_mode<synchronous>, transform_indices = @transform_2, window_bounds = array<i64: 16, 1>}, {transform_indices = @transform_3, window_bounds = array<i64: 1, 16, 256>}]} {
    %c0 = arith.constant 0 : index
    %c0_0 = arith.constant 0 : index
    %0 = vector.load %arg2[%c0, %c0_0] : memref<16x288xbf16, #tpu.memory_space<vmem>>, vector<16x288xbf16>
    %c0_1 = arith.constant 0 : index
    %c0_2 = arith.constant 0 : index
    %c0_3 = arith.constant 0 : index
    %1 = vector.load %arg3[%c0_1, %c0_2, %c0_3] : memref<1x288x256xbf16, #tpu.memory_space<vmem>>, vector<1x288x256xbf16>
    %2 = vector.shape_cast %1 : vector<1x288x256xbf16> to vector<288x256xbf16>
    %cst = arith.constant dense<0.000000e+00> : vector<16x256xf32>
    %3 = tpu.matmul %0, %2, %cst {dimension_numbers = #tpu.dot_dimension_numbers<[1], [0], [0], [1], [0, 0, 1, 1], [], []>} : vector<16x288xbf16>, vector<288x256xbf16>, vector<16x256xf32> -> vector<16x256xf32>
    %c0_4 = arith.constant 0 : index
    %c0_5 = arith.constant 0 : index
    %4 = vector.load %arg4[%c0_4, %c0_5] : memref<16x1xf32, #tpu.memory_space<vmem>>, vector<16x1xf32>
    %5 = vector.broadcast %4 : vector<16x1xf32> to vector<16x256xf32>
    %6 = arith.addf %3, %5 : vector<16x256xf32>
    %cst_6 = arith.constant 0.000000e+00 : f32
    %7 = vector.broadcast %cst_6 : f32 to vector<16x256xf32>
    %8 = arith.maximumf %6, %7 : vector<16x256xf32>
    %9 = arith.truncf %8 : vector<16x256xf32> to vector<16x256xbf16>
    %c0_7 = arith.constant 0 : index
    %c0_8 = arith.constant 0 : index
    %c0_9 = arith.constant 0 : index
    %10 = vector.load %arg5[%c0_7, %c0_8, %c0_9] : memref<1x16x256xbf16, #tpu.memory_space<vmem>>, vector<1x16x256xbf16>
    %11 = vector.shape_cast %10 : vector<1x16x256xbf16> to vector<16x256xbf16>
    %12 = vector.shape_cast %9 : vector<16x256xbf16> to vector<1x16x256xbf16>
    tpu.vector_store %arg5[%c0_7, %c0_8, %c0_9], %12 {strides = array<i32>} : memref<1x16x256xbf16, #tpu.memory_space<vmem>>, vector<1x16x256xbf16>,
    return
  }
  func.func @transform_0(%arg0: i32, %arg1: i32) -> (i32, i32) {
    %c0_i32 = arith.constant 0 : i32
    %c0_i32_0 = arith.constant 0 : i32
    %c0_i32_1 = arith.constant 0 : i32
    return %c0_i32, %c0_i32_0 : i32, i32
  }
  func.func @transform_1(%arg0: i32, %arg1: i32) -> (i32, i32, i32) {
    %c0_i32 = arith.constant 0 : i32
    %c0_i32_0 = arith.constant 0 : i32
    return %arg0, %c0_i32, %arg1 : i32, i32, i32
  }
  func.func @transform_2(%arg0: i32, %arg1: i32) -> (i32, i32) {
    %c0_i32 = arith.constant 0 : i32
    %c0_i32_0 = arith.constant 0 : i32
    %c0_i32_1 = arith.constant 0 : i32
    return %c0_i32, %c0_i32_0 : i32, i32
  }
  func.func @transform_3(%arg0: i32, %arg1: i32) -> (i32, i32, i32) {
    %c0_i32 = arith.constant 0 : i32
    %c0_i32_0 = arith.constant 0 : i32
    return %arg0, %c0_i32, %arg1 : i32, i32, i32
  }
}

module attributes {stable_mosaic.version = 11 : i64} {
  func.func @_matmul_bias_act_kernel(%arg0: i32, %arg1: i32, %arg2: memref<16x720xbf16, #tpu.memory_space<vmem>>, %arg3: memref<1x720x256xbf16, #tpu.memory_space<vmem>>, %arg4: memref<16x1xf32, #tpu.memory_space<vmem>>, %arg5: memref<1x16x256xbf16, #tpu.memory_space<vmem>>) attributes {dimension_semantics = [#tpu.dimension_semantics<parallel>, #tpu.dimension_semantics<parallel>], iteration_bounds = array<i64: 2, 1>, scalar_prefetch = 0 : i64, scratch_operands = 0 : i64, tpu.core_type = #tpu.core_type<tc>, window_params = [{pipeline_mode = #tpu.pipeline_mode<synchronous>, transform_indices = @transform_0, window_bounds = array<i64: 16, 720>}, {transform_indices = @transform_1, window_bounds = array<i64: 1, 720, 256>}, {pipeline_mode = #tpu.pipeline_mode<synchronous>, transform_indices = @transform_2, window_bounds = array<i64: 16, 1>}, {transform_indices = @transform_3, window_bounds = array<i64: 1, 16, 256>}]} {
    %c0 = arith.constant 0 : index
    %c0_0 = arith.constant 0 : index
    %0 = vector.load %arg2[%c0, %c0_0] : memref<16x720xbf16, #tpu.memory_space<vmem>>, vector<16x720xbf16>
    %c0_1 = arith.constant 0 : index
    %c0_2 = arith.constant 0 : index
    %c0_3 = arith.constant 0 : index
    %1 = vector.load %arg3[%c0_1, %c0_2, %c0_3] : memref<1x720x256xbf16, #tpu.memory_space<vmem>>, vector<1x720x256xbf16>
    %2 = vector.shape_cast %1 : vector<1x720x256xbf16> to vector<720x256xbf16>
    %cst = arith.constant dense<0.000000e+00> : vector<16x256xf32>
    %3 = tpu.matmul %0, %2, %cst {dimension_numbers = #tpu.dot_dimension_numbers<[1], [0], [0], [1], [0, 0, 1, 1], [], []>} : vector<16x720xbf16>, vector<720x256xbf16>, vector<16x256xf32> -> vector<16x256xf32>
    %c0_4 = arith.constant 0 : index
    %c0_5 = arith.constant 0 : index
    %4 = vector.load %arg4[%c0_4, %c0_5] : memref<16x1xf32, #tpu.memory_space<vmem>>, vector<16x1xf32>
    %5 = vector.broadcast %4 : vector<16x1xf32> to vector<16x256xf32>
    %6 = arith.addf %3, %5 : vector<16x256xf32>
    %cst_6 = arith.constant 0.000000e+00 : f32
    %7 = vector.broadcast %cst_6 : f32 to vector<16x256xf32>
    %8 = arith.maximumf %6, %7 : vector<16x256xf32>
    %9 = arith.truncf %8 : vector<16x256xf32> to vector<16x256xbf16>
    %c0_7 = arith.constant 0 : index
    %c0_8 = arith.constant 0 : index
    %c0_9 = arith.constant 0 : index
    %10 = vector.load %arg5[%c0_7, %c0_8, %c0_9] : memref<1x16x256xbf16, #tpu.memory_space<vmem>>, vector<1x16x256xbf16>
    %11 = vector.shape_cast %10 : vector<1x16x256xbf16> to vector<16x256xbf16>
    %12 = vector.shape_cast %9 : vector<16x256xbf16> to vector<1x16x256xbf16>
    tpu.vector_store %arg5[%c0_7, %c0_8, %c0_9], %12 {strides = array<i32>} : memref<1x16x256xbf16, #tpu.memory_space<vmem>>, vector<1x16x256xbf16>,
    return
  }
  func.func @transform_0(%arg0: i32, %arg1: i32) -> (i32, i32) {
    %c0_i32 = arith.constant 0 : i32
    %c0_i32_0 = arith.constant 0 : i32
    %c0_i32_1 = arith.constant 0 : i32
    return %c0_i32, %c0_i32_0 : i32, i32
  }
  func.func @transform_1(%arg0: i32, %arg1: i32) -> (i32, i32, i32) {
    %c0_i32 = arith.constant 0 : i32
    %c0_i32_0 = arith.constant 0 : i32
    return %arg0, %c0_i32, %arg1 : i32, i32, i32
  }
  func.func @transform_2(%arg0: i32, %arg1: i32) -> (i32, i32) {
    %c0_i32 = arith.constant 0 : i32
    %c0_i32_0 = arith.constant 0 : i32
    %c0_i32_1 = arith.constant 0 : i32
    return %c0_i32, %c0_i32_0 : i32, i32
  }
  func.func @transform_3(%arg0: i32, %arg1: i32) -> (i32, i32, i32) {
    %c0_i32 = arith.constant 0 : i32
    %c0_i32_0 = arith.constant 0 : i32
    return %arg0, %c0_i32, %arg1 : i32, i32, i32
  }
}

module attributes {stable_mosaic.version = 11 : i64} {
  func.func @_matmul_bias_act_kernel(%arg0: i32, %arg1: i32, %arg2: memref<4x144xbf16, #tpu.memory_space<vmem>>, %arg3: memref<1x144x1024xbf16, #tpu.memory_space<vmem>>, %arg4: memref<4x1xf32, #tpu.memory_space<vmem>>, %arg5: memref<1x4x1024xbf16, #tpu.memory_space<vmem>>) attributes {dimension_semantics = [#tpu.dimension_semantics<parallel>, #tpu.dimension_semantics<parallel>], iteration_bounds = array<i64: 2, 1>, scalar_prefetch = 0 : i64, scratch_operands = 0 : i64, tpu.core_type = #tpu.core_type<tc>, window_params = [{pipeline_mode = #tpu.pipeline_mode<synchronous>, transform_indices = @transform_0, window_bounds = array<i64: 4, 144>}, {transform_indices = @transform_1, window_bounds = array<i64: 1, 144, 1024>}, {pipeline_mode = #tpu.pipeline_mode<synchronous>, transform_indices = @transform_2, window_bounds = array<i64: 4, 1>}, {transform_indices = @transform_3, window_bounds = array<i64: 1, 4, 1024>}]} {
    %c0 = arith.constant 0 : index
    %c0_0 = arith.constant 0 : index
    %0 = vector.load %arg2[%c0, %c0_0] : memref<4x144xbf16, #tpu.memory_space<vmem>>, vector<4x144xbf16>
    %c0_1 = arith.constant 0 : index
    %c0_2 = arith.constant 0 : index
    %c0_3 = arith.constant 0 : index
    %1 = vector.load %arg3[%c0_1, %c0_2, %c0_3] : memref<1x144x1024xbf16, #tpu.memory_space<vmem>>, vector<1x144x1024xbf16>
    %2 = vector.shape_cast %1 : vector<1x144x1024xbf16> to vector<144x1024xbf16>
    %cst = arith.constant dense<0.000000e+00> : vector<4x1024xf32>
    %3 = tpu.matmul %0, %2, %cst {dimension_numbers = #tpu.dot_dimension_numbers<[1], [0], [0], [1], [0, 0, 1, 1], [], []>} : vector<4x144xbf16>, vector<144x1024xbf16>, vector<4x1024xf32> -> vector<4x1024xf32>
    %c0_4 = arith.constant 0 : index
    %c0_5 = arith.constant 0 : index
    %4 = vector.load %arg4[%c0_4, %c0_5] : memref<4x1xf32, #tpu.memory_space<vmem>>, vector<4x1xf32>
    %5 = vector.broadcast %4 : vector<4x1xf32> to vector<4x1024xf32>
    %6 = arith.addf %3, %5 : vector<4x1024xf32>
    %cst_6 = arith.constant 0.000000e+00 : f32
    %7 = vector.broadcast %cst_6 : f32 to vector<4x1024xf32>
    %8 = arith.maximumf %6, %7 : vector<4x1024xf32>
    %9 = arith.truncf %8 : vector<4x1024xf32> to vector<4x1024xbf16>
    %c0_7 = arith.constant 0 : index
    %c0_8 = arith.constant 0 : index
    %c0_9 = arith.constant 0 : index
    %10 = vector.load %arg5[%c0_7, %c0_8, %c0_9] : memref<1x4x1024xbf16, #tpu.memory_space<vmem>>, vector<1x4x1024xbf16>
    %11 = vector.shape_cast %10 : vector<1x4x1024xbf16> to vector<4x1024xbf16>
    %12 = vector.shape_cast %9 : vector<4x1024xbf16> to vector<1x4x1024xbf16>
    tpu.vector_store %arg5[%c0_7, %c0_8, %c0_9], %12 {strides = array<i32>} : memref<1x4x1024xbf16, #tpu.memory_space<vmem>>, vector<1x4x1024xbf16>,
    return
  }
  func.func @transform_0(%arg0: i32, %arg1: i32) -> (i32, i32) {
    %c0_i32 = arith.constant 0 : i32
    %c0_i32_0 = arith.constant 0 : i32
    %c0_i32_1 = arith.constant 0 : i32
    return %c0_i32, %c0_i32_0 : i32, i32
  }
  func.func @transform_1(%arg0: i32, %arg1: i32) -> (i32, i32, i32) {
    %c0_i32 = arith.constant 0 : i32
    %c0_i32_0 = arith.constant 0 : i32
    return %arg0, %c0_i32, %arg1 : i32, i32, i32
  }
  func.func @transform_2(%arg0: i32, %arg1: i32) -> (i32, i32) {
    %c0_i32 = arith.constant 0 : i32
    %c0_i32_0 = arith.constant 0 : i32
    %c0_i32_1 = arith.constant 0 : i32
    return %c0_i32, %c0_i32_0 : i32, i32
  }
  func.func @transform_3(%arg0: i32, %arg1: i32) -> (i32, i32, i32) {
    %c0_i32 = arith.constant 0 : i32
    %c0_i32_0 = arith.constant 0 : i32
    return %arg0, %c0_i32, %arg1 : i32, i32, i32
  }
}

module attributes {stable_mosaic.version = 11 : i64} {
  func.func @_matmul_bias_act_kernel(%arg0: i32, %arg1: i32, %arg2: memref<4x612xbf16, #tpu.memory_space<vmem>>, %arg3: memref<1x612x1024xbf16, #tpu.memory_space<vmem>>, %arg4: memref<4x1xf32, #tpu.memory_space<vmem>>, %arg5: memref<1x4x1024xbf16, #tpu.memory_space<vmem>>) attributes {dimension_semantics = [#tpu.dimension_semantics<parallel>, #tpu.dimension_semantics<parallel>], iteration_bounds = array<i64: 2, 1>, scalar_prefetch = 0 : i64, scratch_operands = 0 : i64, tpu.core_type = #tpu.core_type<tc>, window_params = [{pipeline_mode = #tpu.pipeline_mode<synchronous>, transform_indices = @transform_0, window_bounds = array<i64: 4, 612>}, {transform_indices = @transform_1, window_bounds = array<i64: 1, 612, 1024>}, {pipeline_mode = #tpu.pipeline_mode<synchronous>, transform_indices = @transform_2, window_bounds = array<i64: 4, 1>}, {transform_indices = @transform_3, window_bounds = array<i64: 1, 4, 1024>}]} {
    %c0 = arith.constant 0 : index
    %c0_0 = arith.constant 0 : index
    %0 = vector.load %arg2[%c0, %c0_0] : memref<4x612xbf16, #tpu.memory_space<vmem>>, vector<4x612xbf16>
    %c0_1 = arith.constant 0 : index
    %c0_2 = arith.constant 0 : index
    %c0_3 = arith.constant 0 : index
    %1 = vector.load %arg3[%c0_1, %c0_2, %c0_3] : memref<1x612x1024xbf16, #tpu.memory_space<vmem>>, vector<1x612x1024xbf16>
    %2 = vector.shape_cast %1 : vector<1x612x1024xbf16> to vector<612x1024xbf16>
    %cst = arith.constant dense<0.000000e+00> : vector<4x1024xf32>
    %3 = tpu.matmul %0, %2, %cst {dimension_numbers = #tpu.dot_dimension_numbers<[1], [0], [0], [1], [0, 0, 1, 1], [], []>} : vector<4x612xbf16>, vector<612x1024xbf16>, vector<4x1024xf32> -> vector<4x1024xf32>
    %c0_4 = arith.constant 0 : index
    %c0_5 = arith.constant 0 : index
    %4 = vector.load %arg4[%c0_4, %c0_5] : memref<4x1xf32, #tpu.memory_space<vmem>>, vector<4x1xf32>
    %5 = vector.broadcast %4 : vector<4x1xf32> to vector<4x1024xf32>
    %6 = arith.addf %3, %5 : vector<4x1024xf32>
    %cst_6 = arith.constant 0.000000e+00 : f32
    %7 = vector.broadcast %cst_6 : f32 to vector<4x1024xf32>
    %8 = arith.maximumf %6, %7 : vector<4x1024xf32>
    %9 = arith.truncf %8 : vector<4x1024xf32> to vector<4x1024xbf16>
    %c0_7 = arith.constant 0 : index
    %c0_8 = arith.constant 0 : index
    %c0_9 = arith.constant 0 : index
    %10 = vector.load %arg5[%c0_7, %c0_8, %c0_9] : memref<1x4x1024xbf16, #tpu.memory_space<vmem>>, vector<1x4x1024xbf16>
    %11 = vector.shape_cast %10 : vector<1x4x1024xbf16> to vector<4x1024xbf16>
    %12 = vector.shape_cast %9 : vector<4x1024xbf16> to vector<1x4x1024xbf16>
    tpu.vector_store %arg5[%c0_7, %c0_8, %c0_9], %12 {strides = array<i32>} : memref<1x4x1024xbf16, #tpu.memory_space<vmem>>, vector<1x4x1024xbf16>,
    return
  }
  func.func @transform_0(%arg0: i32, %arg1: i32) -> (i32, i32) {
    %c0_i32 = arith.constant 0 : i32
    %c0_i32_0 = arith.constant 0 : i32
    %c0_i32_1 = arith.constant 0 : i32
    return %c0_i32, %c0_i32_0 : i32, i32
  }
  func.func @transform_1(%arg0: i32, %arg1: i32) -> (i32, i32, i32) {
    %c0_i32 = arith.constant 0 : i32
    %c0_i32_0 = arith.constant 0 : i32
    return %arg0, %c0_i32, %arg1 : i32, i32, i32
  }
  func.func @transform_2(%arg0: i32, %arg1: i32) -> (i32, i32) {
    %c0_i32 = arith.constant 0 : i32
    %c0_i32_0 = arith.constant 0 : i32
    %c0_i32_1 = arith.constant 0 : i32
    return %c0_i32, %c0_i32_0 : i32, i32
  }
  func.func @transform_3(%arg0: i32, %arg1: i32) -> (i32, i32, i32) {
    %c0_i32 = arith.constant 0 : i32
    %c0_i32_0 = arith.constant 0 : i32
    return %arg0, %c0_i32, %arg1 : i32, i32, i32
  }
}

module attributes {stable_mosaic.version = 11 : i64} {
  func.func @_matmul_bias_act_kernel(%arg0: i32, %arg1: i32, %arg2: memref<2x36xbf16, #tpu.memory_space<vmem>>, %arg3: memref<1x36x2048xbf16, #tpu.memory_space<vmem>>, %arg4: memref<2x1xf32, #tpu.memory_space<vmem>>, %arg5: memref<1x2x2048xf32, #tpu.memory_space<vmem>>) attributes {dimension_semantics = [#tpu.dimension_semantics<parallel>, #tpu.dimension_semantics<parallel>], iteration_bounds = array<i64: 2, 2>, scalar_prefetch = 0 : i64, scratch_operands = 0 : i64, tpu.core_type = #tpu.core_type<tc>, window_params = [{pipeline_mode = #tpu.pipeline_mode<synchronous>, transform_indices = @transform_0, window_bounds = array<i64: 2, 36>}, {transform_indices = @transform_1, window_bounds = array<i64: 1, 36, 2048>}, {pipeline_mode = #tpu.pipeline_mode<synchronous>, transform_indices = @transform_2, window_bounds = array<i64: 2, 1>}, {transform_indices = @transform_3, window_bounds = array<i64: 1, 2, 2048>}]} {
    %c0 = arith.constant 0 : index
    %c0_0 = arith.constant 0 : index
    %0 = vector.load %arg2[%c0, %c0_0] : memref<2x36xbf16, #tpu.memory_space<vmem>>, vector<2x36xbf16>
    %c0_1 = arith.constant 0 : index
    %c0_2 = arith.constant 0 : index
    %c0_3 = arith.constant 0 : index
    %1 = vector.load %arg3[%c0_1, %c0_2, %c0_3] : memref<1x36x2048xbf16, #tpu.memory_space<vmem>>, vector<1x36x2048xbf16>
    %2 = vector.shape_cast %1 : vector<1x36x2048xbf16> to vector<36x2048xbf16>
    %cst = arith.constant dense<0.000000e+00> : vector<2x2048xf32>
    %3 = tpu.matmul %0, %2, %cst {dimension_numbers = #tpu.dot_dimension_numbers<[1], [0], [0], [1], [0, 0, 1, 1], [], []>} : vector<2x36xbf16>, vector<36x2048xbf16>, vector<2x2048xf32> -> vector<2x2048xf32>
    %c0_4 = arith.constant 0 : index
    %c0_5 = arith.constant 0 : index
    %4 = vector.load %arg4[%c0_4, %c0_5] : memref<2x1xf32, #tpu.memory_space<vmem>>, vector<2x1xf32>
    %5 = vector.broadcast %4 : vector<2x1xf32> to vector<2x2048xf32>
    %6 = arith.addf %3, %5 : vector<2x2048xf32>
    %c0_6 = arith.constant 0 : index
    %c0_7 = arith.constant 0 : index
    %c0_8 = arith.constant 0 : index
    %7 = vector.load %arg5[%c0_6, %c0_7, %c0_8] : memref<1x2x2048xf32, #tpu.memory_space<vmem>>, vector<1x2x2048xf32>
    %8 = vector.shape_cast %7 : vector<1x2x2048xf32> to vector<2x2048xf32>
    %9 = vector.shape_cast %6 : vector<2x2048xf32> to vector<1x2x2048xf32>
    tpu.vector_store %arg5[%c0_6, %c0_7, %c0_8], %9 {strides = array<i32>} : memref<1x2x2048xf32, #tpu.memory_space<vmem>>, vector<1x2x2048xf32>,
    return
  }
  func.func @transform_0(%arg0: i32, %arg1: i32) -> (i32, i32) {
    %c0_i32 = arith.constant 0 : i32
    %c0_i32_0 = arith.constant 0 : i32
    %c0_i32_1 = arith.constant 0 : i32
    return %c0_i32, %c0_i32_0 : i32, i32
  }
  func.func @transform_1(%arg0: i32, %arg1: i32) -> (i32, i32, i32) {
    %c0_i32 = arith.constant 0 : i32
    %c0_i32_0 = arith.constant 0 : i32
    return %arg0, %c0_i32, %arg1 : i32, i32, i32
  }
  func.func @transform_2(%arg0: i32, %arg1: i32) -> (i32, i32) {
    %c0_i32 = arith.constant 0 : i32
    %c0_i32_0 = arith.constant 0 : i32
    %c0_i32_1 = arith.constant 0 : i32
    return %c0_i32, %c0_i32_0 : i32, i32
  }
  func.func @transform_3(%arg0: i32, %arg1: i32) -> (i32, i32, i32) {
    %c0_i32 = arith.constant 0 : i32
    %c0_i32_0 = arith.constant 0 : i32
    return %arg0, %c0_i32, %arg1 : i32, i32, i32
  }
}

</mosaic_0001>

<bundles_post_ra>
// kernel: segmnet_forward.11
= control target key start
LH: loop header
LB: loop body
LE: loop exit
PB: predicated region body
PF: predicated region fallthrough
CT: control target
= control target key end

     0   :  { %s833_s12 = smov 0   ;;  %s835_s13 = smov 0   ;;  %s954_s0 = inlined_call_operand.vmem [shape: bf16[64,256], index: 0, kind: input, shape index: {}]   ;;  %s955_s1 = inlined_call_operand.vmem [shape: bf16[4,256,16], index: 1, kind: input, shape index: {}]   ;;  %s956_s2 = inlined_call_operand.vmem [shape: f32[64,1], index: 2, kind: input, shape index: {}]   ;;  %s957_s3 = inlined_call_operand.vmem [shape: bf16[4,64,16], index: 3, kind: output, shape index: {}]  }
   0x1   :  { %s837_s14 = smov 0  }
   0x2 LB: > { %s25_s15 = sadd.s32 1, %s806_s13  ;;  %p628_p0 = scmp.ge.s32.totalorder %s810_s14, 1  ;;  %s810_s14 = sphi %s837_s14, %s13_s14   ;;  %s806_s13 = sphi %s835_s13, %s959_s13   ;;  %s802_s12 = sphi %s833_s12, %s958_s12  }
   0x3   : > { %p27_p1 = scmp.ge.s32.totalorder %s25_s15, 4  ;;  %p156_p2 = scmp.lt.s32.totalorder %s810_s14, 5 }
   0x5   : > { %s961_s15 = smov (%p27_p1, %s25_s15), 0  ;;  %p157_p3 = pnand %p628_p0, %p156_p2 }
   0x6   : > { %p186_p4 = scmp.lt.s32.totalorder (!%p157_p3), %s802_s12, 3  ;;  %v778_v0 = vld [vmem:[%s954_s0 + $0x4] ss:$8 sps:$4 sm:$0xff] (!%p157_p3)   ;;  %v812_v1 = vmov (!%p157_p3), 0   ;;  %v245_v3 = vld [vmem:[%s956_s2 + $0x10] sm:$0xff] (!%p157_p3)  ;;  %v246_v16 = vld [vmem:[%s956_s2 + $0x18] sm:$0xff] (!%p157_p3) }
   0x7   : > { %160 = sbr.rel (%p157_p3) target bundleno = 282 (0x11a), region = 32  ;;  %759 = vset.pattern.permute.xlu1 (!%p157_p3), %v812_v1  ;;  %758 = vset.pattern.permute.xlu0 (!%p157_p3), %v812_v1  ;;  %v781_v2 = vld [vmem:[%s954_s0 + $0x24] ss:$8 sps:$4 sm:$0xff] (!%p157_p3)   ;;  %v250_v22 = vld [vmem:[%s956_s2 + $0x38] sm:$0xff] (!%p157_p3)  ;;  %v249_v23 = vld [vmem:[%s956_s2 + $0x30] sm:$0xff] (!%p157_p3)  ;;  %vm532_vm0 = vcmask (!%p157_p3), 125952  }
   0x8   : > { %459 = vmatprep.mubr.bf16.mxu0 (!%p157_p3), %v778_v0  ;;  %475 = vmatprep.mubr.bf16.mxu1 (!%p157_p3), %v781_v2  ;;  %v243_v4 = vld [vmem:[%s956_s2] sm:$0xff] (!%p157_p3)  ;;  %v244_v17 = vld [vmem:[%s956_s2 + $0x8] sm:$0xff] (!%p157_p3)  ;;  %v782_v29 = vld [vmem:[%s954_s0 + $0x14] ss:$8 sps:$4 sm:$0xff] (!%p157_p3)  }
   0x9   : > { %263 = vperm.xlu1 (!%p157_p3), %759, %v245_v3   ;;  %253 = vperm.xlu0 (!%p157_p3), %758, %v243_v4   ;;  %v248_v18 = vld [vmem:[%s956_s2 + $0x28] sm:$0xff] (!%p157_p3)  ;;  %v247_v19 = vld [vmem:[%s956_s2 + $0x20] sm:$0xff] (!%p157_p3)  ;;  %v784_v30 = vld [vmem:[%s954_s0 + $0x34] ss:$8 sps:$4 sm:$0xff] (!%p157_p3)  }
   0xa   : > { %v776_v27 = vld [vmem:[%s954_s0] ss:$8 sps:$4 sm:$0xff] (!%p157_p3)   ;;  %v786_v31 = vld [vmem:[%s954_s0 + $0x10] ss:$8 sps:$4 sm:$0xff] (!%p157_p3)  }
   0xb   : > { %v779_v28 = vld [vmem:[%s954_s0 + $0x20] ss:$8 sps:$4 sm:$0xff] (!%p157_p3)   ;;  %v787_v32 = vld [vmem:[%s954_s0 + $0x30] ss:$8 sps:$4 sm:$0xff] (!%p157_p3)  }
   0xd   : > { %268 = vperm.xlu1 (!%p157_p3), %759, %v246_v16   ;;  %258 = vperm.xlu0 (!%p157_p3), %758, %v244_v17  }
   0xe   : > { %s963_s12 = smov (!%p186_p4, %s802_s12), 3 }
   0xf   : > { %s667_s20 = sshll.u32 %s963_s12, 7  ;;  %s668_s29 = sshll.u32 %s963_s12, 5 }
  0x10   : > { %s863_s23 = scalar_lea.vmem %s955_s1, %s667_s20  ;;  %s927_s5 = scalar_lea.vmem %s957_s3, %s668_s29 }
  0x11   : > { %v760_v5 = vld [vmem:[%s863_s23 + $0x40] sm:$0xff]   ;;  %v762_v7 = vld [vmem:[%s863_s23 + $0x48] sm:$0xff]   ;;  %v764_v9 = vld [vmem:[%s863_s23 + $0x50] sm:$0xff]   ;;  %278 = vperm.xlu1 %759, %v248_v18   ;;  %273 = vperm.xlu0 %758, %v247_v19  }
  0x12   : > { %v761_v6 = vld [vmem:[%s863_s23] sm:$0xff]   ;;  %677 = vmatprep.subr.bf16.mxu0 %v760_v5  ;;  %717 = vmatprep.subr.bf16.mxu1 %v760_v5  ;;  %v763_v8 = vld [vmem:[%s863_s23 + $0x8] sm:$0xff]   ;;  %v765_v10 = vld [vmem:[%s863_s23 + $0x10] sm:$0xff]  }
  0x13   : > { %678 = vmatpush3.bf16.msra.mxu0 %v761_v6  ;;  %725 = vmatpush3.bf16.msra.mxu1 %v761_v6  ;;  %v766_v11 = vld [vmem:[%s863_s23 + $0x58] sm:$0xff]   ;;  %v768_v13 = vld [vmem:[%s863_s23 + $0x60] sm:$0xff]   ;;  %v770_v15 = vld [vmem:[%s863_s23 + $0x68] sm:$0xff]  }
  0x14   : > { %679 = vmatprep.subr.bf16.mxu0 %v762_v7  ;;  %718 = vmatprep.subr.bf16.mxu1 %v762_v7  ;;  %v767_v12 = vld [vmem:[%s863_s23 + $0x18] sm:$0xff]   ;;  %v769_v14 = vld [vmem:[%s863_s23 + $0x20] sm:$0xff]   ;;  %v771_v20 = vld [vmem:[%s863_s23 + $0x28] sm:$0xff]  }
  0x15   : > { %v772_v21 = vld [vmem:[%s863_s23 + $0x70] sm:$0xff]   ;;  %v774_v25 = vld [vmem:[%s863_s23 + $0x78] sm:$0xff]   ;;  %288 = vperm.xlu1 %759, %v250_v22   ;;  %283 = vperm.xlu0 %758, %v249_v23  }
  0x16   : > { %v773_v24 = vld [vmem:[%s863_s23 + $0x30] sm:$0xff]   ;;  %v775_v26 = vld [vmem:[%s863_s23 + $0x38] sm:$0xff]  }
  0x17   : > { %680 = vmatpush3.bf16.msra.mxu0 %v763_v8  ;;  %726 = vmatpush3.bf16.msra.mxu1 %v763_v8 }
  0x18   : > { %681 = vmatprep.subr.bf16.mxu0 %v764_v9  ;;  %719 = vmatprep.subr.bf16.mxu1 %v764_v9 }
  0x1b   : > { %682 = vmatpush3.bf16.msra.mxu0 %v765_v10  ;;  %727 = vmatpush3.bf16.msra.mxu1 %v765_v10 }
  0x1c   : > { %683 = vmatprep.subr.bf16.mxu0 %v766_v11  ;;  %720 = vmatprep.subr.bf16.mxu1 %v766_v11 }
  0x1f   : > { %684 = vmatpush3.bf16.msra.mxu0 %v767_v12  ;;  %728 = vmatpush3.bf16.msra.mxu1 %v767_v12 }
  0x20   : > { %685 = vmatprep.subr.bf16.mxu0 %v768_v13  ;;  %721 = vmatprep.subr.bf16.mxu1 %v768_v13 }
  0x23   : > { %686 = vmatpush3.bf16.msra.mxu0 %v769_v14  ;;  %729 = vmatpush3.bf16.msra.mxu1 %v769_v14 }
  0x24   : > { %687 = vmatprep.subr.bf16.mxu0 %v770_v15  ;;  %722 = vmatprep.subr.bf16.mxu1 %v770_v15 }
  0x27   : > { %688 = vmatpush3.bf16.msra.mxu0 %v771_v20  ;;  %730 = vmatpush3.bf16.msra.mxu1 %v771_v20 }
  0x28   : > { %689 = vmatprep.subr.bf16.mxu0 %v772_v21  ;;  %723 = vmatprep.subr.bf16.mxu1 %v772_v21 }
  0x2b   : > { %690 = vmatpush3.bf16.msra.mxu0 %v773_v24  ;;  %731 = vmatpush3.bf16.msra.mxu1 %v773_v24 }
  0x2c   : > { %691 = vmatprep.subr.bf16.mxu0 %v774_v25  ;;  %724 = vmatprep.subr.bf16.mxu1 %v774_v25 }
  0x2f   : > { %692 = vmatpush3.bf16.msra.mxu0 %v775_v26  ;;  %732 = vmatpush3.bf16.msra.mxu1 %v775_v26 }
  0x32   : > { %460 = vmatmul.mubr.bf16.vlgmr.msra.gmra.mrb[0].mxu0 %v776_v27  ;;  %476 = vmatmul.mubr.bf16.vlgmr.msra.gmra.mrb[0].mxu1 %v779_v28 }
  0x33   : > { %467 = vmatprep.mubr.bf16.mxu0 %v782_v29  ;;  %483 = vmatprep.mubr.bf16.mxu1 %v784_v30 }
  0x3a   : > { %468 = vmatmul.mubr.bf16.gmra.mrb[4].mxu0 %v786_v31  ;;  %484 = vmatmul.mubr.bf16.gmra.mrb[4].mxu1 %v787_v32 }
  0x88   : > { %v254_v33 = vpop.permute.xlu0 %253  ;;  %v264_v34 = vpop.permute.xlu1 %263 }
  0x8c   : > { %v259_v35 = vpop.permute.xlu0 %258  ;;  %v269_v36 = vpop.permute.xlu1 %268 }
  0x90   : > { %v274_v37 = vpop.permute.xlu0 %273  ;;  %v279_v52 = vpop.permute.xlu1 %278 }
  0x94   : > { %v284_v57 = vpop.permute.xlu0 %283  ;;  %v289_v14 = vpop.permute.xlu1 %288 }
 0x105   : > { %v693_v38 = vpop.f32.mrb[0].mxu0  ;;  %v705_v39 = vpop.f32.mrb[0].mxu1 }
 0x106   : > { %v694_v40 = vpop.f32.mrb[1].mxu0  ;;  %v706_v41 = vpop.f32.mrb[1].mxu1 }
 0x107   : > { %v695_v42 = vadd.f32 %v694_v40, %v693_v38  ;;  %v707_v43 = vadd.f32 %v706_v41, %v705_v39  ;;  %v696_v44 = vpop.f32.mrb[2].mxu0  ;;  %v708_v45 = vpop.f32.mrb[2].mxu1 }
 0x108   : > { %v697_v46 = vpop.f32.mrb[3].mxu0  ;;  %v709_v47 = vpop.f32.mrb[3].mxu1 }
 0x109   : > { %v462_v48 = vadd.f32 %v695_v42, %v254_v33  ;;  %v478_v49 = vadd.f32 %v707_v43, %v274_v37  ;;  %v698_v50 = vadd.f32 %v697_v46, %v696_v44  ;;  %v710_v51 = vadd.f32 %v709_v47, %v708_v45 }
 0x10b   : > { %v492_v53 = vmax.f32 %v462_v48, 0.0  ;;  %v496_v54 = vmax.f32 %v478_v49, 0.0  ;;  %v465_v55 = vadd.f32 %v698_v50, %v259_v35  ;;  %v481_v56 = vadd.f32 %v710_v51, %v279_v52 }
 0x10d   : > { %v669_v58 = vpack.c.bf16 %v492_v53, %v492_v53  ;;  %v673_v59 = vpack.c.bf16 %v496_v54, %v496_v54  ;;  %v493_v60 = vmax.f32 %v465_v55, 0.0  ;;  %v497_v61 = vmax.f32 %v481_v56, 0.0  ;;  %v699_v62 = vpop.f32.mrb[4].mxu0  ;;  %v711_v63 = vpop.f32.mrb[4].mxu1 }
 0x10e   : > { %v700_v0 = vpop.f32.mrb[5].mxu0  ;;  %v712_v1 = vpop.f32.mrb[5].mxu1 }
 0x10f   : > { %533 = vst.msk [vmem:[%s927_s5] sm:$0xf] %vm532_vm0, %v669_v58  ;;  %537 = vst.msk [vmem:[%s927_s5 + $0x10] sm:$0xf] %vm532_vm0, %v673_v59  ;;  %v670_v2 = vpack.c.bf16 %v493_v60, %v493_v60  ;;  %v674_v3 = vpack.c.bf16 %v497_v61, %v497_v61  ;;  %v701_v4 = vadd.f32 %v700_v0, %v699_v62  ;;  %v702_v6 = vpop.f32.mrb[6].mxu0  ;;  %v714_v7 = vpop.f32.mrb[6].mxu1 }
 0x110   : > { %v713_v5 = vadd.f32 %v712_v1, %v711_v63  ;;  %v703_v8 = vpop.f32.mrb[7].mxu0  ;;  %v715_v9 = vpop.f32.mrb[7].mxu1 }
 0x111   : > { %534 = vst.msk [vmem:[%s927_s5 + $0x4] sm:$0xf] %vm532_vm0, %v670_v2  ;;  %538 = vst.msk [vmem:[%s927_s5 + $0x14] sm:$0xf] %vm532_vm0, %v674_v3  ;;  %v470_v10 = vadd.f32 %v701_v4, %v264_v34  ;;  %v704_v12 = vadd.f32 %v703_v8, %v702_v6  ;;  %v716_v13 = vadd.f32 %v715_v9, %v714_v7 }
 0x112   : > { %v486_v11 = vadd.f32 %v713_v5, %v284_v57 }
 0x113   : > { %v494_v15 = vmax.f32 %v470_v10, 0.0  ;;  %v473_v17 = vadd.f32 %v704_v12, %v269_v36  ;;  %v489_v18 = vadd.f32 %v716_v13, %v289_v14 }
 0x114   : > { %v498_v16 = vmax.f32 %v486_v11, 0.0 }
 0x115   : > { %v671_v19 = vpack.c.bf16 %v494_v15, %v494_v15  ;;  %v495_v21 = vmax.f32 %v473_v17, 0.0  ;;  %v499_v22 = vmax.f32 %v489_v18, 0.0 }
 0x116   : > { %v675_v20 = vpack.c.bf16 %v498_v16, %v498_v16 }
 0x117   : > { %535 = vst.msk [vmem:[%s927_s5 + $0x8] sm:$0xf] %vm532_vm0, %v671_v19  ;;  %v672_v23 = vpack.c.bf16 %v495_v21, %v495_v21  ;;  %v676_v24 = vpack.c.bf16 %v499_v22, %v499_v22 }
 0x118   : > { %539 = vst.msk [vmem:[%s927_s5 + $0x18] sm:$0xf] %vm532_vm0, %v675_v20 }
 0x119   : > { %536 = vst.msk [vmem:[%s927_s5 + $0xc] sm:$0xf] %vm532_vm0, %v672_v23  ;;  %540 = vst.msk [vmem:[%s927_s5 + $0x1c] sm:$0xf] %vm532_vm0, %v676_v24 }
 0x11a PF: > { %s13_s14 = sadd.s32 1, %s810_s14   ;;  %s958_s12 = smov %s806_s13 }
 0x11b   : > { %p10_p5 = scmp.ge.s32.totalorder %s13_s14, 6   ;;  %s959_s13 = smov %s961_s15 }
 0x11d   :  { %12 = sbr.rel (!%p10_p5) target bundleno = 2 (0x2), region = 62 }

// kernel: segmnet_forward.12
= control target key start
LH: loop header
LB: loop body
LE: loop exit
PB: predicated region body
PF: predicated region fallthrough
CT: control target
= control target key end

     0   :  { %s1283_s12 = smov 0   ;;  %s1285_s13 = smov 0   ;;  %s1456_s0 = inlined_call_operand.vmem [shape: bf16[64,576], index: 0, kind: input, shape index: {}]   ;;  %s1457_s1 = inlined_call_operand.vmem [shape: bf16[4,576,16], index: 1, kind: input, shape index: {}]   ;;  %s1458_s2 = inlined_call_operand.vmem [shape: f32[64,1], index: 2, kind: input, shape index: {}]   ;;  %s1459_s3 = inlined_call_operand.vmem [shape: f32[4,64,16], index: 3, kind: output, shape index: {}]  }
   0x1   :  { %s1287_s14 = smov 0  }
   0x2 LB: > { %s25_s15 = sadd.s32 1, %s1256_s13  ;;  %p967_p0 = scmp.ge.s32.totalorder %s1260_s14, 1  ;;  %s1260_s14 = sphi %s1287_s14, %s13_s14   ;;  %s1256_s13 = sphi %s1285_s13, %s1461_s13   ;;  %s1252_s12 = sphi %s1283_s12, %s1460_s12  }
   0x3   : > { %p27_p1 = scmp.ge.s32.totalorder %s25_s15, 4  ;;  %p156_p2 = scmp.lt.s32.totalorder %s1260_s14, 5 }
   0x5   : > { %s1463_s15 = smov (%p27_p1, %s25_s15), 0  ;;  %p157_p3 = pnand %p967_p0, %p156_p2 }
   0x6   : > { %p186_p4 = scmp.lt.s32.totalorder (!%p157_p3), %s1252_s12, 3  ;;  %v1208_v0 = vld [vmem:[%s1456_s0 + $0x4] ss:$20 sps:$4 sm:$0xff] (!%p157_p3)   ;;  %v1211_v1 = vld [vmem:[%s1456_s0 + $0xc] ss:$20 sps:$4 sm:$0xff] (!%p157_p3)   ;;  %v1262_v2 = vmov (!%p157_p3), 0  }
   0x7   : > { %160 = sbr.rel (%p157_p3) target bundleno = 303 (0x12f), region = 32  ;;  %1172 = vset.pattern.permute.xlu0 (!%p157_p3), %v1262_v2  ;;  %1173 = vset.pattern.permute.xlu1 (!%p157_p3), %v1262_v2  ;;  %v1206_v33 = vld [vmem:[%s1456_s0] ss:$20 sps:$4 sm:$0xff] (!%p157_p3)   ;;  %v1209_v35 = vld [vmem:[%s1456_s0 + $0x8] ss:$20 sps:$4 sm:$0xff] (!%p157_p3)   ;;  %vm663_vm0 = vcmask (!%p157_p3), 523264  }
   0x8   : > { %708 = vmatprep.mubr.bf16.mxu0 (!%p157_p3), %v1208_v0  ;;  %773 = vmatprep.mubr.bf16.mxu1 (!%p157_p3), %v1211_v1  ;;  %v1213_v38 = vld [vmem:[%s1456_s0 + $0x2c] ss:$20 sps:$4 sm:$0xff] (!%p157_p3)   ;;  %v1215_v39 = vld [vmem:[%s1456_s0 + $0x34] ss:$20 sps:$4 sm:$0xff] (!%p157_p3)   ;;  %v1218_v43 = vld [vmem:[%s1456_s0 + $0x30] ss:$20 sps:$4 sm:$0xff] (!%p157_p3)  }
   0x9   : > { %v1217_v42 = vld [vmem:[%s1456_s0 + $0x28] ss:$20 sps:$4 sm:$0xff] (!%p157_p3)   ;;  %v299_v47 = vld [vmem:[%s1458_s2] sm:$0xff] (!%p157_p3)  ;;  %v301_v48 = vld [vmem:[%s1458_s2 + $0x10] sm:$0xff] (!%p157_p3)  ;;  %vm871_vm1 = vcmask (!%p157_p3), 130048  }
   0xa   : > { %v1220_v44 = vld [vmem:[%s1456_s0 + $0x54] ss:$20 sps:$4 sm:$0xff] (!%p157_p3)   ;;  %v1222_v45 = vld [vmem:[%s1456_s0 + $0x5c] ss:$20 sps:$4 sm:$0xff] (!%p157_p3)   ;;  %309 = vperm.xlu0 (!%p157_p3), %1172, %v299_v47   ;;  %v1225_v50 = vld [vmem:[%s1456_s0 + $0x58] ss:$20 sps:$4 sm:$0xff] (!%p157_p3)   ;;  %319 = vperm.xlu1 (!%p157_p3), %1173, %v301_v48  }
   0xb   : > { %v1224_v49 = vld [vmem:[%s1456_s0 + $0x50] ss:$20 sps:$4 sm:$0xff] (!%p157_p3)   ;;  %v300_v52 = vld [vmem:[%s1458_s2 + $0x8] sm:$0xff] (!%p157_p3)  ;;  %v302_v54 = vld [vmem:[%s1458_s2 + $0x18] sm:$0xff] (!%p157_p3) }
   0xc   : > { %v1227_v51 = vld [vmem:[%s1456_s0 + $0x7c] ss:$20 sps:$4 sm:$0xff] (!%p157_p3)   ;;  %v1229_v53 = vld [vmem:[%s1456_s0 + $0x84] ss:$20 sps:$4 sm:$0xff] (!%p157_p3)   ;;  %v304_v56 = vld [vmem:[%s1458_s2 + $0x28] sm:$0xff] (!%p157_p3) }
   0xd   : > { %v303_v55 = vld [vmem:[%s1458_s2 + $0x20] sm:$0xff] (!%p157_p3)  ;;  %v1231_v57 = vld [vmem:[%s1456_s0 + $0x78] ss:$20 sps:$4 sm:$0xff] (!%p157_p3)   ;;  %v305_v60 = vld [vmem:[%s1458_s2 + $0x30] sm:$0xff] (!%p157_p3) }
   0xe   : > { %s1465_s12 = smov (!%p186_p4, %s1252_s12), 3  ;;  %314 = vperm.xlu0 %1172, %v300_v52   ;;  %324 = vperm.xlu1 %1173, %v302_v54   ;;  %v1232_v58 = vld [vmem:[%s1456_s0 + $0x80] ss:$20 sps:$4 sm:$0xff]   ;;  %v1234_v59 = vld [vmem:[%s1456_s0 + $0x10] ss:$20 sps:$4 sm:$0xff]   ;;  %v306_v62 = vld [vmem:[%s1458_s2 + $0x38] sm:$0xff] }
   0xf   : > { %s1146_s20 = smul.u32 288, %s1465_s12  ;;  %v1235_v61 = vld [vmem:[%s1456_s0 + $0x60] ss:$20 sps:$4 sm:$0xff]   ;;  %v1236_v63 = vld [vmem:[%s1456_s0 + $0x38] ss:$20 sps:$4 sm:$0xff]   ;;  %s1033_s30 = sshll.u32 %s1465_s12, 6 }
  0x10   : > { %v1237_v0 = vld [vmem:[%s1456_s0 + $0x88] ss:$20 sps:$4 sm:$0xff]   ;;  %s201_s6 = scalar_lea.vmem %s1459_s3, %s1033_s30 }
  0x11   : > { %s1313_s23 = scalar_lea.vmem %s1457_s1, %s1146_s20 }
  0x12   : > { %v1174_v3 = vld [vmem:[%s1313_s23 + $0x40] sm:$0xff]   ;;  %v1178_v7 = vld [vmem:[%s1313_s23 + $0x48] sm:$0xff]   ;;  %v1182_v11 = vld [vmem:[%s1313_s23 + $0x50] sm:$0xff]   ;;  %329 = vperm.xlu0 %1172, %v303_v55   ;;  %334 = vperm.xlu1 %1173, %v304_v56  }
  0x13   : > { %v1175_v4 = vld [vmem:[%s1313_s23 + $0xc0] sm:$0xff]   ;;  %1034 = vmatprep.subr.bf16.mxu0 %v1174_v3  ;;  %v1179_v8 = vld [vmem:[%s1313_s23 + $0xc8] sm:$0xff]   ;;  %v1183_v12 = vld [vmem:[%s1313_s23 + $0xd0] sm:$0xff]  }
  0x14   : > { %v1176_v5 = vld [vmem:[%s1313_s23] sm:$0xff]   ;;  %1074 = vmatprep.subr.bf16.mxu1 %v1175_v4  ;;  %v1180_v9 = vld [vmem:[%s1313_s23 + $0x8] sm:$0xff]   ;;  %v1184_v13 = vld [vmem:[%s1313_s23 + $0x10] sm:$0xff]  }
  0x15   : > { %v1177_v6 = vld [vmem:[%s1313_s23 + $0x80] sm:$0xff]   ;;  %1035 = vmatpush3.bf16.msra.mxu0 %v1176_v5  ;;  %v1181_v10 = vld [vmem:[%s1313_s23 + $0x88] sm:$0xff]   ;;  %v1185_v14 = vld [vmem:[%s1313_s23 + $0x90] sm:$0xff]  }
  0x16   : > { %1075 = vmatpush3.bf16.msra.mxu1 %v1177_v6  ;;  %1036 = vmatprep.subr.bf16.mxu0 %v1178_v7  ;;  %v1186_v15 = vld [vmem:[%s1313_s23 + $0x58] sm:$0xff]   ;;  %v1190_v19 = vld [vmem:[%s1313_s23 + $0x60] sm:$0xff]   ;;  %v1194_v23 = vld [vmem:[%s1313_s23 + $0x68] sm:$0xff]  }
  0x17   : > { %1076 = vmatprep.subr.bf16.mxu1 %v1179_v8  ;;  %v1187_v16 = vld [vmem:[%s1313_s23 + $0xd8] sm:$0xff]   ;;  %v1191_v20 = vld [vmem:[%s1313_s23 + $0xe0] sm:$0xff]   ;;  %v1195_v24 = vld [vmem:[%s1313_s23 + $0xe8] sm:$0xff]   ;;  %339 = vperm.xlu0 %1172, %v305_v60  }
  0x18   : > { %v1188_v17 = vld [vmem:[%s1313_s23 + $0x18] sm:$0xff]   ;;  %v1192_v21 = vld [vmem:[%s1313_s23 + $0x20] sm:$0xff]   ;;  %v1196_v25 = vld [vmem:[%s1313_s23 + $0x28] sm:$0xff]   ;;  %344 = vperm.xlu1 %1173, %v306_v62  }
  0x19   : > { %1037 = vmatpush3.bf16.msra.mxu0 %v1180_v9  ;;  %v1189_v18 = vld [vmem:[%s1313_s23 + $0x98] sm:$0xff]   ;;  %v1193_v22 = vld [vmem:[%s1313_s23 + $0xa0] sm:$0xff]   ;;  %v1197_v26 = vld [vmem:[%s1313_s23 + $0xa8] sm:$0xff]  }
  0x1a   : > { %1077 = vmatpush3.bf16.msra.mxu1 %v1181_v10  ;;  %1038 = vmatprep.subr.bf16.mxu0 %v1182_v11  ;;  %v1198_v27 = vld [vmem:[%s1313_s23 + $0x70] sm:$0xff]   ;;  %v1202_v31 = vld [vmem:[%s1313_s23 + $0x78] sm:$0xff]   ;;  %v1212_v37 = vld [vmem:[%s1313_s23 + $0x100] sm:$0xff]  }
  0x1b   : > { %1078 = vmatprep.subr.bf16.mxu1 %v1183_v12  ;;  %v1199_v28 = vld [vmem:[%s1313_s23 + $0xf0] sm:$0xff]   ;;  %v1203_v32 = vld [vmem:[%s1313_s23 + $0xf8] sm:$0xff]   ;;  %v1219_v40 = vld [vmem:[%s1313_s23 + $0x108] sm:$0xff]  }
  0x1c   : > { %v1200_v29 = vld [vmem:[%s1313_s23 + $0x30] sm:$0xff]   ;;  %v1204_v34 = vld [vmem:[%s1313_s23 + $0x38] sm:$0xff]  }
  0x1d   : > { %1039 = vmatpush3.bf16.msra.mxu0 %v1184_v13  ;;  %v1201_v30 = vld [vmem:[%s1313_s23 + $0xb0] sm:$0xff]   ;;  %v1205_v36 = vld [vmem:[%s1313_s23 + $0xb8] sm:$0xff]  }
  0x1e   : > { %1079 = vmatpush3.bf16.msra.mxu1 %v1185_v14  ;;  %1040 = vmatprep.subr.bf16.mxu0 %v1186_v15  ;;  %v1226_v41 = vld [vmem:[%s1313_s23 + $0x110] sm:$0xff]   ;;  %v1233_v46 = vld [vmem:[%s1313_s23 + $0x118] sm:$0xff]  }
  0x1f   : > { %1080 = vmatprep.subr.bf16.mxu1 %v1187_v16 }
  0x21   : > { %1041 = vmatpush3.bf16.msra.mxu0 %v1188_v17 }
  0x22   : > { %1081 = vmatpush3.bf16.msra.mxu1 %v1189_v18  ;;  %1042 = vmatprep.subr.bf16.mxu0 %v1190_v19 }
  0x23   : > { %1082 = vmatprep.subr.bf16.mxu1 %v1191_v20 }
  0x25   : > { %1043 = vmatpush3.bf16.msra.mxu0 %v1192_v21 }
  0x26   : > { %1083 = vmatpush3.bf16.msra.mxu1 %v1193_v22  ;;  %1044 = vmatprep.subr.bf16.mxu0 %v1194_v23 }
  0x27   : > { %1084 = vmatprep.subr.bf16.mxu1 %v1195_v24 }
  0x29   : > { %1045 = vmatpush3.bf16.msra.mxu0 %v1196_v25 }
  0x2a   : > { %1085 = vmatpush3.bf16.msra.mxu1 %v1197_v26  ;;  %1046 = vmatprep.subr.bf16.mxu0 %v1198_v27 }
  0x2b   : > { %1086 = vmatprep.subr.bf16.mxu1 %v1199_v28 }
  0x2d   : > { %1047 = vmatpush3.bf16.msra.mxu0 %v1200_v29 }
  0x2e   : > { %1087 = vmatpush3.bf16.msra.mxu1 %v1201_v30  ;;  %1048 = vmatprep.subr.bf16.mxu0 %v1202_v31 }
  0x2f   : > { %1088 = vmatprep.subr.bf16.mxu1 %v1203_v32 }
  0x31   : > { %1049 = vmatpush3.bf16.msra.mxu0 %v1204_v34 }
  0x32   : > { %1089 = vmatpush3.bf16.msra.mxu1 %v1205_v36  ;;  %1122 = vmatprep.subr.bf16.mxu0 %v1212_v37 }
  0x33   : > { %1138 = vmatprep.subr.bf16.mxu1 %v1212_v37 }
  0x34   : > { %709 = vmatmul.mubr.bf16.vlgmr.msra.gmra.mrb[0].mxu0 %v1206_v33 }
  0x35   : > { %774 = vmatmul.mubr.bf16.vlgmr.msra.gmra.mrb[0].mxu1 %v1209_v35  ;;  %1123 = vmatpush3.bf16.msra.mxu0 %v1212_v37 }
  0x36   : > { %1142 = vmatpush3.bf16.msra.mxu1 %v1212_v37  ;;  %716 = vmatprep.mubr.bf16.mxu0 %v1213_v38 }
  0x37   : > { %781 = vmatprep.mubr.bf16.mxu1 %v1215_v39  ;;  %1124 = vmatprep.subr.bf16.mxu0 %v1219_v40 }
  0x38   : > { %1139 = vmatprep.subr.bf16.mxu1 %v1219_v40 }
  0x39   : > { %1125 = vmatpush3.bf16.msra.mxu0 %v1219_v40 }
  0x3a   : > { %1143 = vmatpush3.bf16.msra.mxu1 %v1219_v40  ;;  %1126 = vmatprep.subr.bf16.mxu0 %v1226_v41 }
  0x3b   : > { %1140 = vmatprep.subr.bf16.mxu1 %v1226_v41 }
  0x3c   : > { %717 = vmatmul.mubr.bf16.gmra.mrb[4].mxu0 %v1217_v42 }
  0x3d   : > { %782 = vmatmul.mubr.bf16.gmra.mrb[4].mxu1 %v1218_v43  ;;  %724 = vmatprep.mubr.bf16.mxu0 %v1220_v44 }
  0x3e   : > { %789 = vmatprep.mubr.bf16.mxu1 %v1222_v45  ;;  %1127 = vmatpush3.bf16.msra.mxu0 %v1226_v41 }
  0x3f   : > { %1144 = vmatpush3.bf16.msra.mxu1 %v1226_v41  ;;  %1128 = vmatprep.subr.bf16.mxu0 %v1233_v46 }
  0x40   : > { %1141 = vmatprep.subr.bf16.mxu1 %v1233_v46 }
  0x42   : > { %1129 = vmatpush3.bf16.msra.mxu0 %v1233_v46 }
  0x43   : > { %1145 = vmatpush3.bf16.msra.mxu1 %v1233_v46 }
  0x44   : > { %725 = vmatmul.mubr.bf16.gmra.mrb[8].mxu0 %v1224_v49 }
  0x45   : > { %790 = vmatmul.mubr.bf16.gmra.mrb[8].mxu1 %v1225_v50  ;;  %732 = vmatprep.mubr.bf16.mxu0 %v1227_v51 }
  0x46   : > { %797 = vmatprep.mubr.bf16.mxu1 %v1229_v53 }
  0x4c   : > { %733 = vmatmul.mubr.bf16.gmra.mrb[12].mxu0 %v1231_v57 }
  0x4d   : > { %798 = vmatmul.mubr.bf16.gmra.mrb[12].mxu1 %v1232_v58  ;;  %1130 = vmatprep.mubr.msk.bf16.mxu0 %vm663_vm0, %v1234_v59 }
  0x4e   : > { %1134 = vmatprep.mubr.msk.bf16.mxu1 %vm663_vm0, %v1235_v61 }
  0x54   : > { %1131 = vmatmul.mubr.msk.bf16.vlgmr.msra.gmra.mrb[16].mxu0 %vm663_vm0, %v1236_v63 }
  0x55   : > { %1135 = vmatmul.mubr.msk.bf16.vlgmr.msra.gmra.mrb[16].mxu1 %vm663_vm0, %v1237_v0 }
  0x89   : > { %v310_v1 = vpop.permute.xlu0 %309  ;;  %v320_v18 = vpop.permute.xlu1 %319 }
  0x8d   : > { %v315_v3 = vpop.permute.xlu0 %314  ;;  %v325_v33 = vpop.permute.xlu1 %324 }
  0x91   : > { %v330_v36 = vpop.permute.xlu0 %329  ;;  %v335_v50 = vpop.permute.xlu1 %334 }
  0x96   : > { %v340_v54 = vpop.permute.xlu0 %339 }
 0x107   : > { %v1050_v2 = vpop.f32.mrb[0].mxu0 }
 0x108   : > { %v1090_v4 = vpop.f32.mrb[0].mxu1  ;;  %v1051_v5 = vpop.f32.mrb[1].mxu0 }
 0x109   : > { %v1052_v6 = vadd.f32 %v1051_v5, %v1050_v2  ;;  %v1091_v7 = vpop.f32.mrb[1].mxu1  ;;  %v1053_v8 = vpop.f32.mrb[2].mxu0 }
 0x10a   : > { %v1092_v9 = vadd.f32 %v1091_v7, %v1090_v4  ;;  %v1093_v10 = vpop.f32.mrb[2].mxu1  ;;  %v1054_v11 = vpop.f32.mrb[3].mxu0 }
 0x10b   : > { %v711_v12 = vadd.f32 %v1052_v6, %v310_v1  ;;  %v1055_v13 = vadd.f32 %v1054_v11, %v1053_v8  ;;  %v1094_v14 = vpop.f32.mrb[3].mxu1  ;;  %v345_v4 = vpop.permute.xlu1 %344 }
 0x10c   : > { %v1095_v15 = vadd.f32 %v1094_v14, %v1093_v10 }
 0x10d   : > { %v714_v16 = vadd.f32 %v1055_v13, %v315_v3  ;;  %v1429_v17 = vadd.f32 %v1092_v9, %v711_v12 }
 0x10f   : > { %v1056_v19 = vpop.f32.mrb[4].mxu0  ;;  %v1431_v20 = vadd.f32 %v1095_v15, %v714_v16 }
 0x110   : > { %v1096_v21 = vpop.f32.mrb[4].mxu1  ;;  %v1057_v22 = vpop.f32.mrb[5].mxu0 }
 0x111   : > { %v1058_v23 = vadd.f32 %v1057_v22, %v1056_v19  ;;  %v1097_v24 = vpop.f32.mrb[5].mxu1  ;;  %v1059_v25 = vpop.f32.mrb[6].mxu0 }
 0x112   : > { %v1098_v26 = vadd.f32 %v1097_v24, %v1096_v21  ;;  %v1099_v27 = vpop.f32.mrb[6].mxu1  ;;  %v1060_v28 = vpop.f32.mrb[7].mxu0 }
 0x113   : > { %v719_v29 = vadd.f32 %v1058_v23, %v320_v18  ;;  %v1061_v30 = vadd.f32 %v1060_v28, %v1059_v25  ;;  %v1100_v31 = vpop.f32.mrb[7].mxu1 }
 0x114   : > { %v1101_v32 = vadd.f32 %v1100_v31, %v1099_v27 }
 0x115   : > { %v722_v34 = vadd.f32 %v1061_v30, %v325_v33  ;;  %v784_v35 = vadd.f32 %v1098_v26, %v719_v29 }
 0x117   : > { %v1062_v37 = vpop.f32.mrb[8].mxu0  ;;  %v787_v38 = vadd.f32 %v1101_v32, %v722_v34 }
 0x118   : > { %v1102_v39 = vpop.f32.mrb[8].mxu1  ;;  %v1063_v40 = vpop.f32.mrb[9].mxu0 }
 0x119   : > { %v1064_v41 = vadd.f32 %v1063_v40, %v1062_v37  ;;  %v1103_v42 = vpop.f32.mrb[9].mxu1  ;;  %v1065_v43 = vpop.f32.mrb[10].mxu0 }
 0x11a   : > { %v1104_v44 = vadd.f32 %v1103_v42, %v1102_v39  ;;  %v1105_v45 = vpop.f32.mrb[10].mxu1  ;;  %v1066_v46 = vpop.f32.mrb[11].mxu0 }
 0x11b   : > { %v727_v47 = vadd.f32 %v1064_v41, %v330_v36  ;;  %v1067_v48 = vadd.f32 %v1066_v46, %v1065_v43  ;;  %v1106_v49 = vpop.f32.mrb[11].mxu1 }
 0x11c   : > { %v1107_v51 = vadd.f32 %v1106_v49, %v1105_v45 }
 0x11d   : > { %v730_v52 = vadd.f32 %v1067_v48, %v335_v50  ;;  %v792_v53 = vadd.f32 %v1104_v44, %v727_v47 }
 0x11f   : > { %v1068_v55 = vpop.f32.mrb[12].mxu0  ;;  %v795_v56 = vadd.f32 %v1107_v51, %v730_v52 }
 0x120   : > { %v1108_v57 = vpop.f32.mrb[12].mxu1  ;;  %v1069_v58 = vpop.f32.mrb[13].mxu0 }
 0x121   : > { %v1070_v59 = vadd.f32 %v1069_v58, %v1068_v55  ;;  %v1109_v60 = vpop.f32.mrb[13].mxu1  ;;  %v1071_v61 = vpop.f32.mrb[14].mxu0 }
 0x122   : > { %v1110_v62 = vadd.f32 %v1109_v60, %v1108_v57  ;;  %v1111_v63 = vpop.f32.mrb[14].mxu1  ;;  %v1072_v0 = vpop.f32.mrb[15].mxu0 }
 0x123   : > { %v735_v1 = vadd.f32 %v1070_v59, %v340_v54  ;;  %v1073_v2 = vadd.f32 %v1072_v0, %v1071_v61  ;;  %v1112_v3 = vpop.f32.mrb[15].mxu1 }
 0x124   : > { %v1113_v5 = vadd.f32 %v1112_v3, %v1111_v63 }
 0x125   : > { %v738_v6 = vadd.f32 %v1073_v2, %v345_v4  ;;  %v800_v7 = vadd.f32 %v1110_v62, %v735_v1 }
 0x127   : > { %v1132_v8 = vpop.f32.mrb[16].mxu0  ;;  %v803_v9 = vadd.f32 %v1113_v5, %v738_v6 }
 0x128   : > { %v849_v10 = vadd.f32 %v1132_v8, %v784_v35  ;;  %v1136_v11 = vpop.f32.mrb[16].mxu1  ;;  %v840_v12 = vpop.f32.mrb[17].mxu0 }
 0x129   : > { %v865_v13 = vadd.f32 %v1136_v11, %v800_v7  ;;  %v841_v14 = vadd.f32 %v840_v12, %v1429_v17  ;;  %v856_v15 = vpop.f32.mrb[17].mxu1  ;;  %v1133_v16 = vpop.f32.mrb[18].mxu0 }
 0x12a   : > { %874 = vst.msk [vmem:[%s201_s6 + $0x10] sm:$0xff] %vm871_vm1, %v849_v10  ;;  %v857_v18 = vadd.f32 %v856_v15, %v792_v53  ;;  %v852_v19 = vadd.f32 %v1133_v16, %v787_v38  ;;  %v1137_v21 = vpop.f32.mrb[18].mxu1  ;;  %v843_v22 = vpop.f32.mrb[19].mxu0 }
 0x12b   : > { %878 = vst.msk [vmem:[%s201_s6 + $0x30] sm:$0xff] %vm871_vm1, %v865_v13  ;;  %872 = vst.msk [vmem:[%s201_s6] sm:$0xff] %vm871_vm1, %v841_v14  ;;  %v868_v23 = vadd.f32 %v1137_v21, %v803_v9  ;;  %v844_v24 = vadd.f32 %v843_v22, %v1431_v20  ;;  %v859_v25 = vpop.f32.mrb[19].mxu1 }
 0x12c   : > { %876 = vst.msk [vmem:[%s201_s6 + $0x20] sm:$0xff] %vm871_vm1, %v857_v18  ;;  %875 = vst.msk [vmem:[%s201_s6 + $0x18] sm:$0xff] %vm871_vm1, %v852_v19  ;;  %v860_v17 = vadd.f32 %v859_v25, %v795_v56 }
 0x12d   : > { %879 = vst.msk [vmem:[%s201_s6 + $0x38] sm:$0xff] %vm871_vm1, %v868_v23  ;;  %873 = vst.msk [vmem:[%s201_s6 + $0x8] sm:$0xff] %vm871_vm1, %v844_v24 }
 0x12e   : > { %877 = vst.msk [vmem:[%s201_s6 + $0x28] sm:$0xff] %vm871_vm1, %v860_v17 }
 0x12f PF: > { %s13_s14 = sadd.s32 1, %s1260_s14   ;;  %s1460_s12 = smov %s1256_s13 }
 0x130   : > { %p10_p5 = scmp.ge.s32.totalorder %s13_s14, 6   ;;  %s1461_s13 = smov %s1463_s15 }
 0x132   :  { %12 = sbr.rel (!%p10_p5) target bundleno = 2 (0x2), region = 62 }

// kernel: segmnet_forward.13
= control target key start
LH: loop header
LB: loop body
LE: loop exit
PB: predicated region body
PF: predicated region fallthrough
CT: control target
= control target key end

     0   :  { %vm28_vm0 = vcmask 523264   ;;  %s1312_s1 = inlined_call_operand.vmem [shape: f32[2,16,64], index: 1, kind: input, shape index: {}]   ;;  %s1313_s0 = inlined_call_operand.vmem [shape: f32[2,16,64], index: 0, kind: input, shape index: {}]   ;;  %s1314_s2 = inlined_call_operand.vmem [shape: f32[2,1,16], index: 2, kind: input, shape index: {}]   ;;  %s1315_s4 = inlined_call_operand.vmem [shape: f32[2,16], index: 4, kind: output, shape index: {1}]   ;;  %s1316_s3 = inlined_call_operand.vmem [shape: f32[2,16], index: 3, kind: output, shape index: {0}]  }
   0x1   :  { %v963_v0 = vld [vmem:[%s1312_s1 + $0x10] sm:$0xff]  ;;  %v968_v1 = vld [vmem:[%s1312_s1] sm:$0xff]  ;;  %v973_v2 = vld [vmem:[%s1312_s1 + $0x18] sm:$0xff] }
   0x2   :  { %v83_v3 = vmul.f32 %v963_v0, %v963_v0  ;;  %v81_v4 = vmul.f32 %v968_v1, %v968_v1  ;;  %v84_v5 = vmul.f32 %v973_v2, %v973_v2  ;;  %v984_v6 = vld [vmem:[%s1312_s1 + $0x8] sm:$0xff]  ;;  %v991_v8 = vld [vmem:[%s1313_s0 + $0x10] sm:$0xff]  ;;  %v996_v9 = vld [vmem:[%s1313_s0] sm:$0xff] }
   0x3   :  { %v82_v7 = vmul.f32 %v984_v6, %v984_v6  ;;  %v26_v14 = vmul.f32 %v991_v8, %v991_v8  ;;  %v24_v15 = vmul.f32 %v996_v9, %v996_v9  ;;  %v1009_v16 = vld [vmem:[%s1313_s0 + $0x18] sm:$0xff]  ;;  %v1014_v17 = vld [vmem:[%s1313_s0 + $0x8] sm:$0xff] }
   0x4   :  { %v91_v10 = vsel %vm28_vm0, %v83_v3, 0.0  ;;  %v85_v11 = vsel %vm28_vm0, %v81_v4, 0.0  ;;  %v94_v12 = vsel %vm28_vm0, %v84_v5, 0.0  ;;  %v27_v20 = vmul.f32 %v1009_v16, %v1009_v16 }
   0x5   :  { %92 = vadd.xlane.f32.xlu1 %v91_v10  ;;  %86 = vadd.xlane.f32.xlu0 %v85_v11  ;;  %v88_v13 = vsel %vm28_vm0, %v82_v7, 0.0  ;;  %v35_v18 = vsel %vm28_vm0, %v26_v14, 0.0  ;;  %v29_v19 = vsel %vm28_vm0, %v24_v15, 0.0  ;;  %v25_v21 = vmul.f32 %v1014_v17, %v1014_v17 }
   0x6   :  { %v38_v22 = vsel %vm28_vm0, %v27_v20, 0.0 }
   0x7   :  { %v32_v23 = vsel %vm28_vm0, %v25_v21, 0.0 }
   0x9   :  { %95 = vadd.xlane.f32.xlu1 %v94_v12  ;;  %89 = vadd.xlane.f32.xlu0 %v88_v13 }
   0xd   :  { %36 = vadd.xlane.f32.xlu1 %v35_v18  ;;  %30 = vadd.xlane.f32.xlu0 %v29_v19 }
  0x11   :  { %39 = vadd.xlane.f32.xlu1 %v38_v22  ;;  %33 = vadd.xlane.f32.xlu0 %v32_v23 }
  0x92   :  { %v93_v24 = vpop.xlane.xlu1 %92  ;;  %v87_v25 = vpop.xlane.xlu0 %86 }
  0x93   :  { %887 = vrsqrt.f32 %v93_v24  ;;  %vm113_vm1 = vcmp.eq.f32.partialorder %v93_v24, inf  ;;  %vm115_vm2 = vcmp.eq.f32.partialorder %v93_v24, 0.0  ;;  %v116_v35 = vand.u32 2147483648, %v93_v24 }
  0x94   :  { %889 = vrsqrt.f32 %v87_v25  ;;  %vm99_vm3 = vcmp.eq.f32.partialorder %v87_v25, inf  ;;  %v102_v38 = vand.u32 2147483648, %v87_v25  ;;  %vm101_vm4 = vcmp.eq.f32.partialorder %v87_v25, 0.0 }
  0x96   :  { %v96_v26 = vpop.xlane.xlu1 %95  ;;  %v90_v27 = vpop.xlane.xlu0 %89 }
  0x97   :  { %891 = vrsqrt.f32 %v96_v26  ;;  %vm120_vm5 = vcmp.eq.f32.partialorder %v96_v26, inf  ;;  %vm122_vm6 = vcmp.eq.f32.partialorder %v96_v26, 0.0  ;;  %v123_v47 = vand.u32 2147483648, %v96_v26 }
  0x98   :  { %893 = vrsqrt.f32 %v90_v27  ;;  %vm106_vm7 = vcmp.eq.f32.partialorder %v90_v27, inf  ;;  %vm108_vm8 = vcmp.eq.f32.partialorder %v90_v27, 0.0  ;;  %v109_v50 = vand.u32 2147483648, %v90_v27 }
  0x9a   :  { %v37_v28 = vpop.xlane.xlu1 %36  ;;  %v31_v29 = vpop.xlane.xlu0 %30 }
  0x9b   :  { %895 = vrsqrt.f32 %v37_v28  ;;  %vm57_vm9 = vcmp.eq.f32.partialorder %v37_v28, inf  ;;  %vm59_vm10 = vcmp.eq.f32.partialorder %v37_v28, 0.0  ;;  %v60_v59 = vand.u32 2147483648, %v37_v28 }
  0x9c   :  { %897 = vrsqrt.f32 %v31_v29  ;;  %vm43_vm11 = vcmp.eq.f32.partialorder %v31_v29, inf  ;;  %v46_v62 = vand.u32 2147483648, %v31_v29  ;;  %vm45_vm12 = vcmp.eq.f32.partialorder %v31_v29, 0.0 }
  0x9d   :  { %v888_v30 = vpop.eup %887 }
  0x9e   :  { %v890_v31 = vpop.eup %889  ;;  %v112_v32 = vmul.f32 %v888_v30, %v93_v24  ;;  %v1024_v33 = vpop.xlane.xlu1 %39 }
  0x9f   :  { %v1026_v34 = vpop.xlane.xlu0 %33  ;;  %v98_v36 = vmul.f32 %v890_v31, %v87_v25  ;;  %899 = vrsqrt.f32 %v1024_v33  ;;  %vm64_vm13 = vcmp.eq.f32.partialorder %v1024_v33, inf  ;;  %vm66_vm14 = vcmp.eq.f32.partialorder %v1024_v33, 0.0 }
  0xa0   :  { %v114_v37 = vsel %vm113_vm1, %v93_v24, %v112_v32  ;;  %901 = vrsqrt.f32 %v1026_v34  ;;  %v67_v12 = vand.u32 2147483648, %v1024_v33  ;;  %vm50_vm15 = vcmp.eq.f32.partialorder %v1026_v34, inf }
  0xa1   :  { %v892_v39 = vpop.eup %891  ;;  %v117_v40 = vsel %vm115_vm2, %v116_v35, %v114_v37  ;;  %v100_v41 = vsel %vm99_vm3, %v87_v25, %v98_v36  ;;  %v53_v18 = vand.u32 2147483648, %v1026_v34  ;;  %vm52_vm1 = vcmp.eq.f32.partialorder %v1026_v34, 0.0  ;;  %vm876_vm2 = vmpackc.low %vm28_vm0, %vm28_vm0 }
  0xa2   :  { %v894_v42 = vpop.eup %893  ;;  %v127_v43 = vmax.f32 %v117_v40, 1e-12  ;;  %v103_v44 = vsel %vm101_vm4, %v102_v38, %v100_v41  ;;  %v119_v45 = vmul.f32 %v892_v39, %v96_v26  ;;  %v311_v39 = vld [vmem:[%s1314_s2] sm:$0x1] }
  0xa3   :  { %v125_v46 = vmax.f32 %v103_v44, 1e-12  ;;  %v105_v48 = vmul.f32 %v894_v42, %v90_v27  ;;  %v537_v41 = vsub.f32 1.0, %v311_v39 }
  0xa4   :  { %v121_v49 = vsel %vm120_vm5, %v96_v26, %v119_v45  ;;  %903 = vrcp.f32 %v127_v43 }
  0xa5   :  { %v896_v51 = vpop.eup %895  ;;  %v124_v52 = vsel %vm122_vm6, %v123_v47, %v121_v49  ;;  %v107_v53 = vsel %vm106_vm7, %v90_v27, %v105_v48  ;;  %905 = vrcp.f32 %v125_v46 }
  0xa6   :  { %v898_v54 = vpop.eup %897  ;;  %v128_v55 = vmax.f32 %v124_v52, 1e-12  ;;  %v110_v56 = vsel %vm108_vm8, %v109_v50, %v107_v53  ;;  %v56_v57 = vmul.f32 %v896_v51, %v37_v28 }
  0xa7   :  { %v126_v58 = vmax.f32 %v110_v56, 1e-12  ;;  %v42_v60 = vmul.f32 %v898_v54, %v31_v29 }
  0xa8   :  { %v58_v61 = vsel %vm57_vm9, %v37_v28, %v56_v57  ;;  %907 = vrcp.f32 %v128_v55 }
  0xa9   :  { %v900_v63 = vpop.eup %899  ;;  %v44_v3 = vsel %vm43_vm11, %v31_v29, %v42_v60  ;;  %909 = vrcp.f32 %v126_v58  ;;  %v61_v4 = vsel %vm59_vm10, %v60_v59, %v58_v61 }
  0xaa   :  { %v902_v5 = vpop.eup %901  ;;  %v63_v7 = vmul.f32 %v900_v63, %v1024_v33  ;;  %v47_v10 = vsel %vm45_vm12, %v46_v62, %v44_v3  ;;  %v71_v11 = vmax.f32 %v61_v4, 1e-12 }
  0xab   :  { %v49_v13 = vmul.f32 %v902_v5, %v1026_v34  ;;  %v69_v14 = vmax.f32 %v47_v10, 1e-12 }
  0xac   :  { %v65_v15 = vsel %vm64_vm13, %v1024_v33, %v63_v7  ;;  %911 = vrcp.f32 %v71_v11 }
  0xad   :  { %v68_v19 = vsel %vm66_vm14, %v67_v12, %v65_v15  ;;  %v51_v20 = vsel %vm50_vm15, %v1026_v34, %v49_v13  ;;  %913 = vrcp.f32 %v69_v14 }
  0xae   :  { %v72_v21 = vmax.f32 %v68_v19, 1e-12  ;;  %v54_v22 = vsel %vm52_vm1, %v53_v18, %v51_v20  ;;  %v904_v24 = vpop.eup %903 }
  0xaf   :  { %v70_v23 = vmax.f32 %v54_v22, 1e-12  ;;  %v906_v25 = vpop.eup %905  ;;  %v134_v28 = vmul.f32 %v904_v24, %v963_v0 }
  0xb0   :  { %915 = vrcp.f32 %v72_v21  ;;  %v130_v30 = vmul.f32 %v906_v25, %v968_v1 }
  0xb1   :  { %917 = vrcp.f32 %v70_v23 }
  0xb2   :  { %v908_v26 = vpop.eup %907 }
  0xb3   :  { %v910_v27 = vpop.eup %909  ;;  %v136_v29 = vmul.f32 %v908_v26, %v973_v2 }
  0xb4   :  { %v132_v31 = vmul.f32 %v910_v27, %v984_v6 }
  0xb5   :  { %v881_v32 = vpack.c.bf16 %v136_v29, %v134_v28 }
  0xb6   :  { %v912_v33 = vpop.eup %911  ;;  %v875_v34 = vpack.c.bf16 %v132_v31, %v130_v30 }
  0xb7   :  { %v914_v35 = vpop.eup %913  ;;  %883 = vmatprep.subr.msk.bf16.mxu1 %vm876_vm2, %v881_v32  ;;  %v78_v36 = vmul.f32 %v912_v33, %v991_v8  ;;  %v315_v8 = vlaneseq }
  0xb8   :  { %877 = vmatprep.subr.msk.bf16.mxu0 %vm876_vm2, %v875_v34  ;;  %886 = vmatpush3.bf16.xpose.msk.msra.mxu1 %vm876_vm2, %v881_v32  ;;  %v74_v0 = vmul.f32 %v914_v35, %v996_v9 }
  0xb9   :  { %880 = vmatpush3.bf16.xpose.msk.msra.mxu0 %vm876_vm2, %v875_v34  ;;  %872 = vmatprep.mubr.msk.f32.mxu1 %vm28_vm0, %v78_v36  ;;  %v1055_v38 = vshrl.u32 %v315_v8, 7  ;;  %v1096_v4 = vand.u32 127, %v315_v8 }
  0xba   :  { %v916_v1 = vpop.eup %915  ;;  %865 = vmatprep.mubr.msk.f32.mxu0 %vm28_vm0, %v74_v0 }
  0xbb   :  { %v918_v2 = vpop.eup %917  ;;  %v80_v6 = vmul.f32 %v916_v1, %v1009_v16  ;;  %v317_v9 = vsub.s32 0, %v1055_v38  ;;  %v312_v16 = vld [vmem:[%s1314_s2 + $0x1] sm:$0x1] }
  0xbc   :  { %v76_v37 = vmul.f32 %v918_v2, %v1014_v17  ;;  %v538_v50 = vsub.f32 1.0, %v312_v16 }
  0xbd   :  { %v318_v40 = vrot.slane %v311_v39, %v317_v9  ;;  %v322_v42 = vrot.slane %v312_v16, %v317_v9  ;;  %v544_v48 = vrot.slane %v537_v41, %v317_v9 }
  0xbe   :  { %v548_v55 = vrot.slane %v538_v50, %v317_v9 }
  0xbf   :  { %873 = vmatmul.mubr.msk.f32.vlgmr.msra.gmra.mrb[0].mxu1 %vm28_vm0, %v80_v6 }
  0xc0   :  { %866 = vmatmul.mubr.msk.f32.vlgmr.msra.gmra.mrb[0].mxu0 %vm28_vm0, %v76_v37  ;;  %vm331_vm0 = vcmask 130048  }
 0x192   :  { %v874_v17 = vpop.f32.mrb[0].mxu1 }
 0x193   :  { %v867_v43 = vpop.f32.mrb[0].mxu0  ;;  %v302_v44 = vpop.f32.mrb[1].mxu1  ;;  %v1068_v49 = vmul.f32 %v874_v17, %v322_v42  ;;  %v1084_v59 = vmul.f32 %v874_v17, %v548_v55 }
 0x194   :  { %v1064_v45 = vmul.f32 %v867_v43, %v318_v40  ;;  %v215_v46 = vpop.f32.mrb[1].mxu0  ;;  %v1072_v52 = vmul.f32 %v322_v42, %v302_v44  ;;  %v1076_v54 = vmul.f32 %v867_v43, %v544_v48  ;;  %v1088_v61 = vmul.f32 %v548_v55, %v302_v44 }
 0x195   :  { %v1066_v47 = vmul.f32 %v318_v40, %v215_v46  ;;  %v341_v56 = vsel %vm331_vm0, %v1068_v49, -inf  ;;  %v1080_v57 = vmul.f32 %v544_v48, %v215_v46  ;;  %v564_v63 = vsel %vm331_vm0, %v1084_v59, -inf }
 0x196   :  { %v335_v51 = vsel %vm331_vm0, %v1064_v45, -inf  ;;  %v338_v58 = vsel %vm331_vm0, %v1072_v52, -inf  ;;  %v558_v60 = vsel %vm331_vm0, %v1076_v54, -inf  ;;  %v561_v3 = vsel %vm331_vm0, %v1088_v61, -inf }
 0x197   :  { %336 = vmax.xlane.f32.xlu1 %v335_v51  ;;  %v332_v53 = vsel %vm331_vm0, %v1066_v47, -inf  ;;  %v555_v62 = vsel %vm331_vm0, %v1080_v57, -inf }
 0x198   :  { %333 = vmax.xlane.f32.xlu0 %v332_v53 }
 0x19b   :  { %342 = vmax.xlane.f32.xlu1 %v341_v56 }
 0x19c   :  { %339 = vmax.xlane.f32.xlu0 %v338_v58 }
 0x19f   :  { %559 = vmax.xlane.f32.xlu1 %v558_v60 }
 0x1a0   :  { %556 = vmax.xlane.f32.xlu0 %v555_v62 }
 0x1a3   :  { %565 = vmax.xlane.f32.xlu1 %v564_v63 }
 0x1a4   :  { %562 = vmax.xlane.f32.xlu0 %v561_v3 }
 0x224   :  { %v1098_v5 = vpop.xlane.xlu1 %336 }
 0x225   :  { %vm349_vm3 = vcmp.eq.f32.partialorder %v1064_v45, %v1098_v5  ;;  %v1102_v7 = vpop.xlane.xlu0 %333 }
 0x226   :  { %v353_v10 = vsel %vm349_vm3, %v1096_v4, 16  ;;  %vm348_vm4 = vcmp.eq.f32.partialorder %v1066_v47, %v1102_v7 }
 0x227   :  { %v352_v11 = vsel %vm348_vm4, %v1096_v4, 16  ;;  %v371_v12 = vsel %vm331_vm0, %v353_v10, 2147483647 }
 0x228   :  { %v1109_v13 = vpop.xlane.xlu1 %342  ;;  %v373_v14 = vshra.s32 %v371_v12, 16  ;;  %v356_v15 = vsel %vm331_vm0, %v352_v11, 2147483647  ;;  %v372_v43 = vand.u32 65535, %v371_v12 }
 0x229   :  { %vm351_vm5 = vcmp.eq.f32.partialorder %v1068_v49, %v1109_v13  ;;  %v1114_v18 = vpop.xlane.xlu0 %339  ;;  %v358_v19 = vshra.s32 %v356_v15, 16  ;;  %v357_v44 = vand.u32 65535, %v356_v15 }
 0x22a   :  { %v355_v20 = vsel %vm351_vm5, %v1096_v4, 16  ;;  %vm350_vm6 = vcmp.eq.f32.partialorder %v1072_v52, %v1114_v18  ;;  %v375_v21 = vcvt.s32.f32 %v373_v14  ;;  %v374_v48 = vcvt.s32.f32 %v372_v43 }
 0x22b   :  { %v354_v22 = vsel %vm350_vm6, %v1096_v4, 16  ;;  %v360_v23 = vcvt.s32.f32 %v358_v19  ;;  %v401_v24 = vsel %vm331_vm0, %v355_v20, 2147483647  ;;  %v359_v53 = vcvt.s32.f32 %v357_v44 }
 0x22c   :  { %376 = vmin.xlane.f32.xlu1 %v375_v21  ;;  %v1121_v25 = vpop.xlane.xlu1 %559  ;;  %v403_v26 = vshra.s32 %v401_v24, 16  ;;  %v386_v27 = vsel %vm331_vm0, %v354_v22, 2147483647  ;;  %v402_v50 = vand.u32 65535, %v401_v24 }
 0x22d   :  { %vm572_vm7 = vcmp.eq.f32.partialorder %v1076_v54, %v1121_v25  ;;  %361 = vmin.xlane.f32.xlu0 %v360_v23  ;;  %v1126_v28 = vpop.xlane.xlu0 %556  ;;  %v388_v29 = vshra.s32 %v386_v27, 16  ;;  %v387_v55 = vand.u32 65535, %v386_v27 }
 0x22e   :  { %v576_v30 = vsel %vm572_vm7, %v1096_v4, 16  ;;  %vm571_vm8 = vcmp.eq.f32.partialorder %v1080_v57, %v1126_v28  ;;  %v405_v31 = vcvt.s32.f32 %v403_v26  ;;  %v404_v62 = vcvt.s32.f32 %v402_v50 }
 0x22f   :  { %v575_v32 = vsel %vm571_vm8, %v1096_v4, 16  ;;  %v390_v33 = vcvt.s32.f32 %v388_v29  ;;  %v594_v34 = vsel %vm331_vm0, %v576_v30, 2147483647  ;;  %v389_v10 = vcvt.s32.f32 %v387_v55 }
 0x230   :  { %406 = vmin.xlane.f32.xlu1 %v405_v31  ;;  %v1133_v35 = vpop.xlane.xlu1 %565  ;;  %v596_v36 = vshra.s32 %v594_v34, 16  ;;  %v579_v0 = vsel %vm331_vm0, %v575_v32, 2147483647  ;;  %v595_v63 = vand.u32 65535, %v594_v34 }
 0x231   :  { %vm574_vm9 = vcmp.eq.f32.partialorder %v1084_v59, %v1133_v35  ;;  %391 = vmin.xlane.f32.xlu0 %v390_v33  ;;  %v1138_v1 = vpop.xlane.xlu0 %562  ;;  %v581_v2 = vshra.s32 %v579_v0, 16  ;;  %v580_v11 = vand.u32 65535, %v579_v0 }
 0x232   :  { %v578_v6 = vsel %vm574_vm9, %v1096_v4, 16  ;;  %vm573_vm10 = vcmp.eq.f32.partialorder %v1088_v61, %v1138_v1  ;;  %v598_v37 = vcvt.s32.f32 %v596_v36  ;;  %v597_v19 = vcvt.s32.f32 %v595_v63 }
 0x233   :  { %v577_v8 = vsel %vm573_vm10, %v1096_v4, 16  ;;  %v583_v9 = vcvt.s32.f32 %v581_v2  ;;  %v624_v39 = vsel %vm331_vm0, %v578_v6, 2147483647  ;;  %v582_v22 = vcvt.s32.f32 %v580_v11 }
 0x234   :  { %599 = vmin.xlane.f32.xlu1 %v598_v37  ;;  %v626_v40 = vshra.s32 %v624_v39, 16  ;;  %v609_v16 = vsel %vm331_vm0, %v577_v8, 2147483647  ;;  %v625_v20 = vand.u32 65535, %v624_v39 }
 0x235   :  { %584 = vmin.xlane.f32.xlu0 %v583_v9  ;;  %v611_v41 = vshra.s32 %v609_v16, 16 }
 0x236   :  { %v628_v17 = vcvt.s32.f32 %v626_v40  ;;  %v627_v29 = vcvt.s32.f32 %v625_v20 }
 0x237   :  { %v613_v42 = vcvt.s32.f32 %v611_v41 }
 0x238   :  { %629 = vmin.xlane.f32.xlu1 %v628_v17 }
 0x239   :  { %614 = vmin.xlane.f32.xlu0 %v613_v42 }
 0x2b9   :  { %v377_v46 = vpop.xlane.xlu1 %376 }
 0x2ba   :  { %v362_v51 = vpop.xlane.xlu0 %361  ;;  %vm378_vm11 = vcmp.eq.f32.partialorder %v375_v21, %v377_v46  ;;  %v383_v34 = vcvt.f32.s32 %v377_v46 }
 0x2bb   :  { %v379_v56 = vsel %vm378_vm11, %v374_v48, inf  ;;  %vm363_vm12 = vcmp.eq.f32.partialorder %v360_v23, %v362_v51  ;;  %v610_v23 = vand.u32 65535, %v609_v16  ;;  %v368_v36 = vcvt.f32.s32 %v362_v51 }
 0x2bc   :  { %380 = vmin.xlane.f32.xlu1 %v379_v56  ;;  %v364_v58 = vsel %vm363_vm12, %v359_v53, inf  ;;  %v384_v2 = vshll.u32 %v383_v34, 16 }
 0x2bd   :  { %v407_v60 = vpop.xlane.xlu1 %406  ;;  %365 = vmin.xlane.f32.xlu0 %v364_v58 }
 0x2be   :  { %v392_v3 = vpop.xlane.xlu0 %391  ;;  %vm408_vm13 = vcmp.eq.f32.partialorder %v405_v31, %v407_v60  ;;  %v612_v31 = vcvt.s32.f32 %v610_v23  ;;  %v413_v6 = vcvt.f32.s32 %v407_v60 }
 0x2bf   :  { %v409_v12 = vsel %vm408_vm13, %v404_v62, inf  ;;  %vm393_vm14 = vcmp.eq.f32.partialorder %v390_v33, %v392_v3  ;;  %v398_v39 = vcvt.f32.s32 %v392_v3 }
 0x2c0   :  { %410 = vmin.xlane.f32.xlu1 %v409_v12  ;;  %v394_v14 = vsel %vm393_vm14, %v389_v10, inf  ;;  %v414_v44 = vshll.u32 %v413_v6, 16 }
 0x2c1   :  { %v600_v15 = vpop.xlane.xlu1 %599  ;;  %395 = vmin.xlane.f32.xlu0 %v394_v14  ;;  %v399_v46 = vshll.u32 %v398_v39, 16 }
 0x2c2   :  { %v585_v21 = vpop.xlane.xlu0 %584  ;;  %vm601_vm15 = vcmp.eq.f32.partialorder %v598_v37, %v600_v15  ;;  %v606_v41 = vcvt.f32.s32 %v600_v15 }
 0x2c3   :  { %v602_v24 = vsel %vm601_vm15, %v597_v19, inf  ;;  %vm586_vm1 = vcmp.eq.f32.partialorder %v583_v9, %v585_v21  ;;  %v369_v9 = vshll.u32 %v368_v36, 16  ;;  %v591_v48 = vcvt.f32.s32 %v585_v21 }
 0x2c4   :  { %603 = vmin.xlane.f32.xlu1 %v602_v24  ;;  %v587_v26 = vsel %vm586_vm1, %v582_v22, inf  ;;  %v607_v60 = vshll.u32 %v606_v41, 16 }
 0x2c5   :  { %v630_v27 = vpop.xlane.xlu1 %629  ;;  %588 = vmin.xlane.f32.xlu0 %v587_v26  ;;  %v592_v10 = vshll.u32 %v591_v48, 16 }
 0x2c6   :  { %v615_v30 = vpop.xlane.xlu0 %614  ;;  %vm631_vm2 = vcmp.eq.f32.partialorder %v628_v17, %v630_v27  ;;  %v636_v11 = vcvt.f32.s32 %v630_v27 }
 0x2c7   :  { %v632_v32 = vsel %vm631_vm2, %v627_v29, inf  ;;  %vm616_vm3 = vcmp.eq.f32.partialorder %v613_v42, %v615_v30  ;;  %v621_v14 = vcvt.f32.s32 %v615_v30 }
 0x2c8   :  { %633 = vmin.xlane.f32.xlu1 %v632_v32  ;;  %v617_v33 = vsel %vm616_vm3, %v612_v31, inf  ;;  %v637_v26 = vshll.u32 %v636_v11, 16 }
 0x2c9   :  { %618 = vmin.xlane.f32.xlu0 %v617_v33  ;;  %v622_v29 = vshll.u32 %v621_v14, 16 }
 0x349   :  { %v381_v0 = vpop.xlane.xlu1 %380 }
 0x34a   :  { %v382_v37 = vcvt.f32.s32 %v381_v0  ;;  %v366_v8 = vpop.xlane.xlu0 %365 }
 0x34b   :  { %v367_v40 = vcvt.f32.s32 %v366_v8 }
 0x34c   :  { %v385_v16 = vadd.s32 %v384_v2, %v382_v37 }
 0x34d   :  { %v370_v43 = vadd.s32 %v369_v9, %v367_v40  ;;  %v411_v17 = vpop.xlane.xlu1 %410 }
 0x34e   :  { %v412_v42 = vcvt.f32.s32 %v411_v17  ;;  %v396_v50 = vpop.xlane.xlu0 %395  ;;  %vm417_vm4 = vcmp.eq.s32.totalorder %v1096_v4, %v385_v16 }
 0x34f   :  { %v397_v51 = vcvt.f32.s32 %v396_v50  ;;  %v1148_v53 = vsel %vm417_vm4, -inf, %v1064_v45  ;;  %vm416_vm5 = vcmp.eq.s32.totalorder %v1096_v4, %v370_v43 }
 0x350   :  { %v415_v55 = vadd.s32 %v414_v44, %v412_v42  ;;  %v427_v56 = vsel %vm331_vm0, %v1148_v53, -inf  ;;  %v1154_v58 = vsel %vm416_vm5, -inf, %v1066_v47 }
 0x351   :  { %v400_v62 = vadd.s32 %v399_v46, %v397_v51  ;;  %428 = vmax.xlane.f32.xlu1 %v427_v56  ;;  %v604_v63 = vpop.xlane.xlu1 %603  ;;  %v424_v3 = vsel %vm331_vm0, %v1154_v58, -inf }
 0x352   :  { %v605_v45 = vcvt.f32.s32 %v604_v63  ;;  %425 = vmax.xlane.f32.xlu0 %v424_v3  ;;  %v589_v12 = vpop.xlane.xlu0 %588  ;;  %vm419_vm6 = vcmp.eq.s32.totalorder %v1096_v4, %v415_v55 }
 0x353   :  { %v590_v15 = vcvt.f32.s32 %v589_v12  ;;  %v1160_v19 = vsel %vm419_vm6, -inf, %v1068_v49  ;;  %vm418_vm7 = vcmp.eq.s32.totalorder %v1096_v4, %v400_v62 }
 0x354   :  { %v608_v47 = vadd.s32 %v607_v60, %v605_v45  ;;  %v433_v20 = vsel %vm331_vm0, %v1160_v19, -inf  ;;  %v1166_v21 = vsel %vm418_vm7, -inf, %v1072_v52 }
 0x355   :  { %v593_v22 = vadd.s32 %v592_v10, %v590_v15  ;;  %434 = vmax.xlane.f32.xlu1 %v433_v20  ;;  %v634_v23 = vpop.xlane.xlu1 %633  ;;  %v430_v24 = vsel %vm331_vm0, %v1166_v21, -inf }
 0x356   :  { %v635_v27 = vcvt.f32.s32 %v634_v23  ;;  %431 = vmax.xlane.f32.xlu0 %v430_v24  ;;  %v619_v49 = vpop.xlane.xlu0 %618  ;;  %vm640_vm8 = vcmp.eq.s32.totalorder %v1096_v4, %v608_v47 }
 0x357   :  { %v620_v30 = vcvt.f32.s32 %v619_v49  ;;  %v1172_v31 = vsel %vm640_vm8, -inf, %v1076_v54  ;;  %vm639_vm9 = vcmp.eq.s32.totalorder %v1096_v4, %v593_v22 }
 0x358   :  { %v638_v52 = vadd.s32 %v637_v26, %v635_v27  ;;  %v650_v32 = vsel %vm331_vm0, %v1172_v31, -inf  ;;  %v1178_v33 = vsel %vm639_vm9, -inf, %v1080_v57 }
 0x359   :  { %v623_v34 = vadd.s32 %v622_v29, %v620_v30  ;;  %651 = vmax.xlane.f32.xlu1 %v650_v32  ;;  %v647_v36 = vsel %vm331_vm0, %v1178_v33, -inf }
 0x35a   :  { %648 = vmax.xlane.f32.xlu0 %v647_v36  ;;  %vm642_vm10 = vcmp.eq.s32.totalorder %v1096_v4, %v638_v52 }
 0x35b   :  { %v1184_v54 = vsel %vm642_vm10, -inf, %v1084_v59  ;;  %vm641_vm11 = vcmp.eq.s32.totalorder %v1096_v4, %v623_v34 }
 0x35c   :  { %v656_v0 = vsel %vm331_vm0, %v1184_v54, -inf  ;;  %v1190_v2 = vsel %vm641_vm11, -inf, %v1088_v61 }
 0x35d   :  { %657 = vmax.xlane.f32.xlu1 %v656_v0  ;;  %v653_v57 = vsel %vm331_vm0, %v1190_v2, -inf }
 0x35e   :  { %654 = vmax.xlane.f32.xlu0 %v653_v57 }
 0x3de   :  { %v1194_v6 = vpop.xlane.xlu1 %428 }
 0x3df   :  { %vm441_vm12 = vcmp.eq.f32.partialorder %v1148_v53, %v1194_v6  ;;  %v1198_v59 = vpop.xlane.xlu0 %425 }
 0x3e0   :  { %v445_v37 = vsel %vm441_vm12, %v1096_v4, 16  ;;  %vm440_vm13 = vcmp.eq.f32.partialorder %v1154_v58, %v1198_v59 }
 0x3e1   :  { %v444_v61 = vsel %vm440_vm13, %v1096_v4, 16  ;;  %v463_v8 = vsel %vm331_vm0, %v445_v37, 2147483647 }
 0x3e2   :  { %v1205_v9 = vpop.xlane.xlu1 %434  ;;  %v465_v39 = vshra.s32 %v463_v8, 16  ;;  %v448_v40 = vsel %vm331_vm0, %v444_v61, 2147483647  ;;  %v464_v52 = vand.u32 65535, %v463_v8 }
 0x3e3   :  { %vm443_vm14 = vcmp.eq.f32.partialorder %v1160_v19, %v1205_v9  ;;  %v1210_v16 = vpop.xlane.xlu0 %431  ;;  %v450_v41 = vshra.s32 %v448_v40, 16  ;;  %v449_v32 = vand.u32 65535, %v448_v40 }
 0x3e4   :  { %v447_v43 = vsel %vm443_vm14, %v1096_v4, 16  ;;  %vm442_vm15 = vcmp.eq.f32.partialorder %v1166_v21, %v1210_v16  ;;  %v467_v17 = vcvt.s32.f32 %v465_v39  ;;  %v466_v36 = vcvt.s32.f32 %v464_v52 }
 0x3e5   :  { %v446_v44 = vsel %vm442_vm15, %v1096_v4, 16  ;;  %v452_v48 = vcvt.s32.f32 %v450_v41  ;;  %v493_v42 = vsel %vm331_vm0, %v447_v43, 2147483647  ;;  %v451_v37 = vcvt.s32.f32 %v449_v32 }
 0x3e6   :  { %468 = vmin.xlane.f32.xlu1 %v467_v17  ;;  %v1217_v50 = vpop.xlane.xlu1 %651  ;;  %v495_v46 = vshra.s32 %v493_v42, 16  ;;  %v478_v51 = vsel %vm331_vm0, %v446_v44, 2147483647  ;;  %v494_v0 = vand.u32 65535, %v493_v42 }
 0x3e7   :  { %vm664_vm1 = vcmp.eq.f32.partialorder %v1172_v31, %v1217_v50  ;;  %453 = vmin.xlane.f32.xlu0 %v452_v48  ;;  %v1222_v55 = vpop.xlane.xlu0 %648  ;;  %v480_v56 = vshra.s32 %v478_v51, 16  ;;  %v479_v61 = vand.u32 65535, %v478_v51 }
 0x3e8   :  { %v668_v60 = vsel %vm664_vm1, %v1096_v4, 16  ;;  %vm663_vm2 = vcmp.eq.f32.partialorder %v1178_v33, %v1222_v55  ;;  %v497_v62 = vcvt.s32.f32 %v495_v46  ;;  %v496_v44 = vcvt.s32.f32 %v494_v0 }
 0x3e9   :  { %v667_v63 = vsel %vm663_vm2, %v1096_v4, 16  ;;  %v482_v3 = vcvt.s32.f32 %v480_v56  ;;  %v686_v10 = vsel %vm331_vm0, %v668_v60, 2147483647  ;;  %v481_v60 = vcvt.s32.f32 %v479_v61 }
 0x3ea   :  { %498 = vmin.xlane.f32.xlu1 %v497_v62  ;;  %v1229_v11 = vpop.xlane.xlu1 %657  ;;  %v688_v45 = vshra.s32 %v686_v10, 16  ;;  %v671_v12 = vsel %vm331_vm0, %v667_v63, 2147483647  ;;  %v687_v46 = vand.u32 65535, %v686_v10 }
 0x3eb   :  { %vm666_vm3 = vcmp.eq.f32.partialorder %v1184_v54, %v1229_v11  ;;  %483 = vmin.xlane.f32.xlu0 %v482_v3  ;;  %v1234_v14 = vpop.xlane.xlu0 %654  ;;  %v673_v15 = vshra.s32 %v671_v12, 16  ;;  %v672_v8 = vand.u32 65535, %v671_v12 }
 0x3ec   :  { %v670_v47 = vsel %vm666_vm3, %v1096_v4, 16  ;;  %vm665_vm4 = vcmp.eq.f32.partialorder %v1190_v2, %v1234_v14  ;;  %v690_v20 = vcvt.s32.f32 %v688_v45 }
 0x3ed   :  { %v669_v22 = vsel %vm665_vm4, %v1096_v4, 16  ;;  %v675_v23 = vcvt.s32.f32 %v673_v15  ;;  %v716_v24 = vsel %vm331_vm0, %v670_v47, 2147483647 }
 0x3ee   :  { %691 = vmin.xlane.f32.xlu1 %v690_v20  ;;  %v718_v26 = vshra.s32 %v716_v24, 16  ;;  %v701_v27 = vsel %vm331_vm0, %v669_v22, 2147483647  ;;  %v717_v51 = vand.u32 65535, %v716_v24 }
 0x3ef   :  { %676 = vmin.xlane.f32.xlu0 %v675_v23  ;;  %v703_v49 = vshra.s32 %v701_v27, 16  ;;  %v702_v15 = vand.u32 65535, %v701_v27 }
 0x3f0   :  { %v720_v29 = vcvt.s32.f32 %v718_v26 }
 0x3f1   :  { %v705_v30 = vcvt.s32.f32 %v703_v49 }
 0x3f2   :  { %721 = vmin.xlane.f32.xlu1 %v720_v29 }
 0x3f3   :  { %706 = vmin.xlane.f32.xlu0 %v705_v30 }
 0x473   :  { %v469_v34 = vpop.xlane.xlu1 %468 }
 0x474   :  { %v454_v57 = vpop.xlane.xlu0 %453  ;;  %vm470_vm5 = vcmp.eq.f32.partialorder %v467_v17, %v469_v34  ;;  %v689_v17 = vcvt.s32.f32 %v687_v46  ;;  %v475_v24 = vcvt.f32.s32 %v469_v34 }
 0x475   :  { %v471_v39 = vsel %vm470_vm5, %v466_v36, inf  ;;  %vm455_vm6 = vcmp.eq.f32.partialorder %v452_v48, %v454_v57  ;;  %v674_v48 = vcvt.s32.f32 %v672_v8  ;;  %v460_v52 = vcvt.f32.s32 %v454_v57 }
 0x476   :  { %472 = vmin.xlane.f32.xlu1 %v471_v39  ;;  %v456_v41 = vsel %vm455_vm6, %v451_v37, inf  ;;  %v476_v32 = vshll.u32 %v475_v24, 16  ;;  %vm783_vm6 = vcmask 1041409  }
 0x477   :  { %v499_v43 = vpop.xlane.xlu1 %498  ;;  %457 = vmin.xlane.f32.xlu0 %v456_v41  ;;  %v461_v0 = vshll.u32 %v460_v52, 16 }
 0x478   :  { %v484_v56 = vpop.xlane.xlu0 %483  ;;  %vm500_vm7 = vcmp.eq.f32.partialorder %v497_v62, %v499_v43  ;;  %v719_v62 = vcvt.s32.f32 %v717_v51  ;;  %v505_v27 = vcvt.f32.s32 %v499_v43 }
 0x479   :  { %v501_v40 = vsel %vm500_vm7, %v496_v44, inf  ;;  %vm485_vm8 = vcmp.eq.f32.partialorder %v482_v3, %v484_v56  ;;  %v704_v3 = vcvt.s32.f32 %v702_v15  ;;  %v490_v37 = vcvt.f32.s32 %v484_v56 }
 0x47a   :  { %502 = vmin.xlane.f32.xlu1 %v501_v40  ;;  %v486_v42 = vsel %vm485_vm8, %v481_v60, inf  ;;  %v506_v46 = vshll.u32 %v505_v27, 16  ;;  %vm786_vm7 = vcmask 123904  }
 0x47b   :  { %v692_v63 = vpop.xlane.xlu1 %691  ;;  %487 = vmin.xlane.f32.xlu0 %v486_v42  ;;  %v491_v34 = vshll.u32 %v490_v37, 16 }
 0x47c   :  { %v677_v45 = vpop.xlane.xlu0 %676  ;;  %vm693_vm9 = vcmp.eq.f32.partialorder %v690_v20, %v692_v63  ;;  %v698_v41 = vcvt.f32.s32 %v692_v63 }
 0x47d   :  { %v694_v47 = vsel %vm693_vm9, %v689_v17, inf  ;;  %vm678_vm10 = vcmp.eq.f32.partialorder %v675_v23, %v677_v45  ;;  %v683_v60 = vcvt.f32.s32 %v677_v45 }
 0x47e   :  { %695 = vmin.xlane.f32.xlu1 %v694_v47  ;;  %v679_v10 = vsel %vm678_vm10, %v674_v48, inf  ;;  %v699_v63 = vshll.u32 %v698_v41, 16 }
 0x47f   :  { %v722_v22 = vpop.xlane.xlu1 %721  ;;  %680 = vmin.xlane.f32.xlu0 %v679_v10  ;;  %v684_v48 = vshll.u32 %v683_v60, 16 }
 0x480   :  { %v707_v12 = vpop.xlane.xlu0 %706  ;;  %vm723_vm11 = vcmp.eq.f32.partialorder %v720_v29, %v722_v22  ;;  %v728_v15 = vcvt.f32.s32 %v722_v22 }
 0x481   :  { %v724_v26 = vsel %vm723_vm11, %v719_v62, inf  ;;  %vm708_vm12 = vcmp.eq.f32.partialorder %v705_v30, %v707_v12 }
 0x482   :  { %725 = vmin.xlane.f32.xlu1 %v724_v26  ;;  %v709_v49 = vsel %vm708_vm12, %v704_v3, inf }
 0x483   :  { %710 = vmin.xlane.f32.xlu0 %v709_v49 }
 0x503   :  { %v473_v20 = vpop.xlane.xlu1 %472 }
 0x504   :  { %v474_v36 = vcvt.f32.s32 %v473_v20  ;;  %v458_v23 = vpop.xlane.xlu0 %457  ;;  %v729_v20 = vshll.u32 %v728_v15, 16 }
 0x505   :  { %v459_v61 = vcvt.f32.s32 %v458_v23 }
 0x506   :  { %v477_v39 = vadd.s32 %v476_v32, %v474_v36 }
 0x507   :  { %v462_v44 = vadd.s32 %v461_v0, %v459_v61  ;;  %v503_v29 = vpop.xlane.xlu1 %502 }
 0x508   :  { %v504_v30 = vcvt.f32.s32 %v503_v29  ;;  %v488_v8 = vpop.xlane.xlu0 %487  ;;  %vm509_vm13 = vcmp.eq.s32.totalorder %v1096_v4, %v477_v39  ;;  %v437_v29 = vadd.f32 %v1194_v6, %v1098_v5  ;;  %v438_v5 = vadd.f32 %v1210_v16, %v1114_v18 }
 0x509   :  { %v489_v57 = vcvt.f32.s32 %v488_v8  ;;  %v513_v40 = vsel %vm509_vm13, -inf, %v1148_v53  ;;  %vm508_vm14 = vcmp.eq.s32.totalorder %v1096_v4, %v462_v44  ;;  %v713_v53 = vcvt.f32.s32 %v707_v12 }
 0x50a   :  { %v507_v43 = vadd.s32 %v506_v46, %v504_v30  ;;  %v519_v56 = vsel %vm331_vm0, %v513_v40, -inf  ;;  %v512_v42 = vsel %vm508_vm14, -inf, %v1154_v58  ;;  %v436_v46 = vadd.f32 %v1198_v59, %v1102_v7 }
 0x50b   :  { %v492_v17 = vadd.s32 %v491_v34, %v489_v57  ;;  %520 = vmax.xlane.f32.xlu1 %v519_v56  ;;  %v696_v51 = vpop.xlane.xlu1 %695  ;;  %v516_v45 = vsel %vm331_vm0, %v512_v42, -inf  ;;  %v714_v12 = vshll.u32 %v713_v53, 16  ;;  %v439_v57 = vadd.f32 %v1205_v9, %v1109_v13 }
 0x50c   :  { %v697_v47 = vcvt.f32.s32 %v696_v51  ;;  %517 = vmax.xlane.f32.xlu0 %v516_v45  ;;  %v681_v10 = vpop.xlane.xlu0 %680  ;;  %vm511_vm15 = vcmp.eq.s32.totalorder %v1096_v4, %v507_v43  ;;  %v659_v13 = vadd.f32 %v1222_v55, %v1126_v28  ;;  %v661_v28 = vadd.f32 %v1234_v14, %v1138_v1 }
 0x50d   :  { %v682_v62 = vcvt.f32.s32 %v681_v10  ;;  %v515_v3 = vsel %vm511_vm15, -inf, %v1160_v19  ;;  %vm510_vm1 = vcmp.eq.s32.totalorder %v1096_v4, %v492_v17 }
 0x50e   :  { %v700_v58 = vadd.s32 %v699_v63, %v697_v47  ;;  %v525_v26 = vsel %vm331_vm0, %v515_v3, -inf  ;;  %v514_v49 = vsel %vm510_vm1, -inf, %v1166_v21  ;;  %v662_v47 = vadd.f32 %v1229_v11, %v1133_v35 }
 0x50f   :  { %v685_v24 = vadd.s32 %v684_v48, %v682_v62  ;;  %526 = vmax.xlane.f32.xlu1 %v525_v26  ;;  %v726_v52 = vpop.xlane.xlu1 %725  ;;  %v522_v22 = vsel %vm331_vm0, %v514_v49, -inf }
 0x510   :  { %v727_v32 = vcvt.f32.s32 %v726_v52  ;;  %523 = vmax.xlane.f32.xlu0 %v522_v22  ;;  %v711_v27 = vpop.xlane.xlu0 %710  ;;  %vm732_vm2 = vcmp.eq.s32.totalorder %v1096_v4, %v700_v58 }
 0x511   :  { %v712_v19 = vcvt.f32.s32 %v711_v27  ;;  %v736_v36 = vsel %vm732_vm2, -inf, %v1172_v31  ;;  %vm731_vm3 = vcmp.eq.s32.totalorder %v1096_v4, %v685_v24 }
 0x512   :  { %v730_v23 = vadd.s32 %v729_v20, %v727_v32  ;;  %v742_v21 = vsel %vm331_vm0, %v736_v36, -inf  ;;  %v735_v0 = vsel %vm731_vm3, -inf, %v1178_v33  ;;  %v767_v33 = vadd.s32 4294967288, %v1096_v4 }
 0x513   :  { %v715_v37 = vadd.s32 %v714_v12, %v712_v19  ;;  %743 = vmax.xlane.f32.xlu1 %v742_v21  ;;  %v739_v61 = vsel %vm331_vm0, %v735_v0, -inf }
 0x514   :  { %740 = vmax.xlane.f32.xlu0 %v739_v61  ;;  %vm734_vm4 = vcmp.eq.s32.totalorder %v1096_v4, %v730_v23 }
 0x515   :  { %v738_v39 = vsel %vm734_vm4, -inf, %v1184_v54  ;;  %vm733_vm5 = vcmp.eq.s32.totalorder %v1096_v4, %v715_v37  ;;  %v1272_v54 = vsub.s32 %v767_v33, %v1055_v38 }
 0x516   :  { %v748_v31 = vsel %vm331_vm0, %v738_v39, -inf  ;;  %v737_v41 = vsel %vm733_vm5, -inf, %v1190_v2  ;;  %v1276_v2 = vsub.s32 %v1096_v4, %v1055_v38  ;;  %v660_v38 = vadd.f32 %v1217_v50, %v1121_v25 }
 0x517   :  { %749 = vmax.xlane.f32.xlu1 %v748_v31  ;;  %v745_v44 = vsel %vm331_vm0, %v737_v41, -inf  ;;  %vm772_vm0 = vcmask 130112  }
 0x518   :  { %746 = vmax.xlane.f32.xlu0 %v745_v44 }
 0x598   :  { %v521_v60 = vpop.xlane.xlu1 %520 }
 0x599   :  { %v529_v30 = vadd.f32 %v521_v60, %v437_v29  ;;  %v518_v8 = vpop.xlane.xlu0 %517 }
 0x59a   :  { %v528_v34 = vadd.f32 %v518_v8, %v436_v46 }
 0x59b   :  { %v534_v40 = vmul.f32 0.33333334, %v529_v30 }
 0x59c   :  { %v533_v6 = vmul.f32 0.33333334, %v528_v34  ;;  %v527_v7 = vpop.xlane.xlu1 %526 }
 0x59d   :  { %v771_v59 = vrot.slane %v534_v40, %v1272_v54  ;;  %v531_v43 = vadd.f32 %v527_v7, %v439_v57  ;;  %v524_v56 = vpop.xlane.xlu0 %523 }
 0x59e   :  { %v766_v42 = vrot.slane %v533_v6, %v1276_v2  ;;  %v530_v63 = vadd.f32 %v524_v56, %v438_v5 }
 0x59f   :  { %v536_v4 = vmul.f32 0.33333334, %v531_v43 }
 0x5a0   :  { %v773_v9 = vsel %vm772_vm0, %v771_v59, %v766_v42  ;;  %v535_v18 = vmul.f32 0.33333334, %v530_v63  ;;  %v744_v16 = vpop.xlane.xlu1 %743 }
 0x5a1   :  { %v781_v17 = vrot.slane %v536_v4, %v1272_v54  ;;  %v752_v51 = vadd.f32 %v744_v16, %v660_v38  ;;  %v741_v45 = vpop.xlane.xlu0 %740 }
 0x5a2   :  { %v777_v48 = vrot.slane %v535_v18, %v1276_v2  ;;  %v751_v15 = vadd.f32 %v741_v45, %v659_v13 }
 0x5a3   :  { %v756_v25 = vmul.f32 0.33333334, %v752_v51 }
 0x5a4   :  { %v782_v50 = vsel %vm772_vm0, %v781_v17, %v777_v48  ;;  %v755_v55 = vmul.f32 0.33333334, %v751_v15  ;;  %v750_v10 = vpop.xlane.xlu1 %749 }
 0x5a5   :  { %v784_v53 = vsel %vm783_vm6, %v782_v50, %v773_v9  ;;  %v789_v62 = vsub.f32 %v756_v25, %v534_v40  ;;  %v754_v3 = vadd.f32 %v750_v10, %v662_v47  ;;  %v747_v58 = vpop.xlane.xlu0 %746 }
 0x5a6   :  { %787 = vst.msk [vmem:[%s1315_s4] sm:$0x3] %vm786_vm7, %v784_v53  ;;  %v788_v35 = vsub.f32 %v755_v55, %v533_v6  ;;  %v753_v11 = vadd.f32 %v747_v58, %v661_v28 }
 0x5a7   :  { %v794_v26 = vmul.f32 1.442695, %v789_v62  ;;  %v758_v49 = vmul.f32 0.33333334, %v754_v3 }
 0x5a8   :  { %v792_v24 = vmul.f32 1.442695, %v788_v35  ;;  %v757_v1 = vmul.f32 0.33333334, %v753_v11 }
 0x5a9   :  { %919 = vpow2.f32 %v794_v26  ;;  %v791_v14 = vsub.f32 %v758_v49, %v536_v4 }
 0x5aa   :  { %921 = vpow2.f32 %v792_v24  ;;  %v790_v52 = vsub.f32 %v757_v1, %v535_v18 }
 0x5ab   :  { %v798_v22 = vmul.f32 1.442695, %v791_v14 }
 0x5ac   :  { %v796_v20 = vmul.f32 1.442695, %v790_v52 }
 0x5ad   :  { %923 = vpow2.f32 %v798_v22 }
 0x5ae   :  { %925 = vpow2.f32 %v796_v20 }
 0x5b3   :  { %v920_v32 = vpop.eup %919 }
 0x5b4   :  { %v922_v27 = vpop.eup %921  ;;  %v801_v12 = vadd.f32 1.0, %v920_v32 }
 0x5b5   :  { %v800_v19 = vadd.f32 1.0, %v922_v27 }
 0x5b6   :  { %927 = vrcp.f32 %v801_v12 }
 0x5b7   :  { %v924_v36 = vpop.eup %923  ;;  %929 = vrcp.f32 %v800_v19 }
 0x5b8   :  { %v926_v23 = vpop.eup %925  ;;  %v803_v21 = vadd.f32 1.0, %v924_v36 }
 0x5b9   :  { %v802_v0 = vadd.f32 1.0, %v926_v23 }
 0x5ba   :  { %931 = vrcp.f32 %v803_v21 }
 0x5bb   :  { %933 = vrcp.f32 %v802_v0 }
 0x5c0   :  { %v928_v37 = vpop.eup %927 }
 0x5c1   :  { %v930_v61 = vpop.eup %929  ;;  %v823_v39 = vrot.slane %v928_v37, %v1272_v54 }
 0x5c2   :  { %v819_v31 = vrot.slane %v930_v61, %v1276_v2 }
 0x5c4   :  { %v932_v41 = vpop.eup %931  ;;  %v824_v44 = vsel %vm772_vm0, %v823_v39, %v819_v31 }
 0x5c5   :  { %v934_v33 = vpop.eup %933  ;;  %v832_v29 = vrot.slane %v932_v41, %v1272_v54 }
 0x5c6   :  { %v828_v46 = vrot.slane %v934_v33, %v1276_v2 }
 0x5c8   :  { %v833_v60 = vsel %vm772_vm0, %v832_v29, %v828_v46 }
 0x5c9   :  { %v834_v30 = vsel %vm783_vm6, %v833_v60, %v824_v44 }
 0x5ca   :  { %836 = vst.msk [vmem:[%s1316_s3] sm:$0x3] %vm786_vm7, %v834_v30 }

// kernel: segmnet_forward.14
= control target key start
LH: loop header
LB: loop body
LE: loop exit
PB: predicated region body
PF: predicated region fallthrough
CT: control target
= control target key end

     0   :  { %s645_s12 = smov 0   ;;  %s647_s13 = smov 0   ;;  %s730_s0 = inlined_call_operand.vmem [shape: bf16[64,18], index: 0, kind: input, shape index: {}]   ;;  %s731_s1 = inlined_call_operand.vmem [shape: bf16[2,18,16], index: 1, kind: input, shape index: {}]   ;;  %s732_s2 = inlined_call_operand.vmem [shape: f32[64,1], index: 2, kind: input, shape index: {}]   ;;  %s733_s3 = inlined_call_operand.vmem [shape: bf16[2,64,16], index: 3, kind: output, shape index: {}]  }
   0x1   :  { %s649_s14 = smov 0  }
   0x2 LB: > { %s25_s15 = sadd.s32 1, %s618_s13  ;;  %p509_p0 = scmp.ge.s32.totalorder %s622_s14, 1  ;;  %s622_s14 = sphi %s649_s14, %s13_s14   ;;  %s618_s13 = sphi %s647_s13, %s735_s13   ;;  %s614_s12 = sphi %s645_s12, %s734_s12  }
   0x3   : > { %p27_p1 = scmp.ge.s32.totalorder %s25_s15, 2  ;;  %p156_p2 = scmp.lt.s32.totalorder %s622_s14, 3 }
   0x5   : > { %s737_s15 = smov (%p27_p1, %s25_s15), 0  ;;  %p157_p3 = pnand %p509_p0, %p156_p2 }
   0x6   : > { %p186_p4 = scmp.lt.s32.totalorder (!%p157_p3), %s614_s12, 1  ;;  %v596_v0 = vld [vmem:[%s730_s0] sm:$0xff] (!%p157_p3)   ;;  %vm291_vm0 = vcmask (!%p157_p3), 146432   ;;  %v597_v1 = vld [vmem:[%s730_s0 + $0x10] sm:$0xff] (!%p157_p3)   ;;  %v624_v2 = vmov (!%p157_p3), 0   ;;  %vm304_vm1 = vcmask (!%p157_p3), 1040384  }
   0x7   : > { %160 = sbr.rel (%p157_p3) target bundleno = 249 (0xf9), region = 32  ;;  %552 = vmatprep.mubr.msk.bf16.mxu0 (!%p157_p3), %vm291_vm0, %v596_v0  ;;  %556 = vmatprep.mubr.msk.bf16.mxu1 (!%p157_p3), %vm291_vm0, %v597_v1  ;;  %v216_v3 = vld [vmem:[%s732_s2 + $0x10] sm:$0xff] (!%p157_p3)  ;;  %v214_v4 = vld [vmem:[%s732_s2] sm:$0xff] (!%p157_p3)  ;;  %v217_v7 = vld [vmem:[%s732_s2 + $0x18] sm:$0xff] (!%p157_p3)  ;;  %vm413_vm2 = vcmask (!%p157_p3), 125952  }
   0x8   : > { %593 = vset.pattern.permute.xlu1 (!%p157_p3), %v624_v2  ;;  %592 = vset.pattern.permute.xlu0 (!%p157_p3), %v624_v2  ;;  %v215_v8 = vld [vmem:[%s732_s2 + $0x8] sm:$0xff] (!%p157_p3)  ;;  %v599_v11 = vld [vmem:[%s730_s0 + $0x18] sm:$0xff] (!%p157_p3)   ;;  %v218_v13 = vld [vmem:[%s732_s2 + $0x20] sm:$0xff] (!%p157_p3) }
   0x9   : > { %234 = vperm.xlu1 (!%p157_p3), %593, %v216_v3   ;;  %224 = vperm.xlu0 (!%p157_p3), %592, %v214_v4   ;;  %v598_v10 = vld [vmem:[%s730_s0 + $0x8] sm:$0xff] (!%p157_p3)   ;;  %v221_v14 = vld [vmem:[%s732_s2 + $0x38] sm:$0xff] (!%p157_p3)  ;;  %v220_v15 = vld [vmem:[%s732_s2 + $0x30] sm:$0xff] (!%p157_p3) }
   0xa   : > { %v219_v12 = vld [vmem:[%s732_s2 + $0x28] sm:$0xff] (!%p157_p3) }
   0xd   : > { %239 = vperm.xlu1 (!%p157_p3), %593, %v217_v7   ;;  %229 = vperm.xlu0 (!%p157_p3), %592, %v215_v8  }
   0xe   : > { %s739_s12 = smov (!%p186_p4, %s614_s12), 1 }
   0xf   : > { %s566_s20 = smul.u32 12, %s739_s12  ;;  %s533_s21 = sshll.u32 %s739_s12, 5 }
  0x10   : > { %s201_s24 = scalar_lea.vmem %s733_s3, %s533_s21 }
  0x11   : > { %s193_s27 = scalar_lea.vmem %s731_s1, %s566_s20  ;;  %249 = vperm.xlu1 %593, %v219_v12   ;;  %244 = vperm.xlu0 %592, %v218_v13  }
  0x12   : > { %v594_v5 = vld [vmem:[%s193_s27] sm:$0xff]   ;;  %v595_v6 = vld [vmem:[%s193_s27 + $0x8] ss:$0 sps:$4 sm:$0x11]  }
  0x13   : > { %548 = vmatprep.subr.bf16.mxu0 %v594_v5  ;;  %560 = vmatprep.subr.bf16.mxu1 %v594_v5  ;;  %v306_v9 = vsel %vm304_vm1, %v595_v6, 0 }
  0x14   : > { %549 = vmatpush3.bf16.msra.mxu0 %v594_v5  ;;  %562 = vmatpush3.bf16.msra.mxu1 %v594_v5 }
  0x15   : > { %564 = vmatprep.subr.msk.bf16.mxu0 %vm304_vm1, %v595_v6  ;;  %565 = vmatprep.subr.msk.bf16.mxu1 %vm304_vm1, %v595_v6 }
  0x16   : > { %259 = vperm.xlu1 %593, %v221_v14   ;;  %254 = vperm.xlu0 %592, %v220_v15  }
  0x18   : > { %551 = vmatpush3.bf16.msra.mxu0 %v306_v9  ;;  %563 = vmatpush3.bf16.msra.mxu1 %v306_v9 }
  0x1b   : > { %553 = vmatmul.mubr.msk.bf16.vlgmr.msra.gmra.mrb[0].mxu0 %vm291_vm0, %v598_v10  ;;  %557 = vmatmul.mubr.msk.bf16.vlgmr.msra.gmra.mrb[0].mxu1 %vm291_vm0, %v599_v11 }
  0x88   : > { %v235_v16 = vpop.permute.xlu1 %234  ;;  %v225_v17 = vpop.permute.xlu0 %224 }
  0x8c   : > { %v240_v18 = vpop.permute.xlu1 %239  ;;  %v230_v19 = vpop.permute.xlu0 %229 }
  0x90   : > { %v250_v20 = vpop.permute.xlu1 %249  ;;  %v245_v21 = vpop.permute.xlu0 %244 }
  0x95   : > { %v260_v22 = vpop.permute.xlu1 %259  ;;  %v255_v23 = vpop.permute.xlu0 %254 }
  0xee   : > { %v554_v24 = vpop.f32.mrb[0].mxu0  ;;  %v558_v25 = vpop.f32.mrb[0].mxu1 }
  0xef   : > { %v351_v26 = vadd.f32 %v554_v24, %v235_v16  ;;  %v367_v27 = vadd.f32 %v558_v25, %v255_v23  ;;  %v342_v28 = vpop.f32.mrb[1].mxu0  ;;  %v358_v29 = vpop.f32.mrb[1].mxu1 }
  0xf0   : > { %v343_v30 = vadd.f32 %v342_v28, %v225_v17  ;;  %v359_v31 = vadd.f32 %v358_v29, %v245_v21  ;;  %v555_v32 = vpop.f32.mrb[2].mxu0  ;;  %v559_v33 = vpop.f32.mrb[2].mxu1 }
  0xf1   : > { %v375_v34 = vmax.f32 %v351_v26, 0.0  ;;  %v379_v35 = vmax.f32 %v367_v27, 0.0  ;;  %v354_v36 = vadd.f32 %v555_v32, %v240_v18  ;;  %v370_v37 = vadd.f32 %v559_v33, %v260_v22  ;;  %v345_v38 = vpop.f32.mrb[3].mxu0  ;;  %v361_v39 = vpop.f32.mrb[3].mxu1 }
  0xf2   : > { %v373_v40 = vmax.f32 %v343_v30, 0.0  ;;  %v377_v41 = vmax.f32 %v359_v31, 0.0  ;;  %v346_v42 = vadd.f32 %v345_v38, %v230_v19  ;;  %v362_v43 = vadd.f32 %v361_v39, %v250_v20 }
  0xf3   : > { %v536_v44 = vpack.c.bf16 %v375_v34, %v375_v34  ;;  %v540_v45 = vpack.c.bf16 %v379_v35, %v379_v35  ;;  %v376_v46 = vmax.f32 %v354_v36, 0.0  ;;  %v380_v47 = vmax.f32 %v370_v37, 0.0 }
  0xf4   : > { %v534_v48 = vpack.c.bf16 %v373_v40, %v373_v40  ;;  %v538_v49 = vpack.c.bf16 %v377_v41, %v377_v41  ;;  %v374_v50 = vmax.f32 %v346_v42, 0.0  ;;  %v378_v51 = vmax.f32 %v362_v43, 0.0 }
  0xf5   : > { %416 = vst.msk [vmem:[%s201_s24 + $0x8] sm:$0xf] %vm413_vm2, %v536_v44  ;;  %420 = vst.msk [vmem:[%s201_s24 + $0x18] sm:$0xf] %vm413_vm2, %v540_v45  ;;  %v537_v52 = vpack.c.bf16 %v376_v46, %v376_v46  ;;  %v541_v53 = vpack.c.bf16 %v380_v47, %v380_v47 }
  0xf6   : > { %414 = vst.msk [vmem:[%s201_s24] sm:$0xf] %vm413_vm2, %v534_v48  ;;  %418 = vst.msk [vmem:[%s201_s24 + $0x10] sm:$0xf] %vm413_vm2, %v538_v49  ;;  %v535_v54 = vpack.c.bf16 %v374_v50, %v374_v50  ;;  %v539_v55 = vpack.c.bf16 %v378_v51, %v378_v51 }
  0xf7   : > { %417 = vst.msk [vmem:[%s201_s24 + $0xc] sm:$0xf] %vm413_vm2, %v537_v52  ;;  %421 = vst.msk [vmem:[%s201_s24 + $0x1c] sm:$0xf] %vm413_vm2, %v541_v53 }
  0xf8   : > { %415 = vst.msk [vmem:[%s201_s24 + $0x4] sm:$0xf] %vm413_vm2, %v535_v54  ;;  %419 = vst.msk [vmem:[%s201_s24 + $0x14] sm:$0xf] %vm413_vm2, %v539_v55 }
  0xf9 PF: > { %s13_s14 = sadd.s32 1, %s622_s14   ;;  %s734_s12 = smov %s618_s13 }
  0xfa   : > { %p10_p5 = scmp.ge.s32.totalorder %s13_s14, 4   ;;  %s735_s13 = smov %s737_s15 }
  0xfc   :  { %12 = sbr.rel (!%p10_p5) target bundleno = 2 (0x2), region = 62 }

// kernel: segmnet_forward.15
= control target key start
LH: loop header
LB: loop body
LE: loop exit
PB: predicated region body
PF: predicated region fallthrough
CT: control target
= control target key end

     0   :  { %s1103_s12 = smov 0   ;;  %s1105_s13 = smov 0   ;;  %s1220_s0 = inlined_call_operand.vmem [shape: bf16[32,576], index: 0, kind: input, shape index: {}]   ;;  %s1221_s1 = inlined_call_operand.vmem [shape: bf16[2,576,64], index: 1, kind: input, shape index: {}]   ;;  %s1222_s2 = inlined_call_operand.vmem [shape: f32[32,1], index: 2, kind: input, shape index: {}]   ;;  %s1223_s3 = inlined_call_operand.vmem [shape: bf16[2,32,64], index: 3, kind: output, shape index: {}]  }
   0x1   :  { %s1107_s14 = smov 0  }
   0x2 LB: > { %s25_s15 = sadd.s32 1, %s1076_s13  ;;  %p843_p0 = scmp.ge.s32.totalorder %s1080_s14, 1  ;;  %s1080_s14 = sphi %s1107_s14, %s13_s14   ;;  %s1076_s13 = sphi %s1105_s13, %s1225_s13   ;;  %s1072_s12 = sphi %s1103_s12, %s1224_s12  }
   0x3   : > { %p27_p1 = scmp.ge.s32.totalorder %s25_s15, 2  ;;  %p156_p2 = scmp.lt.s32.totalorder %s1080_s14, 3 }
   0x5   : > { %s1227_s15 = smov (%p27_p1, %s25_s15), 0  ;;  %p157_p3 = pnand %p843_p0, %p156_p2 }
   0x6   : > { %p186_p4 = scmp.lt.s32.totalorder (!%p157_p3), %s1072_s12, 1  ;;  %v1041_v0 = vld [vmem:[%s1220_s0 + $0x4] ss:$20 sps:$4 sm:$0xff] (!%p157_p3)   ;;  %v1046_v1 = vld [vmem:[%s1220_s0 + $0xc] ss:$20 sps:$4 sm:$0xff] (!%p157_p3)   ;;  %v1082_v2 = vmov (!%p157_p3), 0  }
   0x7   : > { %160 = sbr.rel (%p157_p3) target bundleno = 289 (0x121), region = 32  ;;  %1006 = vset.pattern.permute.xlu0 (!%p157_p3), %v1082_v2  ;;  %1007 = vset.pattern.permute.xlu1 (!%p157_p3), %v1082_v2  ;;  %v1039_v32 = vld [vmem:[%s1220_s0] ss:$20 sps:$4 sm:$0xff] (!%p157_p3)   ;;  %v1044_v36 = vld [vmem:[%s1220_s0 + $0x8] ss:$20 sps:$4 sm:$0xff] (!%p157_p3)   ;;  %vm577_vm0 = vcmask (!%p157_p3), 523264  }
   0x8   : > { %616 = vmatprep.mubr.bf16.mxu0 (!%p157_p3), %v1041_v0  ;;  %665 = vmatprep.mubr.bf16.mxu1 (!%p157_p3), %v1046_v1  ;;  %v1048_v34 = vld [vmem:[%s1220_s0 + $0x2c] ss:$20 sps:$4 sm:$0xff] (!%p157_p3)   ;;  %v1052_v38 = vld [vmem:[%s1220_s0 + $0x34] ss:$20 sps:$4 sm:$0xff] (!%p157_p3)   ;;  %v1056_v46 = vld [vmem:[%s1220_s0 + $0x10] ss:$20 sps:$4 sm:$0xff] (!%p157_p3)  }
   0x9   : > { %v287_v42 = vld [vmem:[%s1222_s2] sm:$0xff] (!%p157_p3)  ;;  %v289_v43 = vld [vmem:[%s1222_s2 + $0x10] sm:$0xff] (!%p157_p3)  ;;  %v1050_v44 = vld [vmem:[%s1220_s0 + $0x28] ss:$20 sps:$4 sm:$0xff] (!%p157_p3)   ;;  %vm751_vm1 = vcmask (!%p157_p3), 519168  }
   0xa   : > { %293 = vperm.xlu0 (!%p157_p3), %1006, %v287_v42   ;;  %v288_v45 = vld [vmem:[%s1222_s2 + $0x8] sm:$0xff] (!%p157_p3)  ;;  %303 = vperm.xlu1 (!%p157_p3), %1007, %v289_v43   ;;  %v290_v47 = vld [vmem:[%s1222_s2 + $0x18] sm:$0xff] (!%p157_p3)  ;;  %v1054_v48 = vld [vmem:[%s1220_s0 + $0x30] ss:$20 sps:$4 sm:$0xff] (!%p157_p3)  }
   0xb   : > { %v1057_v50 = vld [vmem:[%s1220_s0 + $0x38] ss:$20 sps:$4 sm:$0xff] (!%p157_p3)  }
   0xe   : > { %s1229_s12 = smov (!%p186_p4, %s1072_s12), 1  ;;  %298 = vperm.xlu0 %1006, %v288_v45   ;;  %308 = vperm.xlu1 %1007, %v290_v47  }
   0xf   : > { %s980_s20 = smul.u32 288, %s1229_s12 }
  0x11   : > { %s1133_s23 = scalar_lea.vmem %s1221_s1, %s980_s20 }
  0x12   : > { %v1008_v3 = vld [vmem:[%s1133_s23 + $0x40] sm:$0xff]   ;;  %v1012_v7 = vld [vmem:[%s1133_s23 + $0x48] sm:$0xff]   ;;  %v1016_v11 = vld [vmem:[%s1133_s23 + $0x50] sm:$0xff]  }
  0x13   : > { %v1009_v4 = vld [vmem:[%s1133_s23] sm:$0xff]   ;;  %906 = vmatprep.subr.bf16.mxu0 %v1008_v3  ;;  %v1013_v8 = vld [vmem:[%s1133_s23 + $0x8] sm:$0xff]   ;;  %v1017_v12 = vld [vmem:[%s1133_s23 + $0x10] sm:$0xff]  }
  0x14   : > { %v1010_v5 = vld [vmem:[%s1133_s23 + $0xc0] sm:$0xff]   ;;  %907 = vmatpush3.bf16.msra.mxu0 %v1009_v4  ;;  %v1014_v9 = vld [vmem:[%s1133_s23 + $0xc8] sm:$0xff]   ;;  %v1018_v13 = vld [vmem:[%s1133_s23 + $0xd0] sm:$0xff]  }
  0x15   : > { %v1011_v6 = vld [vmem:[%s1133_s23 + $0x80] sm:$0xff]   ;;  %934 = vmatprep.subr.bf16.mxu1 %v1010_v5  ;;  %908 = vmatprep.subr.bf16.mxu0 %v1012_v7  ;;  %v1015_v10 = vld [vmem:[%s1133_s23 + $0x88] sm:$0xff]   ;;  %v1019_v14 = vld [vmem:[%s1133_s23 + $0x90] sm:$0xff]  }
  0x16   : > { %935 = vmatpush3.bf16.msra.mxu1 %v1011_v6  ;;  %v1020_v15 = vld [vmem:[%s1133_s23 + $0x58] sm:$0xff]   ;;  %v1024_v19 = vld [vmem:[%s1133_s23 + $0x60] sm:$0xff]   ;;  %v1028_v23 = vld [vmem:[%s1133_s23 + $0x68] sm:$0xff]  }
  0x17   : > { %936 = vmatprep.subr.bf16.mxu1 %v1014_v9  ;;  %v1021_v16 = vld [vmem:[%s1133_s23 + $0x18] sm:$0xff]   ;;  %v1025_v20 = vld [vmem:[%s1133_s23 + $0x20] sm:$0xff]   ;;  %v1029_v24 = vld [vmem:[%s1133_s23 + $0x28] sm:$0xff]  }
  0x18   : > { %909 = vmatpush3.bf16.msra.mxu0 %v1013_v8  ;;  %v1022_v17 = vld [vmem:[%s1133_s23 + $0xd8] sm:$0xff]   ;;  %v1026_v21 = vld [vmem:[%s1133_s23 + $0xe0] sm:$0xff]   ;;  %v1030_v25 = vld [vmem:[%s1133_s23 + $0xe8] sm:$0xff]  }
  0x19   : > { %910 = vmatprep.subr.bf16.mxu0 %v1016_v11  ;;  %v1023_v18 = vld [vmem:[%s1133_s23 + $0x98] sm:$0xff]   ;;  %v1027_v22 = vld [vmem:[%s1133_s23 + $0xa0] sm:$0xff]   ;;  %v1031_v26 = vld [vmem:[%s1133_s23 + $0xa8] sm:$0xff]  }
  0x1a   : > { %937 = vmatpush3.bf16.msra.mxu1 %v1015_v10  ;;  %v1032_v27 = vld [vmem:[%s1133_s23 + $0x70] sm:$0xff]   ;;  %v1036_v31 = vld [vmem:[%s1133_s23 + $0x78] sm:$0xff]   ;;  %v1043_v39 = vld [vmem:[%s1133_s23 + $0x100] sm:$0xff]  }
  0x1b   : > { %938 = vmatprep.subr.bf16.mxu1 %v1018_v13  ;;  %v1033_v28 = vld [vmem:[%s1133_s23 + $0x30] sm:$0xff]   ;;  %v1037_v33 = vld [vmem:[%s1133_s23 + $0x38] sm:$0xff]   ;;  %v1047_v40 = vld [vmem:[%s1133_s23 + $0x108] sm:$0xff]  }
  0x1c   : > { %911 = vmatpush3.bf16.msra.mxu0 %v1017_v12  ;;  %v1034_v29 = vld [vmem:[%s1133_s23 + $0xf0] sm:$0xff]   ;;  %v1038_v35 = vld [vmem:[%s1133_s23 + $0xf8] sm:$0xff]  }
  0x1d   : > { %912 = vmatprep.subr.bf16.mxu0 %v1020_v15  ;;  %v1035_v30 = vld [vmem:[%s1133_s23 + $0xb0] sm:$0xff]   ;;  %v1042_v37 = vld [vmem:[%s1133_s23 + $0xb8] sm:$0xff]  }
  0x1e   : > { %939 = vmatpush3.bf16.msra.mxu1 %v1019_v14  ;;  %v1051_v41 = vld [vmem:[%s1133_s23 + $0x110] sm:$0xff]   ;;  %v1055_v49 = vld [vmem:[%s1133_s23 + $0x118] sm:$0xff]   ;;  %s901_s23 = sshll.u32 %s1229_s12, 4 }
  0x1f   : > { %940 = vmatprep.subr.bf16.mxu1 %v1022_v17  ;;  %s201_s28 = scalar_lea.vmem %s1223_s3, %s901_s23 }
  0x20   : > { %913 = vmatpush3.bf16.msra.mxu0 %v1021_v16 }
  0x21   : > { %914 = vmatprep.subr.bf16.mxu0 %v1024_v19 }
  0x22   : > { %941 = vmatpush3.bf16.msra.mxu1 %v1023_v18 }
  0x23   : > { %942 = vmatprep.subr.bf16.mxu1 %v1026_v21 }
  0x24   : > { %915 = vmatpush3.bf16.msra.mxu0 %v1025_v20 }
  0x25   : > { %916 = vmatprep.subr.bf16.mxu0 %v1028_v23 }
  0x26   : > { %943 = vmatpush3.bf16.msra.mxu1 %v1027_v22 }
  0x27   : > { %944 = vmatprep.subr.bf16.mxu1 %v1030_v25 }
  0x28   : > { %917 = vmatpush3.bf16.msra.mxu0 %v1029_v24 }
  0x29   : > { %918 = vmatprep.subr.bf16.mxu0 %v1032_v27 }
  0x2a   : > { %945 = vmatpush3.bf16.msra.mxu1 %v1031_v26 }
  0x2b   : > { %946 = vmatprep.subr.bf16.mxu1 %v1034_v29 }
  0x2c   : > { %919 = vmatpush3.bf16.msra.mxu0 %v1033_v28 }
  0x2d   : > { %920 = vmatprep.subr.bf16.mxu0 %v1036_v31 }
  0x2e   : > { %947 = vmatpush3.bf16.msra.mxu1 %v1035_v30 }
  0x2f   : > { %948 = vmatprep.subr.bf16.mxu1 %v1038_v35 }
  0x30   : > { %921 = vmatpush3.bf16.msra.mxu0 %v1037_v33 }
  0x31   : > { %968 = vmatprep.subr.bf16.mxu0 %v1043_v39 }
  0x32   : > { %949 = vmatpush3.bf16.msra.mxu1 %v1042_v37 }
  0x33   : > { %617 = vmatmul.mubr.bf16.vlgmr.msra.gmra.mrb[0].mxu0 %v1039_v32 }
  0x34   : > { %969 = vmatpush3.bf16.msra.mxu0 %v1043_v39  ;;  %624 = vmatprep.mubr.bf16.mxu0 %v1048_v34 }
  0x35   : > { %666 = vmatmul.mubr.bf16.vlgmr.msra.gmra.mrb[0].mxu1 %v1044_v36  ;;  %970 = vmatprep.subr.bf16.mxu0 %v1047_v40 }
  0x36   : > { %673 = vmatprep.mubr.bf16.mxu1 %v1052_v38 }
  0x38   : > { %971 = vmatpush3.bf16.msra.mxu0 %v1047_v40 }
  0x39   : > { %972 = vmatprep.subr.bf16.mxu0 %v1051_v41 }
  0x3b   : > { %625 = vmatmul.mubr.bf16.gmra.mrb[4].mxu0 %v1050_v44 }
  0x3c   : > { %973 = vmatpush3.bf16.msra.mxu0 %v1051_v41  ;;  %976 = vmatprep.mubr.msk.bf16.mxu0 %vm577_vm0, %v1056_v46 }
  0x3d   : > { %674 = vmatmul.mubr.bf16.gmra.mrb[4].mxu1 %v1054_v48  ;;  %974 = vmatprep.subr.bf16.mxu0 %v1055_v49 }
  0x40   : > { %975 = vmatpush3.bf16.msra.mxu0 %v1055_v49 }
  0x43   : > { %977 = vmatmul.mubr.msk.bf16.vlgmr.msra.gmra.mrb[8].mxu0 %vm577_vm0, %v1057_v50 }
  0x89   : > { %v294_v51 = vpop.permute.xlu0 %293  ;;  %v304_v4 = vpop.permute.xlu1 %303 }
  0x8d   : > { %v299_v54 = vpop.permute.xlu0 %298  ;;  %v309_v17 = vpop.permute.xlu1 %308 }
 0x106   : > { %v922_v52 = vpop.f32.mrb[0].mxu0 }
 0x107   : > { %v923_v53 = vpop.f32.mrb[1].mxu0 }
 0x108   : > { %v924_v55 = vadd.f32 %v923_v53, %v922_v52  ;;  %v925_v56 = vpop.f32.mrb[2].mxu0  ;;  %v950_v57 = vpop.f32.mrb[0].mxu1 }
 0x109   : > { %v926_v58 = vpop.f32.mrb[3].mxu0  ;;  %v951_v59 = vpop.f32.mrb[1].mxu1 }
 0x10a   : > { %v619_v60 = vadd.f32 %v924_v55, %v294_v51  ;;  %v927_v61 = vadd.f32 %v926_v58, %v925_v56  ;;  %v952_v62 = vadd.f32 %v951_v59, %v950_v57  ;;  %v953_v63 = vpop.f32.mrb[2].mxu1 }
 0x10b   : > { %v954_v0 = vpop.f32.mrb[3].mxu1 }
 0x10c   : > { %v622_v1 = vadd.f32 %v927_v61, %v299_v54  ;;  %v955_v2 = vadd.f32 %v954_v0, %v953_v63  ;;  %v668_v3 = vadd.f32 %v952_v62, %v619_v60 }
 0x10e   : > { %v928_v5 = vpop.f32.mrb[4].mxu0  ;;  %v671_v6 = vadd.f32 %v955_v2, %v622_v1 }
 0x10f   : > { %v929_v7 = vpop.f32.mrb[5].mxu0 }
 0x110   : > { %v930_v8 = vadd.f32 %v929_v7, %v928_v5  ;;  %v931_v9 = vpop.f32.mrb[6].mxu0  ;;  %v956_v10 = vpop.f32.mrb[4].mxu1 }
 0x111   : > { %v932_v11 = vpop.f32.mrb[7].mxu0  ;;  %v957_v12 = vpop.f32.mrb[5].mxu1 }
 0x112   : > { %v627_v13 = vadd.f32 %v930_v8, %v304_v4  ;;  %v933_v14 = vadd.f32 %v932_v11, %v931_v9  ;;  %v958_v15 = vadd.f32 %v957_v12, %v956_v10  ;;  %v959_v16 = vpop.f32.mrb[6].mxu1 }
 0x113   : > { %v960_v18 = vpop.f32.mrb[7].mxu1 }
 0x114   : > { %v630_v19 = vadd.f32 %v933_v14, %v309_v17  ;;  %v961_v20 = vadd.f32 %v960_v18, %v959_v16  ;;  %v676_v21 = vadd.f32 %v958_v15, %v627_v13 }
 0x116   : > { %v978_v22 = vpop.f32.mrb[8].mxu0  ;;  %v679_v23 = vadd.f32 %v961_v20, %v630_v19 }
 0x117   : > { %v725_v24 = vadd.f32 %v978_v22, %v676_v21  ;;  %v716_v25 = vpop.f32.mrb[9].mxu0 }
 0x118   : > { %v717_v26 = vadd.f32 %v716_v25, %v668_v3  ;;  %v979_v27 = vpop.f32.mrb[10].mxu0 }
 0x119   : > { %v733_v28 = vmax.f32 %v725_v24, 0.0  ;;  %v728_v29 = vadd.f32 %v979_v27, %v679_v23  ;;  %v719_v30 = vpop.f32.mrb[11].mxu0 }
 0x11a   : > { %v731_v31 = vmax.f32 %v717_v26, 0.0  ;;  %v720_v32 = vadd.f32 %v719_v30, %v671_v6 }
 0x11b   : > { %v904_v33 = vpack.c.bf16 %v733_v28, %v733_v28  ;;  %v734_v34 = vmax.f32 %v728_v29, 0.0 }
 0x11c   : > { %v902_v35 = vpack.c.bf16 %v731_v31, %v731_v31  ;;  %v732_v36 = vmax.f32 %v720_v32, 0.0 }
 0x11d   : > { %754 = vst.msk [vmem:[%s201_s28 + $0x8] sm:$0xf] %vm751_vm1, %v904_v33  ;;  %v905_v37 = vpack.c.bf16 %v734_v34, %v734_v34 }
 0x11e   : > { %752 = vst.msk [vmem:[%s201_s28] sm:$0xf] %vm751_vm1, %v902_v35  ;;  %v903_v38 = vpack.c.bf16 %v732_v36, %v732_v36 }
 0x11f   : > { %755 = vst.msk [vmem:[%s201_s28 + $0xc] sm:$0xf] %vm751_vm1, %v905_v37 }
 0x120   : > { %753 = vst.msk [vmem:[%s201_s28 + $0x4] sm:$0xf] %vm751_vm1, %v903_v38 }
 0x121 PF: > { %s13_s14 = sadd.s32 1, %s1080_s14   ;;  %s1224_s12 = smov %s1076_s13 }
 0x122   : > { %p10_p5 = scmp.ge.s32.totalorder %s13_s14, 4   ;;  %s1225_s13 = smov %s1227_s15 }
 0x124   :  { %12 = sbr.rel (!%p10_p5) target bundleno = 2 (0x2), region = 62 }

// kernel: segmnet_forward.16
= control target key start
LH: loop header
LB: loop body
LE: loop exit
PB: predicated region body
PF: predicated region fallthrough
CT: control target
= control target key end

     0   :  { %s1972_s12 = smov 0   ;;  %s1974_s13 = smov 0   ;;  %s2203_s0 = inlined_call_operand.vmem [shape: bf16[32,1440], index: 0, kind: input, shape index: {}]   ;;  %s2204_s1 = inlined_call_operand.vmem [shape: bf16[2,1440,64], index: 1, kind: input, shape index: {}]   ;;  %s2205_s2 = inlined_call_operand.vmem [shape: f32[32,1], index: 2, kind: input, shape index: {}]   ;;  %s2206_s3 = inlined_call_operand.vmem [shape: bf16[2,32,64], index: 3, kind: output, shape index: {}]  }
   0x1   :  { %s1976_s14 = smov 0  }
   0x2 LB: > { %s25_s15 = sadd.s32 1, %s1945_s13  ;;  %p1502_p0 = scmp.ge.s32.totalorder %s1949_s14, 1  ;;  %s1949_s14 = sphi %s1976_s14, %s13_s14   ;;  %s1945_s13 = sphi %s1974_s13, %s2208_s13   ;;  %s1941_s12 = sphi %s1972_s12, %s2207_s12  }
   0x3   : > { %p27_p1 = scmp.ge.s32.totalorder %s25_s15, 2  ;;  %p156_p2 = scmp.lt.s32.totalorder %s1949_s14, 3 }
   0x5   : > { %s2210_s15 = smov (%p27_p1, %s25_s15), 0  ;;  %p157_p3 = pnand %p1502_p0, %p156_p2 }
   0x6   : > { %p186_p4 = scmp.lt.s32.totalorder (!%p157_p3), %s1941_s12, 1  ;;  %v1835_v0 = vld [vmem:[%s2203_s0 + $0x4] ss:$48 sps:$4 sm:$0xff] (!%p157_p3)   ;;  %v1951_v1 = vmov (!%p157_p3), 0   ;;  %v1838_v2 = vld [vmem:[%s2203_s0 + $0xc] ss:$48 sps:$4 sm:$0xff] (!%p157_p3)  }
   0x7   : > { %160 = sbr.rel (%p157_p3) target bundleno = 354 (0x162), region = 32  ;;  %1799 = vset.pattern.permute.xlu0 (!%p157_p3), %v1951_v1  ;;  %1800 = vset.pattern.permute.xlu1 (!%p157_p3), %v1951_v1  ;;  %v1833_v33 = vld [vmem:[%s2203_s0] ss:$48 sps:$4 sm:$0xff] (!%p157_p3)   ;;  %v1836_v35 = vld [vmem:[%s2203_s0 + $0x8] ss:$48 sps:$4 sm:$0xff] (!%p157_p3)   ;;  %vm1089_vm0 = vcmask (!%p157_p3), 261120  }
   0x8   : > { %1128 = vmatprep.mubr.bf16.mxu0 (!%p157_p3), %v1835_v0  ;;  %1177 = vmatprep.mubr.bf16.mxu1 (!%p157_p3), %v1838_v2  ;;  %v1859_v37 = vld [vmem:[%s2203_s0 + $0x64] ss:$48 sps:$4 sm:$0xff] (!%p157_p3)   ;;  %v1864_v39 = vld [vmem:[%s2203_s0 + $0x6c] ss:$48 sps:$4 sm:$0xff] (!%p157_p3)   ;;  %v1861_v45 = vld [vmem:[%s2203_s0 + $0x60] ss:$48 sps:$4 sm:$0xff] (!%p157_p3)  }
   0x9   : > { %v1868_v47 = vld [vmem:[%s2203_s0 + $0x68] ss:$48 sps:$4 sm:$0xff] (!%p157_p3)   ;;  %v1879_v49 = vld [vmem:[%s2203_s0 + $0x14] ss:$48 sps:$4 sm:$0xff] (!%p157_p3)   ;;  %vm1410_vm1 = vcmask (!%p157_p3), 519168  }
   0xe   : > { %s2212_s12 = smov (!%p186_p4, %s1941_s12), 1 }
   0xf   : > { %s1773_s20 = smul.u32 720, %s2212_s12  ;;  %s1628_s4 = sshll.u32 %s2212_s12, 4 }
  0x10   : > { %s201_s7 = scalar_lea.vmem %s2206_s3, %s1628_s4 }
  0x11   : > { %s2004_s23 = scalar_lea.vmem %s2204_s1, %s1773_s20 }
  0x12   : > { %v1801_v3 = vld [vmem:[%s2004_s23 + $0x40] sm:$0xff]   ;;  %v1805_v7 = vld [vmem:[%s2004_s23 + $0x48] sm:$0xff]   ;;  %v1809_v11 = vld [vmem:[%s2004_s23 + $0x50] sm:$0xff]  }
  0x13   : > { %v1802_v4 = vld [vmem:[%s2004_s23 + $0xc0] sm:$0xff]   ;;  %1633 = vmatprep.subr.bf16.mxu0 %v1801_v3  ;;  %v1806_v8 = vld [vmem:[%s2004_s23 + $0xc8] sm:$0xff]   ;;  %v1810_v12 = vld [vmem:[%s2004_s23 + $0xd0] sm:$0xff]  }
  0x14   : > { %v1803_v5 = vld [vmem:[%s2004_s23] sm:$0xff]   ;;  %1661 = vmatprep.subr.bf16.mxu1 %v1802_v4  ;;  %v1807_v9 = vld [vmem:[%s2004_s23 + $0x8] sm:$0xff]   ;;  %v1811_v13 = vld [vmem:[%s2004_s23 + $0x10] sm:$0xff]  }
  0x15   : > { %v1804_v6 = vld [vmem:[%s2004_s23 + $0x80] sm:$0xff]   ;;  %1634 = vmatpush3.bf16.msra.mxu0 %v1803_v5  ;;  %v1808_v10 = vld [vmem:[%s2004_s23 + $0x88] sm:$0xff]   ;;  %v1812_v14 = vld [vmem:[%s2004_s23 + $0x90] sm:$0xff]  }
  0x16   : > { %1662 = vmatpush3.bf16.msra.mxu1 %v1804_v6  ;;  %1635 = vmatprep.subr.bf16.mxu0 %v1805_v7  ;;  %v1813_v15 = vld [vmem:[%s2004_s23 + $0x58] sm:$0xff]   ;;  %v1817_v19 = vld [vmem:[%s2004_s23 + $0x60] sm:$0xff]   ;;  %v1821_v23 = vld [vmem:[%s2004_s23 + $0x68] sm:$0xff]  }
  0x17   : > { %1663 = vmatprep.subr.bf16.mxu1 %v1806_v8  ;;  %v1814_v16 = vld [vmem:[%s2004_s23 + $0xd8] sm:$0xff]   ;;  %v1818_v20 = vld [vmem:[%s2004_s23 + $0xe0] sm:$0xff]   ;;  %v1822_v24 = vld [vmem:[%s2004_s23 + $0xe8] sm:$0xff]  }
  0x18   : > { %v1815_v17 = vld [vmem:[%s2004_s23 + $0x18] sm:$0xff]   ;;  %v1819_v21 = vld [vmem:[%s2004_s23 + $0x20] sm:$0xff]   ;;  %v1823_v25 = vld [vmem:[%s2004_s23 + $0x28] sm:$0xff]  }
  0x19   : > { %1636 = vmatpush3.bf16.msra.mxu0 %v1807_v9  ;;  %v1816_v18 = vld [vmem:[%s2004_s23 + $0x98] sm:$0xff]   ;;  %v1820_v22 = vld [vmem:[%s2004_s23 + $0xa0] sm:$0xff]   ;;  %v1824_v26 = vld [vmem:[%s2004_s23 + $0xa8] sm:$0xff]  }
  0x1a   : > { %1664 = vmatpush3.bf16.msra.mxu1 %v1808_v10  ;;  %1637 = vmatprep.subr.bf16.mxu0 %v1809_v11  ;;  %v1825_v27 = vld [vmem:[%s2004_s23 + $0x70] sm:$0xff]   ;;  %v1829_v31 = vld [vmem:[%s2004_s23 + $0x78] sm:$0xff]   ;;  %v1839_v38 = vld [vmem:[%s2004_s23 + $0x140] sm:$0xff]  }
  0x1b   : > { %1665 = vmatprep.subr.bf16.mxu1 %v1810_v12  ;;  %v1826_v28 = vld [vmem:[%s2004_s23 + $0xf0] sm:$0xff]   ;;  %v1830_v32 = vld [vmem:[%s2004_s23 + $0xf8] sm:$0xff]   ;;  %v1840_v40 = vld [vmem:[%s2004_s23 + $0x1c0] sm:$0xff]  }
  0x1c   : > { %v1827_v29 = vld [vmem:[%s2004_s23 + $0x30] sm:$0xff]   ;;  %v1831_v34 = vld [vmem:[%s2004_s23 + $0x38] sm:$0xff]   ;;  %v1841_v41 = vld [vmem:[%s2004_s23 + $0x100] sm:$0xff]  }
  0x1d   : > { %1638 = vmatpush3.bf16.msra.mxu0 %v1811_v13  ;;  %v1828_v30 = vld [vmem:[%s2004_s23 + $0xb0] sm:$0xff]   ;;  %v1832_v36 = vld [vmem:[%s2004_s23 + $0xb8] sm:$0xff]   ;;  %v1842_v42 = vld [vmem:[%s2004_s23 + $0x180] sm:$0xff]  }
  0x1e   : > { %1666 = vmatpush3.bf16.msra.mxu1 %v1812_v14  ;;  %1639 = vmatprep.subr.bf16.mxu0 %v1813_v15  ;;  %v1843_v43 = vld [vmem:[%s2004_s23 + $0x148] sm:$0xff]   ;;  %v1847_v50 = vld [vmem:[%s2004_s23 + $0x150] sm:$0xff]   ;;  %v1851_v54 = vld [vmem:[%s2004_s23 + $0x158] sm:$0xff]  }
  0x1f   : > { %1667 = vmatprep.subr.bf16.mxu1 %v1814_v16  ;;  %v1844_v44 = vld [vmem:[%s2004_s23 + $0x1c8] sm:$0xff]   ;;  %v1848_v51 = vld [vmem:[%s2004_s23 + $0x1d0] sm:$0xff]   ;;  %v1852_v55 = vld [vmem:[%s2004_s23 + $0x1d8] sm:$0xff]  }
  0x20   : > { %v1845_v46 = vld [vmem:[%s2004_s23 + $0x108] sm:$0xff]   ;;  %v1849_v52 = vld [vmem:[%s2004_s23 + $0x110] sm:$0xff]   ;;  %v1853_v56 = vld [vmem:[%s2004_s23 + $0x118] sm:$0xff]  }
  0x21   : > { %1640 = vmatpush3.bf16.msra.mxu0 %v1815_v17  ;;  %v1846_v48 = vld [vmem:[%s2004_s23 + $0x188] sm:$0xff]   ;;  %v1850_v53 = vld [vmem:[%s2004_s23 + $0x190] sm:$0xff]   ;;  %v1854_v57 = vld [vmem:[%s2004_s23 + $0x198] sm:$0xff]  }
  0x22   : > { %1668 = vmatpush3.bf16.msra.mxu1 %v1816_v18  ;;  %1641 = vmatprep.subr.bf16.mxu0 %v1817_v19  ;;  %v1855_v58 = vld [vmem:[%s2004_s23 + $0x160] sm:$0xff]   ;;  %v1862_v62 = vld [vmem:[%s2004_s23 + $0x168] sm:$0xff]   ;;  %v1869_v3 = vld [vmem:[%s2004_s23 + $0x170] sm:$0xff]  }
  0x23   : > { %1669 = vmatprep.subr.bf16.mxu1 %v1818_v20  ;;  %v1856_v59 = vld [vmem:[%s2004_s23 + $0x1e0] sm:$0xff]   ;;  %v1863_v63 = vld [vmem:[%s2004_s23 + $0x1e8] sm:$0xff]   ;;  %v1870_v4 = vld [vmem:[%s2004_s23 + $0x1f0] sm:$0xff]  }
  0x24   : > { %v1857_v60 = vld [vmem:[%s2004_s23 + $0x120] sm:$0xff]   ;;  %v1866_v0 = vld [vmem:[%s2004_s23 + $0x128] sm:$0xff]   ;;  %v1871_v5 = vld [vmem:[%s2004_s23 + $0x130] sm:$0xff]  }
  0x25   : > { %1642 = vmatpush3.bf16.msra.mxu0 %v1819_v21  ;;  %v1858_v61 = vld [vmem:[%s2004_s23 + $0x1a0] sm:$0xff]   ;;  %v1867_v2 = vld [vmem:[%s2004_s23 + $0x1a8] sm:$0xff]   ;;  %v1872_v6 = vld [vmem:[%s2004_s23 + $0x1b0] sm:$0xff]  }
  0x26   : > { %1670 = vmatpush3.bf16.msra.mxu1 %v1820_v22  ;;  %1643 = vmatprep.subr.bf16.mxu0 %v1821_v23  ;;  %v1873_v7 = vld [vmem:[%s2004_s23 + $0x178] sm:$0xff]   ;;  %v1877_v9 = vld [vmem:[%s2203_s0 + $0x10] ss:$48 sps:$4 sm:$0xff]   ;;  %v1886_v17 = vld [vmem:[%s2004_s23 + $0x248] sm:$0xff]  }
  0x27   : > { %1671 = vmatprep.subr.bf16.mxu1 %v1822_v24  ;;  %v1874_v8 = vld [vmem:[%s2004_s23 + $0x1f8] sm:$0xff]   ;;  %v1883_v14 = vld [vmem:[%s2004_s23 + $0x240] sm:$0xff]   ;;  %v1887_v18 = vld [vmem:[%s2004_s23 + $0x208] sm:$0xff]  }
  0x28   : > { %v1875_v10 = vld [vmem:[%s2004_s23 + $0x138] sm:$0xff]   ;;  %v1884_v15 = vld [vmem:[%s2004_s23 + $0x200] sm:$0xff]   ;;  %v1888_v19 = vld [vmem:[%s2004_s23 + $0x288] sm:$0xff]  }
  0x29   : > { %1644 = vmatpush3.bf16.msra.mxu0 %v1823_v25  ;;  %v1876_v11 = vld [vmem:[%s2004_s23 + $0x1b8] sm:$0xff]   ;;  %v1885_v16 = vld [vmem:[%s2004_s23 + $0x280] sm:$0xff]   ;;  %v1892_v22 = vld [vmem:[%s2004_s23 + $0x250] sm:$0xff]  }
  0x2a   : > { %1672 = vmatpush3.bf16.msra.mxu1 %v1824_v26  ;;  %1645 = vmatprep.subr.bf16.mxu0 %v1825_v27  ;;  %v1880_v12 = vld [vmem:[%s2203_s0 + $0x18] ss:$48 sps:$4 sm:$0xff]   ;;  %v1882_v13 = vld [vmem:[%s2203_s0 + $0x1c] ss:$48 sps:$4 sm:$0xff]   ;;  %v1889_v20 = vld [vmem:[%s2203_s0 + $0x74] ss:$48 sps:$4 sm:$0xff]  }
  0x2b   : > { %1673 = vmatprep.subr.bf16.mxu1 %v1826_v28  ;;  %v1891_v21 = vld [vmem:[%s2203_s0 + $0x70] ss:$48 sps:$4 sm:$0xff]   ;;  %v1893_v23 = vld [vmem:[%s2203_s0 + $0x7c] ss:$48 sps:$4 sm:$0xff]   ;;  %v1897_v26 = vld [vmem:[%s2203_s0 + $0x78] ss:$48 sps:$4 sm:$0xff]  }
  0x2c   : > { %v1895_v24 = vld [vmem:[%s2004_s23 + $0x210] sm:$0xff]   ;;  %v1898_v27 = vld [vmem:[%s2004_s23 + $0x258] sm:$0xff]  }
  0x2d   : > { %1646 = vmatpush3.bf16.msra.mxu0 %v1827_v29  ;;  %v1896_v25 = vld [vmem:[%s2004_s23 + $0x290] sm:$0xff]   ;;  %v1899_v28 = vld [vmem:[%s2004_s23 + $0x218] sm:$0xff]  }
  0x2e   : > { %1674 = vmatpush3.bf16.msra.mxu1 %v1828_v30  ;;  %1647 = vmatprep.subr.bf16.mxu0 %v1829_v31  ;;  %v1900_v29 = vld [vmem:[%s2004_s23 + $0x298] sm:$0xff]   ;;  %v1901_v30 = vld [vmem:[%s2004_s23 + $0x260] sm:$0xff]  }
  0x2f   : > { %1675 = vmatprep.subr.bf16.mxu1 %v1830_v32  ;;  %v1902_v31 = vld [vmem:[%s2004_s23 + $0x220] sm:$0xff]  }
  0x30   : > { %v1903_v32 = vld [vmem:[%s2004_s23 + $0x2a0] sm:$0xff]  }
  0x31   : > { %1648 = vmatpush3.bf16.msra.mxu0 %v1831_v34  ;;  %v1905_v34 = vld [vmem:[%s2004_s23 + $0x228] sm:$0xff]  }
  0x32   : > { %1676 = vmatpush3.bf16.msra.mxu1 %v1832_v36  ;;  %1689 = vmatprep.subr.bf16.mxu0 %v1839_v38  ;;  %v1907_v36 = vld [vmem:[%s2004_s23 + $0x270] sm:$0xff]  }
  0x33   : > { %1717 = vmatprep.subr.bf16.mxu1 %v1840_v40  ;;  %v1909_v38 = vld [vmem:[%s2004_s23 + $0x2b0] sm:$0xff]  }
  0x34   : > { %1129 = vmatmul.mubr.bf16.vlgmr.msra.gmra.mrb[0].mxu0 %v1833_v33  ;;  %v1904_v33 = vld [vmem:[%s2004_s23 + $0x268] sm:$0xff]   ;;  %v1915_v40 = vld [vmem:[%s2203_s0 + $0x24] ss:$48 sps:$4 sm:$0xff]  }
  0x35   : > { %1178 = vmatmul.mubr.bf16.vlgmr.msra.gmra.mrb[0].mxu1 %v1836_v35  ;;  %1690 = vmatpush3.bf16.msra.mxu0 %v1841_v41  ;;  %v1906_v35 = vld [vmem:[%s2004_s23 + $0x2a8] sm:$0xff]   ;;  %v1911_v41 = vld [vmem:[%s2004_s23 + $0x238] sm:$0xff]  }
  0x36   : > { %1718 = vmatpush3.bf16.msra.mxu1 %v1842_v42  ;;  %1136 = vmatprep.mubr.bf16.mxu0 %v1859_v37  ;;  %v1908_v37 = vld [vmem:[%s2004_s23 + $0x230] sm:$0xff]   ;;  %v1912_v42 = vld [vmem:[%s2004_s23 + $0x2b8] sm:$0xff]  }
  0x37   : > { %1691 = vmatprep.subr.bf16.mxu0 %v1843_v43  ;;  %1185 = vmatprep.mubr.bf16.mxu1 %v1864_v39  ;;  %v1910_v39 = vld [vmem:[%s2004_s23 + $0x278] sm:$0xff]   ;;  %v1913_v43 = vld [vmem:[%s2203_s0 + $0x20] ss:$48 sps:$4 sm:$0xff]  }
  0x38   : > { %1719 = vmatprep.subr.bf16.mxu1 %v1844_v44  ;;  %v1918_v44 = vld [vmem:[%s2203_s0 + $0x84] ss:$48 sps:$4 sm:$0xff]  }
  0x39   : > { %1692 = vmatpush3.bf16.msra.mxu0 %v1845_v46  ;;  %v1916_v46 = vld [vmem:[%s2004_s23 + $0x2c0] sm:$0xff]  }
  0x3a   : > { %1720 = vmatpush3.bf16.msra.mxu1 %v1846_v48  ;;  %1693 = vmatprep.subr.bf16.mxu0 %v1847_v50  ;;  %v409_v48 = vld [vmem:[%s2205_s2 + $0x10] sm:$0xff]  ;;  %v1917_v50 = vld [vmem:[%s2004_s23 + $0x2c8] sm:$0xff]  }
  0x3b   : > { %1721 = vmatprep.subr.bf16.mxu1 %v1848_v51  ;;  %423 = vperm.xlu1 %1800, %v409_v48   ;;  %v410_v51 = vld [vmem:[%s2205_s2 + $0x18] sm:$0xff] }
  0x3c   : > { %1137 = vmatmul.mubr.bf16.gmra.mrb[4].mxu0 %v1861_v45  ;;  %v1922_v45 = vld [vmem:[%s2203_s0 + $0x2c] ss:$48 sps:$4 sm:$0xff]  }
  0x3d   : > { %1694 = vmatpush3.bf16.msra.mxu0 %v1849_v52  ;;  %1186 = vmatmul.mubr.bf16.gmra.mrb[4].mxu1 %v1868_v47  ;;  %v407_v47 = vld [vmem:[%s2205_s2] sm:$0xff] }
  0x3e   : > { %1722 = vmatpush3.bf16.msra.mxu1 %v1850_v53  ;;  %1226 = vmatprep.mubr.bf16.mxu0 %v1879_v49  ;;  %v408_v49 = vld [vmem:[%s2205_s2 + $0x8] sm:$0xff]  ;;  %v1923_v52 = vld [vmem:[%s2203_s0 + $0x80] ss:$48 sps:$4 sm:$0xff]  }
  0x3f   : > { %1695 = vmatprep.subr.bf16.mxu0 %v1851_v54  ;;  %1723 = vmatprep.subr.bf16.mxu1 %v1852_v55  ;;  %v1920_v53 = vld [vmem:[%s2203_s0 + $0x28] ss:$48 sps:$4 sm:$0xff]   ;;  %v1924_v54 = vld [vmem:[%s2203_s0 + $0x8c] ss:$48 sps:$4 sm:$0xff]  }
  0x40   : > { %1275 = vmatprep.mubr.bf16.mxu1 %v1882_v13  ;;  %413 = vperm.xlu0 %1799, %v407_v47  }
  0x41   : > { %1696 = vmatpush3.bf16.msra.mxu0 %v1853_v56  ;;  %428 = vperm.xlu1 %1800, %v410_v51  }
  0x42   : > { %1724 = vmatpush3.bf16.msra.mxu1 %v1854_v57  ;;  %1697 = vmatprep.subr.bf16.mxu0 %v1855_v58 }
  0x43   : > { %1725 = vmatprep.subr.bf16.mxu1 %v1856_v59 }
  0x44   : > { %418 = vperm.xlu0 %1799, %v408_v49  }
  0x45   : > { %1698 = vmatpush3.bf16.msra.mxu0 %v1857_v60 }
  0x46   : > { %1726 = vmatpush3.bf16.msra.mxu1 %v1858_v61  ;;  %1699 = vmatprep.subr.bf16.mxu0 %v1862_v62 }
  0x47   : > { %1727 = vmatprep.subr.bf16.mxu1 %v1863_v63 }
  0x49   : > { %1700 = vmatpush3.bf16.msra.mxu0 %v1866_v0 }
  0x4a   : > { %1728 = vmatpush3.bf16.msra.mxu1 %v1867_v2  ;;  %1701 = vmatprep.subr.bf16.mxu0 %v1869_v3 }
  0x4b   : > { %1729 = vmatprep.subr.bf16.mxu1 %v1870_v4 }
  0x4d   : > { %1702 = vmatpush3.bf16.msra.mxu0 %v1871_v5 }
  0x4e   : > { %1730 = vmatpush3.bf16.msra.mxu1 %v1872_v6  ;;  %1703 = vmatprep.subr.bf16.mxu0 %v1873_v7 }
  0x4f   : > { %1731 = vmatprep.subr.bf16.mxu1 %v1874_v8 }
  0x51   : > { %1704 = vmatpush3.bf16.msra.mxu0 %v1875_v10 }
  0x52   : > { %1732 = vmatpush3.bf16.msra.mxu1 %v1876_v11  ;;  %1745 = vmatprep.subr.bf16.mxu0 %v1883_v14 }
  0x53   : > { %1341 = vmatprep.subr.bf16.mxu1 %v1951_v1 }
  0x54   : > { %1227 = vmatmul.mubr.bf16.vlgmr.msra.gmra.mrb[8].mxu0 %v1877_v9 }
  0x55   : > { %1276 = vmatmul.mubr.bf16.vlgmr.msra.gmra.mrb[8].mxu1 %v1880_v12  ;;  %1746 = vmatpush3.bf16.msra.mxu0 %v1884_v15 }
  0x56   : > { %1342 = vmatpush1.bf16.msra.mxu1 %v1885_v16  ;;  %1747 = vmatprep.subr.bf16.mxu0 %v1886_v17 }
  0x57   : > { %1343 = vmatprep.subr.bf16.mxu1 %v1951_v1  ;;  %1234 = vmatprep.mubr.bf16.mxu0 %v1889_v20 }
  0x58   : > { %1283 = vmatprep.mubr.bf16.mxu1 %v1893_v23 }
  0x59   : > { %1748 = vmatpush3.bf16.msra.mxu0 %v1887_v18 }
  0x5a   : > { %1344 = vmatpush1.bf16.msra.mxu1 %v1888_v19  ;;  %1749 = vmatprep.subr.bf16.mxu0 %v1892_v22 }
  0x5b   : > { %1345 = vmatprep.subr.bf16.mxu1 %v1951_v1 }
  0x5c   : > { %1235 = vmatmul.mubr.bf16.gmra.mrb[12].mxu0 %v1891_v21 }
  0x5d   : > { %1750 = vmatpush3.bf16.msra.mxu0 %v1895_v24  ;;  %1284 = vmatmul.mubr.bf16.gmra.mrb[12].mxu1 %v1897_v26 }
  0x5e   : > { %1346 = vmatpush1.bf16.msra.mxu1 %v1896_v25  ;;  %1751 = vmatprep.subr.bf16.mxu0 %v1898_v27 }
  0x5f   : > { %1347 = vmatprep.subr.bf16.mxu1 %v1951_v1  ;;  %1324 = vmatprep.mubr.bf16.mxu0 %v1915_v40 }
  0x60   : > { %1620 = vmatprep.mubr.msk.bf16.mxu1 %vm1089_vm0, %v1922_v45 }
  0x61   : > { %1752 = vmatpush3.bf16.msra.mxu0 %v1899_v28 }
  0x62   : > { %1348 = vmatpush1.bf16.msra.mxu1 %v1900_v29  ;;  %1753 = vmatprep.subr.bf16.mxu0 %v1901_v30 }
  0x63   : > { %1349 = vmatprep.subr.bf16.mxu1 %v1951_v1 }
  0x65   : > { %1754 = vmatpush3.bf16.msra.mxu0 %v1902_v31 }
  0x66   : > { %1350 = vmatpush1.bf16.msra.mxu1 %v1903_v32  ;;  %1755 = vmatprep.subr.bf16.mxu0 %v1904_v33 }
  0x67   : > { %1351 = vmatprep.subr.bf16.mxu1 %v1951_v1 }
  0x69   : > { %1756 = vmatpush3.bf16.msra.mxu0 %v1905_v34 }
  0x6a   : > { %1352 = vmatpush1.bf16.msra.mxu1 %v1906_v35  ;;  %1757 = vmatprep.subr.bf16.mxu0 %v1907_v36 }
  0x6b   : > { %1353 = vmatprep.subr.bf16.mxu1 %v1951_v1 }
  0x6d   : > { %1758 = vmatpush3.bf16.msra.mxu0 %v1908_v37 }
  0x6e   : > { %1354 = vmatpush1.bf16.msra.mxu1 %v1909_v38  ;;  %1759 = vmatprep.subr.bf16.mxu0 %v1910_v39 }
  0x6f   : > { %1355 = vmatprep.subr.bf16.mxu1 %v1951_v1 }
  0x71   : > { %1760 = vmatpush3.bf16.msra.mxu0 %v1911_v41 }
  0x72   : > { %1356 = vmatpush1.bf16.msra.mxu1 %v1912_v42 }
  0x73   : > { %1357 = vmatprep.subr.bf16.mxu1 %v1951_v1 }
  0x74   : > { %1325 = vmatmul.mubr.bf16.vlgmr.msra.gmra.mrb[16].mxu0 %v1913_v43 }
  0x75   : > { %1332 = vmatprep.mubr.bf16.mxu0 %v1918_v44 }
  0x76   : > { %1358 = vmatpush1.bf16.msra.mxu1 %v1916_v46 }
  0x77   : > { %1359 = vmatprep.subr.bf16.mxu1 %v1951_v1  ;;  %v1926_v1 = vld [vmem:[%s2203_s0 + $0x88] ss:$48 sps:$4 sm:$0xff]  }
  0x7a   : > { %1360 = vmatpush1.bf16.msra.mxu1 %v1917_v50 }
  0x7c   : > { %1333 = vmatmul.mubr.bf16.gmra.mrb[20].mxu0 %v1923_v52 }
  0x7d   : > { %1374 = vmatmul.mubr.bf16.vlgmr.msra.gmra.mrb[16].mxu1 %v1920_v53 }
  0x7e   : > { %1621 = vmatprep.mubr.msk.bf16.mxu1 %vm1089_vm0, %v1924_v54 }
  0x85   : > { %1382 = vmatmul.mubr.bf16.gmra.mrb[20].mxu1 %v1926_v1 }
  0xba   : > { %v424_v56 = vpop.permute.xlu1 %423 }
  0xbf   : > { %v414_v55 = vpop.permute.xlu0 %413 }
  0xc0   : > { %v429_v12 = vpop.permute.xlu1 %428 }
  0xc3   : > { %v419_v58 = vpop.permute.xlu0 %418 }
 0x107   : > { %v1649_v57 = vpop.f32.mrb[0].mxu0 }
 0x108   : > { %v1677_v59 = vpop.f32.mrb[0].mxu1  ;;  %v1650_v60 = vpop.f32.mrb[1].mxu0 }
 0x109   : > { %v1651_v61 = vadd.f32 %v1650_v60, %v1649_v57  ;;  %v1678_v62 = vpop.f32.mrb[1].mxu1  ;;  %v1652_v63 = vpop.f32.mrb[2].mxu0 }
 0x10a   : > { %v1679_v0 = vadd.f32 %v1678_v62, %v1677_v59  ;;  %v1680_v2 = vpop.f32.mrb[2].mxu1  ;;  %v1653_v3 = vpop.f32.mrb[3].mxu0 }
 0x10b   : > { %v1131_v4 = vadd.f32 %v1651_v61, %v414_v55  ;;  %v1654_v5 = vadd.f32 %v1653_v3, %v1652_v63  ;;  %v1681_v6 = vpop.f32.mrb[3].mxu1 }
 0x10c   : > { %v1682_v7 = vadd.f32 %v1681_v6, %v1680_v2 }
 0x10d   : > { %v1180_v8 = vadd.f32 %v1679_v0, %v1131_v4  ;;  %v1134_v9 = vadd.f32 %v1654_v5, %v419_v58 }
 0x10f   : > { %v1183_v10 = vadd.f32 %v1682_v7, %v1134_v9  ;;  %v1655_v11 = vpop.f32.mrb[4].mxu0 }
 0x110   : > { %v1656_v13 = vpop.f32.mrb[5].mxu0  ;;  %v1683_v14 = vpop.f32.mrb[4].mxu1 }
 0x111   : > { %v1657_v15 = vadd.f32 %v1656_v13, %v1655_v11  ;;  %v1658_v16 = vpop.f32.mrb[6].mxu0  ;;  %v1684_v17 = vpop.f32.mrb[5].mxu1 }
 0x112   : > { %v1659_v18 = vpop.f32.mrb[7].mxu0  ;;  %v1685_v19 = vadd.f32 %v1684_v17, %v1683_v14  ;;  %v1686_v20 = vpop.f32.mrb[6].mxu1 }
 0x113   : > { %v1139_v21 = vadd.f32 %v1657_v15, %v424_v56  ;;  %v1660_v22 = vadd.f32 %v1659_v18, %v1658_v16  ;;  %v1687_v23 = vpop.f32.mrb[7].mxu1 }
 0x114   : > { %v1688_v24 = vadd.f32 %v1687_v23, %v1686_v20 }
 0x115   : > { %v1188_v25 = vadd.f32 %v1685_v19, %v1139_v21  ;;  %v1142_v26 = vadd.f32 %v1660_v22, %v429_v12 }
 0x117   : > { %v1191_v27 = vadd.f32 %v1688_v24, %v1142_v26 }
 0x127   : > { %v1705_v28 = vpop.f32.mrb[8].mxu0 }
 0x128   : > { %v1733_v29 = vpop.f32.mrb[8].mxu1  ;;  %v1706_v30 = vpop.f32.mrb[9].mxu0 }
 0x129   : > { %v1707_v31 = vadd.f32 %v1706_v30, %v1705_v28  ;;  %v1734_v32 = vpop.f32.mrb[9].mxu1  ;;  %v1708_v33 = vpop.f32.mrb[10].mxu0 }
 0x12a   : > { %v1735_v34 = vadd.f32 %v1734_v32, %v1733_v29  ;;  %v1736_v35 = vpop.f32.mrb[10].mxu1  ;;  %v1709_v36 = vpop.f32.mrb[11].mxu0 }
 0x12b   : > { %v1229_v37 = vadd.f32 %v1707_v31, %v1180_v8  ;;  %v1710_v38 = vadd.f32 %v1709_v36, %v1708_v33  ;;  %v1737_v39 = vpop.f32.mrb[11].mxu1 }
 0x12c   : > { %v1738_v40 = vadd.f32 %v1737_v39, %v1736_v35 }
 0x12d   : > { %v1278_v41 = vadd.f32 %v1735_v34, %v1229_v37  ;;  %v1232_v42 = vadd.f32 %v1710_v38, %v1183_v10 }
 0x12f   : > { %v1281_v43 = vadd.f32 %v1738_v40, %v1232_v42  ;;  %v1711_v44 = vpop.f32.mrb[12].mxu0 }
 0x130   : > { %v1712_v45 = vpop.f32.mrb[13].mxu0  ;;  %v1739_v50 = vpop.f32.mrb[12].mxu1 }
 0x131   : > { %v1713_v46 = vadd.f32 %v1712_v45, %v1711_v44  ;;  %v1714_v47 = vpop.f32.mrb[14].mxu0  ;;  %v1740_v52 = vpop.f32.mrb[13].mxu1 }
 0x132   : > { %v1715_v48 = vpop.f32.mrb[15].mxu0  ;;  %v1741_v54 = vadd.f32 %v1740_v52, %v1739_v50  ;;  %v1742_v1 = vpop.f32.mrb[14].mxu1 }
 0x133   : > { %v1237_v49 = vadd.f32 %v1713_v46, %v1188_v25  ;;  %v1716_v51 = vadd.f32 %v1715_v48, %v1714_v47  ;;  %v1743_v55 = vpop.f32.mrb[15].mxu1 }
 0x134   : > { %v1744_v57 = vadd.f32 %v1743_v55, %v1742_v1 }
 0x135   : > { %v1240_v53 = vadd.f32 %v1716_v51, %v1191_v27  ;;  %v1286_v56 = vadd.f32 %v1741_v54, %v1237_v49 }
 0x137   : > { %v1289_v58 = vadd.f32 %v1744_v57, %v1240_v53 }
 0x147   : > { %v1761_v59 = vpop.f32.mrb[16].mxu0 }
 0x148   : > { %v1762_v60 = vpop.f32.mrb[17].mxu0 }
 0x149   : > { %v1763_v61 = vadd.f32 %v1762_v60, %v1761_v59  ;;  %v1764_v62 = vpop.f32.mrb[18].mxu0 }
 0x14a   : > { %v1765_v63 = vpop.f32.mrb[19].mxu0 }
 0x14b   : > { %v1766_v0 = vadd.f32 %v1765_v63, %v1764_v62  ;;  %v1327_v2 = vadd.f32 %v1763_v61, %v1278_v41 }
 0x14d   : > { %v1330_v3 = vadd.f32 %v1766_v0, %v1281_v43 }
 0x14f   : > { %v1767_v4 = vpop.f32.mrb[20].mxu0 }
 0x150   : > { %v1375_v5 = vpop.f32.mrb[16].mxu1  ;;  %v1768_v6 = vpop.f32.mrb[21].mxu0 }
 0x151   : > { %v1376_v7 = vadd.f32 %v1375_v5, %v1327_v2  ;;  %v1769_v8 = vadd.f32 %v1768_v6, %v1767_v4  ;;  %v1377_v9 = vpop.f32.mrb[17].mxu1  ;;  %v1770_v10 = vpop.f32.mrb[22].mxu0 }
 0x152   : > { %v1378_v11 = vpop.f32.mrb[18].mxu1  ;;  %v1771_v12 = vpop.f32.mrb[23].mxu0 }
 0x153   : > { %v1390_v13 = vmax.f32 %v1376_v7, 0.0  ;;  %v1379_v14 = vadd.f32 %v1378_v11, %v1330_v3  ;;  %v1772_v15 = vadd.f32 %v1771_v12, %v1770_v10  ;;  %v1380_v16 = vpop.f32.mrb[19].mxu1  ;;  %v1335_v17 = vadd.f32 %v1769_v8, %v1286_v56 }
 0x155   : > { %v1629_v18 = vpack.c.bf16 %v1390_v13, %v1390_v13  ;;  %v1391_v19 = vmax.f32 %v1379_v14, 0.0  ;;  %v1338_v20 = vadd.f32 %v1772_v15, %v1289_v58 }
 0x157   : > { %1411 = vst.msk [vmem:[%s201_s7] sm:$0xf] %vm1410_vm1, %v1629_v18  ;;  %v1630_v21 = vpack.c.bf16 %v1391_v19, %v1391_v19 }
 0x158   : > { %v1383_v22 = vpop.f32.mrb[20].mxu1 }
 0x159   : > { %1412 = vst.msk [vmem:[%s201_s7 + $0x4] sm:$0xf] %vm1410_vm1, %v1630_v21  ;;  %v1384_v23 = vadd.f32 %v1383_v22, %v1335_v17  ;;  %v1385_v24 = vpop.f32.mrb[21].mxu1 }
 0x15a   : > { %v1386_v25 = vpop.f32.mrb[22].mxu1 }
 0x15b   : > { %v1392_v26 = vmax.f32 %v1384_v23, 0.0  ;;  %v1387_v27 = vadd.f32 %v1386_v25, %v1338_v20  ;;  %v1388_v28 = vpop.f32.mrb[23].mxu1 }
 0x15d   : > { %v1631_v29 = vpack.c.bf16 %v1392_v26, %v1392_v26  ;;  %v1393_v30 = vmax.f32 %v1387_v27, 0.0 }
 0x15f   : > { %1413 = vst.msk [vmem:[%s201_s7 + $0x8] sm:$0xf] %vm1410_vm1, %v1631_v29  ;;  %v1632_v31 = vpack.c.bf16 %v1393_v30, %v1393_v30 }
 0x161   : > { %1414 = vst.msk [vmem:[%s201_s7 + $0xc] sm:$0xf] %vm1410_vm1, %v1632_v31 }
 0x162 PF: > { %s13_s14 = sadd.s32 1, %s1949_s14   ;;  %s2207_s12 = smov %s1945_s13 }
 0x163   : > { %p10_p5 = scmp.ge.s32.totalorder %s13_s14, 4   ;;  %s2208_s13 = smov %s2210_s15 }
 0x165   :  { %12 = sbr.rel (!%p10_p5) target bundleno = 2 (0x2), region = 62 }

// kernel: segmnet_forward.17
= control target key start
LH: loop header
LB: loop body
LE: loop exit
PB: predicated region body
PF: predicated region fallthrough
CT: control target
= control target key end

     0   :  { %s846_s12 = smov 0   ;;  %s848_s13 = smov 0   ;;  %s936_s0 = inlined_call_operand.vmem [shape: bf16[16,288], index: 0, kind: input, shape index: {}]   ;;  %s937_s1 = inlined_call_operand.vmem [shape: bf16[2,288,256], index: 1, kind: input, shape index: {}]   ;;  %s938_s2 = inlined_call_operand.vmem [shape: f32[16,1], index: 2, kind: input, shape index: {}]   ;;  %s939_s3 = inlined_call_operand.vmem [shape: bf16[2,16,256], index: 3, kind: output, shape index: {}]  }
   0x1   :  { %s850_s14 = smov 0  }
   0x2 LB: > { %s25_s15 = sadd.s32 1, %s819_s13  ;;  %p657_p0 = scmp.ge.s32.totalorder %s823_s14, 1  ;;  %s823_s14 = sphi %s850_s14, %s13_s14   ;;  %s819_s13 = sphi %s848_s13, %s941_s13   ;;  %s815_s12 = sphi %s846_s12, %s940_s12  }
   0x3   : > { %p27_p1 = scmp.ge.s32.totalorder %s25_s15, 2  ;;  %p158_p2 = scmp.lt.s32.totalorder %s823_s14, 3 }
   0x5   : > { %s943_s15 = smov (%p27_p1, %s25_s15), 0  ;;  %p159_p3 = pnand %p657_p0, %p158_p2 }
   0x6   : > { %p191_p4 = scmp.lt.s32.totalorder (!%p159_p3), %s815_s12, 1  ;;  %v825_v0 = vmov (!%p159_p3), 0   ;;  %v799_v1 = vld [vmem:[%s936_s0 + $0x4] ss:$12 sps:$4 sm:$0xff] (!%p159_p3)   ;;  %v252_v3 = vld [vmem:[%s938_s2 + $0x8] sm:$0xff] (!%p159_p3)  ;;  %vm458_vm0 = vcmask (!%p159_p3), 261120  }
   0x7   : > { %162 = sbr.rel (%p159_p3) target bundleno = 307 (0x133), region = 32  ;;  %537 = vmatprep.mubr.bf16.mxu0 (!%p159_p3), %v825_v0  ;;  %742 = vset.pattern.permute.xlu0 (!%p159_p3), %v825_v0  ;;  %v251_v2 = vld [vmem:[%s938_s2] sm:$0xff] (!%p159_p3)  ;;  %v800_v23 = vld [vmem:[%s936_s0 + $0x8] ss:$12 sps:$4 sm:$0xff] (!%p159_p3)  }
   0x8   : > { %494 = vmatprep.mubr.bf16.mxu1 (!%p159_p3), %v799_v1  ;;  %255 = vperm.xlu0 (!%p159_p3), %742, %v251_v2   ;;  %v797_v41 = vld [vmem:[%s936_s0] ss:$12 sps:$4 sm:$0xff] (!%p159_p3)  }
   0xc   : > { %260 = vperm.xlu0 (!%p159_p3), %742, %v252_v3  }
   0xe   : > { %s945_s12 = smov (!%p191_p4, %s815_s12), 1 }
   0xf   : > { %s716_s20 = smul.u32 288, %s945_s12  ;;  %s705_s30 = sshll.u32 %s945_s12, 4 }
  0x10   : > { %s208_s6 = scalar_lea.vmem %s939_s3, %s705_s30 }
  0x11   : > { %s879_s25 = scalar_lea.vmem %s937_s1, %s716_s20 }
  0x12   : > { %v743_v4 = vld [vmem:[%s879_s25 + $0x4] ss:$8 sps:$4 sm:$0xff]   ;;  %v745_v5 = vld [vmem:[%s879_s25] ss:$8 sps:$4 sm:$0xff]   ;;  %v746_v6 = vld [vmem:[%s879_s25 + $0x14] ss:$8 sps:$4 sm:$0xff]  }
  0x13   : > { %462 = vmatprep.subr.bf16.mxu1 %v743_v4  ;;  %v748_v7 = vld [vmem:[%s879_s25 + $0x10] ss:$8 sps:$4 sm:$0xff]   ;;  %v749_v8 = vld [vmem:[%s879_s25 + $0x24] ss:$8 sps:$4 sm:$0xff]   ;;  %v751_v9 = vld [vmem:[%s879_s25 + $0x20] ss:$8 sps:$4 sm:$0xff]  }
  0x14   : > { %463 = vmatpush1.bf16.msra.mxu1 %v745_v5  ;;  %v752_v10 = vld [vmem:[%s879_s25 + $0x34] ss:$8 sps:$4 sm:$0xff]   ;;  %v754_v11 = vld [vmem:[%s879_s25 + $0x30] ss:$8 sps:$4 sm:$0xff]   ;;  %v755_v12 = vld [vmem:[%s879_s25 + $0x44] ss:$8 sps:$4 sm:$0xff]  }
  0x15   : > { %464 = vmatprep.subr.bf16.mxu1 %v746_v6  ;;  %v757_v13 = vld [vmem:[%s879_s25 + $0x40] ss:$8 sps:$4 sm:$0xff]   ;;  %v758_v14 = vld [vmem:[%s879_s25 + $0x54] ss:$8 sps:$4 sm:$0xff]   ;;  %v760_v15 = vld [vmem:[%s879_s25 + $0x50] ss:$8 sps:$4 sm:$0xff]  }
  0x16   : > { %v785_v16 = vld [vmem:[%s879_s25 + $0x104] ss:$8 sps:$4 sm:$0xff]   ;;  %v789_v18 = vld [vmem:[%s879_s25 + $0x100] ss:$8 sps:$4 sm:$0xff]   ;;  %v791_v19 = vld [vmem:[%s879_s25 + $0x114] ss:$8 sps:$4 sm:$0xff]  }
  0x17   : > { %v761_v17 = vld [vmem:[%s879_s25 + $0x64] ss:$8 sps:$4 sm:$0xff]   ;;  %505 = vmatprep.subr.bf16.mxu0 %v785_v16  ;;  %v763_v20 = vld [vmem:[%s879_s25 + $0x60] ss:$8 sps:$4 sm:$0xff]   ;;  %v795_v21 = vld [vmem:[%s879_s25 + $0x110] ss:$8 sps:$4 sm:$0xff]  }
  0x18   : > { %465 = vmatpush1.bf16.msra.mxu1 %v748_v7  ;;  %506 = vmatpush1.bf16.msra.mxu0 %v789_v18  ;;  %v764_v22 = vld [vmem:[%s879_s25 + $0x74] ss:$8 sps:$4 sm:$0xff]   ;;  %v766_v24 = vld [vmem:[%s879_s25 + $0x70] ss:$8 sps:$4 sm:$0xff]   ;;  %v767_v25 = vld [vmem:[%s879_s25 + $0x84] ss:$8 sps:$4 sm:$0xff]  }
  0x19   : > { %466 = vmatprep.subr.bf16.mxu1 %v749_v8  ;;  %507 = vmatprep.subr.bf16.mxu0 %v791_v19  ;;  %v769_v26 = vld [vmem:[%s879_s25 + $0x80] ss:$8 sps:$4 sm:$0xff]   ;;  %v770_v27 = vld [vmem:[%s879_s25 + $0x94] ss:$8 sps:$4 sm:$0xff]   ;;  %v772_v28 = vld [vmem:[%s879_s25 + $0x90] ss:$8 sps:$4 sm:$0xff]  }
  0x1a   : > { %v773_v29 = vld [vmem:[%s879_s25 + $0xa4] ss:$8 sps:$4 sm:$0xff]   ;;  %v775_v30 = vld [vmem:[%s879_s25 + $0xa0] ss:$8 sps:$4 sm:$0xff]   ;;  %v776_v31 = vld [vmem:[%s879_s25 + $0xb4] ss:$8 sps:$4 sm:$0xff]  }
  0x1b   : > { %v778_v32 = vld [vmem:[%s879_s25 + $0xb0] ss:$8 sps:$4 sm:$0xff]   ;;  %v779_v33 = vld [vmem:[%s879_s25 + $0xc4] ss:$8 sps:$4 sm:$0xff]   ;;  %v781_v34 = vld [vmem:[%s879_s25 + $0xc0] ss:$8 sps:$4 sm:$0xff]  }
  0x1c   : > { %467 = vmatpush1.bf16.msra.mxu1 %v751_v9  ;;  %508 = vmatpush1.bf16.msra.mxu0 %v795_v21  ;;  %v782_v35 = vld [vmem:[%s879_s25 + $0xd4] ss:$8 sps:$4 sm:$0xff]   ;;  %v784_v36 = vld [vmem:[%s879_s25 + $0xd0] ss:$8 sps:$4 sm:$0xff]   ;;  %v787_v37 = vld [vmem:[%s879_s25 + $0xe4] ss:$8 sps:$4 sm:$0xff]  }
  0x1d   : > { %468 = vmatprep.subr.bf16.mxu1 %v752_v10  ;;  %v790_v38 = vld [vmem:[%s879_s25 + $0xe0] ss:$8 sps:$4 sm:$0xff]   ;;  %v793_v39 = vld [vmem:[%s879_s25 + $0xf4] ss:$8 sps:$4 sm:$0xff]   ;;  %v796_v40 = vld [vmem:[%s879_s25 + $0xf0] ss:$8 sps:$4 sm:$0xff]  }
  0x1f   : > { %700 = vmatmul.mubr.msk.bf16.vlgmr.msra.gmra.mrb[0].mxu0 %vm458_vm0, %v800_v23 }
  0x20   : > { %469 = vmatpush1.bf16.msra.mxu1 %v754_v11 }
  0x21   : > { %470 = vmatprep.subr.bf16.mxu1 %v755_v12 }
  0x24   : > { %471 = vmatpush1.bf16.msra.mxu1 %v757_v13 }
  0x25   : > { %472 = vmatprep.subr.bf16.mxu1 %v758_v14 }
  0x28   : > { %473 = vmatpush1.bf16.msra.mxu1 %v760_v15 }
  0x29   : > { %474 = vmatprep.subr.bf16.mxu1 %v761_v17 }
  0x2c   : > { %475 = vmatpush1.bf16.msra.mxu1 %v763_v20 }
  0x2d   : > { %476 = vmatprep.subr.bf16.mxu1 %v764_v22 }
  0x30   : > { %477 = vmatpush1.bf16.msra.mxu1 %v766_v24 }
  0x31   : > { %478 = vmatprep.subr.bf16.mxu1 %v767_v25 }
  0x34   : > { %479 = vmatpush1.bf16.msra.mxu1 %v769_v26 }
  0x35   : > { %480 = vmatprep.subr.bf16.mxu1 %v770_v27 }
  0x38   : > { %481 = vmatpush1.bf16.msra.mxu1 %v772_v28 }
  0x39   : > { %482 = vmatprep.subr.bf16.mxu1 %v773_v29 }
  0x3c   : > { %483 = vmatpush1.bf16.msra.mxu1 %v775_v30 }
  0x3d   : > { %484 = vmatprep.subr.bf16.mxu1 %v776_v31 }
  0x40   : > { %485 = vmatpush1.bf16.msra.mxu1 %v778_v32 }
  0x41   : > { %486 = vmatprep.subr.bf16.mxu1 %v779_v33 }
  0x44   : > { %487 = vmatpush1.bf16.msra.mxu1 %v781_v34 }
  0x45   : > { %488 = vmatprep.subr.bf16.mxu1 %v782_v35 }
  0x48   : > { %489 = vmatpush1.bf16.msra.mxu1 %v784_v36 }
  0x49   : > { %490 = vmatprep.subr.bf16.mxu1 %v787_v37 }
  0x4c   : > { %491 = vmatpush1.bf16.msra.mxu1 %v790_v38 }
  0x4d   : > { %492 = vmatprep.subr.bf16.mxu1 %v793_v39 }
  0x50   : > { %493 = vmatpush1.bf16.msra.mxu1 %v796_v40 }
  0x53   : > { %495 = vmatmul.mubr.bf16.vlgmr.msra.gmra.mrb[0].mxu1 %v797_v41 }
  0x87   : > { %v256_v46 = vpop.permute.xlu0 %255 }
  0x8b   : > { %v261_v50 = vpop.permute.xlu0 %260 }
  0xf2   : > { %v539_v42 = vpop.f32.mrb[0].mxu0 }
  0xf3   : > { %v541_v43 = vpop.f32.mrb[1].mxu0 }
  0xf4   : > { %v543_v44 = vpop.f32.mrb[2].mxu0 }
  0xf5   : > { %v545_v45 = vpop.f32.mrb[3].mxu0 }
 0x126   : > { %v496_v47 = vpop.f32.mrb[0].mxu1 }
 0x127   : > { %v497_v48 = vadd.f32 %v496_v47, %v256_v46  ;;  %v498_v49 = vpop.f32.mrb[1].mxu1 }
 0x128   : > { %v499_v51 = vadd.f32 %v498_v49, %v256_v46  ;;  %v500_v52 = vpop.f32.mrb[2].mxu1 }
 0x129   : > { %v540_v53 = vadd.f32 %v539_v42, %v497_v48  ;;  %v501_v54 = vadd.f32 %v500_v52, %v261_v50  ;;  %v502_v55 = vpop.f32.mrb[3].mxu1 }
 0x12a   : > { %v542_v56 = vadd.f32 %v541_v43, %v499_v51  ;;  %v503_v57 = vadd.f32 %v502_v55, %v261_v50 }
 0x12b   : > { %v548_v58 = vmax.f32 %v540_v53, 0.0  ;;  %v544_v59 = vadd.f32 %v543_v44, %v501_v54 }
 0x12c   : > { %v549_v60 = vmax.f32 %v542_v56, 0.0  ;;  %v546_v61 = vadd.f32 %v545_v45, %v503_v57 }
 0x12d   : > { %v550_v62 = vmax.f32 %v544_v59, 0.0 }
 0x12e   : > { %v706_v63 = vpack.c.bf16 %v549_v60, %v548_v58  ;;  %v551_v0 = vmax.f32 %v546_v61, 0.0 }
 0x130   : > { %564 = vst [vmem:[%s208_s6] sm:$0xff] %v706_v63  ;;  %v707_v1 = vpack.c.bf16 %v551_v0, %v550_v62 }
 0x132   : > { %565 = vst [vmem:[%s208_s6 + $0x8] sm:$0xff] %v707_v1 }
 0x133 PF: > { %s13_s14 = sadd.s32 1, %s823_s14   ;;  %s940_s12 = smov %s819_s13 }
 0x134   : > { %p10_p5 = scmp.ge.s32.totalorder %s13_s14, 4   ;;  %s941_s13 = smov %s943_s15 }
 0x136   :  { %12 = sbr.rel (!%p10_p5) target bundleno = 2 (0x2), region = 62 }

// kernel: segmnet_forward.18
= control target key start
LH: loop header
LB: loop body
LE: loop exit
PB: predicated region body
PF: predicated region fallthrough
CT: control target
= control target key end

     0   :  { %s1376_s12 = smov 0   ;;  %s1378_s13 = smov 0   ;;  %s1529_s0 = inlined_call_operand.vmem [shape: bf16[16,720], index: 0, kind: input, shape index: {}]   ;;  %s1530_s1 = inlined_call_operand.vmem [shape: bf16[2,720,256], index: 1, kind: input, shape index: {}]   ;;  %s1531_s2 = inlined_call_operand.vmem [shape: f32[16,1], index: 2, kind: input, shape index: {}]   ;;  %s1532_s3 = inlined_call_operand.vmem [shape: bf16[2,16,256], index: 3, kind: output, shape index: {}]  }
   0x1   :  { %s1380_s14 = smov 0  }
   0x2 LB: > { %s25_s15 = sadd.s32 1, %s1349_s13  ;;  %p1040_p0 = scmp.ge.s32.totalorder %s1353_s14, 1  ;;  %s1353_s14 = sphi %s1380_s14, %s13_s14   ;;  %s1349_s13 = sphi %s1378_s13, %s1534_s13   ;;  %s1345_s12 = sphi %s1376_s12, %s1533_s12  }
   0x3   : > { %p27_p1 = scmp.ge.s32.totalorder %s25_s15, 2  ;;  %p158_p2 = scmp.lt.s32.totalorder %s1353_s14, 3 }
   0x5   : > { %s1536_s15 = smov (%p27_p1, %s25_s15), 0  ;;  %p159_p3 = pnand %p1040_p0, %p158_p2 }
   0x6   : > { %p191_p4 = scmp.lt.s32.totalorder (!%p159_p3), %s1345_s12, 1  ;;  %v1252_v0 = vld [vmem:[%s1529_s0 + $0xc] ss:$24 sps:$4 sm:$0xff] (!%p159_p3)   ;;  %v1355_v2 = vmov (!%p159_p3), 0   ;;  %v1250_v63 = vld [vmem:[%s1529_s0 + $0x8] ss:$24 sps:$4 sm:$0xff] (!%p159_p3)  }
   0x7   : > { %162 = sbr.rel (%p159_p3) target bundleno = 357 (0x165), region = 32  ;;  %v1324_v1 = vld [vmem:[%s1529_s0 + $0x4] ss:$24 sps:$4 sm:$0xff] (!%p159_p3)   ;;  %1186 = vset.pattern.permute.xlu0 (!%p159_p3), %v1355_v2  ;;  %877 = vmatprep.mubr.bf16.mxu0 (!%p159_p3), %v1252_v0  ;;  %v308_v4 = vld [vmem:[%s1531_s2 + $0x8] sm:$0xff] (!%p159_p3)  ;;  %vm798_vm0 = vcmask (!%p159_p3), 654336  }
   0x8   : > { %834 = vmatprep.mubr.bf16.mxu1 (!%p159_p3), %v1324_v1  ;;  %v307_v3 = vld [vmem:[%s1531_s2] sm:$0xff] (!%p159_p3) }
   0x9   : > { %311 = vperm.xlu0 (!%p159_p3), %1186, %v307_v3  }
   0xd   : > { %316 = vperm.xlu0 (!%p159_p3), %1186, %v308_v4   ;;  %v1328_v4 = vld [vmem:[%s1529_s0 + $0x14] ss:$24 sps:$4 sm:$0xff] (!%p159_p3)  }
   0xe   : > { %s1538_s12 = smov (!%p191_p4, %s1345_s12), 1 }
   0xf   : > { %s1160_s20 = smul.u32 720, %s1538_s12  ;;  %s1145_s9 = sshll.u32 %s1538_s12, 4 }
  0x10   : > { %s208_s16 = scalar_lea.vmem %s1532_s3, %s1145_s9 }
  0x11   : > { %s1409_s25 = scalar_lea.vmem %s1530_s1, %s1160_s20 }
  0x12   : > { %v1187_v5 = vld [vmem:[%s1409_s25 + $0x104] ss:$8 sps:$4 sm:$0xff]   ;;  %v1189_v6 = vld [vmem:[%s1409_s25 + $0x100] ss:$8 sps:$4 sm:$0xff]   ;;  %v1190_v7 = vld [vmem:[%s1409_s25 + $0x114] ss:$8 sps:$4 sm:$0xff]  }
  0x13   : > { %845 = vmatprep.subr.bf16.mxu0 %v1187_v5  ;;  %v1192_v8 = vld [vmem:[%s1409_s25 + $0x110] ss:$8 sps:$4 sm:$0xff]   ;;  %v1193_v9 = vld [vmem:[%s1409_s25 + $0x124] ss:$8 sps:$4 sm:$0xff]   ;;  %v1195_v10 = vld [vmem:[%s1409_s25 + $0x120] ss:$8 sps:$4 sm:$0xff]  }
  0x14   : > { %846 = vmatpush1.bf16.msra.mxu0 %v1189_v6  ;;  %v1196_v11 = vld [vmem:[%s1409_s25 + $0x134] ss:$8 sps:$4 sm:$0xff]   ;;  %v1198_v12 = vld [vmem:[%s1409_s25 + $0x130] ss:$8 sps:$4 sm:$0xff]   ;;  %v1199_v13 = vld [vmem:[%s1409_s25 + $0x144] ss:$8 sps:$4 sm:$0xff]  }
  0x15   : > { %847 = vmatprep.subr.bf16.mxu0 %v1190_v7  ;;  %v1201_v14 = vld [vmem:[%s1409_s25 + $0x140] ss:$8 sps:$4 sm:$0xff]   ;;  %v1202_v15 = vld [vmem:[%s1409_s25 + $0x154] ss:$8 sps:$4 sm:$0xff]   ;;  %v1223_v16 = vld [vmem:[%s1409_s25 + $0x4] ss:$8 sps:$4 sm:$0xff]  }
  0x16   : > { %v1225_v17 = vld [vmem:[%s1409_s25] ss:$8 sps:$4 sm:$0xff]   ;;  %v1204_v18 = vld [vmem:[%s1409_s25 + $0x150] ss:$8 sps:$4 sm:$0xff]   ;;  %802 = vmatprep.subr.bf16.mxu1 %v1223_v16  ;;  %v1229_v19 = vld [vmem:[%s1409_s25 + $0x14] ss:$8 sps:$4 sm:$0xff]  }
  0x17   : > { %803 = vmatpush1.bf16.msra.mxu1 %v1225_v17  ;;  %v1231_v20 = vld [vmem:[%s1409_s25 + $0x10] ss:$8 sps:$4 sm:$0xff]   ;;  %v1205_v21 = vld [vmem:[%s1409_s25 + $0x164] ss:$8 sps:$4 sm:$0xff]   ;;  %v1207_v22 = vld [vmem:[%s1409_s25 + $0x160] ss:$8 sps:$4 sm:$0xff]  }
  0x18   : > { %848 = vmatpush1.bf16.msra.mxu0 %v1192_v8  ;;  %804 = vmatprep.subr.bf16.mxu1 %v1229_v19  ;;  %v1235_v23 = vld [vmem:[%s1409_s25 + $0x24] ss:$8 sps:$4 sm:$0xff]   ;;  %v1208_v24 = vld [vmem:[%s1409_s25 + $0x174] ss:$8 sps:$4 sm:$0xff]   ;;  %v1237_v25 = vld [vmem:[%s1409_s25 + $0x20] ss:$8 sps:$4 sm:$0xff]  }
  0x19   : > { %849 = vmatprep.subr.bf16.mxu0 %v1193_v9  ;;  %v1241_v26 = vld [vmem:[%s1409_s25 + $0x34] ss:$8 sps:$4 sm:$0xff]   ;;  %v1210_v27 = vld [vmem:[%s1409_s25 + $0x170] ss:$8 sps:$4 sm:$0xff]   ;;  %v1211_v28 = vld [vmem:[%s1409_s25 + $0x184] ss:$8 sps:$4 sm:$0xff]  }
  0x1a   : > { %v1243_v29 = vld [vmem:[%s1409_s25 + $0x30] ss:$8 sps:$4 sm:$0xff]   ;;  %v1247_v30 = vld [vmem:[%s1409_s25 + $0x44] ss:$8 sps:$4 sm:$0xff]   ;;  %v1213_v31 = vld [vmem:[%s1409_s25 + $0x180] ss:$8 sps:$4 sm:$0xff]  }
  0x1b   : > { %805 = vmatpush1.bf16.msra.mxu1 %v1231_v20  ;;  %v1214_v32 = vld [vmem:[%s1409_s25 + $0x194] ss:$8 sps:$4 sm:$0xff]   ;;  %v1249_v33 = vld [vmem:[%s1409_s25 + $0x40] ss:$8 sps:$4 sm:$0xff]   ;;  %v1216_v35 = vld [vmem:[%s1409_s25 + $0x190] ss:$8 sps:$4 sm:$0xff]  }
  0x1c   : > { %850 = vmatpush1.bf16.msra.mxu0 %v1195_v10  ;;  %806 = vmatprep.subr.bf16.mxu1 %v1235_v23  ;;  %v1256_v34 = vld [vmem:[%s1409_s25 + $0x54] ss:$8 sps:$4 sm:$0xff]   ;;  %v1217_v36 = vld [vmem:[%s1409_s25 + $0x1a4] ss:$8 sps:$4 sm:$0xff]   ;;  %v1258_v37 = vld [vmem:[%s1409_s25 + $0x50] ss:$8 sps:$4 sm:$0xff]  }
  0x1d   : > { %851 = vmatprep.subr.bf16.mxu0 %v1196_v11  ;;  %v1262_v38 = vld [vmem:[%s1409_s25 + $0x64] ss:$8 sps:$4 sm:$0xff]   ;;  %v1219_v39 = vld [vmem:[%s1409_s25 + $0x1a0] ss:$8 sps:$4 sm:$0xff]   ;;  %v1220_v40 = vld [vmem:[%s1409_s25 + $0x1b4] ss:$8 sps:$4 sm:$0xff]  }
  0x1e   : > { %v1264_v41 = vld [vmem:[%s1409_s25 + $0x60] ss:$8 sps:$4 sm:$0xff]   ;;  %v1268_v42 = vld [vmem:[%s1409_s25 + $0x74] ss:$8 sps:$4 sm:$0xff]   ;;  %v1222_v43 = vld [vmem:[%s1409_s25 + $0x1b0] ss:$8 sps:$4 sm:$0xff]  }
  0x1f   : > { %807 = vmatpush1.bf16.msra.mxu1 %v1237_v25  ;;  %v1226_v44 = vld [vmem:[%s1409_s25 + $0x1c4] ss:$8 sps:$4 sm:$0xff]   ;;  %v1270_v45 = vld [vmem:[%s1409_s25 + $0x70] ss:$8 sps:$4 sm:$0xff]   ;;  %v1228_v47 = vld [vmem:[%s1409_s25 + $0x1c0] ss:$8 sps:$4 sm:$0xff]  }
  0x20   : > { %852 = vmatpush1.bf16.msra.mxu0 %v1198_v12  ;;  %808 = vmatprep.subr.bf16.mxu1 %v1241_v26  ;;  %v1274_v46 = vld [vmem:[%s1409_s25 + $0x84] ss:$8 sps:$4 sm:$0xff]   ;;  %v1232_v48 = vld [vmem:[%s1409_s25 + $0x1d4] ss:$8 sps:$4 sm:$0xff]   ;;  %v1276_v49 = vld [vmem:[%s1409_s25 + $0x80] ss:$8 sps:$4 sm:$0xff]  }
  0x21   : > { %853 = vmatprep.subr.bf16.mxu0 %v1199_v13  ;;  %v1280_v50 = vld [vmem:[%s1409_s25 + $0x94] ss:$8 sps:$4 sm:$0xff]   ;;  %v1234_v51 = vld [vmem:[%s1409_s25 + $0x1d0] ss:$8 sps:$4 sm:$0xff]   ;;  %v1238_v52 = vld [vmem:[%s1409_s25 + $0x1e4] ss:$8 sps:$4 sm:$0xff]  }
  0x22   : > { %v1282_v53 = vld [vmem:[%s1409_s25 + $0x90] ss:$8 sps:$4 sm:$0xff]   ;;  %v1286_v54 = vld [vmem:[%s1409_s25 + $0xa4] ss:$8 sps:$4 sm:$0xff]   ;;  %v1240_v55 = vld [vmem:[%s1409_s25 + $0x1e0] ss:$8 sps:$4 sm:$0xff]  }
  0x23   : > { %809 = vmatpush1.bf16.msra.mxu1 %v1243_v29  ;;  %v1244_v56 = vld [vmem:[%s1409_s25 + $0x1f4] ss:$8 sps:$4 sm:$0xff]   ;;  %v1288_v57 = vld [vmem:[%s1409_s25 + $0xa0] ss:$8 sps:$4 sm:$0xff]   ;;  %v1246_v59 = vld [vmem:[%s1409_s25 + $0x1f0] ss:$8 sps:$4 sm:$0xff]  }
  0x24   : > { %854 = vmatpush1.bf16.msra.mxu0 %v1201_v14  ;;  %810 = vmatprep.subr.bf16.mxu1 %v1247_v30  ;;  %v1292_v58 = vld [vmem:[%s1409_s25 + $0xb4] ss:$8 sps:$4 sm:$0xff]   ;;  %v1294_v60 = vld [vmem:[%s1409_s25 + $0xb0] ss:$8 sps:$4 sm:$0xff]   ;;  %v1255_v61 = vld [vmem:[%s1409_s25 + $0x204] ss:$8 sps:$4 sm:$0xff]  }
  0x25   : > { %855 = vmatprep.subr.bf16.mxu0 %v1202_v15  ;;  %v1298_v62 = vld [vmem:[%s1409_s25 + $0xc4] ss:$8 sps:$4 sm:$0xff]   ;;  %v1253_v0 = vld [vmem:[%s1409_s25 + $0x200] ss:$8 sps:$4 sm:$0xff]   ;;  %v1261_v2 = vld [vmem:[%s1409_s25 + $0x214] ss:$8 sps:$4 sm:$0xff]  }
  0x26   : > { %v1300_v1 = vld [vmem:[%s1409_s25 + $0xc0] ss:$8 sps:$4 sm:$0xff]   ;;  %v1304_v3 = vld [vmem:[%s1409_s25 + $0xd4] ss:$8 sps:$4 sm:$0xff]   ;;  %v1259_v5 = vld [vmem:[%s1409_s25 + $0x210] ss:$8 sps:$4 sm:$0xff]  }
  0x27   : > { %811 = vmatpush1.bf16.msra.mxu1 %v1249_v33  ;;  %v1306_v6 = vld [vmem:[%s1409_s25 + $0xd0] ss:$8 sps:$4 sm:$0xff]   ;;  %v1267_v7 = vld [vmem:[%s1409_s25 + $0x224] ss:$8 sps:$4 sm:$0xff]   ;;  %v1265_v9 = vld [vmem:[%s1409_s25 + $0x220] ss:$8 sps:$4 sm:$0xff]  }
  0x28   : > { %856 = vmatpush1.bf16.msra.mxu0 %v1204_v18  ;;  %812 = vmatprep.subr.bf16.mxu1 %v1256_v34  ;;  %v1310_v8 = vld [vmem:[%s1409_s25 + $0xe4] ss:$8 sps:$4 sm:$0xff]   ;;  %v1312_v10 = vld [vmem:[%s1409_s25 + $0xe0] ss:$8 sps:$4 sm:$0xff]   ;;  %v1273_v11 = vld [vmem:[%s1409_s25 + $0x234] ss:$8 sps:$4 sm:$0xff]  }
  0x29   : > { %857 = vmatprep.subr.bf16.mxu0 %v1205_v21  ;;  %v1316_v12 = vld [vmem:[%s1409_s25 + $0xf4] ss:$8 sps:$4 sm:$0xff]   ;;  %v1271_v13 = vld [vmem:[%s1409_s25 + $0x230] ss:$8 sps:$4 sm:$0xff]   ;;  %v1279_v15 = vld [vmem:[%s1409_s25 + $0x244] ss:$8 sps:$4 sm:$0xff]  }
  0x2a   : > { %v1318_v14 = vld [vmem:[%s1409_s25 + $0xf0] ss:$8 sps:$4 sm:$0xff]   ;;  %v1277_v17 = vld [vmem:[%s1409_s25 + $0x240] ss:$8 sps:$4 sm:$0xff]   ;;  %v1285_v18 = vld [vmem:[%s1409_s25 + $0x254] ss:$8 sps:$4 sm:$0xff]  }
  0x2b   : > { %813 = vmatpush1.bf16.msra.mxu1 %v1258_v37  ;;  %v1322_v16 = vld [vmem:[%s1529_s0] ss:$24 sps:$4 sm:$0xff]   ;;  %v1291_v20 = vld [vmem:[%s1409_s25 + $0x264] ss:$8 sps:$4 sm:$0xff]   ;;  %v1309_v26 = vld [vmem:[%s1409_s25 + $0x294] ss:$8 sps:$4 sm:$0xff]  }
  0x2c   : > { %858 = vmatpush1.bf16.msra.mxu0 %v1207_v22  ;;  %814 = vmatprep.subr.bf16.mxu1 %v1262_v38  ;;  %v1283_v19 = vld [vmem:[%s1409_s25 + $0x250] ss:$8 sps:$4 sm:$0xff]   ;;  %v1289_v21 = vld [vmem:[%s1409_s25 + $0x260] ss:$8 sps:$4 sm:$0xff]   ;;  %v1297_v22 = vld [vmem:[%s1409_s25 + $0x274] ss:$8 sps:$4 sm:$0xff]  }
  0x2d   : > { %859 = vmatprep.subr.bf16.mxu0 %v1208_v24  ;;  %v1295_v23 = vld [vmem:[%s1409_s25 + $0x270] ss:$8 sps:$4 sm:$0xff]   ;;  %v1303_v24 = vld [vmem:[%s1409_s25 + $0x284] ss:$8 sps:$4 sm:$0xff]   ;;  %v1301_v25 = vld [vmem:[%s1409_s25 + $0x280] ss:$8 sps:$4 sm:$0xff]  }
  0x2e   : > { %v1313_v29 = vld [vmem:[%s1409_s25 + $0x2a0] ss:$8 sps:$4 sm:$0xff]   ;;  %v1321_v30 = vld [vmem:[%s1409_s25 + $0x2b4] ss:$8 sps:$4 sm:$0xff]  }
  0x2f   : > { %815 = vmatpush1.bf16.msra.mxu1 %v1264_v41  ;;  %v1325_v33 = vld [vmem:[%s1409_s25 + $0x2c0] ss:$8 sps:$4 sm:$0xff]  }
  0x30   : > { %860 = vmatpush1.bf16.msra.mxu0 %v1210_v27  ;;  %816 = vmatprep.subr.bf16.mxu1 %v1268_v42  ;;  %v1307_v27 = vld [vmem:[%s1409_s25 + $0x290] ss:$8 sps:$4 sm:$0xff]  }
  0x31   : > { %861 = vmatprep.subr.bf16.mxu0 %v1211_v28  ;;  %v1315_v28 = vld [vmem:[%s1409_s25 + $0x2a4] ss:$8 sps:$4 sm:$0xff]   ;;  %v1330_v34 = vld [vmem:[%s1529_s0 + $0x10] ss:$24 sps:$4 sm:$0xff]  }
  0x33   : > { %817 = vmatpush1.bf16.msra.mxu1 %v1270_v45 }
  0x34   : > { %862 = vmatpush1.bf16.msra.mxu0 %v1213_v31  ;;  %818 = vmatprep.subr.bf16.mxu1 %v1274_v46  ;;  %v1319_v31 = vld [vmem:[%s1409_s25 + $0x2b0] ss:$8 sps:$4 sm:$0xff]  }
  0x35   : > { %863 = vmatprep.subr.bf16.mxu0 %v1214_v32  ;;  %v1327_v32 = vld [vmem:[%s1409_s25 + $0x2c4] ss:$8 sps:$4 sm:$0xff]  }
  0x37   : > { %819 = vmatpush1.bf16.msra.mxu1 %v1276_v49 }
  0x38   : > { %864 = vmatpush1.bf16.msra.mxu0 %v1216_v35  ;;  %820 = vmatprep.subr.bf16.mxu1 %v1280_v50 }
  0x39   : > { %865 = vmatprep.subr.bf16.mxu0 %v1217_v36 }
  0x3b   : > { %821 = vmatpush1.bf16.msra.mxu1 %v1282_v53 }
  0x3c   : > { %866 = vmatpush1.bf16.msra.mxu0 %v1219_v39  ;;  %822 = vmatprep.subr.bf16.mxu1 %v1286_v54 }
  0x3d   : > { %867 = vmatprep.subr.bf16.mxu0 %v1220_v40 }
  0x3f   : > { %823 = vmatpush1.bf16.msra.mxu1 %v1288_v57 }
  0x40   : > { %868 = vmatpush1.bf16.msra.mxu0 %v1222_v43  ;;  %824 = vmatprep.subr.bf16.mxu1 %v1292_v58 }
  0x41   : > { %869 = vmatprep.subr.bf16.mxu0 %v1226_v44 }
  0x43   : > { %825 = vmatpush1.bf16.msra.mxu1 %v1294_v60 }
  0x44   : > { %870 = vmatpush1.bf16.msra.mxu0 %v1228_v47  ;;  %826 = vmatprep.subr.bf16.mxu1 %v1298_v62 }
  0x45   : > { %871 = vmatprep.subr.bf16.mxu0 %v1232_v48 }
  0x47   : > { %827 = vmatpush1.bf16.msra.mxu1 %v1300_v1 }
  0x48   : > { %872 = vmatpush1.bf16.msra.mxu0 %v1234_v51  ;;  %828 = vmatprep.subr.bf16.mxu1 %v1304_v3 }
  0x49   : > { %873 = vmatprep.subr.bf16.mxu0 %v1238_v52 }
  0x4b   : > { %829 = vmatpush1.bf16.msra.mxu1 %v1306_v6 }
  0x4c   : > { %874 = vmatpush1.bf16.msra.mxu0 %v1240_v55  ;;  %830 = vmatprep.subr.bf16.mxu1 %v1310_v8 }
  0x4d   : > { %875 = vmatprep.subr.bf16.mxu0 %v1244_v56 }
  0x4f   : > { %831 = vmatpush1.bf16.msra.mxu1 %v1312_v10 }
  0x50   : > { %876 = vmatpush1.bf16.msra.mxu0 %v1246_v59  ;;  %832 = vmatprep.subr.bf16.mxu1 %v1316_v12 }
  0x51   : > { %888 = vmatprep.subr.bf16.mxu0 %v1255_v61 }
  0x53   : > { %878 = vmatmul.mubr.bf16.vlgmr.msra.gmra.mrb[0].mxu0 %v1250_v63  ;;  %833 = vmatpush1.bf16.msra.mxu1 %v1318_v14 }
  0x54   : > { %889 = vmatpush1.bf16.msra.mxu0 %v1253_v0  ;;  %1140 = vmatprep.mubr.msk.bf16.mxu0 %vm798_vm0, %v1328_v4 }
  0x55   : > { %890 = vmatprep.subr.bf16.mxu0 %v1261_v2 }
  0x56   : > { %835 = vmatmul.mubr.bf16.vlgmr.msra.gmra.mrb[0].mxu1 %v1322_v16 }
  0x58   : > { %891 = vmatpush1.bf16.msra.mxu0 %v1259_v5 }
  0x59   : > { %892 = vmatprep.subr.bf16.mxu0 %v1267_v7 }
  0x5c   : > { %893 = vmatpush1.bf16.msra.mxu0 %v1265_v9 }
  0x5d   : > { %894 = vmatprep.subr.bf16.mxu0 %v1273_v11 }
  0x60   : > { %895 = vmatpush1.bf16.msra.mxu0 %v1271_v13 }
  0x61   : > { %896 = vmatprep.subr.bf16.mxu0 %v1279_v15 }
  0x64   : > { %897 = vmatpush1.bf16.msra.mxu0 %v1277_v17 }
  0x65   : > { %898 = vmatprep.subr.bf16.mxu0 %v1285_v18 }
  0x68   : > { %899 = vmatpush1.bf16.msra.mxu0 %v1283_v19 }
  0x69   : > { %900 = vmatprep.subr.bf16.mxu0 %v1291_v20 }
  0x6c   : > { %901 = vmatpush1.bf16.msra.mxu0 %v1289_v21 }
  0x6d   : > { %902 = vmatprep.subr.bf16.mxu0 %v1297_v22 }
  0x70   : > { %903 = vmatpush1.bf16.msra.mxu0 %v1295_v23 }
  0x71   : > { %904 = vmatprep.subr.bf16.mxu0 %v1303_v24 }
  0x74   : > { %905 = vmatpush1.bf16.msra.mxu0 %v1301_v25 }
  0x75   : > { %906 = vmatprep.subr.bf16.mxu0 %v1309_v26 }
  0x78   : > { %907 = vmatpush1.bf16.msra.mxu0 %v1307_v27 }
  0x79   : > { %908 = vmatprep.subr.bf16.mxu0 %v1315_v28 }
  0x7c   : > { %909 = vmatpush1.bf16.msra.mxu0 %v1313_v29 }
  0x7d   : > { %910 = vmatprep.subr.bf16.mxu0 %v1321_v30 }
  0x80   : > { %911 = vmatpush1.bf16.msra.mxu0 %v1319_v31 }
  0x81   : > { %912 = vmatprep.subr.bf16.mxu0 %v1327_v32 }
  0x84   : > { %913 = vmatpush1.bf16.msra.mxu0 %v1325_v33 }
  0x87   : > { %921 = vmatmul.mubr.bf16.vlgmr.msra.gmra.mrb[0].mxu0 %v1330_v34 }
  0x88   : > { %v312_v39 = vpop.permute.xlu0 %311 }
  0x8c   : > { %v317_v41 = vpop.permute.xlu0 %316 }
 0x129   : > { %v836_v35 = vpop.f32.mrb[0].mxu1 }
 0x12a   : > { %v838_v36 = vpop.f32.mrb[1].mxu1  ;;  %v837_v40 = vadd.f32 %v836_v35, %v312_v39 }
 0x12b   : > { %v840_v37 = vpop.f32.mrb[2].mxu1  ;;  %v839_v42 = vadd.f32 %v838_v36, %v312_v39 }
 0x12c   : > { %v842_v38 = vpop.f32.mrb[3].mxu1  ;;  %v841_v44 = vadd.f32 %v840_v37, %v317_v41 }
 0x12d   : > { %v843_v47 = vadd.f32 %v842_v38, %v317_v41 }
 0x15a   : > { %v922_v43 = vpop.f32.mrb[0].mxu0 }
 0x15b   : > { %v1149_v45 = vadd.f32 %v922_v43, %v837_v40  ;;  %v924_v46 = vpop.f32.mrb[1].mxu0 }
 0x15c   : > { %v1151_v48 = vadd.f32 %v924_v46, %v839_v42  ;;  %v926_v49 = vpop.f32.mrb[2].mxu0 }
 0x15d   : > { %v931_v50 = vmax.f32 %v1149_v45, 0.0  ;;  %v1153_v51 = vadd.f32 %v926_v49, %v841_v44  ;;  %v928_v52 = vpop.f32.mrb[3].mxu0 }
 0x15e   : > { %v932_v53 = vmax.f32 %v1151_v48, 0.0  ;;  %v1155_v54 = vadd.f32 %v928_v52, %v843_v47 }
 0x15f   : > { %v933_v55 = vmax.f32 %v1153_v51, 0.0 }
 0x160   : > { %v1146_v56 = vpack.c.bf16 %v932_v53, %v931_v50  ;;  %v934_v57 = vmax.f32 %v1155_v54, 0.0 }
 0x162   : > { %947 = vst [vmem:[%s208_s16] sm:$0xff] %v1146_v56  ;;  %v1147_v58 = vpack.c.bf16 %v934_v57, %v933_v55 }
 0x164   : > { %948 = vst [vmem:[%s208_s16 + $0x8] sm:$0xff] %v1147_v58 }
 0x165 PF: > { %s13_s14 = sadd.s32 1, %s1353_s14   ;;  %s1533_s12 = smov %s1349_s13 }
 0x166   : > { %p10_p5 = scmp.ge.s32.totalorder %s13_s14, 4   ;;  %s1534_s13 = smov %s1536_s15 }
 0x168   :  { %12 = sbr.rel (!%p10_p5) target bundleno = 2 (0x2), region = 62 }

// kernel: segmnet_forward.19
= control target key start
LH: loop header
LB: loop body
LE: loop exit
PB: predicated region body
PF: predicated region fallthrough
CT: control target
= control target key end

     0   :  { %s1143_s12 = smov 0   ;;  %s1145_s13 = smov 0   ;;  %s1278_s0 = inlined_call_operand.vmem [shape: bf16[4,144], index: 0, kind: input, shape index: {}]   ;;  %s1279_s1 = inlined_call_operand.vmem [shape: bf16[2,144,1024], index: 1, kind: input, shape index: {}]   ;;  %s1280_s2 = inlined_call_operand.vmem [shape: f32[4,1], index: 2, kind: input, shape index: {}]   ;;  %s1281_s3 = inlined_call_operand.vmem [shape: bf16[2,4,1024], index: 3, kind: output, shape index: {}]  }
   0x1   :  { %s1147_s14 = smov 0  }
   0x2 LB: > { %s25_s15 = sadd.s32 1, %s1115_s13  ;;  %p981_p0 = scmp.ge.s32.totalorder %s1119_s14, 1  ;;  %s1119_s14 = sphi %s1147_s14, %s13_s14   ;;  %s1115_s13 = sphi %s1145_s13, %s1283_s13   ;;  %s1111_s12 = sphi %s1143_s12, %s1282_s12  }
   0x3   : > { %p27_p1 = scmp.ge.s32.totalorder %s25_s15, 2  ;;  %p158_p2 = scmp.lt.s32.totalorder %s1119_s14, 3 }
   0x5   : > { %s1285_s15 = smov (%p27_p1, %s25_s15), 0  ;;  %p159_p3 = pnand %p981_p0, %p158_p2 }
   0x6   : > { %p191_p4 = scmp.lt.s32.totalorder (!%p159_p3), %s1111_s12, 1  ;;  %v1164_v0 = vld.sshfl [vmem:[%s1278_s0] sm:$0x33 pattern:$0x76325410] (!%p159_p3)  ;;  %vm660_vm0 = vcmask (!%p159_p3), 130048  }
   0x7   : > { %162 = sbr.rel (%p159_p3) target bundleno = 318 (0x13e), region = 32  ;;  %v1168_v1 = vcombine.high (!%p159_p3), %v1164_v0, %v1164_v0  ;;  %v284_v2 = vld [vmem:[%s1280_s2] sm:$0xf] (!%p159_p3)  ;;  %v1121_v3 = vmov (!%p159_p3), 0  }
   0x8   : > { %1096 = vset.pattern.permute.xlu0 (!%p159_p3), %v1121_v3 }
   0x9   : > { %1058 = vmatprep.mubr.msk.bf16.mxu0 (!%p159_p3), %vm660_vm0, %v1168_v1  ;;  %1059 = vmatprep.mubr.msk.bf16.mxu1 (!%p159_p3), %vm660_vm0, %v1168_v1 }
   0xa   : > { %287 = vperm.xlu0 (!%p159_p3), %1096, %v284_v2  }
   0xe   : > { %s1287_s12 = smov (!%p191_p4, %s1111_s12), 1 }
   0xf   : > { %s1069_s20 = smul.u32 576, %s1287_s12  ;;  %s1068_s24 = sshll.u32 %s1287_s12, 4 }
  0x10   : > { %s208_s27 = scalar_lea.vmem %s1281_s3, %s1068_s24 }
  0x11   : > { %s1183_s23 = scalar_lea.vmem %s1279_s1, %s1069_s20 }
  0x12   : > { %v212_v4 = vld [vmem:[%s1183_s23] sm:$0xff]  ;;  %v213_v6 = vld [vmem:[%s1183_s23 + $0x8] sm:$0xff] }
  0x13   : > { %v216_v5 = vld [vmem:[%s1183_s23 + $0x20] sm:$0xff]  ;;  %v217_v8 = vld [vmem:[%s1183_s23 + $0x28] sm:$0xff] }
  0x14   : > { %v987_v7 = vcombine.high %v212_v4, %v216_v5  ;;  %v986_v9 = vcombine.low %v212_v4, %v216_v5  ;;  %v220_v10 = vld [vmem:[%s1183_s23 + $0x40] sm:$0xff]  ;;  %v989_v12 = vcombine.high %v213_v6, %v217_v8  ;;  %v988_v13 = vcombine.low %v213_v6, %v217_v8  ;;  %v221_v15 = vld [vmem:[%s1183_s23 + $0x48] sm:$0xff] }
  0x15   : > { %v224_v11 = vld [vmem:[%s1183_s23 + $0x60] sm:$0xff]  ;;  %v225_v16 = vld [vmem:[%s1183_s23 + $0x68] sm:$0xff] }
  0x16   : > { %v995_v14 = vcombine.high %v220_v10, %v224_v11  ;;  %v228_v17 = vld [vmem:[%s1183_s23 + $0x80] sm:$0xff]  ;;  %664 = vmatprep.subr.bf16.mxu0 %v987_v7  ;;  %v997_v18 = vcombine.high %v221_v15, %v225_v16  ;;  %v229_v20 = vld [vmem:[%s1183_s23 + $0x88] sm:$0xff]  ;;  %705 = vmatprep.subr.bf16.mxu1 %v989_v12  ;;  %v994_v22 = vcombine.low %v220_v10, %v224_v11  ;;  %v214_v12 = vld [vmem:[%s1183_s23 + $0x10] sm:$0xff] }
  0x17   : > { %v232_v19 = vld [vmem:[%s1183_s23 + $0xa0] sm:$0xff]  ;;  %v233_v21 = vld [vmem:[%s1183_s23 + $0xa8] sm:$0xff]  ;;  %665 = vmatpush1.bf16.msra.mxu0 %v986_v9  ;;  %706 = vmatpush1.bf16.msra.mxu1 %v988_v13  ;;  %v996_v23 = vcombine.low %v221_v15, %v225_v16  ;;  %v218_v13 = vld [vmem:[%s1183_s23 + $0x30] sm:$0xff] }
  0x18   : > { %666 = vmatprep.subr.bf16.mxu0 %v995_v14  ;;  %v1003_v24 = vcombine.high %v228_v17, %v232_v19  ;;  %707 = vmatprep.subr.bf16.mxu1 %v997_v18  ;;  %v1005_v25 = vcombine.high %v229_v20, %v233_v21  ;;  %v236_v26 = vld [vmem:[%s1183_s23 + $0xc0] sm:$0xff]  ;;  %v237_v28 = vld [vmem:[%s1183_s23 + $0xc8] sm:$0xff]  ;;  %v1002_v30 = vcombine.low %v228_v17, %v232_v19  ;;  %v215_v14 = vld [vmem:[%s1183_s23 + $0x18] sm:$0xff] }
  0x19   : > { %v240_v27 = vld [vmem:[%s1183_s23 + $0xe0] sm:$0xff]  ;;  %v241_v29 = vld [vmem:[%s1183_s23 + $0xe8] sm:$0xff]  ;;  %v1004_v31 = vcombine.low %v229_v20, %v233_v21  ;;  %v219_v15 = vld [vmem:[%s1183_s23 + $0x38] sm:$0xff]  ;;  %v991_v18 = vcombine.high %v214_v12, %v218_v13 }
  0x1a   : > { %v1011_v32 = vcombine.high %v236_v26, %v240_v27  ;;  %v1013_v33 = vcombine.high %v237_v28, %v241_v29  ;;  %v244_v34 = vld [vmem:[%s1183_s23 + $0x100] sm:$0xff]  ;;  %v245_v36 = vld [vmem:[%s1183_s23 + $0x108] sm:$0xff]  ;;  %v1010_v38 = vcombine.low %v236_v26, %v240_v27  ;;  %v1012_v39 = vcombine.low %v237_v28, %v241_v29  ;;  %v222_v20 = vld [vmem:[%s1183_s23 + $0x50] sm:$0xff] }
  0x1b   : > { %667 = vmatpush1.bf16.msra.mxu0 %v994_v22  ;;  %708 = vmatpush1.bf16.msra.mxu1 %v996_v23  ;;  %v248_v35 = vld [vmem:[%s1183_s23 + $0x120] sm:$0xff]  ;;  %v249_v37 = vld [vmem:[%s1183_s23 + $0x128] sm:$0xff]  ;;  %v993_v19 = vcombine.high %v215_v14, %v219_v15  ;;  %v226_v21 = vld [vmem:[%s1183_s23 + $0x70] sm:$0xff] }
  0x1c   : > { %668 = vmatprep.subr.bf16.mxu0 %v1003_v24  ;;  %709 = vmatprep.subr.bf16.mxu1 %v1005_v25  ;;  %v1019_v40 = vcombine.high %v244_v34, %v248_v35  ;;  %v1021_v41 = vcombine.high %v245_v36, %v249_v37  ;;  %v252_v42 = vld [vmem:[%s1183_s23 + $0x140] sm:$0xff]  ;;  %v253_v44 = vld [vmem:[%s1183_s23 + $0x148] sm:$0xff]  ;;  %v1018_v46 = vcombine.low %v244_v34, %v248_v35  ;;  %v223_v22 = vld [vmem:[%s1183_s23 + $0x58] sm:$0xff] }
  0x1d   : > { %v256_v43 = vld [vmem:[%s1183_s23 + $0x160] sm:$0xff]  ;;  %v257_v45 = vld [vmem:[%s1183_s23 + $0x168] sm:$0xff]  ;;  %v1020_v47 = vcombine.low %v245_v36, %v249_v37  ;;  %v227_v23 = vld [vmem:[%s1183_s23 + $0x78] sm:$0xff]  ;;  %v990_v24 = vcombine.low %v214_v12, %v218_v13  ;;  %v992_v25 = vcombine.low %v215_v14, %v219_v15  ;;  %v999_v26 = vcombine.high %v222_v20, %v226_v21 }
  0x1e   : > { %v1027_v48 = vcombine.high %v252_v42, %v256_v43  ;;  %v1029_v49 = vcombine.high %v253_v44, %v257_v45  ;;  %v260_v50 = vld [vmem:[%s1183_s23 + $0x180] sm:$0xff]  ;;  %v261_v52 = vld [vmem:[%s1183_s23 + $0x188] sm:$0xff]  ;;  %v1026_v54 = vcombine.low %v252_v42, %v256_v43  ;;  %v1028_v55 = vcombine.low %v253_v44, %v257_v45  ;;  %v230_v28 = vld [vmem:[%s1183_s23 + $0x90] sm:$0xff] }
  0x1f   : > { %669 = vmatpush1.bf16.msra.mxu0 %v1002_v30  ;;  %710 = vmatpush1.bf16.msra.mxu1 %v1004_v31  ;;  %v264_v51 = vld [vmem:[%s1183_s23 + $0x1a0] sm:$0xff]  ;;  %v265_v53 = vld [vmem:[%s1183_s23 + $0x1a8] sm:$0xff]  ;;  %v1001_v27 = vcombine.high %v223_v22, %v227_v23  ;;  %v234_v29 = vld [vmem:[%s1183_s23 + $0xb0] sm:$0xff] }
  0x20   : > { %670 = vmatprep.subr.bf16.mxu0 %v1011_v32  ;;  %711 = vmatprep.subr.bf16.mxu1 %v1013_v33  ;;  %v1035_v56 = vcombine.high %v260_v50, %v264_v51  ;;  %v1037_v57 = vcombine.high %v261_v52, %v265_v53  ;;  %v268_v58 = vld [vmem:[%s1183_s23 + $0x1c0] sm:$0xff]  ;;  %v269_v60 = vld [vmem:[%s1183_s23 + $0x1c8] sm:$0xff]  ;;  %v1034_v62 = vcombine.low %v260_v50, %v264_v51  ;;  %v231_v30 = vld [vmem:[%s1183_s23 + $0x98] sm:$0xff] }
  0x21   : > { %v272_v59 = vld [vmem:[%s1183_s23 + $0x1e0] sm:$0xff]  ;;  %v273_v61 = vld [vmem:[%s1183_s23 + $0x1e8] sm:$0xff]  ;;  %v1036_v63 = vcombine.low %v261_v52, %v265_v53  ;;  %v235_v31 = vld [vmem:[%s1183_s23 + $0xb8] sm:$0xff]  ;;  %v998_v32 = vcombine.low %v222_v20, %v226_v21  ;;  %v1000_v33 = vcombine.low %v223_v22, %v227_v23  ;;  %v1007_v34 = vcombine.high %v230_v28, %v234_v29 }
  0x22   : > { %v1043_v2 = vcombine.high %v268_v58, %v272_v59  ;;  %v1045_v3 = vcombine.high %v269_v60, %v273_v61  ;;  %v276_v4 = vld [vmem:[%s1183_s23 + $0x200] sm:$0xff]  ;;  %v277_v6 = vld [vmem:[%s1183_s23 + $0x208] sm:$0xff]  ;;  %v1042_v8 = vcombine.low %v268_v58, %v272_v59  ;;  %v1044_v9 = vcombine.low %v269_v60, %v273_v61  ;;  %v238_v36 = vld [vmem:[%s1183_s23 + $0xd0] sm:$0xff] }
  0x23   : > { %671 = vmatpush1.bf16.msra.mxu0 %v1010_v38  ;;  %712 = vmatpush1.bf16.msra.mxu1 %v1012_v39  ;;  %v280_v5 = vld [vmem:[%s1183_s23 + $0x220] sm:$0xff]  ;;  %v281_v7 = vld [vmem:[%s1183_s23 + $0x228] sm:$0xff]  ;;  %v1009_v35 = vcombine.high %v231_v30, %v235_v31  ;;  %v242_v37 = vld [vmem:[%s1183_s23 + $0xf0] sm:$0xff]  ;;  %v1122_v23 = vmov 1983009808  }
  0x24   : > { %672 = vmatprep.subr.bf16.mxu0 %v1019_v40  ;;  %713 = vmatprep.subr.bf16.mxu1 %v1021_v41  ;;  %v1051_v10 = vcombine.high %v276_v4, %v280_v5  ;;  %v1053_v11 = vcombine.high %v277_v6, %v281_v7  ;;  %v1050_v16 = vcombine.low %v276_v4, %v280_v5  ;;  %v239_v38 = vld [vmem:[%s1183_s23 + $0xd8] sm:$0xff]  ;;  %v246_v44 = vld [vmem:[%s1183_s23 + $0x110] sm:$0xff] }
  0x25   : > { %v1052_v17 = vcombine.low %v277_v6, %v281_v7  ;;  %v243_v39 = vld [vmem:[%s1183_s23 + $0xf8] sm:$0xff]  ;;  %v1006_v40 = vcombine.low %v230_v28, %v234_v29  ;;  %v1008_v41 = vcombine.low %v231_v30, %v235_v31  ;;  %v1015_v42 = vcombine.high %v238_v36, %v242_v37  ;;  %v250_v45 = vld [vmem:[%s1183_s23 + $0x130] sm:$0xff] }
  0x26   : > { %v1017_v43 = vcombine.high %v239_v38, %v243_v39  ;;  %v254_v51 = vld [vmem:[%s1183_s23 + $0x150] sm:$0xff]  ;;  %v255_v53 = vld [vmem:[%s1183_s23 + $0x158] sm:$0xff] }
  0x27   : > { %673 = vmatpush1.bf16.msra.mxu0 %v1018_v46  ;;  %714 = vmatpush1.bf16.msra.mxu1 %v1020_v47  ;;  %v247_v46 = vld [vmem:[%s1183_s23 + $0x118] sm:$0xff]  ;;  %v258_v52 = vld [vmem:[%s1183_s23 + $0x170] sm:$0xff] }
  0x28   : > { %674 = vmatprep.subr.bf16.mxu0 %v1027_v48  ;;  %715 = vmatprep.subr.bf16.mxu1 %v1029_v49  ;;  %v251_v47 = vld [vmem:[%s1183_s23 + $0x138] sm:$0xff]  ;;  %v1014_v48 = vcombine.low %v238_v36, %v242_v37  ;;  %v1023_v49 = vcombine.high %v246_v44, %v250_v45  ;;  %v262_v59 = vld [vmem:[%s1183_s23 + $0x190] sm:$0xff] }
  0x29   : > { %v1025_v50 = vcombine.high %v247_v46, %v251_v47  ;;  %v266_v60 = vld [vmem:[%s1183_s23 + $0x1b0] sm:$0xff]  ;;  %v263_v61 = vld [vmem:[%s1183_s23 + $0x198] sm:$0xff] }
  0x2a   : > { %v270_v5 = vld [vmem:[%s1183_s23 + $0x1d0] sm:$0xff]  ;;  %v271_v7 = vld [vmem:[%s1183_s23 + $0x1d8] sm:$0xff] }
  0x2b   : > { %675 = vmatpush1.bf16.msra.mxu0 %v1026_v54  ;;  %716 = vmatpush1.bf16.msra.mxu1 %v1028_v55  ;;  %v259_v54 = vld [vmem:[%s1183_s23 + $0x178] sm:$0xff]  ;;  %v1022_v55 = vcombine.low %v246_v44, %v250_v45  ;;  %v274_v6 = vld [vmem:[%s1183_s23 + $0x1f0] sm:$0xff] }
  0x2c   : > { %676 = vmatprep.subr.bf16.mxu0 %v1035_v56  ;;  %717 = vmatprep.subr.bf16.mxu1 %v1037_v57  ;;  %v1024_v56 = vcombine.low %v247_v46, %v251_v47  ;;  %v1031_v57 = vcombine.high %v254_v51, %v258_v52  ;;  %v1033_v58 = vcombine.high %v255_v53, %v259_v54  ;;  %v278_v13 = vld [vmem:[%s1183_s23 + $0x210] sm:$0xff]  ;;  %v279_v15 = vld [vmem:[%s1183_s23 + $0x218] sm:$0xff] }
  0x2d   : > { %v282_v14 = vld [vmem:[%s1183_s23 + $0x230] sm:$0xff] }
  0x2e   : > { %v1054_v21 = vcombine.low %v278_v13, %v282_v14 }
  0x2f   : > { %677 = vmatpush1.bf16.msra.mxu0 %v1034_v62  ;;  %718 = vmatpush1.bf16.msra.mxu1 %v1036_v63  ;;  %v267_v62 = vld [vmem:[%s1183_s23 + $0x1b8] sm:$0xff]  ;;  %v1030_v63 = vcombine.low %v254_v51, %v258_v52 }
  0x30   : > { %678 = vmatprep.subr.bf16.mxu0 %v1043_v2  ;;  %719 = vmatprep.subr.bf16.mxu1 %v1045_v3  ;;  %v1032_v2 = vcombine.low %v255_v53, %v259_v54  ;;  %v1039_v3 = vcombine.high %v262_v59, %v266_v60  ;;  %v1041_v4 = vcombine.high %v263_v61, %v267_v62 }
  0x33   : > { %679 = vmatpush1.bf16.msra.mxu0 %v1042_v8  ;;  %720 = vmatpush1.bf16.msra.mxu1 %v1044_v9  ;;  %v275_v8 = vld [vmem:[%s1183_s23 + $0x1f8] sm:$0xff]  ;;  %v1038_v9 = vcombine.low %v262_v59, %v266_v60 }
  0x34   : > { %680 = vmatprep.subr.bf16.mxu0 %v1051_v10  ;;  %721 = vmatprep.subr.bf16.mxu1 %v1053_v11  ;;  %v1040_v10 = vcombine.low %v263_v61, %v267_v62  ;;  %v1047_v11 = vcombine.high %v270_v5, %v274_v6  ;;  %v1049_v12 = vcombine.high %v271_v7, %v275_v8 }
  0x37   : > { %681 = vmatpush1.bf16.msra.mxu0 %v1050_v16  ;;  %722 = vmatpush1.bf16.msra.mxu1 %v1052_v17  ;;  %v283_v16 = vld [vmem:[%s1183_s23 + $0x238] sm:$0xff]  ;;  %v1046_v17 = vcombine.low %v270_v5, %v274_v6 }
  0x38   : > { %746 = vmatprep.subr.bf16.mxu0 %v991_v18  ;;  %787 = vmatprep.subr.bf16.mxu1 %v993_v19  ;;  %v1048_v18 = vcombine.low %v271_v7, %v275_v8  ;;  %v1055_v19 = vcombine.high %v278_v13, %v282_v14  ;;  %v1057_v20 = vcombine.high %v279_v15, %v283_v16 }
  0x39   : > { %v1056_v22 = vcombine.low %v279_v15, %v283_v16 }
  0x3a   : > { %697 = vmatmul.mubr.bf16.vlgmr.msra.gmra.mrb[0].mxu0 %v1164_v0  ;;  %738 = vmatmul.mubr.bf16.vlgmr.msra.gmra.mrb[0].mxu1 %v1164_v0 }
  0x3b   : > { %747 = vmatpush1.bf16.msra.mxu0 %v990_v24  ;;  %788 = vmatpush1.bf16.msra.mxu1 %v992_v25  ;;  %v855_v24 = vunpack.c.l.s4 %v1122_v23  ;;  %v857_v25 = vlaneseq }
  0x3c   : > { %748 = vmatprep.subr.bf16.mxu0 %v999_v26  ;;  %789 = vmatprep.subr.bf16.mxu1 %v1001_v27 }
  0x3d   : > { %1060 = vmatprep.mubr.msk.bf16.mxu0 %vm660_vm0, %v1168_v1  ;;  %1061 = vmatprep.mubr.msk.bf16.mxu1 %vm660_vm0, %v1168_v1  ;;  %v1016_v1 = vcombine.low %v239_v38, %v243_v39  ;;  %v856_v28 = vunpack.c.0.s8 %v855_v24  ;;  %v858_v29 = vshrl.u32 %v857_v25, 7 }
  0x3f   : > { %749 = vmatpush1.bf16.msra.mxu0 %v998_v32  ;;  %790 = vmatpush1.bf16.msra.mxu1 %v1000_v33 }
  0x40   : > { %750 = vmatprep.subr.bf16.mxu0 %v1007_v34  ;;  %791 = vmatprep.subr.bf16.mxu1 %v1009_v35 }
  0x43   : > { %751 = vmatpush1.bf16.msra.mxu0 %v1006_v40  ;;  %792 = vmatpush1.bf16.msra.mxu1 %v1008_v41  ;;  %v859_v41 = vsub.s32 %v856_v28, %v858_v29 }
  0x44   : > { %752 = vmatprep.subr.bf16.mxu0 %v1015_v42  ;;  %793 = vmatprep.subr.bf16.mxu1 %v1017_v43 }
  0x47   : > { %753 = vmatpush1.bf16.msra.mxu0 %v1014_v48  ;;  %794 = vmatpush1.bf16.msra.mxu1 %v1016_v1 }
  0x48   : > { %754 = vmatprep.subr.bf16.mxu0 %v1023_v49  ;;  %795 = vmatprep.subr.bf16.mxu1 %v1025_v50 }
  0x4b   : > { %755 = vmatpush1.bf16.msra.mxu0 %v1022_v55  ;;  %796 = vmatpush1.bf16.msra.mxu1 %v1024_v56 }
  0x4c   : > { %756 = vmatprep.subr.bf16.mxu0 %v1031_v57  ;;  %797 = vmatprep.subr.bf16.mxu1 %v1033_v58 }
  0x4f   : > { %757 = vmatpush1.bf16.msra.mxu0 %v1030_v63  ;;  %798 = vmatpush1.bf16.msra.mxu1 %v1032_v2 }
  0x50   : > { %758 = vmatprep.subr.bf16.mxu0 %v1039_v3  ;;  %799 = vmatprep.subr.bf16.mxu1 %v1041_v4 }
  0x53   : > { %759 = vmatpush1.bf16.msra.mxu0 %v1038_v9  ;;  %800 = vmatpush1.bf16.msra.mxu1 %v1040_v10 }
  0x54   : > { %760 = vmatprep.subr.bf16.mxu0 %v1047_v11  ;;  %801 = vmatprep.subr.bf16.mxu1 %v1049_v12 }
  0x57   : > { %761 = vmatpush1.bf16.msra.mxu0 %v1046_v17  ;;  %802 = vmatpush1.bf16.msra.mxu1 %v1048_v18 }
  0x58   : > { %762 = vmatprep.subr.bf16.mxu0 %v1055_v19  ;;  %803 = vmatprep.subr.bf16.mxu1 %v1057_v20 }
  0x5b   : > { %763 = vmatpush1.bf16.msra.mxu0 %v1054_v21  ;;  %804 = vmatpush1.bf16.msra.mxu1 %v1056_v22 }
  0x5e   : > { %779 = vmatmul.mubr.bf16.vlgmr.msra.gmra.mrb[4].mxu0 %v1164_v0  ;;  %820 = vmatmul.mubr.bf16.vlgmr.msra.gmra.mrb[4].mxu1 %v1164_v0 }
  0x89   : > { %v288_v26 = vpop.permute.xlu0 %287 }
 0x10d   : > { %v698_v27 = vpop.f32.mrb[0].mxu0  ;;  %v739_v30 = vpop.f32.mrb[0].mxu1 }
 0x10e   : > { %v699_v31 = vadd.f32 %v698_v27, %v288_v26  ;;  %v700_v32 = vpop.f32.mrb[1].mxu0  ;;  %v740_v34 = vadd.f32 %v739_v30, %v288_v26  ;;  %v741_v35 = vpop.f32.mrb[1].mxu1 }
 0x10f   : > { %v701_v33 = vadd.f32 %v700_v32, %v288_v26  ;;  %v702_v36 = vpop.f32.mrb[2].mxu0  ;;  %v742_v38 = vadd.f32 %v741_v35, %v288_v26  ;;  %v743_v39 = vpop.f32.mrb[2].mxu1 }
 0x110   : > { %v828_v37 = vmax.f32 %v699_v31, 0.0  ;;  %v703_v40 = vpop.f32.mrb[3].mxu0  ;;  %v830_v42 = vmax.f32 %v740_v34, 0.0  ;;  %v744_v43 = vpop.f32.mrb[3].mxu1 }
 0x111   : > { %v829_v0 = vmax.f32 %v701_v33, 0.0  ;;  %v831_v44 = vmax.f32 %v742_v38, 0.0 }
 0x113   : > { %v1062_v45 = vpack.c.bf16 %v829_v0, %v828_v37  ;;  %v1063_v46 = vpack.c.bf16 %v831_v44, %v830_v42 }
 0x115   : > { %v860_v47 = vrot.slane %v1062_v45, %v859_v41  ;;  %v867_v48 = vrot.slane %v1063_v46, %v859_v41 }
 0x117   : > { %v868_v1 = vcombine.low %v860_v47, %v867_v48 }
 0x119   : > { %888 = vst [vmem:[%s208_s27] sm:$0xff] %v868_v1 }
 0x131   : > { %v780_v49 = vpop.f32.mrb[4].mxu0  ;;  %v821_v51 = vpop.f32.mrb[4].mxu1 }
 0x132   : > { %v781_v50 = vadd.f32 %v780_v49, %v288_v26  ;;  %v782_v52 = vpop.f32.mrb[5].mxu0  ;;  %v822_v53 = vadd.f32 %v821_v51, %v288_v26  ;;  %v823_v55 = vpop.f32.mrb[5].mxu1 }
 0x133   : > { %v783_v54 = vadd.f32 %v782_v52, %v288_v26  ;;  %v784_v56 = vpop.f32.mrb[6].mxu0  ;;  %v824_v58 = vadd.f32 %v823_v55, %v288_v26  ;;  %v825_v59 = vpop.f32.mrb[6].mxu1 }
 0x134   : > { %v832_v57 = vmax.f32 %v781_v50, 0.0  ;;  %v785_v60 = vpop.f32.mrb[7].mxu0  ;;  %v834_v61 = vmax.f32 %v822_v53, 0.0  ;;  %v826_v63 = vpop.f32.mrb[7].mxu1 }
 0x135   : > { %v833_v62 = vmax.f32 %v783_v54, 0.0  ;;  %v835_v2 = vmax.f32 %v824_v58, 0.0 }
 0x137   : > { %v1064_v3 = vpack.c.bf16 %v833_v62, %v832_v57  ;;  %v1065_v4 = vpack.c.bf16 %v835_v2, %v834_v61 }
 0x139   : > { %v877_v5 = vrot.slane %v1064_v3, %v859_v41  ;;  %v884_v6 = vrot.slane %v1065_v4, %v859_v41 }
 0x13b   : > { %v885_v7 = vcombine.low %v877_v5, %v884_v6 }
 0x13d   : > { %889 = vst [vmem:[%s208_s27 + $0x8] sm:$0xff] %v885_v7 }
 0x13e PF: > { %s13_s14 = sadd.s32 1, %s1119_s14   ;;  %s1282_s12 = smov %s1115_s13 }
 0x13f   : > { %p10_p5 = scmp.ge.s32.totalorder %s13_s14, 4   ;;  %s1283_s13 = smov %s1285_s15 }
 0x141   :  { %12 = sbr.rel (!%p10_p5) target bundleno = 2 (0x2), region = 62 }

// kernel: segmnet_forward.20
= control target key start
LH: loop header
LB: loop body
LE: loop exit
PB: predicated region body
PF: predicated region fallthrough
CT: control target
= control target key end

     0   :  { %s3226_s12 = smov 0   ;;  %s3228_s13 = smov 0   ;;  %s3646_s0 = inlined_call_operand.vmem [shape: bf16[4,612], index: 0, kind: input, shape index: {}]   ;;  %s3647_s1 = inlined_call_operand.vmem [shape: bf16[2,612,1024], index: 1, kind: input, shape index: {}]   ;;  %s3648_s2 = inlined_call_operand.vmem [shape: f32[4,1], index: 2, kind: input, shape index: {}]   ;;  %s3649_s3 = inlined_call_operand.vmem [shape: bf16[2,4,1024], index: 3, kind: output, shape index: {}]  }
   0x1   :  { %s3230_s14 = smov 0  }
   0x2 LB: > { %s25_s15 = sadd.s32 1, %s3198_s13  ;;  %p2771_p0 = scmp.ge.s32.totalorder %s3202_s14, 1  ;;  %s3202_s14 = sphi %s3230_s14, %s13_s14   ;;  %s3198_s13 = sphi %s3228_s13, %s3651_s13   ;;  %s3194_s12 = sphi %s3226_s12, %s3650_s12  }
   0x3   : > { %p27_p1 = scmp.ge.s32.totalorder %s25_s15, 2  ;;  %p158_p2 = scmp.lt.s32.totalorder %s3202_s14, 3 }
   0x5   : > { %s3653_s15 = smov (%p27_p1, %s25_s15), 0  ;;  %p159_p3 = pnand %p2771_p0, %p158_p2 }
   0x6   : > { %p191_p4 = scmp.lt.s32.totalorder (!%p159_p3), %s3194_s12, 1  ;;  %v533_v0 = vlaneseq (!%p159_p3)  ;;  %v3204_v1 = vmov (!%p159_p3), 1983009808   ;;  %v3250_v5 = vld [vmem:[%s3646_s0] sm:$0xff] (!%p159_p3)  ;;  %vm2101_vm0 = vcmask (!%p159_p3), 1041408   ;;  %vm2097_vm1 = vcmask (!%p159_p3), 818176  }
   0x7   : > { %162 = sbr.rel (%p159_p3) target bundleno = 558 (0x22e), region = 32  ;;  %v531_v2 = vunpack.c.l.s4 (!%p159_p3), %v3204_v1 }
   0x8   : > { %v534_v3 = vshrl.u32 (!%p159_p3), %v533_v0, 7 }
   0x9   : > { %v532_v4 = vunpack.c.0.s8 (!%p159_p3), %v531_v2 }
   0xb   : > { %v3252_v6 = vsub.s32 (!%p159_p3), %v532_v4, %v534_v3 }
   0xd   : > { %v3264_v10 = vrot.slane (!%p159_p3), %v3250_v5, %v3252_v6 }
   0xe   : > { %s3655_s12 = smov (!%p191_p4, %s3194_s12), 1 }
   0xf   : > { %s3143_s16 = smul.u32 2464, %s3655_s12  ;;  %v3277_v26 = vcombine.high %v3264_v10, %v3264_v10  ;;  %s3102_s26 = sshll.u32 %s3655_s12, 4 }
  0x10   : > { %s208_s29 = scalar_lea.vmem %s3649_s3, %s3102_s26 }
  0x11   : > { %s3257_s21 = scalar_lea.vmem %s3647_s1, %s3143_s16  ;;  %2158 = vmatprep.mubr.bf16.mxu0 %v3277_v26  ;;  %2281 = vmatprep.mubr.bf16.mxu1 %v3277_v26 }
  0x12   : > { %v213_v7 = vld [vmem:[%s3257_s21] sm:$0xff]  ;;  %v214_v9 = vld [vmem:[%s3257_s21 + $0x8] sm:$0xff] }
  0x13   : > { %v217_v8 = vld [vmem:[%s3257_s21 + $0x20] sm:$0xff]  ;;  %v218_v12 = vld [vmem:[%s3257_s21 + $0x28] sm:$0xff] }
  0x14   : > { %v2777_v11 = vcombine.high %v213_v7, %v217_v8  ;;  %v2776_v13 = vcombine.low %v213_v7, %v217_v8  ;;  %v221_v14 = vld [vmem:[%s3257_s21 + $0x40] sm:$0xff]  ;;  %v2779_v16 = vcombine.high %v214_v9, %v218_v12  ;;  %v2778_v17 = vcombine.low %v214_v9, %v218_v12  ;;  %v222_v19 = vld [vmem:[%s3257_s21 + $0x48] sm:$0xff] }
  0x15   : > { %v225_v15 = vld [vmem:[%s3257_s21 + $0x60] sm:$0xff]  ;;  %v226_v20 = vld [vmem:[%s3257_s21 + $0x68] sm:$0xff] }
  0x16   : > { %v2785_v18 = vcombine.high %v221_v14, %v225_v15  ;;  %v229_v21 = vld [vmem:[%s3257_s21 + $0x80] sm:$0xff]  ;;  %2126 = vmatprep.subr.bf16.mxu0 %v2777_v11  ;;  %v2787_v22 = vcombine.high %v222_v19, %v226_v20  ;;  %v230_v24 = vld [vmem:[%s3257_s21 + $0x88] sm:$0xff]  ;;  %2249 = vmatprep.subr.bf16.mxu1 %v2779_v16  ;;  %v2784_v27 = vcombine.low %v221_v14, %v225_v15 }
  0x17   : > { %v233_v23 = vld [vmem:[%s3257_s21 + $0xa0] sm:$0xff]  ;;  %v234_v25 = vld [vmem:[%s3257_s21 + $0xa8] sm:$0xff]  ;;  %2127 = vmatpush1.bf16.msra.mxu0 %v2776_v13  ;;  %2250 = vmatpush1.bf16.msra.mxu1 %v2778_v17  ;;  %v2786_v28 = vcombine.low %v222_v19, %v226_v20 }
  0x18   : > { %2128 = vmatprep.subr.bf16.mxu0 %v2785_v18  ;;  %v2793_v29 = vcombine.high %v229_v21, %v233_v23  ;;  %2251 = vmatprep.subr.bf16.mxu1 %v2787_v22  ;;  %v2795_v30 = vcombine.high %v230_v24, %v234_v25  ;;  %v237_v31 = vld [vmem:[%s3257_s21 + $0xc0] sm:$0xff]  ;;  %v238_v33 = vld [vmem:[%s3257_s21 + $0xc8] sm:$0xff]  ;;  %v2792_v35 = vcombine.low %v229_v21, %v233_v23  ;;  %v3205_v22 = vmov 0  }
  0x19   : > { %v241_v32 = vld [vmem:[%s3257_s21 + $0xe0] sm:$0xff]  ;;  %v242_v34 = vld [vmem:[%s3257_s21 + $0xe8] sm:$0xff]  ;;  %v2794_v36 = vcombine.low %v230_v24, %v234_v25  ;;  %3170 = vset.pattern.permute.xlu0 %v3205_v22 }
  0x1a   : > { %v2801_v37 = vcombine.high %v237_v31, %v241_v32  ;;  %v2803_v38 = vcombine.high %v238_v33, %v242_v34  ;;  %v245_v39 = vld [vmem:[%s3257_s21 + $0x100] sm:$0xff]  ;;  %v246_v41 = vld [vmem:[%s3257_s21 + $0x108] sm:$0xff]  ;;  %v2800_v43 = vcombine.low %v237_v31, %v241_v32  ;;  %v2802_v44 = vcombine.low %v238_v33, %v242_v34 }
  0x1b   : > { %2129 = vmatpush1.bf16.msra.mxu0 %v2784_v27  ;;  %2252 = vmatpush1.bf16.msra.mxu1 %v2786_v28  ;;  %v249_v40 = vld [vmem:[%s3257_s21 + $0x120] sm:$0xff]  ;;  %v250_v42 = vld [vmem:[%s3257_s21 + $0x128] sm:$0xff] }
  0x1c   : > { %2130 = vmatprep.subr.bf16.mxu0 %v2793_v29  ;;  %2253 = vmatprep.subr.bf16.mxu1 %v2795_v30  ;;  %v2809_v45 = vcombine.high %v245_v39, %v249_v40  ;;  %v2811_v46 = vcombine.high %v246_v41, %v250_v42  ;;  %v253_v47 = vld [vmem:[%s3257_s21 + $0x140] sm:$0xff]  ;;  %v254_v49 = vld [vmem:[%s3257_s21 + $0x148] sm:$0xff]  ;;  %v2808_v51 = vcombine.low %v245_v39, %v249_v40 }
  0x1d   : > { %v257_v48 = vld [vmem:[%s3257_s21 + $0x160] sm:$0xff]  ;;  %v258_v50 = vld [vmem:[%s3257_s21 + $0x168] sm:$0xff]  ;;  %v2810_v52 = vcombine.low %v246_v41, %v250_v42 }
  0x1e   : > { %v2817_v53 = vcombine.high %v253_v47, %v257_v48  ;;  %v2819_v54 = vcombine.high %v254_v49, %v258_v50  ;;  %v261_v55 = vld [vmem:[%s3257_s21 + $0x180] sm:$0xff]  ;;  %v262_v57 = vld [vmem:[%s3257_s21 + $0x188] sm:$0xff]  ;;  %v2816_v59 = vcombine.low %v253_v47, %v257_v48  ;;  %v2818_v60 = vcombine.low %v254_v49, %v258_v50 }
  0x1f   : > { %2131 = vmatpush1.bf16.msra.mxu0 %v2792_v35  ;;  %2254 = vmatpush1.bf16.msra.mxu1 %v2794_v36  ;;  %v265_v56 = vld [vmem:[%s3257_s21 + $0x1a0] sm:$0xff]  ;;  %v266_v58 = vld [vmem:[%s3257_s21 + $0x1a8] sm:$0xff] }
  0x20   : > { %2132 = vmatprep.subr.bf16.mxu0 %v2801_v37  ;;  %2255 = vmatprep.subr.bf16.mxu1 %v2803_v38  ;;  %v2825_v61 = vcombine.high %v261_v55, %v265_v56  ;;  %v2827_v62 = vcombine.high %v262_v57, %v266_v58  ;;  %v269_v63 = vld [vmem:[%s3257_s21 + $0x1c0] sm:$0xff]  ;;  %v270_v1 = vld [vmem:[%s3257_s21 + $0x1c8] sm:$0xff]  ;;  %v2824_v3 = vcombine.low %v261_v55, %v265_v56 }
  0x21   : > { %v273_v0 = vld [vmem:[%s3257_s21 + $0x1e0] sm:$0xff]  ;;  %v274_v2 = vld [vmem:[%s3257_s21 + $0x1e8] sm:$0xff]  ;;  %v2826_v4 = vcombine.low %v262_v57, %v266_v58 }
  0x22   : > { %v2833_v7 = vcombine.high %v269_v63, %v273_v0  ;;  %v2835_v8 = vcombine.high %v270_v1, %v274_v2  ;;  %v277_v9 = vld [vmem:[%s3257_s21 + $0x200] sm:$0xff]  ;;  %v278_v12 = vld [vmem:[%s3257_s21 + $0x208] sm:$0xff]  ;;  %v2832_v14 = vcombine.low %v269_v63, %v273_v0  ;;  %v2834_v15 = vcombine.low %v270_v1, %v274_v2 }
  0x23   : > { %2133 = vmatpush1.bf16.msra.mxu0 %v2800_v43  ;;  %2256 = vmatpush1.bf16.msra.mxu1 %v2802_v44  ;;  %v281_v11 = vld [vmem:[%s3257_s21 + $0x220] sm:$0xff]  ;;  %v282_v13 = vld [vmem:[%s3257_s21 + $0x228] sm:$0xff] }
  0x24   : > { %2134 = vmatprep.subr.bf16.mxu0 %v2809_v45  ;;  %2257 = vmatprep.subr.bf16.mxu1 %v2811_v46  ;;  %v2841_v16 = vcombine.high %v277_v9, %v281_v11  ;;  %v2843_v17 = vcombine.high %v278_v12, %v282_v13  ;;  %v285_v18 = vld [vmem:[%s3257_s21 + $0x240] sm:$0xff]  ;;  %v286_v20 = vld [vmem:[%s3257_s21 + $0x248] sm:$0xff]  ;;  %v2840_v23 = vcombine.low %v277_v9, %v281_v11 }
  0x25   : > { %v289_v19 = vld [vmem:[%s3257_s21 + $0x260] sm:$0xff]  ;;  %v290_v21 = vld [vmem:[%s3257_s21 + $0x268] sm:$0xff]  ;;  %v2842_v24 = vcombine.low %v278_v12, %v282_v13 }
  0x26   : > { %v2849_v25 = vcombine.high %v285_v18, %v289_v19  ;;  %v2851_v27 = vcombine.high %v286_v20, %v290_v21  ;;  %v293_v28 = vld [vmem:[%s3257_s21 + $0x280] sm:$0xff]  ;;  %v294_v30 = vld [vmem:[%s3257_s21 + $0x288] sm:$0xff]  ;;  %v2848_v32 = vcombine.low %v285_v18, %v289_v19  ;;  %v2850_v33 = vcombine.low %v286_v20, %v290_v21 }
  0x27   : > { %2135 = vmatpush1.bf16.msra.mxu0 %v2808_v51  ;;  %2258 = vmatpush1.bf16.msra.mxu1 %v2810_v52  ;;  %v297_v29 = vld [vmem:[%s3257_s21 + $0x2a0] sm:$0xff]  ;;  %v298_v31 = vld [vmem:[%s3257_s21 + $0x2a8] sm:$0xff] }
  0x28   : > { %2136 = vmatprep.subr.bf16.mxu0 %v2817_v53  ;;  %2259 = vmatprep.subr.bf16.mxu1 %v2819_v54  ;;  %v2857_v34 = vcombine.high %v293_v28, %v297_v29  ;;  %v2859_v35 = vcombine.high %v294_v30, %v298_v31  ;;  %v301_v36 = vld [vmem:[%s3257_s21 + $0x2c0] sm:$0xff]  ;;  %v302_v38 = vld [vmem:[%s3257_s21 + $0x2c8] sm:$0xff]  ;;  %v2856_v40 = vcombine.low %v293_v28, %v297_v29 }
  0x29   : > { %v305_v37 = vld [vmem:[%s3257_s21 + $0x2e0] sm:$0xff]  ;;  %v306_v39 = vld [vmem:[%s3257_s21 + $0x2e8] sm:$0xff]  ;;  %v2858_v41 = vcombine.low %v294_v30, %v298_v31 }
  0x2a   : > { %v2865_v42 = vcombine.high %v301_v36, %v305_v37  ;;  %v2867_v43 = vcombine.high %v302_v38, %v306_v39  ;;  %v309_v44 = vld [vmem:[%s3257_s21 + $0x300] sm:$0xff]  ;;  %v310_v46 = vld [vmem:[%s3257_s21 + $0x308] sm:$0xff]  ;;  %v2864_v48 = vcombine.low %v301_v36, %v305_v37  ;;  %v2866_v49 = vcombine.low %v302_v38, %v306_v39 }
  0x2b   : > { %2137 = vmatpush1.bf16.msra.mxu0 %v2816_v59  ;;  %2260 = vmatpush1.bf16.msra.mxu1 %v2818_v60  ;;  %v313_v45 = vld [vmem:[%s3257_s21 + $0x320] sm:$0xff]  ;;  %v314_v47 = vld [vmem:[%s3257_s21 + $0x328] sm:$0xff] }
  0x2c   : > { %2138 = vmatprep.subr.bf16.mxu0 %v2825_v61  ;;  %2261 = vmatprep.subr.bf16.mxu1 %v2827_v62  ;;  %v2873_v50 = vcombine.high %v309_v44, %v313_v45  ;;  %v2875_v51 = vcombine.high %v310_v46, %v314_v47  ;;  %v317_v52 = vld [vmem:[%s3257_s21 + $0x340] sm:$0xff]  ;;  %v318_v54 = vld [vmem:[%s3257_s21 + $0x348] sm:$0xff]  ;;  %v2872_v56 = vcombine.low %v309_v44, %v313_v45 }
  0x2d   : > { %v321_v53 = vld [vmem:[%s3257_s21 + $0x360] sm:$0xff]  ;;  %v322_v55 = vld [vmem:[%s3257_s21 + $0x368] sm:$0xff]  ;;  %v2874_v57 = vcombine.low %v310_v46, %v314_v47 }
  0x2e   : > { %v2881_v58 = vcombine.high %v317_v52, %v321_v53  ;;  %v2883_v59 = vcombine.high %v318_v54, %v322_v55  ;;  %v325_v60 = vld [vmem:[%s3257_s21 + $0x380] sm:$0xff]  ;;  %v326_v62 = vld [vmem:[%s3257_s21 + $0x388] sm:$0xff]  ;;  %v2880_v0 = vcombine.low %v317_v52, %v321_v53  ;;  %v2882_v1 = vcombine.low %v318_v54, %v322_v55 }
  0x2f   : > { %2139 = vmatpush1.bf16.msra.mxu0 %v2824_v3  ;;  %2262 = vmatpush1.bf16.msra.mxu1 %v2826_v4  ;;  %v329_v61 = vld [vmem:[%s3257_s21 + $0x3a0] sm:$0xff]  ;;  %v330_v63 = vld [vmem:[%s3257_s21 + $0x3a8] sm:$0xff] }
  0x30   : > { %2140 = vmatprep.subr.bf16.mxu0 %v2833_v7  ;;  %2263 = vmatprep.subr.bf16.mxu1 %v2835_v8  ;;  %v2889_v2 = vcombine.high %v325_v60, %v329_v61  ;;  %v2891_v3 = vcombine.high %v326_v62, %v330_v63  ;;  %v333_v4 = vld [vmem:[%s3257_s21 + $0x3c0] sm:$0xff]  ;;  %v334_v8 = vld [vmem:[%s3257_s21 + $0x3c8] sm:$0xff]  ;;  %v2888_v11 = vcombine.low %v325_v60, %v329_v61 }
  0x31   : > { %v337_v7 = vld [vmem:[%s3257_s21 + $0x3e0] sm:$0xff]  ;;  %v338_v9 = vld [vmem:[%s3257_s21 + $0x3e8] sm:$0xff]  ;;  %v2890_v12 = vcombine.low %v326_v62, %v330_v63 }
  0x32   : > { %v2897_v13 = vcombine.high %v333_v4, %v337_v7  ;;  %v342_v18 = vld [vmem:[%s3257_s21 + $0x408] sm:$0xff]  ;;  %v2896_v20 = vcombine.low %v333_v4, %v337_v7  ;;  %v2898_v21 = vcombine.low %v334_v8, %v338_v9  ;;  %v369_v44 = vld [vmem:[%s3257_s21 + $0x4e0] sm:$0xff] }
  0x33   : > { %2141 = vmatpush1.bf16.msra.mxu0 %v2832_v14  ;;  %2264 = vmatpush1.bf16.msra.mxu1 %v2834_v15  ;;  %v2899_v14 = vcombine.high %v334_v8, %v338_v9  ;;  %v341_v15 = vld [vmem:[%s3257_s21 + $0x400] sm:$0xff]  ;;  %v346_v19 = vld [vmem:[%s3257_s21 + $0x428] sm:$0xff] }
  0x34   : > { %2142 = vmatprep.subr.bf16.mxu0 %v2841_v16  ;;  %2265 = vmatprep.subr.bf16.mxu1 %v2843_v17  ;;  %v345_v16 = vld [vmem:[%s3257_s21 + $0x420] sm:$0xff]  ;;  %v529_v17 = vcombine.high %v3250_v5, %v3250_v5  ;;  %v350_v5 = vld [vmem:[%s3257_s21 + $0x448] sm:$0xff]  ;;  %v2906_v31 = vcombine.low %v342_v18, %v346_v19 }
  0x35   : > { %v354_v29 = vld [vmem:[%s3257_s21 + $0x468] sm:$0xff]  ;;  %v2904_v30 = vcombine.low %v341_v15, %v345_v16  ;;  %v377_v52 = vld [vmem:[%s3257_s21 + $0x520] sm:$0xff] }
  0x36   : > { %v3343_v28 = vrot.slane %v529_v17, %v3252_v6  ;;  %v358_v37 = vld [vmem:[%s3257_s21 + $0x488] sm:$0xff]  ;;  %v385_v60 = vld [vmem:[%s3257_s21 + $0x560] sm:$0xff] }
  0x37   : > { %2143 = vmatpush1.bf16.msra.mxu0 %v2840_v23  ;;  %2266 = vmatpush1.bf16.msra.mxu1 %v2842_v24  ;;  %v2905_v23 = vcombine.high %v341_v15, %v345_v16  ;;  %v2907_v24 = vcombine.high %v342_v18, %v346_v19  ;;  %v362_v38 = vld [vmem:[%s3257_s21 + $0x4a8] sm:$0xff]  ;;  %v393_v4 = vld [vmem:[%s3257_s21 + $0x5a0] sm:$0xff] }
  0x38   : > { %2144 = vmatprep.subr.bf16.mxu0 %v2849_v25  ;;  %2267 = vmatprep.subr.bf16.mxu1 %v2851_v27  ;;  %v349_v25 = vld [vmem:[%s3257_s21 + $0x440] sm:$0xff]  ;;  %v3351_v36 = vcombine.high %v3343_v28, %v3343_v28  ;;  %v366_v45 = vld [vmem:[%s3257_s21 + $0x4c8] sm:$0xff] }
  0x39   : > { %v353_v27 = vld [vmem:[%s3257_s21 + $0x460] sm:$0xff]  ;;  %v370_v46 = vld [vmem:[%s3257_s21 + $0x4e8] sm:$0xff] }
  0x3a   : > { %v2912_v39 = vcombine.low %v349_v25, %v353_v27  ;;  %v374_v53 = vld [vmem:[%s3257_s21 + $0x508] sm:$0xff]  ;;  %v401_v15 = vld [vmem:[%s3257_s21 + $0x5e0] sm:$0xff] }
  0x3b   : > { %2145 = vmatpush1.bf16.msra.mxu0 %v2848_v32  ;;  %2268 = vmatpush1.bf16.msra.mxu1 %v2850_v33  ;;  %v2913_v32 = vcombine.high %v349_v25, %v353_v27  ;;  %v2915_v33 = vcombine.high %v350_v5, %v354_v29  ;;  %v378_v54 = vld [vmem:[%s3257_s21 + $0x528] sm:$0xff] }
  0x3c   : > { %2146 = vmatprep.subr.bf16.mxu0 %v2857_v34  ;;  %2269 = vmatprep.subr.bf16.mxu1 %v2859_v35  ;;  %v357_v34 = vld [vmem:[%s3257_s21 + $0x480] sm:$0xff]  ;;  %v382_v61 = vld [vmem:[%s3257_s21 + $0x548] sm:$0xff] }
  0x3d   : > { %v361_v35 = vld [vmem:[%s3257_s21 + $0x4a0] sm:$0xff]  ;;  %v386_v62 = vld [vmem:[%s3257_s21 + $0x568] sm:$0xff] }
  0x3e   : > { %v2920_v47 = vcombine.low %v357_v34, %v361_v35  ;;  %v390_v7 = vld [vmem:[%s3257_s21 + $0x588] sm:$0xff] }
  0x3f   : > { %2147 = vmatpush1.bf16.msra.mxu0 %v2856_v40  ;;  %2270 = vmatpush1.bf16.msra.mxu1 %v2858_v41  ;;  %v2914_v40 = vcombine.low %v350_v5, %v354_v29  ;;  %v2921_v41 = vcombine.high %v357_v34, %v361_v35  ;;  %v394_v8 = vld [vmem:[%s3257_s21 + $0x5a8] sm:$0xff] }
  0x40   : > { %2148 = vmatprep.subr.bf16.mxu0 %v2865_v42  ;;  %2271 = vmatprep.subr.bf16.mxu1 %v2867_v43  ;;  %v2923_v42 = vcombine.high %v358_v37, %v362_v38  ;;  %v365_v43 = vld [vmem:[%s3257_s21 + $0x4c0] sm:$0xff]  ;;  %v398_v16 = vld [vmem:[%s3257_s21 + $0x5c8] sm:$0xff]  ;;  %v2954_v19 = vcombine.low %v390_v7, %v394_v8 }
  0x41   : > { %v2928_v55 = vcombine.low %v365_v43, %v369_v44  ;;  %v402_v17 = vld [vmem:[%s3257_s21 + $0x5e8] sm:$0xff] }
  0x42   : > { %v406_v25 = vld [vmem:[%s3257_s21 + $0x608] sm:$0xff]  ;;  %v2962_v29 = vcombine.low %v398_v16, %v402_v17 }
  0x43   : > { %2149 = vmatpush1.bf16.msra.mxu0 %v2864_v48  ;;  %2272 = vmatpush1.bf16.msra.mxu1 %v2866_v49  ;;  %v2922_v48 = vcombine.low %v358_v37, %v362_v38  ;;  %v2929_v49 = vcombine.high %v365_v43, %v369_v44  ;;  %v410_v27 = vld [vmem:[%s3257_s21 + $0x628] sm:$0xff] }
  0x44   : > { %2150 = vmatprep.subr.bf16.mxu0 %v2873_v50  ;;  %2273 = vmatprep.subr.bf16.mxu1 %v2875_v51  ;;  %v2931_v50 = vcombine.high %v366_v45, %v370_v46  ;;  %v373_v51 = vld [vmem:[%s3257_s21 + $0x500] sm:$0xff]  ;;  %v414_v34 = vld [vmem:[%s3257_s21 + $0x648] sm:$0xff]  ;;  %v2970_v38 = vcombine.low %v406_v25, %v410_v27 }
  0x45   : > { %v2936_v63 = vcombine.low %v373_v51, %v377_v52  ;;  %v418_v35 = vld [vmem:[%s3257_s21 + $0x668] sm:$0xff] }
  0x46   : > { %v422_v43 = vld [vmem:[%s3257_s21 + $0x688] sm:$0xff] }
  0x47   : > { %2151 = vmatpush1.bf16.msra.mxu0 %v2872_v56  ;;  %2274 = vmatpush1.bf16.msra.mxu1 %v2874_v57  ;;  %v2930_v56 = vcombine.low %v366_v45, %v370_v46  ;;  %v2937_v57 = vcombine.high %v373_v51, %v377_v52  ;;  %v426_v44 = vld [vmem:[%s3257_s21 + $0x6a8] sm:$0xff]  ;;  %v2978_v46 = vcombine.low %v414_v34, %v418_v35 }
  0x48   : > { %2152 = vmatprep.subr.bf16.mxu0 %v2881_v58  ;;  %2275 = vmatprep.subr.bf16.mxu1 %v2883_v59  ;;  %v2939_v58 = vcombine.high %v374_v53, %v378_v54  ;;  %v381_v59 = vld [vmem:[%s3257_s21 + $0x540] sm:$0xff]  ;;  %v430_v51 = vld [vmem:[%s3257_s21 + $0x6c8] sm:$0xff] }
  0x49   : > { %v2944_v9 = vcombine.low %v381_v59, %v385_v60  ;;  %v434_v52 = vld [vmem:[%s3257_s21 + $0x6e8] sm:$0xff] }
  0x4b   : > { %2153 = vmatpush1.bf16.msra.mxu0 %v2880_v0  ;;  %2276 = vmatpush1.bf16.msra.mxu1 %v2882_v1  ;;  %v2938_v0 = vcombine.low %v374_v53, %v378_v54  ;;  %v2945_v1 = vcombine.high %v381_v59, %v385_v60  ;;  %v2986_v54 = vcombine.low %v422_v43, %v426_v44  ;;  %v438_v59 = vld [vmem:[%s3257_s21 + $0x708] sm:$0xff] }
  0x4c   : > { %2154 = vmatprep.subr.bf16.mxu0 %v2889_v2  ;;  %2277 = vmatprep.subr.bf16.mxu1 %v2891_v3  ;;  %v2947_v2 = vcombine.high %v382_v61, %v386_v62  ;;  %v389_v3 = vld [vmem:[%s3257_s21 + $0x580] sm:$0xff]  ;;  %v442_v60 = vld [vmem:[%s3257_s21 + $0x728] sm:$0xff] }
  0x4d   : > { %v2952_v18 = vcombine.low %v389_v3, %v393_v4 }
  0x4f   : > { %2155 = vmatpush1.bf16.msra.mxu0 %v2888_v11  ;;  %2278 = vmatpush1.bf16.msra.mxu1 %v2890_v12  ;;  %v2946_v11 = vcombine.low %v382_v61, %v386_v62  ;;  %v2953_v12 = vcombine.high %v389_v3, %v393_v4  ;;  %v2994_v62 = vcombine.low %v430_v51, %v434_v52  ;;  %v446_v3 = vld [vmem:[%s3257_s21 + $0x748] sm:$0xff] }
  0x50   : > { %2156 = vmatprep.subr.bf16.mxu0 %v2897_v13  ;;  %2279 = vmatprep.subr.bf16.mxu1 %v2899_v14  ;;  %v2955_v13 = vcombine.high %v390_v7, %v394_v8  ;;  %v397_v14 = vld [vmem:[%s3257_s21 + $0x5c0] sm:$0xff]  ;;  %v450_v4 = vld [vmem:[%s3257_s21 + $0x768] sm:$0xff]  ;;  %v3002_v8 = vcombine.low %v438_v59, %v442_v60 }
  0x51   : > { %v2960_v5 = vcombine.low %v397_v14, %v401_v15 }
  0x53   : > { %2157 = vmatpush1.bf16.msra.mxu0 %v2896_v20  ;;  %2280 = vmatpush1.bf16.msra.mxu1 %v2898_v21  ;;  %v2961_v20 = vcombine.high %v397_v14, %v401_v15  ;;  %v2963_v21 = vcombine.high %v398_v16, %v402_v17  ;;  %v457_v14 = vld [vmem:[%s3257_s21 + $0x7a0] sm:$0xff]  ;;  %v454_v15 = vld [vmem:[%s3257_s21 + $0x788] sm:$0xff] }
  0x54   : > { %2167 = vmatprep.subr.bf16.mxu0 %v2905_v23  ;;  %2290 = vmatprep.subr.bf16.mxu1 %v2907_v24  ;;  %v405_v23 = vld [vmem:[%s3257_s21 + $0x600] sm:$0xff]  ;;  %v458_v16 = vld [vmem:[%s3257_s21 + $0x7a8] sm:$0xff] }
  0x55   : > { %v409_v24 = vld [vmem:[%s3257_s21 + $0x620] sm:$0xff] }
  0x56   : > { %2159 = vmatmul.mubr.bf16.vlgmr.msra.gmra.mrb[0].mxu0 %v3264_v10  ;;  %2282 = vmatmul.mubr.bf16.vlgmr.msra.gmra.mrb[0].mxu1 %v3264_v10  ;;  %v2968_v37 = vcombine.low %v405_v23, %v409_v24 }
  0x57   : > { %2168 = vmatpush1.bf16.msra.mxu0 %v2904_v30  ;;  %2291 = vmatpush1.bf16.msra.mxu1 %v2906_v31  ;;  %v2969_v30 = vcombine.high %v405_v23, %v409_v24  ;;  %v2971_v31 = vcombine.high %v406_v25, %v410_v27  ;;  %v465_v23 = vld [vmem:[%s3257_s21 + $0x7e0] sm:$0xff]  ;;  %v462_v24 = vld [vmem:[%s3257_s21 + $0x7c8] sm:$0xff] }
  0x58   : > { %2169 = vmatprep.subr.bf16.mxu0 %v2913_v32  ;;  %2292 = vmatprep.subr.bf16.mxu1 %v2915_v33  ;;  %v413_v32 = vld [vmem:[%s3257_s21 + $0x640] sm:$0xff]  ;;  %v466_v25 = vld [vmem:[%s3257_s21 + $0x7e8] sm:$0xff] }
  0x59   : > { %2199 = vmatprep.mubr.bf16.mxu0 %v3351_v36  ;;  %2322 = vmatprep.mubr.bf16.mxu1 %v3351_v36  ;;  %v417_v33 = vld [vmem:[%s3257_s21 + $0x660] sm:$0xff] }
  0x5a   : > { %v2976_v45 = vcombine.low %v413_v32, %v417_v33 }
  0x5b   : > { %2170 = vmatpush1.bf16.msra.mxu0 %v2912_v39  ;;  %2293 = vmatpush1.bf16.msra.mxu1 %v2914_v40  ;;  %v2977_v39 = vcombine.high %v413_v32, %v417_v33  ;;  %v2979_v40 = vcombine.high %v414_v34, %v418_v35  ;;  %v473_v32 = vld [vmem:[%s3257_s21 + $0x820] sm:$0xff]  ;;  %v470_v33 = vld [vmem:[%s3257_s21 + $0x808] sm:$0xff] }
  0x5c   : > { %2171 = vmatprep.subr.bf16.mxu0 %v2921_v41  ;;  %2294 = vmatprep.subr.bf16.mxu1 %v2923_v42  ;;  %v421_v41 = vld [vmem:[%s3257_s21 + $0x680] sm:$0xff]  ;;  %v474_v34 = vld [vmem:[%s3257_s21 + $0x828] sm:$0xff] }
  0x5d   : > { %v425_v42 = vld [vmem:[%s3257_s21 + $0x6a0] sm:$0xff] }
  0x5e   : > { %v2984_v53 = vcombine.low %v421_v41, %v425_v42 }
  0x5f   : > { %2172 = vmatpush1.bf16.msra.mxu0 %v2920_v47  ;;  %2295 = vmatpush1.bf16.msra.mxu1 %v2922_v48  ;;  %v2985_v47 = vcombine.high %v421_v41, %v425_v42  ;;  %v2987_v48 = vcombine.high %v422_v43, %v426_v44  ;;  %v481_v41 = vld [vmem:[%s3257_s21 + $0x860] sm:$0xff]  ;;  %v478_v42 = vld [vmem:[%s3257_s21 + $0x848] sm:$0xff] }
  0x60   : > { %2173 = vmatprep.subr.bf16.mxu0 %v2929_v49  ;;  %2296 = vmatprep.subr.bf16.mxu1 %v2931_v50  ;;  %v429_v49 = vld [vmem:[%s3257_s21 + $0x6c0] sm:$0xff]  ;;  %v482_v43 = vld [vmem:[%s3257_s21 + $0x868] sm:$0xff] }
  0x61   : > { %v433_v50 = vld [vmem:[%s3257_s21 + $0x6e0] sm:$0xff] }
  0x62   : > { %v2992_v61 = vcombine.low %v429_v49, %v433_v50 }
  0x63   : > { %2174 = vmatpush1.bf16.msra.mxu0 %v2928_v55  ;;  %2297 = vmatpush1.bf16.msra.mxu1 %v2930_v56  ;;  %v2993_v55 = vcombine.high %v429_v49, %v433_v50  ;;  %v2995_v56 = vcombine.high %v430_v51, %v434_v52  ;;  %v489_v49 = vld [vmem:[%s3257_s21 + $0x8a0] sm:$0xff]  ;;  %v486_v50 = vld [vmem:[%s3257_s21 + $0x888] sm:$0xff] }
  0x64   : > { %2175 = vmatprep.subr.bf16.mxu0 %v2937_v57  ;;  %2298 = vmatprep.subr.bf16.mxu1 %v2939_v58  ;;  %v437_v57 = vld [vmem:[%s3257_s21 + $0x700] sm:$0xff]  ;;  %v490_v51 = vld [vmem:[%s3257_s21 + $0x8a8] sm:$0xff] }
  0x65   : > { %v441_v58 = vld [vmem:[%s3257_s21 + $0x720] sm:$0xff] }
  0x66   : > { %v3000_v7 = vcombine.low %v437_v57, %v441_v58 }
  0x67   : > { %2176 = vmatpush1.bf16.msra.mxu0 %v2936_v63  ;;  %2299 = vmatpush1.bf16.msra.mxu1 %v2938_v0  ;;  %v3001_v63 = vcombine.high %v437_v57, %v441_v58  ;;  %v3003_v0 = vcombine.high %v438_v59, %v442_v60  ;;  %v497_v57 = vld [vmem:[%s3257_s21 + $0x8e0] sm:$0xff]  ;;  %v494_v58 = vld [vmem:[%s3257_s21 + $0x8c8] sm:$0xff] }
  0x68   : > { %2177 = vmatprep.subr.bf16.mxu0 %v2945_v1  ;;  %2300 = vmatprep.subr.bf16.mxu1 %v2947_v2  ;;  %v445_v1 = vld [vmem:[%s3257_s21 + $0x740] sm:$0xff]  ;;  %v498_v59 = vld [vmem:[%s3257_s21 + $0x8e8] sm:$0xff] }
  0x69   : > { %v449_v2 = vld [vmem:[%s3257_s21 + $0x760] sm:$0xff] }
  0x6a   : > { %v3008_v17 = vcombine.low %v445_v1, %v449_v2 }
  0x6b   : > { %2178 = vmatpush1.bf16.msra.mxu0 %v2944_v9  ;;  %2301 = vmatpush1.bf16.msra.mxu1 %v2946_v11  ;;  %v3009_v9 = vcombine.high %v445_v1, %v449_v2  ;;  %v521_v11 = vld [vmem:[%s3648_s2] sm:$0xf]  ;;  %v502_v2 = vld [vmem:[%s3257_s21 + $0x908] sm:$0xff] }
  0x6c   : > { %2179 = vmatprep.subr.bf16.mxu0 %v2953_v12  ;;  %2302 = vmatprep.subr.bf16.mxu1 %v2955_v13  ;;  %v3011_v12 = vcombine.high %v446_v3, %v450_v4  ;;  %v453_v13 = vld [vmem:[%s3257_s21 + $0x780] sm:$0xff] }
  0x6d   : > { %524 = vperm.xlu0 %3170, %v521_v11   ;;  %v3016_v27 = vcombine.low %v453_v13, %v457_v14  ;;  %v505_v1 = vld [vmem:[%s3257_s21 + $0x920] sm:$0xff] }
  0x6e   : > { %v509_v11 = vld [vmem:[%s3257_s21 + $0x940] sm:$0xff] }
  0x6f   : > { %2180 = vmatpush1.bf16.msra.mxu0 %v2952_v18  ;;  %2303 = vmatpush1.bf16.msra.mxu1 %v2954_v19  ;;  %v3010_v18 = vcombine.low %v446_v3, %v450_v4  ;;  %v3017_v19 = vcombine.high %v453_v13, %v457_v14  ;;  %v506_v3 = vld [vmem:[%s3257_s21 + $0x928] sm:$0xff] }
  0x70   : > { %2181 = vmatprep.subr.bf16.mxu0 %v2961_v20  ;;  %2304 = vmatprep.subr.bf16.mxu1 %v2963_v21  ;;  %v3019_v20 = vcombine.high %v454_v15, %v458_v16  ;;  %v461_v21 = vld [vmem:[%s3257_s21 + $0x7c0] sm:$0xff]  ;;  %v510_v13 = vld [vmem:[%s3257_s21 + $0x948] sm:$0xff] }
  0x71   : > { %v3024_v35 = vcombine.low %v461_v21, %v465_v23  ;;  %v514_v14 = vld [vmem:[%s3257_s21 + $0x968] sm:$0xff] }
  0x73   : > { %2182 = vmatpush1.bf16.msra.mxu0 %v2960_v5  ;;  %2305 = vmatpush1.bf16.msra.mxu1 %v2962_v29  ;;  %v3018_v5 = vcombine.low %v454_v15, %v458_v16  ;;  %v3025_v29 = vcombine.high %v461_v21, %v465_v23  ;;  %v3066_v16 = vcombine.low %v502_v2, %v506_v3 }
  0x74   : > { %2183 = vmatprep.subr.bf16.mxu0 %v2969_v30  ;;  %2306 = vmatprep.subr.bf16.mxu1 %v2971_v31  ;;  %v3027_v30 = vcombine.high %v462_v24, %v466_v25  ;;  %v469_v31 = vld [vmem:[%s3257_s21 + $0x800] sm:$0xff]  ;;  %v3074_v23 = vcombine.low %v510_v13, %v514_v14 }
  0x75   : > { %v3032_v44 = vcombine.low %v469_v31, %v473_v32 }
  0x77   : > { %2184 = vmatpush1.bf16.msra.mxu0 %v2968_v37  ;;  %2307 = vmatpush1.bf16.msra.mxu1 %v2970_v38  ;;  %v3026_v37 = vcombine.low %v462_v24, %v466_v25  ;;  %v3033_v38 = vcombine.high %v469_v31, %v473_v32  ;;  %v216_v31 = vld [vmem:[%s3257_s21 + $0x18] sm:$0xff] }
  0x78   : > { %2185 = vmatprep.subr.bf16.mxu0 %v2977_v39  ;;  %2308 = vmatprep.subr.bf16.mxu1 %v2979_v40  ;;  %v3035_v39 = vcombine.high %v470_v33, %v474_v34  ;;  %v477_v40 = vld [vmem:[%s3257_s21 + $0x840] sm:$0xff]  ;;  %v220_v32 = vld [vmem:[%s3257_s21 + $0x38] sm:$0xff] }
  0x79   : > { %v3040_v52 = vcombine.low %v477_v40, %v481_v41 }
  0x7b   : > { %2186 = vmatpush1.bf16.msra.mxu0 %v2976_v45  ;;  %2309 = vmatpush1.bf16.msra.mxu1 %v2978_v46  ;;  %v3034_v45 = vcombine.low %v470_v33, %v474_v34  ;;  %v3041_v46 = vcombine.high %v477_v40, %v481_v41  ;;  %v224_v40 = vld [vmem:[%s3257_s21 + $0x58] sm:$0xff] }
  0x7c   : > { %2187 = vmatprep.subr.bf16.mxu0 %v2985_v47  ;;  %2310 = vmatprep.subr.bf16.mxu1 %v2987_v48  ;;  %v3043_v47 = vcombine.high %v478_v42, %v482_v43  ;;  %v485_v48 = vld [vmem:[%s3257_s21 + $0x880] sm:$0xff]  ;;  %v228_v41 = vld [vmem:[%s3257_s21 + $0x78] sm:$0xff] }
  0x7d   : > { %v3048_v60 = vcombine.low %v485_v48, %v489_v49 }
  0x7f   : > { %2188 = vmatpush1.bf16.msra.mxu0 %v2984_v53  ;;  %2311 = vmatpush1.bf16.msra.mxu1 %v2986_v54  ;;  %v3042_v53 = vcombine.low %v478_v42, %v482_v43  ;;  %v3049_v54 = vcombine.high %v485_v48, %v489_v49  ;;  %v3459_v42 = vld.sshfl [vmem:[%s3646_s0 + $0x8] sm:$0x3 pattern:$0x76325410]  ;;  %v235_v48 = vld [vmem:[%s3257_s21 + $0xb0] sm:$0xff]  ;;  %v232_v49 = vld [vmem:[%s3257_s21 + $0x98] sm:$0xff] }
  0x80   : > { %2189 = vmatprep.subr.bf16.mxu0 %v2993_v55  ;;  %2312 = vmatprep.subr.bf16.mxu1 %v2995_v56  ;;  %v3051_v55 = vcombine.high %v486_v50, %v490_v51  ;;  %v493_v56 = vld [vmem:[%s3257_s21 + $0x8c0] sm:$0xff] }
  0x81   : > { %v3056_v4 = vcombine.low %v493_v56, %v497_v57 }
  0x83   : > { %2190 = vmatpush1.bf16.msra.mxu0 %v2992_v61  ;;  %2313 = vmatpush1.bf16.msra.mxu1 %v2994_v62  ;;  %v3050_v61 = vcombine.low %v486_v50, %v490_v51  ;;  %v3057_v62 = vcombine.high %v493_v56, %v497_v57  ;;  %v236_v50 = vld [vmem:[%s3257_s21 + $0xb8] sm:$0xff]  ;;  %v243_v56 = vld [vmem:[%s3257_s21 + $0xf0] sm:$0xff] }
  0x84   : > { %2191 = vmatprep.subr.bf16.mxu0 %v3001_v63  ;;  %2314 = vmatprep.subr.bf16.mxu1 %v3003_v0  ;;  %v3059_v63 = vcombine.high %v494_v58, %v498_v59  ;;  %v501_v0 = vld [vmem:[%s3257_s21 + $0x900] sm:$0xff]  ;;  %v240_v57 = vld [vmem:[%s3257_s21 + $0xd8] sm:$0xff] }
  0x85   : > { %v3064_v15 = vcombine.low %v501_v0, %v505_v1 }
  0x87   : > { %2192 = vmatpush1.bf16.msra.mxu0 %v3000_v7  ;;  %2315 = vmatpush1.bf16.msra.mxu1 %v3002_v8  ;;  %v3058_v7 = vcombine.low %v494_v58, %v498_v59  ;;  %v3065_v8 = vcombine.high %v501_v0, %v505_v1  ;;  %v244_v58 = vld [vmem:[%s3257_s21 + $0xf8] sm:$0xff]  ;;  %v251_v0 = vld [vmem:[%s3257_s21 + $0x130] sm:$0xff] }
  0x88   : > { %2193 = vmatprep.subr.bf16.mxu0 %v3009_v9  ;;  %2316 = vmatprep.subr.bf16.mxu1 %v3011_v12  ;;  %v3067_v9 = vcombine.high %v502_v2, %v506_v3  ;;  %v513_v12 = vld [vmem:[%s3257_s21 + $0x960] sm:$0xff]  ;;  %v248_v1 = vld [vmem:[%s3257_s21 + $0x118] sm:$0xff] }
  0x89   : > { %v3072_v21 = vcombine.low %v509_v11, %v513_v12  ;;  %v252_v2 = vld [vmem:[%s3257_s21 + $0x138] sm:$0xff] }
  0x8b   : > { %2194 = vmatpush1.bf16.msra.mxu0 %v3008_v17  ;;  %2317 = vmatpush1.bf16.msra.mxu1 %v3010_v18  ;;  %v3073_v17 = vcombine.high %v509_v11, %v513_v12  ;;  %v3075_v18 = vcombine.high %v510_v13, %v514_v14  ;;  %v256_v11 = vld [vmem:[%s3257_s21 + $0x158] sm:$0xff]  ;;  %v2814_v14 = vcombine.low %v248_v1, %v252_v2 }
  0x8c   : > { %2195 = vmatprep.subr.bf16.mxu0 %v3017_v19  ;;  %2318 = vmatprep.subr.bf16.mxu1 %v3019_v20  ;;  %v517_v19 = vld [vmem:[%s3257_s21 + $0x980] sm:$0x33]  ;;  %v518_v20 = vld [vmem:[%s3257_s21 + $0x988] sm:$0x33]  ;;  %v260_v12 = vld [vmem:[%s3257_s21 + $0x178] sm:$0xff] }
  0x8d   : > { %v3081_v24 = vcombine.high %v517_v19, %v517_v19  ;;  %v3080_v25 = vcombine.low %v517_v19, %v517_v19  ;;  %v264_v19 = vld [vmem:[%s3257_s21 + $0x198] sm:$0xff] }
  0x8f   : > { %2196 = vmatpush1.bf16.msra.mxu0 %v3016_v27  ;;  %2319 = vmatpush1.bf16.msra.mxu1 %v3018_v5  ;;  %v3083_v27 = vcombine.high %v518_v20, %v518_v20  ;;  %v3082_v5 = vcombine.low %v518_v20, %v518_v20  ;;  %v2103_v33 = vsel %vm2101_vm0, %v3080_v25, 0  ;;  %v268_v20 = vld [vmem:[%s3257_s21 + $0x1b8] sm:$0xff] }
  0x90   : > { %2197 = vmatprep.subr.bf16.mxu0 %v3025_v29  ;;  %2320 = vmatprep.subr.bf16.mxu1 %v3027_v30  ;;  %v215_v29 = vld [vmem:[%s3257_s21 + $0x10] sm:$0xff]  ;;  %v2831_v25 = vcombine.high %v264_v19, %v268_v20 }
  0x91   : > { %v219_v30 = vld [vmem:[%s3257_s21 + $0x30] sm:$0xff] }
  0x92   : > { %v2781_v34 = vcombine.high %v215_v29, %v219_v30  ;;  %v2780_v43 = vcombine.low %v215_v29, %v219_v30  ;;  %v272_v29 = vld [vmem:[%s3257_s21 + $0x1d8] sm:$0xff] }
  0x93   : > { %2198 = vmatpush1.bf16.msra.mxu0 %v3024_v35  ;;  %2321 = vmatpush1.bf16.msra.mxu1 %v3026_v37  ;;  %v2109_v35 = vsel %vm2101_vm0, %v3082_v5, 0  ;;  %v2783_v37 = vcombine.high %v216_v31, %v220_v32  ;;  %v275_v5 = vld [vmem:[%s3257_s21 + $0x1f0] sm:$0xff]  ;;  %v276_v30 = vld [vmem:[%s3257_s21 + $0x1f8] sm:$0xff] }
  0x94   : > { %2208 = vmatprep.subr.bf16.mxu0 %v3033_v38  ;;  %2331 = vmatprep.subr.bf16.mxu1 %v3035_v39  ;;  %v223_v38 = vld [vmem:[%s3257_s21 + $0x50] sm:$0xff] }
  0x95   : > { %v227_v39 = vld [vmem:[%s3257_s21 + $0x70] sm:$0xff] }
  0x96   : > { %2200 = vmatmul.mubr.bf16.vlgmr.msra.gmra.mrb[0].mxu0 %v3343_v28  ;;  %2323 = vmatmul.mubr.bf16.vlgmr.msra.gmra.mrb[0].mxu1 %v3343_v28  ;;  %v2788_v51 = vcombine.low %v223_v38, %v227_v39 }
  0x97   : > { %2209 = vmatpush1.bf16.msra.mxu0 %v3032_v44  ;;  %2332 = vmatpush1.bf16.msra.mxu1 %v3034_v45  ;;  %v2782_v44 = vcombine.low %v216_v31, %v220_v32  ;;  %v2789_v45 = vcombine.high %v223_v38, %v227_v39  ;;  %v2830_v32 = vcombine.low %v264_v19, %v268_v20  ;;  %v280_v38 = vld [vmem:[%s3257_s21 + $0x218] sm:$0xff] }
  0x98   : > { %2210 = vmatprep.subr.bf16.mxu0 %v3041_v46  ;;  %2333 = vmatprep.subr.bf16.mxu1 %v3043_v47  ;;  %v2791_v46 = vcombine.high %v224_v40, %v228_v41  ;;  %v231_v47 = vld [vmem:[%s3257_s21 + $0x90] sm:$0xff]  ;;  %v284_v39 = vld [vmem:[%s3257_s21 + $0x238] sm:$0xff] }
  0x99   : > { %2240 = vmatprep.mubr.bf16.mxu0 %v3205_v22  ;;  %2363 = vmatprep.mubr.bf16.mxu1 %v3205_v22  ;;  %v2796_v59 = vcombine.low %v231_v47, %v235_v48 }
  0x9b   : > { %2211 = vmatpush1.bf16.msra.mxu0 %v3040_v52  ;;  %2334 = vmatpush1.bf16.msra.mxu1 %v3042_v53  ;;  %v2790_v52 = vcombine.low %v224_v40, %v228_v41  ;;  %v2797_v53 = vcombine.high %v231_v47, %v235_v48  ;;  %v2838_v41 = vcombine.low %v272_v29, %v276_v30  ;;  %v288_v47 = vld [vmem:[%s3257_s21 + $0x258] sm:$0xff] }
  0x9c   : > { %2212 = vmatprep.subr.bf16.mxu0 %v3049_v54  ;;  %2335 = vmatprep.subr.bf16.mxu1 %v3051_v55  ;;  %v2799_v54 = vcombine.high %v232_v49, %v236_v50  ;;  %v239_v55 = vld [vmem:[%s3257_s21 + $0xd0] sm:$0xff]  ;;  %v292_v48 = vld [vmem:[%s3257_s21 + $0x278] sm:$0xff] }
  0x9d   : > { %v2804_v3 = vcombine.low %v239_v55, %v243_v56 }
  0x9f   : > { %2213 = vmatpush1.bf16.msra.mxu0 %v3048_v60  ;;  %2336 = vmatpush1.bf16.msra.mxu1 %v3050_v61  ;;  %v2798_v60 = vcombine.low %v232_v49, %v236_v50  ;;  %v2805_v61 = vcombine.high %v239_v55, %v243_v56  ;;  %v2846_v50 = vcombine.low %v280_v38, %v284_v39  ;;  %v296_v55 = vld [vmem:[%s3257_s21 + $0x298] sm:$0xff] }
  0xa0   : > { %2214 = vmatprep.subr.bf16.mxu0 %v3057_v62  ;;  %2337 = vmatprep.subr.bf16.mxu1 %v3059_v63  ;;  %v2807_v62 = vcombine.high %v240_v57, %v244_v58  ;;  %v247_v63 = vld [vmem:[%s3257_s21 + $0x110] sm:$0xff]  ;;  %v300_v56 = vld [vmem:[%s3257_s21 + $0x2b8] sm:$0xff] }
  0xa1   : > { %v2812_v13 = vcombine.low %v247_v63, %v251_v0 }
  0xa3   : > { %2215 = vmatpush1.bf16.msra.mxu0 %v3056_v4  ;;  %2338 = vmatpush1.bf16.msra.mxu1 %v3058_v7  ;;  %v2813_v4 = vcombine.high %v247_v63, %v251_v0  ;;  %v2815_v7 = vcombine.high %v248_v1, %v252_v2  ;;  %v304_v63 = vld [vmem:[%s3257_s21 + $0x2d8] sm:$0xff]  ;;  %v2862_v2 = vcombine.low %v296_v55, %v300_v56 }
  0xa4   : > { %2216 = vmatprep.subr.bf16.mxu0 %v3065_v8  ;;  %2339 = vmatprep.subr.bf16.mxu1 %v3067_v9  ;;  %v255_v8 = vld [vmem:[%s3257_s21 + $0x150] sm:$0xff]  ;;  %v308_v0 = vld [vmem:[%s3257_s21 + $0x2f8] sm:$0xff] }
  0xa5   : > { %v259_v9 = vld [vmem:[%s3257_s21 + $0x170] sm:$0xff] }
  0xa7   : > { %2217 = vmatpush1.bf16.msra.mxu0 %v3064_v15  ;;  %2340 = vmatpush1.bf16.msra.mxu1 %v3066_v16  ;;  %v2821_v15 = vcombine.high %v255_v8, %v259_v9  ;;  %v2823_v16 = vcombine.high %v256_v11, %v260_v12 }
  0xa8   : > { %2218 = vmatprep.subr.bf16.mxu0 %v3073_v17  ;;  %2341 = vmatprep.subr.bf16.mxu1 %v3075_v18  ;;  %v263_v17 = vld [vmem:[%s3257_s21 + $0x190] sm:$0xff] }
  0xa9   : > { %v267_v18 = vld [vmem:[%s3257_s21 + $0x1b0] sm:$0xff] }
  0xaa   : > { %v2828_v31 = vcombine.low %v263_v17, %v267_v18 }
  0xab   : > { %2219 = vmatpush1.bf16.msra.mxu0 %v3072_v21  ;;  %2342 = vmatpush1.bf16.msra.mxu1 %v3074_v23  ;;  %v2820_v21 = vcombine.low %v255_v8, %v259_v9  ;;  %v2822_v23 = vcombine.low %v256_v11, %v260_v12  ;;  %v312_v8 = vld [vmem:[%s3257_s21 + $0x318] sm:$0xff]  ;;  %v2870_v12 = vcombine.low %v304_v63, %v308_v0 }
  0xac   : > { %3088 = vmatprep.subr.msk.bf16.mxu0 %vm2101_vm0, %v3081_v24  ;;  %3090 = vmatprep.subr.msk.bf16.mxu1 %vm2101_vm0, %v3083_v27  ;;  %v2829_v24 = vcombine.high %v263_v17, %v267_v18  ;;  %v271_v27 = vld [vmem:[%s3257_s21 + $0x1d0] sm:$0xff]  ;;  %v316_v9 = vld [vmem:[%s3257_s21 + $0x338] sm:$0xff] }
  0xad   : > { %v2836_v40 = vcombine.low %v271_v27, %v275_v5  ;;  %v320_v17 = vld [vmem:[%s3257_s21 + $0x358] sm:$0xff]  ;;  %v2878_v20 = vcombine.low %v312_v8, %v316_v9 }
  0xae   : > { %v324_v18 = vld [vmem:[%s3257_s21 + $0x378] sm:$0xff] }
  0xaf   : > { %2221 = vmatpush1.bf16.msra.mxu0 %v2103_v33  ;;  %2344 = vmatpush1.bf16.msra.mxu1 %v2109_v35  ;;  %v2837_v33 = vcombine.high %v271_v27, %v275_v5  ;;  %v279_v35 = vld [vmem:[%s3257_s21 + $0x210] sm:$0xff]  ;;  %v328_v27 = vld [vmem:[%s3257_s21 + $0x398] sm:$0xff] }
  0xb0   : > { %2372 = vmatprep.subr.bf16.mxu0 %v2781_v34  ;;  %2495 = vmatprep.subr.bf16.mxu1 %v2783_v37  ;;  %v2839_v34 = vcombine.high %v272_v29, %v276_v30  ;;  %v283_v37 = vld [vmem:[%s3257_s21 + $0x230] sm:$0xff]  ;;  %v332_v5 = vld [vmem:[%s3257_s21 + $0x3b8] sm:$0xff]  ;;  %v2886_v30 = vcombine.low %v320_v17, %v324_v18 }
  0xb1   : > { %v2844_v49 = vcombine.low %v279_v35, %v283_v37 }
  0xb2   : > { %3089 = vmatmul.mubr.msk.bf16.vlgmr.msra.gmra.mrb[0].mxu0 %vm2097_vm1, %v3459_v42  ;;  %3091 = vmatmul.mubr.msk.bf16.vlgmr.msra.gmra.mrb[0].mxu1 %vm2097_vm1, %v3459_v42 }
  0xb3   : > { %2373 = vmatpush1.bf16.msra.mxu0 %v2780_v43  ;;  %2496 = vmatpush1.bf16.msra.mxu1 %v2782_v44  ;;  %v2845_v43 = vcombine.high %v279_v35, %v283_v37  ;;  %v2847_v44 = vcombine.high %v280_v38, %v284_v39  ;;  %v336_v35 = vld [vmem:[%s3257_s21 + $0x3d8] sm:$0xff]  ;;  %v2894_v39 = vcombine.low %v328_v27, %v332_v5 }
  0xb4   : > { %2374 = vmatprep.subr.bf16.mxu0 %v2789_v45  ;;  %2497 = vmatprep.subr.bf16.mxu1 %v2791_v46  ;;  %v287_v45 = vld [vmem:[%s3257_s21 + $0x250] sm:$0xff]  ;;  %v340_v37 = vld [vmem:[%s3257_s21 + $0x3f8] sm:$0xff] }
  0xb5   : > { %2404 = vmatprep.mubr.bf16.mxu0 %v3277_v26  ;;  %2527 = vmatprep.mubr.bf16.mxu1 %v3277_v26  ;;  %v2806_v26 = vcombine.low %v240_v57, %v244_v58  ;;  %v291_v46 = vld [vmem:[%s3257_s21 + $0x270] sm:$0xff]  ;;  %v2854_v58 = vcombine.low %v288_v47, %v292_v48 }
  0xb6   : > { %v2852_v57 = vcombine.low %v287_v45, %v291_v46 }
  0xb7   : > { %2375 = vmatpush1.bf16.msra.mxu0 %v2788_v51  ;;  %2498 = vmatpush1.bf16.msra.mxu1 %v2790_v52  ;;  %v2853_v51 = vcombine.high %v287_v45, %v291_v46  ;;  %v2855_v52 = vcombine.high %v288_v47, %v292_v48  ;;  %v344_v45 = vld [vmem:[%s3257_s21 + $0x418] sm:$0xff]  ;;  %v2902_v48 = vcombine.low %v336_v35, %v340_v37 }
  0xb8   : > { %2376 = vmatprep.subr.bf16.mxu0 %v2797_v53  ;;  %2499 = vmatprep.subr.bf16.mxu1 %v2799_v54  ;;  %v295_v53 = vld [vmem:[%s3257_s21 + $0x290] sm:$0xff]  ;;  %v348_v46 = vld [vmem:[%s3257_s21 + $0x438] sm:$0xff] }
  0xb9   : > { %v299_v54 = vld [vmem:[%s3257_s21 + $0x2b0] sm:$0xff] }
  0xba   : > { %v2860_v1 = vcombine.low %v295_v53, %v299_v54 }
  0xbb   : > { %2377 = vmatpush1.bf16.msra.mxu0 %v2796_v59  ;;  %2500 = vmatpush1.bf16.msra.mxu1 %v2798_v60  ;;  %v2861_v59 = vcombine.high %v295_v53, %v299_v54  ;;  %v2863_v60 = vcombine.high %v296_v55, %v300_v56  ;;  %v352_v53 = vld [vmem:[%s3257_s21 + $0x458] sm:$0xff]  ;;  %v2910_v56 = vcombine.low %v344_v45, %v348_v46 }
  0xbc   : > { %2378 = vmatprep.subr.bf16.mxu0 %v2805_v61  ;;  %2501 = vmatprep.subr.bf16.mxu1 %v2807_v62  ;;  %v303_v61 = vld [vmem:[%s3257_s21 + $0x2d0] sm:$0xff]  ;;  %v356_v54 = vld [vmem:[%s3257_s21 + $0x478] sm:$0xff] }
  0xbd   : > { %v307_v62 = vld [vmem:[%s3257_s21 + $0x2f0] sm:$0xff] }
  0xbe   : > { %v2868_v11 = vcombine.low %v303_v61, %v307_v62 }
  0xbf   : > { %2379 = vmatpush1.bf16.msra.mxu0 %v2804_v3  ;;  %2502 = vmatpush1.bf16.msra.mxu1 %v2806_v26  ;;  %v2869_v3 = vcombine.high %v303_v61, %v307_v62  ;;  %v2871_v26 = vcombine.high %v304_v63, %v308_v0  ;;  %v360_v61 = vld [vmem:[%s3257_s21 + $0x498] sm:$0xff]  ;;  %v2918_v0 = vcombine.low %v352_v53, %v356_v54 }
  0xc0   : > { %2380 = vmatprep.subr.bf16.mxu0 %v2813_v4  ;;  %2503 = vmatprep.subr.bf16.mxu1 %v2815_v7  ;;  %v311_v4 = vld [vmem:[%s3257_s21 + $0x310] sm:$0xff]  ;;  %v364_v62 = vld [vmem:[%s3257_s21 + $0x4b8] sm:$0xff] }
  0xc1   : > { %v315_v7 = vld [vmem:[%s3257_s21 + $0x330] sm:$0xff] }
  0xc2   : > { %v2876_v19 = vcombine.low %v311_v4, %v315_v7 }
  0xc3   : > { %2381 = vmatpush1.bf16.msra.mxu0 %v2812_v13  ;;  %2504 = vmatpush1.bf16.msra.mxu1 %v2814_v14  ;;  %v2877_v13 = vcombine.high %v311_v4, %v315_v7  ;;  %v2879_v14 = vcombine.high %v312_v8, %v316_v9  ;;  %v368_v4 = vld [vmem:[%s3257_s21 + $0x4d8] sm:$0xff]  ;;  %v2926_v8 = vcombine.low %v360_v61, %v364_v62 }
  0xc4   : > { %2382 = vmatprep.subr.bf16.mxu0 %v2821_v15  ;;  %2505 = vmatprep.subr.bf16.mxu1 %v2823_v16  ;;  %v319_v15 = vld [vmem:[%s3257_s21 + $0x350] sm:$0xff]  ;;  %v372_v7 = vld [vmem:[%s3257_s21 + $0x4f8] sm:$0xff] }
  0xc5   : > { %v323_v16 = vld [vmem:[%s3257_s21 + $0x370] sm:$0xff] }
  0xc6   : > { %v2884_v29 = vcombine.low %v319_v15, %v323_v16 }
  0xc7   : > { %2383 = vmatpush1.bf16.msra.mxu0 %v2820_v21  ;;  %2506 = vmatpush1.bf16.msra.mxu1 %v2822_v23  ;;  %v2885_v21 = vcombine.high %v319_v15, %v323_v16  ;;  %v2887_v23 = vcombine.high %v320_v17, %v324_v18  ;;  %v380_v15 = vld [vmem:[%s3257_s21 + $0x538] sm:$0xff] }
  0xc8   : > { %2384 = vmatprep.subr.bf16.mxu0 %v2829_v24  ;;  %2507 = vmatprep.subr.bf16.mxu1 %v2831_v25  ;;  %v327_v24 = vld [vmem:[%s3257_s21 + $0x390] sm:$0xff] }
  0xc9   : > { %v331_v25 = vld [vmem:[%s3257_s21 + $0x3b0] sm:$0xff] }
  0xca   : > { %v2892_v38 = vcombine.low %v327_v24, %v331_v25 }
  0xcb   : > { %2385 = vmatpush1.bf16.msra.mxu0 %v2828_v31  ;;  %2508 = vmatpush1.bf16.msra.mxu1 %v2830_v32  ;;  %v2893_v31 = vcombine.high %v327_v24, %v331_v25  ;;  %v2895_v32 = vcombine.high %v328_v27, %v332_v5 }
  0xcc   : > { %2386 = vmatprep.subr.bf16.mxu0 %v2837_v33  ;;  %2509 = vmatprep.subr.bf16.mxu1 %v2839_v34  ;;  %v335_v33 = vld [vmem:[%s3257_s21 + $0x3d0] sm:$0xff] }
  0xcd   : > { %v339_v34 = vld [vmem:[%s3257_s21 + $0x3f0] sm:$0xff] }
  0xce   : > { %v2900_v47 = vcombine.low %v335_v33, %v339_v34 }
  0xcf   : > { %2387 = vmatpush1.bf16.msra.mxu0 %v2836_v40  ;;  %2510 = vmatpush1.bf16.msra.mxu1 %v2838_v41  ;;  %v2901_v40 = vcombine.high %v335_v33, %v339_v34  ;;  %v2903_v41 = vcombine.high %v336_v35, %v340_v37 }
  0xd0   : > { %2388 = vmatprep.subr.bf16.mxu0 %v2845_v43  ;;  %2511 = vmatprep.subr.bf16.mxu1 %v2847_v44  ;;  %v343_v43 = vld [vmem:[%s3257_s21 + $0x410] sm:$0xff] }
  0xd1   : > { %v347_v44 = vld [vmem:[%s3257_s21 + $0x430] sm:$0xff] }
  0xd2   : > { %v2908_v55 = vcombine.low %v343_v43, %v347_v44 }
  0xd3   : > { %2389 = vmatpush1.bf16.msra.mxu0 %v2844_v49  ;;  %2512 = vmatpush1.bf16.msra.mxu1 %v2846_v50  ;;  %v2909_v49 = vcombine.high %v343_v43, %v347_v44  ;;  %v2911_v50 = vcombine.high %v344_v45, %v348_v46 }
  0xd4   : > { %2390 = vmatprep.subr.bf16.mxu0 %v2853_v51  ;;  %2513 = vmatprep.subr.bf16.mxu1 %v2855_v52  ;;  %v351_v51 = vld [vmem:[%s3257_s21 + $0x450] sm:$0xff] }
  0xd5   : > { %v355_v52 = vld [vmem:[%s3257_s21 + $0x470] sm:$0xff] }
  0xd6   : > { %v2916_v63 = vcombine.low %v351_v51, %v355_v52 }
  0xd7   : > { %2391 = vmatpush1.bf16.msra.mxu0 %v2852_v57  ;;  %2514 = vmatpush1.bf16.msra.mxu1 %v2854_v58  ;;  %v2917_v57 = vcombine.high %v351_v51, %v355_v52  ;;  %v2919_v58 = vcombine.high %v352_v53, %v356_v54 }
  0xd8   : > { %2392 = vmatprep.subr.bf16.mxu0 %v2861_v59  ;;  %2515 = vmatprep.subr.bf16.mxu1 %v2863_v60  ;;  %v359_v59 = vld [vmem:[%s3257_s21 + $0x490] sm:$0xff] }
  0xd9   : > { %v363_v60 = vld [vmem:[%s3257_s21 + $0x4b0] sm:$0xff] }
  0xdb   : > { %2393 = vmatpush1.bf16.msra.mxu0 %v2860_v1  ;;  %2516 = vmatpush1.bf16.msra.mxu1 %v2862_v2  ;;  %v2925_v1 = vcombine.high %v359_v59, %v363_v60  ;;  %v2927_v2 = vcombine.high %v360_v61, %v364_v62 }
  0xdc   : > { %2394 = vmatprep.subr.bf16.mxu0 %v2869_v3  ;;  %2517 = vmatprep.subr.bf16.mxu1 %v2871_v26  ;;  %v367_v3 = vld [vmem:[%s3257_s21 + $0x4d0] sm:$0xff] }
  0xdd   : > { %v371_v26 = vld [vmem:[%s3257_s21 + $0x4f0] sm:$0xff] }
  0xde   : > { %v2933_v9 = vcombine.high %v367_v3, %v371_v26  ;;  %v2932_v16 = vcombine.low %v367_v3, %v371_v26 }
  0xdf   : > { %2395 = vmatpush1.bf16.msra.mxu0 %v2868_v11  ;;  %2518 = vmatpush1.bf16.msra.mxu1 %v2870_v12  ;;  %v2935_v11 = vcombine.high %v368_v4, %v372_v7  ;;  %v375_v12 = vld [vmem:[%s3257_s21 + $0x510] sm:$0xff] }
  0xe0   : > { %2396 = vmatprep.subr.bf16.mxu0 %v2877_v13  ;;  %2519 = vmatprep.subr.bf16.mxu1 %v2879_v14  ;;  %v379_v13 = vld [vmem:[%s3257_s21 + $0x530] sm:$0xff]  ;;  %v376_v14 = vld [vmem:[%s3257_s21 + $0x518] sm:$0xff] }
  0xe1   : > { %v2941_v17 = vcombine.high %v375_v12, %v379_v13  ;;  %v2943_v18 = vcombine.high %v376_v14, %v380_v15  ;;  %v2940_v24 = vcombine.low %v375_v12, %v379_v13  ;;  %v2942_v25 = vcombine.low %v376_v14, %v380_v15 }
  0xe3   : > { %2397 = vmatpush1.bf16.msra.mxu0 %v2876_v19  ;;  %2520 = vmatpush1.bf16.msra.mxu1 %v2878_v20  ;;  %v383_v19 = vld [vmem:[%s3257_s21 + $0x550] sm:$0xff] }
  0xe4   : > { %2398 = vmatprep.subr.bf16.mxu0 %v2885_v21  ;;  %2521 = vmatprep.subr.bf16.mxu1 %v2887_v23  ;;  %v387_v20 = vld [vmem:[%s3257_s21 + $0x570] sm:$0xff]  ;;  %v384_v21 = vld [vmem:[%s3257_s21 + $0x558] sm:$0xff] }
  0xe5   : > { %v388_v23 = vld [vmem:[%s3257_s21 + $0x578] sm:$0xff]  ;;  %v2949_v27 = vcombine.high %v383_v19, %v387_v20  ;;  %v2948_v33 = vcombine.low %v383_v19, %v387_v20 }
  0xe6   : > { %v2951_v5 = vcombine.high %v384_v21, %v388_v23  ;;  %v2950_v34 = vcombine.low %v384_v21, %v388_v23 }
  0xe7   : > { %2399 = vmatpush1.bf16.msra.mxu0 %v2884_v29  ;;  %2522 = vmatpush1.bf16.msra.mxu1 %v2886_v30  ;;  %v391_v29 = vld [vmem:[%s3257_s21 + $0x590] sm:$0xff] }
  0xe8   : > { %2400 = vmatprep.subr.bf16.mxu0 %v2893_v31  ;;  %2523 = vmatprep.subr.bf16.mxu1 %v2895_v32  ;;  %v395_v30 = vld [vmem:[%s3257_s21 + $0x5b0] sm:$0xff]  ;;  %v392_v31 = vld [vmem:[%s3257_s21 + $0x598] sm:$0xff] }
  0xe9   : > { %v396_v32 = vld [vmem:[%s3257_s21 + $0x5b8] sm:$0xff]  ;;  %v2957_v35 = vcombine.high %v391_v29, %v395_v30  ;;  %v2956_v43 = vcombine.low %v391_v29, %v395_v30 }
  0xea   : > { %v2959_v37 = vcombine.high %v392_v31, %v396_v32  ;;  %v2958_v44 = vcombine.low %v392_v31, %v396_v32 }
  0xeb   : > { %2401 = vmatpush1.bf16.msra.mxu0 %v2892_v38  ;;  %2524 = vmatpush1.bf16.msra.mxu1 %v2894_v39  ;;  %v399_v38 = vld [vmem:[%s3257_s21 + $0x5d0] sm:$0xff] }
  0xec   : > { %2402 = vmatprep.subr.bf16.mxu0 %v2901_v40  ;;  %2525 = vmatprep.subr.bf16.mxu1 %v2903_v41  ;;  %v403_v39 = vld [vmem:[%s3257_s21 + $0x5f0] sm:$0xff]  ;;  %v400_v40 = vld [vmem:[%s3257_s21 + $0x5d8] sm:$0xff] }
  0xed   : > { %v404_v41 = vld [vmem:[%s3257_s21 + $0x5f8] sm:$0xff]  ;;  %v2965_v45 = vcombine.high %v399_v38, %v403_v39  ;;  %v2964_v51 = vcombine.low %v399_v38, %v403_v39 }
  0xee   : > { %v2967_v46 = vcombine.high %v400_v40, %v404_v41  ;;  %v2966_v52 = vcombine.low %v400_v40, %v404_v41 }
  0xef   : > { %2403 = vmatpush1.bf16.msra.mxu0 %v2900_v47  ;;  %2526 = vmatpush1.bf16.msra.mxu1 %v2902_v48  ;;  %v407_v47 = vld [vmem:[%s3257_s21 + $0x610] sm:$0xff] }
  0xf0   : > { %2413 = vmatprep.subr.bf16.mxu0 %v2909_v49  ;;  %2536 = vmatprep.subr.bf16.mxu1 %v2911_v50  ;;  %v411_v48 = vld [vmem:[%s3257_s21 + $0x630] sm:$0xff]  ;;  %v408_v49 = vld [vmem:[%s3257_s21 + $0x618] sm:$0xff] }
  0xf1   : > { %v412_v50 = vld [vmem:[%s3257_s21 + $0x638] sm:$0xff]  ;;  %v2973_v53 = vcombine.high %v407_v47, %v411_v48 }
  0xf2   : > { %2405 = vmatmul.mubr.bf16.vlgmr.msra.gmra.mrb[4].mxu0 %v3264_v10  ;;  %2528 = vmatmul.mubr.bf16.vlgmr.msra.gmra.mrb[4].mxu1 %v3264_v10  ;;  %v2924_v10 = vcombine.low %v359_v59, %v363_v60  ;;  %v2975_v54 = vcombine.high %v408_v49, %v412_v50  ;;  %v2972_v59 = vcombine.low %v407_v47, %v411_v48 }
  0xf3   : > { %2414 = vmatpush1.bf16.msra.mxu0 %v2908_v55  ;;  %2537 = vmatpush1.bf16.msra.mxu1 %v2910_v56  ;;  %v415_v55 = vld [vmem:[%s3257_s21 + $0x650] sm:$0xff]  ;;  %v2974_v60 = vcombine.low %v408_v49, %v412_v50 }
  0xf4   : > { %2415 = vmatprep.subr.bf16.mxu0 %v2917_v57  ;;  %2538 = vmatprep.subr.bf16.mxu1 %v2919_v58  ;;  %v419_v56 = vld [vmem:[%s3257_s21 + $0x670] sm:$0xff]  ;;  %v416_v57 = vld [vmem:[%s3257_s21 + $0x658] sm:$0xff] }
  0xf5   : > { %2445 = vmatprep.mubr.bf16.mxu0 %v3351_v36  ;;  %2568 = vmatprep.mubr.bf16.mxu1 %v3351_v36  ;;  %v2934_v36 = vcombine.low %v368_v4, %v372_v7  ;;  %v420_v58 = vld [vmem:[%s3257_s21 + $0x678] sm:$0xff]  ;;  %v2981_v61 = vcombine.high %v415_v55, %v419_v56  ;;  %v2980_v3 = vcombine.low %v415_v55, %v419_v56 }
  0xf6   : > { %v2983_v62 = vcombine.high %v416_v57, %v420_v58  ;;  %v2982_v26 = vcombine.low %v416_v57, %v420_v58 }
  0xf7   : > { %2416 = vmatpush1.bf16.msra.mxu0 %v2916_v63  ;;  %2539 = vmatpush1.bf16.msra.mxu1 %v2918_v0  ;;  %v423_v63 = vld [vmem:[%s3257_s21 + $0x690] sm:$0xff] }
  0xf8   : > { %2417 = vmatprep.subr.bf16.mxu0 %v2925_v1  ;;  %2540 = vmatprep.subr.bf16.mxu1 %v2927_v2  ;;  %v427_v0 = vld [vmem:[%s3257_s21 + $0x6b0] sm:$0xff]  ;;  %v424_v1 = vld [vmem:[%s3257_s21 + $0x698] sm:$0xff] }
  0xf9   : > { %v428_v2 = vld [vmem:[%s3257_s21 + $0x6b8] sm:$0xff]  ;;  %v2989_v4 = vcombine.high %v423_v63, %v427_v0  ;;  %v2988_v12 = vcombine.low %v423_v63, %v427_v0 }
  0xfa   : > { %v2991_v7 = vcombine.high %v424_v1, %v428_v2  ;;  %v2990_v13 = vcombine.low %v424_v1, %v428_v2 }
  0xfb   : > { %2418 = vmatpush1.bf16.msra.mxu0 %v2924_v10  ;;  %2541 = vmatpush1.bf16.msra.mxu1 %v2926_v8  ;;  %v431_v10 = vld [vmem:[%s3257_s21 + $0x6d0] sm:$0xff] }
  0xfc   : > { %2419 = vmatprep.subr.bf16.mxu0 %v2933_v9  ;;  %2542 = vmatprep.subr.bf16.mxu1 %v2935_v11  ;;  %v435_v8 = vld [vmem:[%s3257_s21 + $0x6f0] sm:$0xff]  ;;  %v432_v9 = vld [vmem:[%s3257_s21 + $0x6d8] sm:$0xff] }
  0xfd   : > { %v436_v11 = vld [vmem:[%s3257_s21 + $0x6f8] sm:$0xff]  ;;  %v2997_v14 = vcombine.high %v431_v10, %v435_v8  ;;  %v2996_v19 = vcombine.low %v431_v10, %v435_v8 }
  0xfe   : > { %v2999_v15 = vcombine.high %v432_v9, %v436_v11  ;;  %v2998_v20 = vcombine.low %v432_v9, %v436_v11 }
  0xff   : > { %2420 = vmatpush1.bf16.msra.mxu0 %v2932_v16  ;;  %2543 = vmatpush1.bf16.msra.mxu1 %v2934_v36  ;;  %v439_v16 = vld [vmem:[%s3257_s21 + $0x710] sm:$0xff] }
 0x100   : > { %2421 = vmatprep.subr.bf16.mxu0 %v2941_v17  ;;  %2544 = vmatprep.subr.bf16.mxu1 %v2943_v18  ;;  %v443_v36 = vld [vmem:[%s3257_s21 + $0x730] sm:$0xff]  ;;  %v440_v17 = vld [vmem:[%s3257_s21 + $0x718] sm:$0xff] }
 0x101   : > { %v444_v18 = vld [vmem:[%s3257_s21 + $0x738] sm:$0xff]  ;;  %v3005_v21 = vcombine.high %v439_v16, %v443_v36  ;;  %v3004_v29 = vcombine.low %v439_v16, %v443_v36 }
 0x102   : > { %v3007_v23 = vcombine.high %v440_v17, %v444_v18  ;;  %v3006_v30 = vcombine.low %v440_v17, %v444_v18  ;;  %v503_v18 = vld [vmem:[%s3257_s21 + $0x910] sm:$0xff] }
 0x103   : > { %2422 = vmatpush1.bf16.msra.mxu0 %v2940_v24  ;;  %2545 = vmatpush1.bf16.msra.mxu1 %v2942_v25  ;;  %v447_v24 = vld [vmem:[%s3257_s21 + $0x750] sm:$0xff] }
 0x104   : > { %2423 = vmatprep.subr.bf16.mxu0 %v2949_v27  ;;  %2546 = vmatprep.subr.bf16.mxu1 %v2951_v5  ;;  %v451_v25 = vld [vmem:[%s3257_s21 + $0x770] sm:$0xff]  ;;  %v448_v27 = vld [vmem:[%s3257_s21 + $0x758] sm:$0xff] }
 0x105   : > { %v452_v5 = vld [vmem:[%s3257_s21 + $0x778] sm:$0xff]  ;;  %v3013_v31 = vcombine.high %v447_v24, %v451_v25  ;;  %v3012_v38 = vcombine.low %v447_v24, %v451_v25 }
 0x106   : > { %v3015_v32 = vcombine.high %v448_v27, %v452_v5  ;;  %v3014_v39 = vcombine.low %v448_v27, %v452_v5  ;;  %v511_v27 = vld [vmem:[%s3257_s21 + $0x950] sm:$0xff] }
 0x107   : > { %2424 = vmatpush1.bf16.msra.mxu0 %v2948_v33  ;;  %2547 = vmatpush1.bf16.msra.mxu1 %v2950_v34  ;;  %v455_v33 = vld [vmem:[%s3257_s21 + $0x790] sm:$0xff] }
 0x108   : > { %2425 = vmatprep.subr.bf16.mxu0 %v2957_v35  ;;  %2548 = vmatprep.subr.bf16.mxu1 %v2959_v37  ;;  %v459_v34 = vld [vmem:[%s3257_s21 + $0x7b0] sm:$0xff]  ;;  %v456_v35 = vld [vmem:[%s3257_s21 + $0x798] sm:$0xff] }
 0x109   : > { %v460_v37 = vld [vmem:[%s3257_s21 + $0x7b8] sm:$0xff]  ;;  %v3021_v40 = vcombine.high %v455_v33, %v459_v34  ;;  %v3020_v47 = vcombine.low %v455_v33, %v459_v34  ;;  %v515_v5 = vld [vmem:[%s3257_s21 + $0x970] sm:$0xff] }
 0x10a   : > { %v3023_v41 = vcombine.high %v456_v35, %v460_v37  ;;  %v3022_v48 = vcombine.low %v456_v35, %v460_v37  ;;  %v3077_v33 = vcombine.high %v511_v27, %v515_v5  ;;  %v519_v35 = vld [vmem:[%s3257_s21 + $0x990] sm:$0x33]  ;;  %v520_v37 = vld [vmem:[%s3257_s21 + $0x998] sm:$0x33] }
 0x10b   : > { %2426 = vmatpush1.bf16.msra.mxu0 %v2956_v43  ;;  %2549 = vmatpush1.bf16.msra.mxu1 %v2958_v44  ;;  %v463_v43 = vld [vmem:[%s3257_s21 + $0x7d0] sm:$0xff] }
 0x10c   : > { %2427 = vmatprep.subr.bf16.mxu0 %v2965_v45  ;;  %2550 = vmatprep.subr.bf16.mxu1 %v2967_v46  ;;  %v467_v44 = vld [vmem:[%s3257_s21 + $0x7f0] sm:$0xff]  ;;  %v464_v45 = vld [vmem:[%s3257_s21 + $0x7d8] sm:$0xff] }
 0x10d   : > { %v468_v46 = vld [vmem:[%s3257_s21 + $0x7f8] sm:$0xff]  ;;  %v3029_v49 = vcombine.high %v463_v43, %v467_v44  ;;  %v3028_v55 = vcombine.low %v463_v43, %v467_v44  ;;  %v3087_v43 = vcombine.high %v520_v37, %v520_v37  ;;  %v3086_v44 = vcombine.low %v520_v37, %v520_v37 }
 0x10e   : > { %v3031_v50 = vcombine.high %v464_v45, %v468_v46  ;;  %v3030_v56 = vcombine.low %v464_v45, %v468_v46 }
 0x10f   : > { %2428 = vmatpush1.bf16.msra.mxu0 %v2964_v51  ;;  %2551 = vmatpush1.bf16.msra.mxu1 %v2966_v52  ;;  %v471_v51 = vld [vmem:[%s3257_s21 + $0x810] sm:$0xff]  ;;  %v2121_v46 = vsel %vm2101_vm0, %v3086_v44, 0 }
 0x110   : > { %2429 = vmatprep.subr.bf16.mxu0 %v2973_v53  ;;  %2552 = vmatprep.subr.bf16.mxu1 %v2975_v54  ;;  %v475_v52 = vld [vmem:[%s3257_s21 + $0x830] sm:$0xff]  ;;  %v472_v53 = vld [vmem:[%s3257_s21 + $0x818] sm:$0xff] }
 0x111   : > { %v476_v54 = vld [vmem:[%s3257_s21 + $0x838] sm:$0xff]  ;;  %v3037_v57 = vcombine.high %v471_v51, %v475_v52  ;;  %v3036_v63 = vcombine.low %v471_v51, %v475_v52 }
 0x112   : > { %v3039_v58 = vcombine.high %v472_v53, %v476_v54  ;;  %v3038_v0 = vcombine.low %v472_v53, %v476_v54 }
 0x113   : > { %2430 = vmatpush1.bf16.msra.mxu0 %v2972_v59  ;;  %2553 = vmatpush1.bf16.msra.mxu1 %v2974_v60  ;;  %v479_v59 = vld [vmem:[%s3257_s21 + $0x850] sm:$0xff] }
 0x114   : > { %2431 = vmatprep.subr.bf16.mxu0 %v2981_v61  ;;  %2554 = vmatprep.subr.bf16.mxu1 %v2983_v62  ;;  %v483_v60 = vld [vmem:[%s3257_s21 + $0x870] sm:$0xff]  ;;  %v480_v61 = vld [vmem:[%s3257_s21 + $0x858] sm:$0xff] }
 0x115   : > { %v484_v62 = vld [vmem:[%s3257_s21 + $0x878] sm:$0xff]  ;;  %v3045_v1 = vcombine.high %v479_v59, %v483_v60  ;;  %v3044_v10 = vcombine.low %v479_v59, %v483_v60 }
 0x116   : > { %v3047_v2 = vcombine.high %v480_v61, %v484_v62  ;;  %v3046_v8 = vcombine.low %v480_v61, %v484_v62 }
 0x117   : > { %2432 = vmatpush1.bf16.msra.mxu0 %v2980_v3  ;;  %2555 = vmatpush1.bf16.msra.mxu1 %v2982_v26  ;;  %v487_v3 = vld [vmem:[%s3257_s21 + $0x890] sm:$0xff] }
 0x118   : > { %2433 = vmatprep.subr.bf16.mxu0 %v2989_v4  ;;  %2556 = vmatprep.subr.bf16.mxu1 %v2991_v7  ;;  %v491_v26 = vld [vmem:[%s3257_s21 + $0x8b0] sm:$0xff]  ;;  %v488_v4 = vld [vmem:[%s3257_s21 + $0x898] sm:$0xff] }
 0x119   : > { %v492_v7 = vld [vmem:[%s3257_s21 + $0x8b8] sm:$0xff]  ;;  %v3053_v9 = vcombine.high %v487_v3, %v491_v26 }
 0x11a   : > { %v3055_v11 = vcombine.high %v488_v4, %v492_v7  ;;  %v3054_v16 = vcombine.low %v488_v4, %v492_v7 }
 0x11b   : > { %2434 = vmatpush1.bf16.msra.mxu0 %v2988_v12  ;;  %2557 = vmatpush1.bf16.msra.mxu1 %v2990_v13  ;;  %v495_v12 = vld [vmem:[%s3257_s21 + $0x8d0] sm:$0xff] }
 0x11c   : > { %2435 = vmatprep.subr.bf16.mxu0 %v2997_v14  ;;  %2558 = vmatprep.subr.bf16.mxu1 %v2999_v15  ;;  %v499_v13 = vld [vmem:[%s3257_s21 + $0x8f0] sm:$0xff]  ;;  %v496_v14 = vld [vmem:[%s3257_s21 + $0x8d8] sm:$0xff] }
 0x11d   : > { %v500_v15 = vld [vmem:[%s3257_s21 + $0x8f8] sm:$0xff]  ;;  %v3061_v36 = vcombine.high %v495_v12, %v499_v13 }
 0x11e   : > { %v3063_v17 = vcombine.high %v496_v14, %v500_v15 }
 0x11f   : > { %2436 = vmatpush1.bf16.msra.mxu0 %v2996_v19  ;;  %2559 = vmatpush1.bf16.msra.mxu1 %v2998_v20  ;;  %v507_v19 = vld [vmem:[%s3257_s21 + $0x930] sm:$0xff]  ;;  %v504_v20 = vld [vmem:[%s3257_s21 + $0x918] sm:$0xff] }
 0x120   : > { %2437 = vmatprep.subr.bf16.mxu0 %v3005_v21  ;;  %2560 = vmatprep.subr.bf16.mxu1 %v3007_v23  ;;  %v508_v21 = vld [vmem:[%s3257_s21 + $0x938] sm:$0xff]  ;;  %v3060_v23 = vcombine.low %v495_v12, %v499_v13  ;;  %v3069_v24 = vcombine.high %v503_v18, %v507_v19 }
 0x121   : > { %v3071_v25 = vcombine.high %v504_v20, %v508_v21 }
 0x123   : > { %2438 = vmatpush1.bf16.msra.mxu0 %v3004_v29  ;;  %2561 = vmatpush1.bf16.msra.mxu1 %v3006_v30  ;;  %v512_v29 = vld [vmem:[%s3257_s21 + $0x958] sm:$0xff] }
 0x124   : > { %2439 = vmatprep.subr.bf16.mxu0 %v3013_v31  ;;  %2562 = vmatprep.subr.bf16.mxu1 %v3015_v32  ;;  %v516_v30 = vld [vmem:[%s3257_s21 + $0x978] sm:$0xff]  ;;  %v3068_v31 = vcombine.low %v503_v18, %v507_v19  ;;  %v3070_v32 = vcombine.low %v504_v20, %v508_v21 }
 0x125   : > { %v3079_v34 = vcombine.high %v512_v29, %v516_v30 }
 0x127   : > { %2440 = vmatpush1.bf16.msra.mxu0 %v3012_v38  ;;  %2563 = vmatpush1.bf16.msra.mxu1 %v3014_v39  ;;  %v3076_v38 = vcombine.low %v511_v27, %v515_v5  ;;  %v3078_v39 = vcombine.low %v512_v29, %v516_v30 }
 0x128   : > { %2441 = vmatprep.subr.bf16.mxu0 %v3021_v40  ;;  %2564 = vmatprep.subr.bf16.mxu1 %v3023_v41  ;;  %v3085_v40 = vcombine.high %v519_v35, %v519_v35  ;;  %v3084_v41 = vcombine.low %v519_v35, %v519_v35 }
 0x12a   : > { %v2115_v45 = vsel %vm2101_vm0, %v3084_v41, 0 }
 0x12b   : > { %2442 = vmatpush1.bf16.msra.mxu0 %v3020_v47  ;;  %2565 = vmatpush1.bf16.msra.mxu1 %v3022_v48  ;;  %v525_v47 = vpop.permute.xlu0 %524 }
 0x12c   : > { %2443 = vmatprep.subr.bf16.mxu0 %v3029_v49  ;;  %2566 = vmatprep.subr.bf16.mxu1 %v3031_v50 }
 0x12f   : > { %2444 = vmatpush1.bf16.msra.mxu0 %v3028_v55  ;;  %2567 = vmatpush1.bf16.msra.mxu1 %v3030_v56 }
 0x130   : > { %2454 = vmatprep.subr.bf16.mxu0 %v3037_v57  ;;  %2577 = vmatprep.subr.bf16.mxu1 %v3039_v58 }
 0x132   : > { %2446 = vmatmul.mubr.bf16.vlgmr.msra.gmra.mrb[4].mxu0 %v3343_v28  ;;  %2569 = vmatmul.mubr.bf16.vlgmr.msra.gmra.mrb[4].mxu1 %v3343_v28  ;;  %v3052_v28 = vcombine.low %v487_v3, %v491_v26 }
 0x133   : > { %2455 = vmatpush1.bf16.msra.mxu0 %v3036_v63  ;;  %2578 = vmatpush1.bf16.msra.mxu1 %v3038_v0 }
 0x134   : > { %2456 = vmatprep.subr.bf16.mxu0 %v3045_v1  ;;  %2579 = vmatprep.subr.bf16.mxu1 %v3047_v2 }
 0x135   : > { %2486 = vmatprep.mubr.bf16.mxu0 %v3205_v22  ;;  %2609 = vmatprep.mubr.bf16.mxu1 %v3205_v22  ;;  %v3062_v22 = vcombine.low %v496_v14, %v500_v15 }
 0x137   : > { %2457 = vmatpush1.bf16.msra.mxu0 %v3044_v10  ;;  %2580 = vmatpush1.bf16.msra.mxu1 %v3046_v8 }
 0x138   : > { %2458 = vmatprep.subr.bf16.mxu0 %v3053_v9  ;;  %2581 = vmatprep.subr.bf16.mxu1 %v3055_v11 }
 0x13b   : > { %2459 = vmatpush1.bf16.msra.mxu0 %v3052_v28  ;;  %2582 = vmatpush1.bf16.msra.mxu1 %v3054_v16 }
 0x13c   : > { %2460 = vmatprep.subr.bf16.mxu0 %v3061_v36  ;;  %2583 = vmatprep.subr.bf16.mxu1 %v3063_v17 }
 0x13f   : > { %2461 = vmatpush1.bf16.msra.mxu0 %v3060_v23  ;;  %2584 = vmatpush1.bf16.msra.mxu1 %v3062_v22 }
 0x140   : > { %2462 = vmatprep.subr.bf16.mxu0 %v3069_v24  ;;  %2585 = vmatprep.subr.bf16.mxu1 %v3071_v25 }
 0x143   : > { %2463 = vmatpush1.bf16.msra.mxu0 %v3068_v31  ;;  %2586 = vmatpush1.bf16.msra.mxu1 %v3070_v32 }
 0x144   : > { %2464 = vmatprep.subr.bf16.mxu0 %v3077_v33  ;;  %2587 = vmatprep.subr.bf16.mxu1 %v3079_v34 }
 0x147   : > { %2465 = vmatpush1.bf16.msra.mxu0 %v3076_v38  ;;  %2588 = vmatpush1.bf16.msra.mxu1 %v3078_v39 }
 0x148   : > { %3092 = vmatprep.subr.msk.bf16.mxu0 %vm2101_vm0, %v3085_v40  ;;  %3094 = vmatprep.subr.msk.bf16.mxu1 %vm2101_vm0, %v3087_v43 }
 0x14b   : > { %2467 = vmatpush1.bf16.msra.mxu0 %v2115_v45  ;;  %2590 = vmatpush1.bf16.msra.mxu1 %v2121_v46 }
 0x14e   : > { %3093 = vmatmul.mubr.msk.bf16.vlgmr.msra.gmra.mrb[4].mxu0 %vm2097_vm1, %v3459_v42  ;;  %3095 = vmatmul.mubr.msk.bf16.vlgmr.msra.gmra.mrb[4].mxu1 %vm2097_vm1, %v3459_v42 }
 0x185   : > { %v2242_v48 = vpop.f32.mrb[0].mxu0  ;;  %v2365_v50 = vpop.f32.mrb[0].mxu1 }
 0x186   : > { %v3103_v49 = vadd.f32 %v2242_v48, %v525_v47  ;;  %v2244_v51 = vpop.f32.mrb[1].mxu0  ;;  %v3105_v52 = vadd.f32 %v2365_v50, %v525_v47  ;;  %v2367_v54 = vpop.f32.mrb[1].mxu1 }
 0x187   : > { %v3104_v53 = vadd.f32 %v2244_v51, %v525_v47  ;;  %v2246_v55 = vpop.f32.mrb[2].mxu0  ;;  %v3106_v57 = vadd.f32 %v2367_v54, %v525_v47  ;;  %v2369_v58 = vpop.f32.mrb[2].mxu1 }
 0x188   : > { %v2618_v56 = vmax.f32 %v3103_v49, 0.0  ;;  %v2247_v59 = vpop.f32.mrb[3].mxu0  ;;  %v2620_v60 = vmax.f32 %v3105_v52, 0.0  ;;  %v2370_v62 = vpop.f32.mrb[3].mxu1 }
 0x189   : > { %v2619_v61 = vmax.f32 %v3104_v53, 0.0  ;;  %v2621_v63 = vmax.f32 %v3106_v57, 0.0 }
 0x18b   : > { %v3096_v0 = vpack.c.bf16 %v2619_v61, %v2618_v56  ;;  %v3097_v42 = vpack.c.bf16 %v2621_v63, %v2620_v60 }
 0x18d   : > { %v2650_v1 = vrot.slane %v3096_v0, %v3252_v6  ;;  %v2657_v2 = vrot.slane %v3097_v42, %v3252_v6 }
 0x18f   : > { %v2658_v3 = vcombine.low %v2650_v1, %v2657_v2 }
 0x191   : > { %2678 = vst [vmem:[%s208_s29] sm:$0xff] %v2658_v3 }
 0x221   : > { %v2488_v26 = vpop.f32.mrb[4].mxu0  ;;  %v2611_v7 = vpop.f32.mrb[4].mxu1 }
 0x222   : > { %v3107_v4 = vadd.f32 %v2488_v26, %v525_v47  ;;  %v2490_v10 = vpop.f32.mrb[5].mxu0  ;;  %v3109_v8 = vadd.f32 %v2611_v7, %v525_v47  ;;  %v2613_v11 = vpop.f32.mrb[5].mxu1 }
 0x223   : > { %v3108_v9 = vadd.f32 %v2490_v10, %v525_v47  ;;  %v2492_v12 = vpop.f32.mrb[6].mxu0  ;;  %v3110_v14 = vadd.f32 %v2613_v11, %v525_v47  ;;  %v2615_v15 = vpop.f32.mrb[6].mxu1 }
 0x224   : > { %v2622_v13 = vmax.f32 %v3107_v4, 0.0  ;;  %v2493_v28 = vpop.f32.mrb[7].mxu0  ;;  %v2624_v16 = vmax.f32 %v3109_v8, 0.0  ;;  %v2616_v17 = vpop.f32.mrb[7].mxu1 }
 0x225   : > { %v2623_v36 = vmax.f32 %v3108_v9, 0.0  ;;  %v2625_v18 = vmax.f32 %v3110_v14, 0.0 }
 0x227   : > { %v3098_v19 = vpack.c.bf16 %v2623_v36, %v2622_v13  ;;  %v3099_v20 = vpack.c.bf16 %v2625_v18, %v2624_v16 }
 0x229   : > { %v2667_v21 = vrot.slane %v3098_v19, %v3252_v6  ;;  %v2674_v23 = vrot.slane %v3099_v20, %v3252_v6 }
 0x22b   : > { %v2675_v22 = vcombine.low %v2667_v21, %v2674_v23 }
 0x22d   : > { %2679 = vst [vmem:[%s208_s29 + $0x8] sm:$0xff] %v2675_v22 }
 0x22e PF: > { %s13_s14 = sadd.s32 1, %s3202_s14   ;;  %s3650_s12 = smov %s3198_s13 }
 0x22f   : > { %p10_p5 = scmp.ge.s32.totalorder %s13_s14, 4   ;;  %s3651_s13 = smov %s3653_s15 }
 0x231   :  { %12 = sbr.rel (!%p10_p5) target bundleno = 2 (0x2), region = 62 }

// kernel: segmnet_forward.21
= control target key start
LH: loop header
LB: loop body
LE: loop exit
PB: predicated region body
PF: predicated region fallthrough
CT: control target
= control target key end

     0   :  { %s1343_s12 = smov 0   ;;  %s1345_s13 = smov 0   ;;  %s1642_s0 = inlined_call_operand.vmem [shape: bf16[2,36], index: 0, kind: input, shape index: {}]   ;;  %s1643_s1 = inlined_call_operand.vmem [shape: bf16[2,36,4096], index: 1, kind: input, shape index: {}]   ;;  %s1644_s2 = inlined_call_operand.vmem [shape: f32[2,1], index: 2, kind: input, shape index: {}]   ;;  %s1645_s3 = inlined_call_operand.vmem [shape: f32[2,2,4096], index: 3, kind: output, shape index: {}]  }
   0x1   :  { %s1347_s14 = smov 0   ;;  %s1349_s15 = smov 0  }
   0x2   :  { %s1351_s16 = smov 0   ;;  %s1353_s17 = smov 0  }
   0x3   :  { %s1355_s18 = smov 0  }
   0x4 LB: > { %s22_s19 = sadd.s32 1, %s1311_s16  ;;  %s25_s20 = sadd.s32 1, %s1315_s17  ;;  %s1319_s18 = sphi %s1355_s18, %s13_s18   ;;  %s1315_s17 = sphi %s1353_s17, %s1651_s17   ;;  %s1311_s16 = sphi %s1351_s16, %s1650_s16   ;;  %s1307_s15 = sphi %s1349_s15, %s1649_s15   ;;  %s1303_s14 = sphi %s1347_s14, %s1648_s14   ;;  %s1299_s13 = sphi %s1345_s13, %s1647_s13   ;;  %s1295_s12 = sphi %s1343_s12, %s1646_s12  }
   0x5   : > { %p23_p0 = scmp.ge.s32.totalorder %s22_s19, 2  ;;  %p62_p1 = scmp.ne.s32.totalorder %s1299_s13, %s1295_s12 }
   0x6   : > { %p63_p2 = scmp.eq.s32.totalorder %s1319_s18, 0  ;;  %s55_s24 = sadd.s32 1, %s1299_s13 }
   0x7   : > { %s1653_s19 = smov (%p23_p0, %s22_s19), 0  ;;  %s1655_s20 = smov (!%p23_p0, %s25_s20), %s1315_s17 }
   0x8   : > { %p64_p3 = por %p63_p2, %p62_p1  ;;  %p27_p4 = scmp.ge.s32.totalorder %s1655_s20, 2 }
   0x9   : > { %s51_s21 = ssub.s32 %s1311_s16, %s1653_s19  ;;  %p1114_p6 = scmp.ge.s32.totalorder %s1319_s18, 4 }
   0xa   : > { %s1657_s20 = smov (%p27_p4, %s1655_s20), 0 }
   0xb   : > { %s50_s22 = ssub.s32 %s1315_s17, %s1657_s20  ;;  %143 = sbr.rel (%p1114_p6) target bundleno = 46 (0x2e), region = 24 }
   0xc   : > { %s52_s23 = sor.u32 %s51_s21, %s50_s22 }
   0xd   : > { %p53_p5 = scmp.eq.s32.totalorder %s52_s23, 0 }
   0xf   : > { %s1394_s25 = scalar_select %p53_p5, %s1299_s13, %s55_s24  }
  0x12   : > { %146 = sbr.rel (!%p64_p3) target bundleno = 46 (0x2e), region = 28  ;;  %s148_s26 = sand.u32 (%p64_p3), 1, %s1299_s13  }
  0x13   : > { %s1187_s27 = smul.u32 (%p64_p3), 320, %s148_s26  ;;  %s1115_s28 = sshll.u32 (%p64_p3), %s1311_s16, 4 }
  0x14   : > { %s1188_s29 = smul.u32 (%p64_p3), 160, %s1315_s17 }
  0x15   : > { %s1408_s8 = scalar_lea.vmem (%p64_p3), [#allocation2], %s1187_s27 }
  0x16   : > { %s153_s30 = sadd.s32 (%p64_p3), %s1188_s29, %s1115_s28 }
  0x17   : > { %s1116_s4 = sshll.u32 (%p64_p3), %s153_s30, 2 }
  0x18   : > { %s1403_s7 = scalar_lea.vmem (%p64_p3), %s1643_s1, %s1116_s4 }
  0x19   : > { %v168_v0 = vld [vmem:[%s1403_s7] sm:$0xff]  ;;  %v170_v1 = vld [vmem:[%s1403_s7 + $0x8] sm:$0xff]  ;;  %v172_v2 = vld [vmem:[%s1403_s7 + $0x10] sm:$0xff] }
  0x1a   : > { %169 = vst [vmem:[%s1408_s8] sm:$0xff] %v168_v0  ;;  %171 = vst [vmem:[%s1408_s8 + $0x8] sm:$0xff] %v170_v1  ;;  %v174_v3 = vld [vmem:[%s1403_s7 + $0x18] sm:$0xff]  ;;  %v176_v4 = vld [vmem:[%s1403_s7 + $0x20] sm:$0xff] }
  0x1b   : > { %173 = vst [vmem:[%s1408_s8 + $0x10] sm:$0xff] %v172_v2  ;;  %v178_v5 = vld [vmem:[%s1403_s7 + $0x28] sm:$0xff]  ;;  %175 = vst [vmem:[%s1408_s8 + $0x18] sm:$0xff] %v174_v3  ;;  %v180_v6 = vld [vmem:[%s1403_s7 + $0x30] sm:$0xff] }
  0x1c   : > { %177 = vst [vmem:[%s1408_s8 + $0x20] sm:$0xff] %v176_v4  ;;  %179 = vst [vmem:[%s1408_s8 + $0x28] sm:$0xff] %v178_v5  ;;  %v182_v7 = vld [vmem:[%s1403_s7 + $0x38] sm:$0xff]  ;;  %v184_v8 = vld [vmem:[%s1403_s7 + $0x80] sm:$0xff] }
  0x1d   : > { %181 = vst [vmem:[%s1408_s8 + $0x30] sm:$0xff] %v180_v6  ;;  %183 = vst [vmem:[%s1408_s8 + $0x38] sm:$0xff] %v182_v7  ;;  %v186_v9 = vld [vmem:[%s1403_s7 + $0x88] sm:$0xff]  ;;  %v188_v10 = vld [vmem:[%s1403_s7 + $0x90] sm:$0xff] }
  0x1e   : > { %185 = vst [vmem:[%s1408_s8 + $0x40] sm:$0xff] %v184_v8  ;;  %v190_v11 = vld [vmem:[%s1403_s7 + $0x98] sm:$0xff]  ;;  %187 = vst [vmem:[%s1408_s8 + $0x48] sm:$0xff] %v186_v9  ;;  %v192_v12 = vld [vmem:[%s1403_s7 + $0xa0] sm:$0xff] }
  0x1f   : > { %189 = vst [vmem:[%s1408_s8 + $0x50] sm:$0xff] %v188_v10  ;;  %191 = vst [vmem:[%s1408_s8 + $0x58] sm:$0xff] %v190_v11  ;;  %v194_v13 = vld [vmem:[%s1403_s7 + $0xa8] sm:$0xff]  ;;  %v196_v14 = vld [vmem:[%s1403_s7 + $0xb0] sm:$0xff] }
  0x20   : > { %193 = vst [vmem:[%s1408_s8 + $0x60] sm:$0xff] %v192_v12  ;;  %195 = vst [vmem:[%s1408_s8 + $0x68] sm:$0xff] %v194_v13  ;;  %v198_v15 = vld [vmem:[%s1403_s7 + $0xb8] sm:$0xff]  ;;  %v200_v16 = vld [vmem:[%s1403_s7 + $0x100] sm:$0xff] }
  0x21   : > { %197 = vst [vmem:[%s1408_s8 + $0x70] sm:$0xff] %v196_v14  ;;  %v202_v17 = vld [vmem:[%s1403_s7 + $0x108] sm:$0xff]  ;;  %199 = vst [vmem:[%s1408_s8 + $0x78] sm:$0xff] %v198_v15  ;;  %v204_v18 = vld [vmem:[%s1403_s7 + $0x110] sm:$0xff] }
  0x22   : > { %201 = vst [vmem:[%s1408_s8 + $0x80] sm:$0xff] %v200_v16  ;;  %203 = vst [vmem:[%s1408_s8 + $0x88] sm:$0xff] %v202_v17  ;;  %v206_v19 = vld [vmem:[%s1403_s7 + $0x118] sm:$0xff]  ;;  %v208_v20 = vld [vmem:[%s1403_s7 + $0x120] sm:$0xff] }
  0x23   : > { %205 = vst [vmem:[%s1408_s8 + $0x90] sm:$0xff] %v204_v18  ;;  %207 = vst [vmem:[%s1408_s8 + $0x98] sm:$0xff] %v206_v19  ;;  %v210_v21 = vld [vmem:[%s1403_s7 + $0x128] sm:$0xff]  ;;  %v212_v22 = vld [vmem:[%s1403_s7 + $0x130] sm:$0xff] }
  0x24   : > { %209 = vst [vmem:[%s1408_s8 + $0xa0] sm:$0xff] %v208_v20  ;;  %v214_v23 = vld [vmem:[%s1403_s7 + $0x138] sm:$0xff]  ;;  %211 = vst [vmem:[%s1408_s8 + $0xa8] sm:$0xff] %v210_v21  ;;  %v216_v24 = vld [vmem:[%s1403_s7 + $0x180] sm:$0xff] }
  0x25   : > { %213 = vst [vmem:[%s1408_s8 + $0xb0] sm:$0xff] %v212_v22  ;;  %215 = vst [vmem:[%s1408_s8 + $0xb8] sm:$0xff] %v214_v23  ;;  %v218_v25 = vld [vmem:[%s1403_s7 + $0x188] sm:$0xff]  ;;  %v220_v26 = vld [vmem:[%s1403_s7 + $0x190] sm:$0xff] }
  0x26   : > { %217 = vst [vmem:[%s1408_s8 + $0xc0] sm:$0xff] %v216_v24  ;;  %219 = vst [vmem:[%s1408_s8 + $0xc8] sm:$0xff] %v218_v25  ;;  %v222_v27 = vld [vmem:[%s1403_s7 + $0x198] sm:$0xff]  ;;  %v224_v28 = vld [vmem:[%s1403_s7 + $0x1a0] sm:$0xff] }
  0x27   : > { %221 = vst [vmem:[%s1408_s8 + $0xd0] sm:$0xff] %v220_v26  ;;  %v226_v29 = vld [vmem:[%s1403_s7 + $0x1a8] sm:$0xff]  ;;  %223 = vst [vmem:[%s1408_s8 + $0xd8] sm:$0xff] %v222_v27  ;;  %v228_v30 = vld [vmem:[%s1403_s7 + $0x1b0] sm:$0xff] }
  0x28   : > { %225 = vst [vmem:[%s1408_s8 + $0xe0] sm:$0xff] %v224_v28  ;;  %227 = vst [vmem:[%s1408_s8 + $0xe8] sm:$0xff] %v226_v29  ;;  %v230_v31 = vld [vmem:[%s1403_s7 + $0x1b8] sm:$0xff]  ;;  %v232_v32 = vld [vmem:[%s1403_s7 + $0x200] sm:$0xff] }
  0x29   : > { %229 = vst [vmem:[%s1408_s8 + $0xf0] sm:$0xff] %v228_v30  ;;  %231 = vst [vmem:[%s1408_s8 + $0xf8] sm:$0xff] %v230_v31  ;;  %v234_v33 = vld [vmem:[%s1403_s7 + $0x208] sm:$0xff]  ;;  %v236_v34 = vld [vmem:[%s1403_s7 + $0x210] sm:$0xff] }
  0x2a   : > { %233 = vst [vmem:[%s1408_s8 + $0x100] sm:$0xff] %v232_v32  ;;  %v238_v35 = vld [vmem:[%s1403_s7 + $0x218] sm:$0xff]  ;;  %235 = vst [vmem:[%s1408_s8 + $0x108] sm:$0xff] %v234_v33  ;;  %v240_v36 = vld [vmem:[%s1403_s7 + $0x220] sm:$0xff] }
  0x2b   : > { %237 = vst [vmem:[%s1408_s8 + $0x110] sm:$0xff] %v236_v34  ;;  %239 = vst [vmem:[%s1408_s8 + $0x118] sm:$0xff] %v238_v35  ;;  %v242_v37 = vld [vmem:[%s1403_s7 + $0x228] sm:$0xff]  ;;  %v244_v38 = vld [vmem:[%s1403_s7 + $0x230] sm:$0xff] }
  0x2c   : > { %241 = vst [vmem:[%s1408_s8 + $0x120] sm:$0xff] %v240_v36  ;;  %243 = vst [vmem:[%s1408_s8 + $0x128] sm:$0xff] %v242_v37  ;;  %v246_v39 = vld [vmem:[%s1403_s7 + $0x238] sm:$0xff] }
  0x2d   : > { %245 = vst [vmem:[%s1408_s8 + $0x130] sm:$0xff] %v244_v38  ;;  %247 = vst [vmem:[%s1408_s8 + $0x138] sm:$0xff] %v246_v39 }
  0x2e PF: > { %p1117_p7 = scmp.ge.s32.totalorder %s1319_s18, 1  ;;  %p252_p8 = scmp.lt.s32.totalorder %s1319_s18, 5 }
  0x30   : > { %p253_p9 = pnand %p1117_p7, %p252_p8 }
  0x31   : > { %s259_s9 = sand.u32 (!%p253_p9), 1, %s1295_s12   ;;  %v1321_v40 = vmov (!%p253_p9), 0   ;;  %v339_v41 = vld [vmem:[%s1644_s2] sm:$0x3] (!%p253_p9)  ;;  %vm549_vm0 = vcmask (!%p253_p9), 1041408   ;;  %vm545_vm1 = vcmask (!%p253_p9), 293888  }
  0x32   : > { %256 = sbr.rel (%p253_p9) target bundleno = 328 (0x148), region = 51  ;;  %630 = vmatprep.mubr.bf16.mxu0 (!%p253_p9), %v1321_v40  ;;  %671 = vmatprep.mubr.bf16.mxu1 (!%p253_p9), %v1321_v40  ;;  %v1523_v12 = vld [vmem:[%s1642_s0] sm:$0x1] (!%p253_p9)  ;;  %s1118_s24 = sshll.u32 (!%p253_p9), %s1303_s14, 4 }
  0x33   : > { %s1189_s10 = smul.u32 (!%p253_p9), 320, %s259_s9  ;;  %1248 = vset.pattern.permute.xlu0 (!%p253_p9), %v1321_v40  ;;  %p288_p10 = scmp.lt.s32.totalorder (!%p253_p9), %s1307_s15, 1 }
  0x34   : > { %342 = vperm.xlu0 (!%p253_p9), %1248, %v339_v41   ;;  %p290_p11 = scmp.lt.s32.totalorder (!%p253_p9), %s1118_s24, 31 }
  0x35   : > { %s1496_s22 = scalar_lea.vmem (!%p253_p9), [#allocation2], %s1189_s10 }
  0x36   : > { %v299_v42 = vld [vmem:[%s1496_s22] sm:$0xff] (!%p253_p9)  ;;  %v300_v44 = vld [vmem:[%s1496_s22 + $0x8] sm:$0xff] (!%p253_p9)  ;;  %v301_v0 = vld [vmem:[%s1496_s22 + $0x10] sm:$0xff] (!%p253_p9) }
  0x37   : > { %v307_v43 = vld [vmem:[%s1496_s22 + $0x40] sm:$0xff] (!%p253_p9)  ;;  %v308_v46 = vld [vmem:[%s1496_s22 + $0x48] sm:$0xff] (!%p253_p9)  ;;  %v309_v1 = vld [vmem:[%s1496_s22 + $0x50] sm:$0xff] (!%p253_p9) }
  0x38   : > { %v1122_v45 = vcombine.high (!%p253_p9), %v299_v42, %v307_v43  ;;  %v1121_v47 = vcombine.low (!%p253_p9), %v299_v42, %v307_v43  ;;  %v315_v48 = vld [vmem:[%s1496_s22 + $0x80] sm:$0xff] (!%p253_p9)  ;;  %v1124_v50 = vcombine.high (!%p253_p9), %v300_v44, %v308_v46  ;;  %v1123_v51 = vcombine.low (!%p253_p9), %v300_v44, %v308_v46  ;;  %v316_v53 = vld [vmem:[%s1496_s22 + $0x88] sm:$0xff] (!%p253_p9)  ;;  %v302_v2 = vld [vmem:[%s1496_s22 + $0x18] sm:$0xff] (!%p253_p9) }
  0x39   : > { %v323_v49 = vld [vmem:[%s1496_s22 + $0xc0] sm:$0xff]  ;;  %v324_v54 = vld [vmem:[%s1496_s22 + $0xc8] sm:$0xff]  ;;  %v310_v3 = vld [vmem:[%s1496_s22 + $0x58] sm:$0xff]  ;;  %v1126_v5 = vcombine.high %v301_v0, %v309_v1  ;;  %v1125_v13 = vcombine.low %v301_v0, %v309_v1  ;;  %s1659_s15 = smov (!%p288_p10, %s1307_s15), 1  ;;  %s1661_s24 = smov (!%p290_p11, %s1118_s24), 31 }
  0x3a   : > { %v1138_v52 = vcombine.high %v315_v48, %v323_v49  ;;  %v331_v55 = vld [vmem:[%s1496_s22 + $0x100] sm:$0x33]  ;;  %598 = vmatprep.subr.bf16.mxu0 %v1122_v45  ;;  %v1140_v56 = vcombine.high %v316_v53, %v324_v54  ;;  %v332_v57 = vld [vmem:[%s1496_s22 + $0x108] sm:$0x33]  ;;  %639 = vmatprep.subr.bf16.mxu1 %v1124_v50  ;;  %v1137_v58 = vcombine.low %v315_v48, %v323_v49  ;;  %v317_v8 = vld [vmem:[%s1496_s22 + $0x90] sm:$0xff]  ;;  %s1119_s26 = sshll.u32 %s1659_s15, 5 }
  0x3b   : > { %599 = vmatpush1.bf16.msra.mxu0 %v1121_v47  ;;  %640 = vmatpush1.bf16.msra.mxu1 %v1123_v51  ;;  %v1139_v59 = vcombine.low %v316_v53, %v324_v54  ;;  %v1154_v60 = vcombine.high %v331_v55, %v331_v55  ;;  %v1153_v61 = vcombine.low %v331_v55, %v331_v55  ;;  %v325_v9 = vld [vmem:[%s1496_s22 + $0xd0] sm:$0xff]  ;;  %v318_v10 = vld [vmem:[%s1496_s22 + $0x98] sm:$0xff]  ;;  %v303_v25 = vld [vmem:[%s1496_s22 + $0x20] sm:$0xff]  ;;  %s293_s14 = sadd.s32 %s1119_s26, %s1661_s24 }
  0x3c   : > { %600 = vmatprep.subr.bf16.mxu0 %v1138_v52  ;;  %641 = vmatprep.subr.bf16.mxu1 %v1140_v56  ;;  %v1156_v62 = vcombine.high %v332_v57, %v332_v57  ;;  %v1155_v63 = vcombine.low %v332_v57, %v332_v57  ;;  %v1128_v7 = vcombine.high %v302_v2, %v310_v3  ;;  %v326_v11 = vld [vmem:[%s1496_s22 + $0xd8] sm:$0xff]  ;;  %v333_v17 = vld [vmem:[%s1496_s22 + $0x110] sm:$0x33]  ;;  %v311_v26 = vld [vmem:[%s1496_s22 + $0x60] sm:$0xff]  ;;  %s1120_s15 = sshll.u32 %s293_s14, 1 }
  0x3d   : > { %v551_v4 = vsel %vm549_vm0, %v1153_v61, 0  ;;  %v1127_v14 = vcombine.low %v302_v2, %v310_v3  ;;  %v1142_v15 = vcombine.high %v317_v8, %v325_v9  ;;  %v1144_v16 = vcombine.high %v318_v10, %v326_v11  ;;  %v334_v18 = vld [vmem:[%s1496_s22 + $0x118] sm:$0x33]  ;;  %v304_v27 = vld [vmem:[%s1496_s22 + $0x28] sm:$0xff]  ;;  %v319_v33 = vld [vmem:[%s1496_s22 + $0xa0] sm:$0xff]  ;;  %s1597_s29 = scalar_lea.vmem %s1645_s3, %s1120_s15 }
  0x3e   : > { %v557_v6 = vsel %vm549_vm0, %v1155_v63, 0  ;;  %v1141_v19 = vcombine.low %v317_v8, %v325_v9  ;;  %v1143_v20 = vcombine.low %v318_v10, %v326_v11  ;;  %v1158_v21 = vcombine.high %v333_v17, %v333_v17  ;;  %v312_v28 = vld [vmem:[%s1496_s22 + $0x68] sm:$0xff]  ;;  %v327_v34 = vld [vmem:[%s1496_s22 + $0xe0] sm:$0xff]  ;;  %v305_v50 = vld [vmem:[%s1496_s22 + $0x30] sm:$0xff] }
  0x3f   : > { %601 = vmatpush1.bf16.msra.mxu0 %v1137_v58  ;;  %642 = vmatpush1.bf16.msra.mxu1 %v1139_v59  ;;  %v1157_v22 = vcombine.low %v333_v17, %v333_v17  ;;  %v1160_v23 = vcombine.high %v334_v18, %v334_v18  ;;  %v1159_v24 = vcombine.low %v334_v18, %v334_v18  ;;  %v320_v35 = vld [vmem:[%s1496_s22 + $0xa8] sm:$0xff]  ;;  %v335_v42 = vld [vmem:[%s1496_s22 + $0x120] sm:$0x33]  ;;  %v313_v51 = vld [vmem:[%s1496_s22 + $0x70] sm:$0xff] }
  0x40   : > { %1169 = vmatprep.subr.msk.bf16.mxu0 %vm549_vm0, %v1154_v60  ;;  %1171 = vmatprep.subr.msk.bf16.mxu1 %vm549_vm0, %v1156_v62  ;;  %v1130_v30 = vcombine.high %v303_v25, %v311_v26  ;;  %v1132_v32 = vcombine.high %v304_v27, %v312_v28  ;;  %v328_v36 = vld [vmem:[%s1496_s22 + $0xe8] sm:$0xff]  ;;  %v1129_v37 = vcombine.low %v303_v25, %v311_v26  ;;  %v306_v52 = vld [vmem:[%s1496_s22 + $0x38] sm:$0xff]  ;;  %v321_v58 = vld [vmem:[%s1496_s22 + $0xb0] sm:$0xff] }
  0x41   : > { %v563_v29 = vsel %vm549_vm0, %v1157_v22, 0  ;;  %v569_v31 = vsel %vm549_vm0, %v1159_v24, 0  ;;  %v1131_v38 = vcombine.low %v304_v27, %v312_v28  ;;  %v1146_v39 = vcombine.high %v319_v33, %v327_v34  ;;  %v336_v43 = vld [vmem:[%s1496_s22 + $0x128] sm:$0x33]  ;;  %v314_v53 = vld [vmem:[%s1496_s22 + $0x78] sm:$0xff]  ;;  %v329_v59 = vld [vmem:[%s1496_s22 + $0xf0] sm:$0xff] }
  0x42   : > { %v1148_v41 = vcombine.high %v320_v35, %v328_v36  ;;  %v1145_v44 = vcombine.low %v319_v33, %v327_v34  ;;  %v1147_v45 = vcombine.low %v320_v35, %v328_v36  ;;  %v1162_v46 = vcombine.high %v335_v42, %v335_v42  ;;  %v322_v60 = vld [vmem:[%s1496_s22 + $0xb8] sm:$0xff]  ;;  %v337_v2 = vld [vmem:[%s1496_s22 + $0x130] sm:$0x33] }
  0x43   : > { %603 = vmatpush1.bf16.msra.mxu0 %v551_v4  ;;  %644 = vmatpush1.bf16.msra.mxu1 %v557_v6  ;;  %v1161_v47 = vcombine.low %v335_v42, %v335_v42  ;;  %v1164_v48 = vcombine.high %v336_v43, %v336_v43  ;;  %v1163_v49 = vcombine.low %v336_v43, %v336_v43  ;;  %v330_v61 = vld [vmem:[%s1496_s22 + $0xf8] sm:$0xff] }
  0x44   : > { %680 = vmatprep.subr.bf16.mxu0 %v1126_v5  ;;  %721 = vmatprep.subr.bf16.mxu1 %v1128_v7  ;;  %v1134_v55 = vcombine.high %v305_v50, %v313_v51  ;;  %v1136_v57 = vcombine.high %v306_v52, %v314_v53  ;;  %v1133_v62 = vcombine.low %v305_v50, %v313_v51  ;;  %v338_v3 = vld [vmem:[%s1496_s22 + $0x138] sm:$0x33] }
  0x45   : > { %v575_v54 = vsel %vm549_vm0, %v1161_v47, 0  ;;  %v581_v56 = vsel %vm549_vm0, %v1163_v49, 0  ;;  %v1135_v63 = vcombine.low %v306_v52, %v314_v53  ;;  %v1150_v0 = vcombine.high %v321_v58, %v329_v59 }
  0x46   : > { %1170 = vmatmul.mubr.msk.bf16.vlgmr.msra.gmra.mrb[0].mxu0 %vm545_vm1, %v1523_v12  ;;  %1172 = vmatmul.mubr.msk.bf16.vlgmr.msra.gmra.mrb[0].mxu1 %vm545_vm1, %v1523_v12  ;;  %v1152_v1 = vcombine.high %v322_v60, %v330_v61  ;;  %v1149_v4 = vcombine.low %v321_v58, %v329_v59  ;;  %v1151_v5 = vcombine.low %v322_v60, %v330_v61 }
  0x47   : > { %681 = vmatpush1.bf16.msra.mxu0 %v1125_v13  ;;  %722 = vmatpush1.bf16.msra.mxu1 %v1127_v14  ;;  %v1166_v6 = vcombine.high %v337_v2, %v337_v2  ;;  %v1165_v7 = vcombine.low %v337_v2, %v337_v2  ;;  %v1168_v8 = vcombine.high %v338_v3, %v338_v3  ;;  %v947_v14 = vlaneseq }
  0x48   : > { %682 = vmatprep.subr.bf16.mxu0 %v1142_v15  ;;  %723 = vmatprep.subr.bf16.mxu1 %v1144_v16  ;;  %v1167_v9 = vcombine.low %v338_v3, %v338_v3 }
  0x49   : > { %712 = vmatprep.mubr.bf16.mxu0 %v1321_v40  ;;  %753 = vmatprep.mubr.bf16.mxu1 %v1321_v40  ;;  %v587_v10 = vsel %vm549_vm0, %v1165_v7, 0  ;;  %v948_v17 = vshrl.u32 %v947_v14, 7 }
  0x4a   : > { %v593_v11 = vsel %vm549_vm0, %v1167_v9, 0 }
  0x4b   : > { %683 = vmatpush1.bf16.msra.mxu0 %v1141_v19  ;;  %724 = vmatpush1.bf16.msra.mxu1 %v1143_v20 }
  0x4c   : > { %1173 = vmatprep.subr.msk.bf16.mxu0 %vm549_vm0, %v1158_v21  ;;  %1175 = vmatprep.subr.msk.bf16.mxu1 %vm549_vm0, %v1160_v23 }
  0x4f   : > { %685 = vmatpush1.bf16.msra.mxu0 %v563_v29  ;;  %726 = vmatpush1.bf16.msra.mxu1 %v569_v31 }
  0x50   : > { %762 = vmatprep.subr.bf16.mxu0 %v1130_v30  ;;  %803 = vmatprep.subr.bf16.mxu1 %v1132_v32 }
  0x52   : > { %1174 = vmatmul.mubr.msk.bf16.vlgmr.msra.gmra.mrb[4].mxu0 %vm545_vm1, %v1523_v12  ;;  %1176 = vmatmul.mubr.msk.bf16.vlgmr.msra.gmra.mrb[4].mxu1 %vm545_vm1, %v1523_v12 }
  0x53   : > { %763 = vmatpush1.bf16.msra.mxu0 %v1129_v37  ;;  %804 = vmatpush1.bf16.msra.mxu1 %v1131_v38 }
  0x54   : > { %764 = vmatprep.subr.bf16.mxu0 %v1146_v39  ;;  %805 = vmatprep.subr.bf16.mxu1 %v1148_v41 }
  0x55   : > { %794 = vmatprep.mubr.bf16.mxu0 %v1321_v40  ;;  %835 = vmatprep.mubr.bf16.mxu1 %v1321_v40 }
  0x57   : > { %765 = vmatpush1.bf16.msra.mxu0 %v1145_v44  ;;  %806 = vmatpush1.bf16.msra.mxu1 %v1147_v45 }
  0x58   : > { %1177 = vmatprep.subr.msk.bf16.mxu0 %vm549_vm0, %v1162_v46  ;;  %1179 = vmatprep.subr.msk.bf16.mxu1 %vm549_vm0, %v1164_v48 }
  0x5b   : > { %767 = vmatpush1.bf16.msra.mxu0 %v575_v54  ;;  %808 = vmatpush1.bf16.msra.mxu1 %v581_v56 }
  0x5c   : > { %844 = vmatprep.subr.bf16.mxu0 %v1134_v55  ;;  %885 = vmatprep.subr.bf16.mxu1 %v1136_v57 }
  0x5e   : > { %1178 = vmatmul.mubr.msk.bf16.vlgmr.msra.gmra.mrb[8].mxu0 %vm545_vm1, %v1523_v12  ;;  %1180 = vmatmul.mubr.msk.bf16.vlgmr.msra.gmra.mrb[8].mxu1 %vm545_vm1, %v1523_v12 }
  0x5f   : > { %845 = vmatpush1.bf16.msra.mxu0 %v1133_v62  ;;  %886 = vmatpush1.bf16.msra.mxu1 %v1135_v63 }
  0x60   : > { %846 = vmatprep.subr.bf16.mxu0 %v1150_v0  ;;  %887 = vmatprep.subr.bf16.mxu1 %v1152_v1 }
  0x61   : > { %876 = vmatprep.mubr.bf16.mxu0 %v1321_v40  ;;  %917 = vmatprep.mubr.bf16.mxu1 %v1321_v40  ;;  %v1322_v40 = vmov 1983009808  }
  0x62   : > { %v945_v13 = vunpack.c.l.s4 %v1322_v40 }
  0x63   : > { %847 = vmatpush1.bf16.msra.mxu0 %v1149_v4  ;;  %888 = vmatpush1.bf16.msra.mxu1 %v1151_v5 }
  0x64   : > { %1181 = vmatprep.subr.msk.bf16.mxu0 %vm549_vm0, %v1166_v6  ;;  %1183 = vmatprep.subr.msk.bf16.mxu1 %vm549_vm0, %v1168_v8  ;;  %v946_v16 = vunpack.c.0.s8 %v945_v13 }
  0x66   : > { %v1588_v22 = vsub.s32 %v946_v16, %v948_v17 }
  0x67   : > { %849 = vmatpush1.bf16.msra.mxu0 %v587_v10  ;;  %890 = vmatpush1.bf16.msra.mxu1 %v593_v11 }
  0x6a   : > { %1182 = vmatmul.mubr.msk.bf16.vlgmr.msra.gmra.mrb[12].mxu0 %vm545_vm1, %v1523_v12  ;;  %1184 = vmatmul.mubr.msk.bf16.vlgmr.msra.gmra.mrb[12].mxu1 %vm545_vm1, %v1523_v12 }
  0xb3   : > { %v1584_v15 = vpop.permute.xlu0 %342 }
 0x119   : > { %v632_v18 = vpop.f32.mrb[0].mxu0  ;;  %v673_v19 = vpop.f32.mrb[0].mxu1 }
 0x11a   : > { %v633_v20 = vadd.f32 %v632_v18, %v1584_v15  ;;  %v634_v21 = vpop.f32.mrb[1].mxu0  ;;  %v674_v23 = vadd.f32 %v673_v19, %v1584_v15  ;;  %v675_v24 = vpop.f32.mrb[1].mxu1 }
 0x11b   : > { %v635_v12 = vadd.f32 %v634_v21, %v1584_v15  ;;  %v636_v25 = vpop.f32.mrb[2].mxu0  ;;  %v676_v26 = vadd.f32 %v675_v24, %v1584_v15  ;;  %v677_v27 = vpop.f32.mrb[2].mxu1 }
 0x11c   : > { %v637_v28 = vpop.f32.mrb[3].mxu0  ;;  %v678_v30 = vpop.f32.mrb[3].mxu1 }
 0x11d   : > { %v942_v29 = vcombine.low %v633_v20, %v635_v12  ;;  %v943_v31 = vcombine.low %v674_v23, %v676_v26 }
 0x11f   : > { %v950_v32 = vrot.slane %v942_v29, %v1588_v22  ;;  %v957_v33 = vrot.slane %v943_v31, %v1588_v22 }
 0x121   : > { %v958_v34 = vcombine.low %v950_v32, %v957_v33 }
 0x123   : > { %1014 = vst [vmem:[%s1597_s29] sm:$0xff] %v958_v34 }
 0x125   : > { %v714_v35 = vpop.f32.mrb[4].mxu0  ;;  %v755_v37 = vpop.f32.mrb[4].mxu1 }
 0x126   : > { %v715_v36 = vadd.f32 %v714_v35, %v1584_v15  ;;  %v716_v38 = vpop.f32.mrb[5].mxu0  ;;  %v756_v39 = vadd.f32 %v755_v37, %v1584_v15  ;;  %v757_v42 = vpop.f32.mrb[5].mxu1 }
 0x127   : > { %v717_v41 = vadd.f32 %v716_v38, %v1584_v15  ;;  %v718_v43 = vpop.f32.mrb[6].mxu0  ;;  %v758_v44 = vadd.f32 %v757_v42, %v1584_v15  ;;  %v759_v45 = vpop.f32.mrb[6].mxu1 }
 0x128   : > { %v719_v46 = vpop.f32.mrb[7].mxu0  ;;  %v760_v48 = vpop.f32.mrb[7].mxu1 }
 0x129   : > { %v959_v47 = vcombine.low %v715_v36, %v717_v41  ;;  %v960_v49 = vcombine.low %v756_v39, %v758_v44 }
 0x12b   : > { %v967_v50 = vrot.slane %v959_v47, %v1588_v22  ;;  %v974_v51 = vrot.slane %v960_v49, %v1588_v22 }
 0x12d   : > { %v975_v52 = vcombine.low %v967_v50, %v974_v51 }
 0x12f   : > { %1015 = vst [vmem:[%s1597_s29 + $0x8] sm:$0xff] %v975_v52 }
 0x131   : > { %v796_v53 = vpop.f32.mrb[8].mxu0  ;;  %v837_v55 = vpop.f32.mrb[8].mxu1 }
 0x132   : > { %v797_v54 = vadd.f32 %v796_v53, %v1584_v15  ;;  %v798_v56 = vpop.f32.mrb[9].mxu0  ;;  %v838_v57 = vadd.f32 %v837_v55, %v1584_v15  ;;  %v839_v59 = vpop.f32.mrb[9].mxu1 }
 0x133   : > { %v799_v58 = vadd.f32 %v798_v56, %v1584_v15  ;;  %v800_v60 = vpop.f32.mrb[10].mxu0  ;;  %v840_v61 = vadd.f32 %v839_v59, %v1584_v15  ;;  %v841_v62 = vpop.f32.mrb[10].mxu1 }
 0x134   : > { %v801_v63 = vpop.f32.mrb[11].mxu0  ;;  %v842_v1 = vpop.f32.mrb[11].mxu1 }
 0x135   : > { %v976_v0 = vcombine.low %v797_v54, %v799_v58  ;;  %v977_v2 = vcombine.low %v838_v57, %v840_v61 }
 0x137   : > { %v984_v3 = vrot.slane %v976_v0, %v1588_v22  ;;  %v991_v4 = vrot.slane %v977_v2, %v1588_v22 }
 0x139   : > { %v992_v5 = vcombine.low %v984_v3, %v991_v4 }
 0x13b   : > { %1016 = vst [vmem:[%s1597_s29 + $0x10] sm:$0xff] %v992_v5 }
 0x13d   : > { %v878_v6 = vpop.f32.mrb[12].mxu0  ;;  %v919_v8 = vpop.f32.mrb[12].mxu1 }
 0x13e   : > { %v879_v7 = vadd.f32 %v878_v6, %v1584_v15  ;;  %v880_v9 = vpop.f32.mrb[13].mxu0  ;;  %v920_v10 = vadd.f32 %v919_v8, %v1584_v15  ;;  %v921_v40 = vpop.f32.mrb[13].mxu1 }
 0x13f   : > { %v881_v11 = vadd.f32 %v880_v9, %v1584_v15  ;;  %v882_v13 = vpop.f32.mrb[14].mxu0  ;;  %v922_v14 = vadd.f32 %v921_v40, %v1584_v15  ;;  %v923_v16 = vpop.f32.mrb[14].mxu1 }
 0x140   : > { %v883_v17 = vpop.f32.mrb[15].mxu0  ;;  %v924_v19 = vpop.f32.mrb[15].mxu1 }
 0x141   : > { %v993_v18 = vcombine.low %v879_v7, %v881_v11  ;;  %v994_v20 = vcombine.low %v920_v10, %v922_v14 }
 0x143   : > { %v1001_v21 = vrot.slane %v993_v18, %v1588_v22  ;;  %v1008_v12 = vrot.slane %v994_v20, %v1588_v22 }
 0x145   : > { %v1009_v23 = vcombine.low %v1001_v21, %v1008_v12 }
 0x147   : > { %1017 = vst [vmem:[%s1597_s29 + $0x18] sm:$0xff] %v1009_v23 }
 0x148 PF: > { %s13_s18 = sadd.s32 1, %s1319_s18   ;;  %s1646_s12 = smov %s1299_s13 }
 0x149   : > { %p10_p12 = scmp.ge.s32.totalorder %s13_s18, 6   ;;  %s1647_s13 = smov %s1394_s25 }
 0x14a   : > { %s1648_s14 = smov %s1311_s16  ;;  %s1649_s15 = smov %s1315_s17 }
 0x14b   : > { %s1650_s16 = smov %s1653_s19  ;;  %s1651_s17 = smov %s1657_s20 }
 0x14c   :  { %12 = sbr.rel (!%p10_p12) target bundleno = 4 (0x4), region = 90 }

</bundles_post_ra>
